<compile_context>
chip_gen: v7x
topology: tpu7x:2x2x1
jax: 0.10.0
libtpu: 0.0.40
codegen_flags: <defaults>
</compile_context>

<pallas_src>
import functools

import jax
import jax.numpy as jnp
from jax.experimental import pallas as pl
from jax.experimental.pallas import tpu as pltpu

MID1, MID2, MID3 = 4096, 2048, 1024  # hidden widths from the PyTorch module


def _default_tn():
    """Weight-slab lane width. 1024 on 128-MiB-VMEM chips (v5e/v6e); 512 otherwise
    (v7x has only 64 MiB VMEM per TensorCore)."""
    try:
        kind = jax.devices()[0].device_kind.lower()
    except Exception:
        return 512
    return 1024 if ("v5" in kind or "v6" in kind) else 512


def _vmem_limit_bytes(m, in_dim, out_dim, tn):
    bf16, f32 = 2, 4
    lane = lambda n: max(n, 128)
    # double-buffered weight / bias slabs
    w = 2 * (in_dim * tn + MID1 * tn + MID2 * tn + MID3 * lane(out_dim)) * bf16
    b = 2 * (3 * tn + lane(out_dim)) * f32
    # resident input / output blocks (double-buffered by the pipeline)
    xo = 2 * (m * in_dim + m * lane(out_dim)) * f32
    # persistent activation scratch (bf16)
    acts = m * (MID1 + MID2 + MID3) * bf16
    need = w + b + xo + acts
    # Stay below v7x's 64 MiB physical VMEM per TensorCore.
    return min(int(need * 1.3) + (4 << 20), 48 << 20)


def _slab_matmul(act_ref, n_slabs, w_ref, b_ref, tn):
    """sum_l act[l] @ w[l*tn:(l+1)*tn, :] + b  (full-K reduction, f32 accumulation)."""
    m = act_ref.shape[1]
    n = w_ref.shape[1]
    y = jnp.zeros((m, n), jnp.float32)
    for l in range(n_slabs):  # static unroll; partial-K accumulation on the MXU
        y = y + jnp.dot(
            act_ref[l],
            w_ref[pl.ds(l * tn, tn), :],
            preferred_element_type=jnp.float32,
        )
    return y + b_ref[...]


def _fused_kernel(x_ref, w1_ref, b1_ref, w2_ref, b2_ref, w3_ref, b3_ref,
                  w4_ref, b4_ref, o_ref, act1_ref, act2_ref, act3_ref,
                  *, tn, n1, n2, n3):
    step = pl.program_id(0)

    # ---- fc1 + relu: one (in_dim x tn) weight slab per step -------------------
    @pl.when(step < n1)
    def _():
        y = jnp.dot(x_ref[...].astype(jnp.bfloat16), w1_ref[...],
                    preferred_element_type=jnp.float32) + b1_ref[...]
        act1_ref[step] = jnp.maximum(y, 0.0).astype(act1_ref.dtype)

    # ---- fc2 + relu ------------------------------------------------------------
    @pl.when(jnp.logical_and(step >= n1, step < n1 + n2))
    def _():
        y = _slab_matmul(act1_ref, n1, w2_ref, b2_ref, tn)
        act2_ref[step - n1] = jnp.maximum(y, 0.0).astype(act2_ref.dtype)

    # ---- fc2_2 + relu ----------------------------------------------------------
    @pl.when(jnp.logical_and(step >= n1 + n2, step < n1 + n2 + n3))
    def _():
        y = _slab_matmul(act2_ref, n2, w3_ref, b3_ref, tn)
        act3_ref[step - n1 - n2] = jnp.maximum(y, 0.0).astype(act3_ref.dtype)

    # ---- fc3 + row-wise L2 normalize (final grid step) --------------------------
    @pl.when(step == n1 + n2 + n3)
    def _():
        y = _slab_matmul(act3_ref, n3, w4_ref, b4_ref, tn)
        # Matches `x / torch.norm(x, dim=1, keepdim=True)` (no epsilon, per reference).
        inv = jax.lax.rsqrt(jnp.sum(y * y, axis=1, keepdims=True))
        o_ref[...] = (y * inv).astype(o_ref.dtype)


def _fused_forward(x, params, tn):
    (w1, b1), (w2, b2), (w3, b3), (w4, b4) = params
    m, in_dim = x.shape
    out_dim = w4.shape[1]
    assert w1.shape == (in_dim, MID1)
    assert w2.shape == (MID1, MID2)
    assert w3.shape == (MID2, MID3)
    assert w4.shape == (MID3, out_dim)
    assert MID1 % tn == 0 and MID2 % tn == 0 and MID3 % tn == 0

    n1, n2, n3 = MID1 // tn, MID2 // tn, MID3 // tn
    grid = (n1 + n2 + n3 + 1,)

    # Per-layer slab indices.  Clamping keeps the block index constant outside a
    # layer's step range, so every weight slab is DMA'd exactly once.
    def j1(s):
        return (0, jnp.minimum(s, n1 - 1))

    def j2(s):
        return (0, jnp.maximum(jnp.minimum(s - n1, n2 - 1), 0))

    def j3(s):
        return (0, jnp.maximum(jnp.minimum(s - n1 - n2, n3 - 1), 0))

    def j_const(s):
        return (0, 0)

    weight_elems = in_dim * MID1 + MID1 * MID2 + MID2 * MID3 + MID3 * out_dim
    cost = pl.CostEstimate(
        flops=2 * m * weight_elems,
        transcendentals=m,
        bytes_accessed=2 * weight_elems                       # bf16 weights
        + 4 * (MID1 + MID2 + MID3 + out_dim)                  # f32 biases
        + 4 * (m * in_dim + m * out_dim),                     # f32 x / out
    )

    kernel = functools.partial(_fused_kernel, tn=tn, n1=n1, n2=n2, n3=n3)
    return pl.pallas_call(
        kernel,
        out_shape=jax.ShapeDtypeStruct((m, out_dim), x.dtype),
        grid_spec=pltpu.PrefetchScalarGridSpec(
            num_scalar_prefetch=0,
            grid=grid,
            in_specs=[
                pl.BlockSpec((m, in_dim), j_const),      # x: resident, DMA'd once
                pl.BlockSpec((in_dim, tn), j1),          # W1 slab (bf16)
                pl.BlockSpec((1, tn), j1),               # b1 slab (f32)
                pl.BlockSpec((MID1, tn), j2),            # W2 slab (bf16)
                pl.BlockSpec((1, tn), j2),               # b2 slab
                pl.BlockSpec((MID2, tn), j3),            # W3 slab (bf16)
                pl.BlockSpec((1, tn), j3),               # b3 slab
                pl.BlockSpec((MID3, out_dim), j_const),  # W4 (single slab)
                pl.BlockSpec((1, out_dim), j_const),     # b4
            ],
            out_specs=pl.BlockSpec((m, out_dim), j_const),
            scratch_shapes=[
                pltpu.VMEM((n1, m, tn), jnp.bfloat16),   # fc1 activations
                pltpu.VMEM((n2, m, tn), jnp.bfloat16),   # fc2 activations
                pltpu.VMEM((n3, m, tn), jnp.bfloat16),   # fc2_2 activations
            ],
        ),
        compiler_params=pltpu.CompilerParams(
            # Layers chain through VMEM scratch -> the grid axis is sequential.
            dimension_semantics=("arbitrary",),
            vmem_limit_bytes=_vmem_limit_bytes(m, in_dim, out_dim, tn),
        ),
        cost_estimate=cost,
    )(x, w1, b1, w2, b2, w3, b3, w4, b4)


@jax.jit
def image_net_forward(x, params):
    return _fused_forward(x, params, tn=_default_tn())


def init_params(key, input_dim, output_dim):
    dims = [(input_dim, MID1), (MID1, MID2), (MID2, MID3), (MID3, output_dim)]
    params = []
    for i, (fan_in, fan_out) in enumerate(dims):
        kw, kb = jax.random.split(jax.random.fold_in(key, i))
        # Deterministic, scale-controlled init keeps the relu chain finite.
        # Weights stored in bf16 so HBM streaming is half the bytes of f32.
        w = (jax.random.normal(kw, (fan_in, fan_out), jnp.float32)
             / jnp.sqrt(float(fan_in))).astype(jnp.bfloat16)
        b = 0.01 * jax.random.normal(kb, (1, fan_out), jnp.float32)
        params.append((w, b))
    return params


if __name__ == "__main__":
    key = jax.random.PRNGKey(0)
    batch, input_dim, output_dim = 8, 512, 64

    kx, kp = jax.random.split(key)
    x = jax.random.normal(kx, (batch, input_dim), jnp.float32)
    params = init_params(kp, input_dim, output_dim)

    out = jax.block_until_ready(image_net_forward(x, params))

    # Pure-JAX reference on the same (bf16) weights, f32 math throughout.
    def ref_forward(x, params):
        (w1, b1), (w2, b2), (w3, b3), (w4, b4) = params
        h = jnp.maximum(x @ w1.astype(jnp.float32) + b1, 0.0)
        h = jnp.maximum(h @ w2.astype(jnp.float32) + b2, 0.0)
        h = jnp.maximum(h @ w3.astype(jnp.float32) + b3, 0.0)
        y = h @ w4.astype(jnp.float32) + b4
        return y / jnp.linalg.norm(y, axis=1, keepdims=True)

    ref = ref_forward(x, params)

    assert out.shape == (batch, output_dim)
    row_norms = jnp.linalg.norm(out, axis=1)
    assert bool(jnp.all(jnp.abs(row_norms - 1.0) < 1e-3)), row_norms
    max_err = float(jnp.max(jnp.abs(out - ref)))
    assert max_err < 5e-2, f"max abs err vs reference: {max_err}"

    print("KERNEL_OK")
</pallas_src>

<mosaic_0001>
module attributes {stable_mosaic.version = 11 : i64} {
  func.func @_fused_kernel(%arg0: i32, %arg1: memref<8x512xf32, #tpu.memory_space<vmem>>, %arg2: memref<512x512xbf16, #tpu.memory_space<vmem>>, %arg3: memref<1x512xf32, #tpu.memory_space<vmem>>, %arg4: memref<4096x512xbf16, #tpu.memory_space<vmem>>, %arg5: memref<1x512xf32, #tpu.memory_space<vmem>>, %arg6: memref<2048x512xbf16, #tpu.memory_space<vmem>>, %arg7: memref<1x512xf32, #tpu.memory_space<vmem>>, %arg8: memref<1024x64xbf16, #tpu.memory_space<vmem>>, %arg9: memref<1x64xf32, #tpu.memory_space<vmem>>, %arg10: memref<8x64xf32, #tpu.memory_space<vmem>>, %arg11: memref<8x8x512xbf16, #tpu.memory_space<vmem>>, %arg12: memref<4x8x512xbf16, #tpu.memory_space<vmem>>, %arg13: memref<2x8x512xbf16, #tpu.memory_space<vmem>>) attributes {dimension_semantics = [#tpu.dimension_semantics<arbitrary>], iteration_bounds = array<i64: 15>, scalar_prefetch = 0 : i64, scratch_operands = 3 : i64, tpu.core_type = #tpu.core_type<tc>, window_params = [{pipeline_mode = #tpu.pipeline_mode<synchronous>, transform_indices = @transform_0, window_bounds = array<i64: 8, 512>}, {transform_indices = @transform_1, window_bounds = array<i64: 512, 512>}, {transform_indices = @transform_2, window_bounds = array<i64: 1, 512>}, {transform_indices = @transform_3, window_bounds = array<i64: 4096, 512>}, {transform_indices = @transform_4, window_bounds = array<i64: 1, 512>}, {transform_indices = @transform_5, window_bounds = array<i64: 2048, 512>}, {transform_indices = @transform_6, window_bounds = array<i64: 1, 512>}, {pipeline_mode = #tpu.pipeline_mode<synchronous>, transform_indices = @transform_7, window_bounds = array<i64: 1024, 64>}, {pipeline_mode = #tpu.pipeline_mode<synchronous>, transform_indices = @transform_8, window_bounds = array<i64: 1, 64>}, {pipeline_mode = #tpu.pipeline_mode<synchronous>, transform_indices = @transform_9, window_bounds = array<i64: 8, 64>}]} {
    %c8_i32 = arith.constant 8 : i32
    %0 = arith.cmpi slt, %arg0, %c8_i32 : i32
    %1 = arith.extui %0 : i1 to i32
    %c0_i32 = arith.constant 0 : i32
    %2 = arith.cmpi ne, %1, %c0_i32 : i32
    scf.if %2 {
      %c0 = arith.constant 0 : index
      %c0_6 = arith.constant 0 : index
      %16 = vector.load %arg1[%c0, %c0_6] : memref<8x512xf32, #tpu.memory_space<vmem>>, vector<8x512xf32>
      %17 = arith.truncf %16 : vector<8x512xf32> to vector<8x512xbf16>
      %c0_7 = arith.constant 0 : index
      %c0_8 = arith.constant 0 : index
      %18 = vector.load %arg2[%c0_7, %c0_8] : memref<512x512xbf16, #tpu.memory_space<vmem>>, vector<512x512xbf16>
      %cst = arith.constant dense<0.000000e+00> : vector<8x512xf32>
      %19 = tpu.matmul %17, %18, %cst {dimension_numbers = #tpu.dot_dimension_numbers<[1], [0], [0], [1], [0, 0, 1, 1], [], []>} : vector<8x512xbf16>, vector<512x512xbf16>, vector<8x512xf32> -> vector<8x512xf32>
      %c0_9 = arith.constant 0 : index
      %c0_10 = arith.constant 0 : index
      %20 = vector.load %arg3[%c0_9, %c0_10] : memref<1x512xf32, #tpu.memory_space<vmem>>, vector<1x512xf32>
      %21 = vector.broadcast %20 : vector<1x512xf32> to vector<8x512xf32>
      %22 = arith.addf %19, %21 : vector<8x512xf32>
      %cst_11 = arith.constant 0.000000e+00 : f32
      %23 = vector.broadcast %cst_11 : f32 to vector<8x512xf32>
      %24 = arith.maximumf %22, %23 : vector<8x512xf32>
      %25 = arith.truncf %24 : vector<8x512xf32> to vector<8x512xbf16>
      %26 = arith.index_cast %arg0 : i32 to index
      %c0_12 = arith.constant 0 : index
      %c0_13 = arith.constant 0 : index
      %27 = vector.load %arg11[%26, %c0_12, %c0_13] : memref<8x8x512xbf16, #tpu.memory_space<vmem>>, vector<1x8x512xbf16>
      %28 = vector.shape_cast %27 : vector<1x8x512xbf16> to vector<8x512xbf16>
      %29 = vector.shape_cast %25 : vector<8x512xbf16> to vector<1x8x512xbf16>
      tpu.vector_store %arg11[%26, %c0_12, %c0_13], %29 {strides = array<i32>} : memref<8x8x512xbf16, #tpu.memory_space<vmem>>, vector<1x8x512xbf16>,
    } else {
    }
    %c8_i32_0 = arith.constant 8 : i32
    %3 = arith.cmpi sge, %arg0, %c8_i32_0 : i32
    %c12_i32 = arith.constant 12 : i32
    %4 = arith.cmpi slt, %arg0, %c12_i32 : i32
    %5 = arith.andi %3, %4 : i1
    %6 = arith.extui %5 : i1 to i32
    %c0_i32_1 = arith.constant 0 : i32
    %7 = arith.cmpi ne, %6, %c0_i32_1 : i32
    scf.if %7 {
      %cst = arith.constant 0.000000e+00 : f32
      %16 = vector.broadcast %cst : f32 to vector<8x512xf32>
      %c0 = arith.constant 0 : index
      %c0_6 = arith.constant 0 : index
      %c0_7 = arith.constant 0 : index
      %17 = vector.load %arg11[%c0, %c0_6, %c0_7] : memref<8x8x512xbf16, #tpu.memory_space<vmem>>, vector<1x8x512xbf16>
      %18 = vector.shape_cast %17 : vector<1x8x512xbf16> to vector<8x512xbf16>
      %c0_8 = arith.constant 0 : index
      %c0_9 = arith.constant 0 : index
      %19 = vector.load %arg4[%c0_8, %c0_9] : memref<4096x512xbf16, #tpu.memory_space<vmem>>, vector<512x512xbf16>
      %cst_10 = arith.constant dense<0.000000e+00> : vector<8x512xf32>
      %20 = tpu.matmul %18, %19, %cst_10 {dimension_numbers = #tpu.dot_dimension_numbers<[1], [0], [0], [1], [0, 0, 1, 1], [], []>} : vector<8x512xbf16>, vector<512x512xbf16>, vector<8x512xf32> -> vector<8x512xf32>
      %21 = arith.addf %16, %20 : vector<8x512xf32>
      %c1 = arith.constant 1 : index
      %c0_11 = arith.constant 0 : index
      %c0_12 = arith.constant 0 : index
      %22 = vector.load %arg11[%c1, %c0_11, %c0_12] : memref<8x8x512xbf16, #tpu.memory_space<vmem>>, vector<1x8x512xbf16>
      %23 = vector.shape_cast %22 : vector<1x8x512xbf16> to vector<8x512xbf16>
      %c512 = arith.constant 512 : index
      %c0_13 = arith.constant 0 : index
      %24 = vector.load %arg4[%c512, %c0_13] : memref<4096x512xbf16, #tpu.memory_space<vmem>>, vector<512x512xbf16>
      %cst_14 = arith.constant dense<0.000000e+00> : vector<8x512xf32>
      %25 = tpu.matmul %23, %24, %cst_14 {dimension_numbers = #tpu.dot_dimension_numbers<[1], [0], [0], [1], [0, 0, 1, 1], [], []>} : vector<8x512xbf16>, vector<512x512xbf16>, vector<8x512xf32> -> vector<8x512xf32>
      %26 = arith.addf %21, %25 : vector<8x512xf32>
      %c2 = arith.constant 2 : index
      %c0_15 = arith.constant 0 : index
      %c0_16 = arith.constant 0 : index
      %27 = vector.load %arg11[%c2, %c0_15, %c0_16] : memref<8x8x512xbf16, #tpu.memory_space<vmem>>, vector<1x8x512xbf16>
      %28 = vector.shape_cast %27 : vector<1x8x512xbf16> to vector<8x512xbf16>
      %c1024 = arith.constant 1024 : index
      %c0_17 = arith.constant 0 : index
      %29 = vector.load %arg4[%c1024, %c0_17] : memref<4096x512xbf16, #tpu.memory_space<vmem>>, vector<512x512xbf16>
      %cst_18 = arith.constant dense<0.000000e+00> : vector<8x512xf32>
      %30 = tpu.matmul %28, %29, %cst_18 {dimension_numbers = #tpu.dot_dimension_numbers<[1], [0], [0], [1], [0, 0, 1, 1], [], []>} : vector<8x512xbf16>, vector<512x512xbf16>, vector<8x512xf32> -> vector<8x512xf32>
      %31 = arith.addf %26, %30 : vector<8x512xf32>
      %c3 = arith.constant 3 : index
      %c0_19 = arith.constant 0 : index
      %c0_20 = arith.constant 0 : index
      %32 = vector.load %arg11[%c3, %c0_19, %c0_20] : memref<8x8x512xbf16, #tpu.memory_space<vmem>>, vector<1x8x512xbf16>
      %33 = vector.shape_cast %32 : vector<1x8x512xbf16> to vector<8x512xbf16>
      %c1536 = arith.constant 1536 : index
      %c0_21 = arith.constant 0 : index
      %34 = vector.load %arg4[%c1536, %c0_21] : memref<4096x512xbf16, #tpu.memory_space<vmem>>, vector<512x512xbf16>
      %cst_22 = arith.constant dense<0.000000e+00> : vector<8x512xf32>
      %35 = tpu.matmul %33, %34, %cst_22 {dimension_numbers = #tpu.dot_dimension_numbers<[1], [0], [0], [1], [0, 0, 1, 1], [], []>} : vector<8x512xbf16>, vector<512x512xbf16>, vector<8x512xf32> -> vector<8x512xf32>
      %36 = arith.addf %31, %35 : vector<8x512xf32>
      %c4 = arith.constant 4 : index
      %c0_23 = arith.constant 0 : index
      %c0_24 = arith.constant 0 : index
      %37 = vector.load %arg11[%c4, %c0_23, %c0_24] : memref<8x8x512xbf16, #tpu.memory_space<vmem>>, vector<1x8x512xbf16>
      %38 = vector.shape_cast %37 : vector<1x8x512xbf16> to vector<8x512xbf16>
      %c2048 = arith.constant 2048 : index
      %c0_25 = arith.constant 0 : index
      %39 = vector.load %arg4[%c2048, %c0_25] : memref<4096x512xbf16, #tpu.memory_space<vmem>>, vector<512x512xbf16>
      %cst_26 = arith.constant dense<0.000000e+00> : vector<8x512xf32>
      %40 = tpu.matmul %38, %39, %cst_26 {dimension_numbers = #tpu.dot_dimension_numbers<[1], [0], [0], [1], [0, 0, 1, 1], [], []>} : vector<8x512xbf16>, vector<512x512xbf16>, vector<8x512xf32> -> vector<8x512xf32>
      %41 = arith.addf %36, %40 : vector<8x512xf32>
      %c5 = arith.constant 5 : index
      %c0_27 = arith.constant 0 : index
      %c0_28 = arith.constant 0 : index
      %42 = vector.load %arg11[%c5, %c0_27, %c0_28] : memref<8x8x512xbf16, #tpu.memory_space<vmem>>, vector<1x8x512xbf16>
      %43 = vector.shape_cast %42 : vector<1x8x512xbf16> to vector<8x512xbf16>
      %c2560 = arith.constant 2560 : index
      %c0_29 = arith.constant 0 : index
      %44 = vector.load %arg4[%c2560, %c0_29] : memref<4096x512xbf16, #tpu.memory_space<vmem>>, vector<512x512xbf16>
      %cst_30 = arith.constant dense<0.000000e+00> : vector<8x512xf32>
      %45 = tpu.matmul %43, %44, %cst_30 {dimension_numbers = #tpu.dot_dimension_numbers<[1], [0], [0], [1], [0, 0, 1, 1], [], []>} : vector<8x512xbf16>, vector<512x512xbf16>, vector<8x512xf32> -> vector<8x512xf32>
      %46 = arith.addf %41, %45 : vector<8x512xf32>
      %c6 = arith.constant 6 : index
      %c0_31 = arith.constant 0 : index
      %c0_32 = arith.constant 0 : index
      %47 = vector.load %arg11[%c6, %c0_31, %c0_32] : memref<8x8x512xbf16, #tpu.memory_space<vmem>>, vector<1x8x512xbf16>
      %48 = vector.shape_cast %47 : vector<1x8x512xbf16> to vector<8x512xbf16>
      %c3072 = arith.constant 3072 : index
      %c0_33 = arith.constant 0 : index
      %49 = vector.load %arg4[%c3072, %c0_33] : memref<4096x512xbf16, #tpu.memory_space<vmem>>, vector<512x512xbf16>
      %cst_34 = arith.constant dense<0.000000e+00> : vector<8x512xf32>
      %50 = tpu.matmul %48, %49, %cst_34 {dimension_numbers = #tpu.dot_dimension_numbers<[1], [0], [0], [1], [0, 0, 1, 1], [], []>} : vector<8x512xbf16>, vector<512x512xbf16>, vector<8x512xf32> -> vector<8x512xf32>
      %51 = arith.addf %46, %50 : vector<8x512xf32>
      %c7 = arith.constant 7 : index
      %c0_35 = arith.constant 0 : index
      %c0_36 = arith.constant 0 : index
      %52 = vector.load %arg11[%c7, %c0_35, %c0_36] : memref<8x8x512xbf16, #tpu.memory_space<vmem>>, vector<1x8x512xbf16>
      %53 = vector.shape_cast %52 : vector<1x8x512xbf16> to vector<8x512xbf16>
      %c3584 = arith.constant 3584 : index
      %c0_37 = arith.constant 0 : index
      %54 = vector.load %arg4[%c3584, %c0_37] : memref<4096x512xbf16, #tpu.memory_space<vmem>>, vector<512x512xbf16>
      %cst_38 = arith.constant dense<0.000000e+00> : vector<8x512xf32>
      %55 = tpu.matmul %53, %54, %cst_38 {dimension_numbers = #tpu.dot_dimension_numbers<[1], [0], [0], [1], [0, 0, 1, 1], [], []>} : vector<8x512xbf16>, vector<512x512xbf16>, vector<8x512xf32> -> vector<8x512xf32>
      %56 = arith.addf %51, %55 : vector<8x512xf32>
      %c0_39 = arith.constant 0 : index
      %c0_40 = arith.constant 0 : index
      %57 = vector.load %arg5[%c0_39, %c0_40] : memref<1x512xf32, #tpu.memory_space<vmem>>, vector<1x512xf32>
      %58 = vector.broadcast %57 : vector<1x512xf32> to vector<8x512xf32>
      %59 = arith.addf %56, %58 : vector<8x512xf32>
      %cst_41 = arith.constant 0.000000e+00 : f32
      %60 = vector.broadcast %cst_41 : f32 to vector<8x512xf32>
      %61 = arith.maximumf %59, %60 : vector<8x512xf32>
      %62 = arith.truncf %61 : vector<8x512xf32> to vector<8x512xbf16>
      %c8_i32_42 = arith.constant 8 : i32
      %63 = arith.subi %arg0, %c8_i32_42 : i32
      %64 = arith.index_cast %63 : i32 to index
      %c0_43 = arith.constant 0 : index
      %c0_44 = arith.constant 0 : index
      %65 = vector.load %arg12[%64, %c0_43, %c0_44] : memref<4x8x512xbf16, #tpu.memory_space<vmem>>, vector<1x8x512xbf16>
      %66 = vector.shape_cast %65 : vector<1x8x512xbf16> to vector<8x512xbf16>
      %67 = vector.shape_cast %62 : vector<8x512xbf16> to vector<1x8x512xbf16>
      tpu.vector_store %arg12[%64, %c0_43, %c0_44], %67 {strides = array<i32>} : memref<4x8x512xbf16, #tpu.memory_space<vmem>>, vector<1x8x512xbf16>,
    } else {
    }
    %c12_i32_2 = arith.constant 12 : i32
    %8 = arith.cmpi sge, %arg0, %c12_i32_2 : i32
    %c14_i32 = arith.constant 14 : i32
    %9 = arith.cmpi slt, %arg0, %c14_i32 : i32
    %10 = arith.andi %8, %9 : i1
    %11 = arith.extui %10 : i1 to i32
    %c0_i32_3 = arith.constant 0 : i32
    %12 = arith.cmpi ne, %11, %c0_i32_3 : i32
    scf.if %12 {
      %cst = arith.constant 0.000000e+00 : f32
      %16 = vector.broadcast %cst : f32 to vector<8x512xf32>
      %c0 = arith.constant 0 : index
      %c0_6 = arith.constant 0 : index
      %c0_7 = arith.constant 0 : index
      %17 = vector.load %arg12[%c0, %c0_6, %c0_7] : memref<4x8x512xbf16, #tpu.memory_space<vmem>>, vector<1x8x512xbf16>
      %18 = vector.shape_cast %17 : vector<1x8x512xbf16> to vector<8x512xbf16>
      %c0_8 = arith.constant 0 : index
      %c0_9 = arith.constant 0 : index
      %19 = vector.load %arg6[%c0_8, %c0_9] : memref<2048x512xbf16, #tpu.memory_space<vmem>>, vector<512x512xbf16>
      %cst_10 = arith.constant dense<0.000000e+00> : vector<8x512xf32>
      %20 = tpu.matmul %18, %19, %cst_10 {dimension_numbers = #tpu.dot_dimension_numbers<[1], [0], [0], [1], [0, 0, 1, 1], [], []>} : vector<8x512xbf16>, vector<512x512xbf16>, vector<8x512xf32> -> vector<8x512xf32>
      %21 = arith.addf %16, %20 : vector<8x512xf32>
      %c1 = arith.constant 1 : index
      %c0_11 = arith.constant 0 : index
      %c0_12 = arith.constant 0 : index
      %22 = vector.load %arg12[%c1, %c0_11, %c0_12] : memref<4x8x512xbf16, #tpu.memory_space<vmem>>, vector<1x8x512xbf16>
      %23 = vector.shape_cast %22 : vector<1x8x512xbf16> to vector<8x512xbf16>
      %c512 = arith.constant 512 : index
      %c0_13 = arith.constant 0 : index
      %24 = vector.load %arg6[%c512, %c0_13] : memref<2048x512xbf16, #tpu.memory_space<vmem>>, vector<512x512xbf16>
      %cst_14 = arith.constant dense<0.000000e+00> : vector<8x512xf32>
      %25 = tpu.matmul %23, %24, %cst_14 {dimension_numbers = #tpu.dot_dimension_numbers<[1], [0], [0], [1], [0, 0, 1, 1], [], []>} : vector<8x512xbf16>, vector<512x512xbf16>, vector<8x512xf32> -> vector<8x512xf32>
      %26 = arith.addf %21, %25 : vector<8x512xf32>
      %c2 = arith.constant 2 : index
      %c0_15 = arith.constant 0 : index
      %c0_16 = arith.constant 0 : index
      %27 = vector.load %arg12[%c2, %c0_15, %c0_16] : memref<4x8x512xbf16, #tpu.memory_space<vmem>>, vector<1x8x512xbf16>
      %28 = vector.shape_cast %27 : vector<1x8x512xbf16> to vector<8x512xbf16>
      %c1024 = arith.constant 1024 : index
      %c0_17 = arith.constant 0 : index
      %29 = vector.load %arg6[%c1024, %c0_17] : memref<2048x512xbf16, #tpu.memory_space<vmem>>, vector<512x512xbf16>
      %cst_18 = arith.constant dense<0.000000e+00> : vector<8x512xf32>
      %30 = tpu.matmul %28, %29, %cst_18 {dimension_numbers = #tpu.dot_dimension_numbers<[1], [0], [0], [1], [0, 0, 1, 1], [], []>} : vector<8x512xbf16>, vector<512x512xbf16>, vector<8x512xf32> -> vector<8x512xf32>
      %31 = arith.addf %26, %30 : vector<8x512xf32>
      %c3 = arith.constant 3 : index
      %c0_19 = arith.constant 0 : index
      %c0_20 = arith.constant 0 : index
      %32 = vector.load %arg12[%c3, %c0_19, %c0_20] : memref<4x8x512xbf16, #tpu.memory_space<vmem>>, vector<1x8x512xbf16>
      %33 = vector.shape_cast %32 : vector<1x8x512xbf16> to vector<8x512xbf16>
      %c1536 = arith.constant 1536 : index
      %c0_21 = arith.constant 0 : index
      %34 = vector.load %arg6[%c1536, %c0_21] : memref<2048x512xbf16, #tpu.memory_space<vmem>>, vector<512x512xbf16>
      %cst_22 = arith.constant dense<0.000000e+00> : vector<8x512xf32>
      %35 = tpu.matmul %33, %34, %cst_22 {dimension_numbers = #tpu.dot_dimension_numbers<[1], [0], [0], [1], [0, 0, 1, 1], [], []>} : vector<8x512xbf16>, vector<512x512xbf16>, vector<8x512xf32> -> vector<8x512xf32>
      %36 = arith.addf %31, %35 : vector<8x512xf32>
      %c0_23 = arith.constant 0 : index
      %c0_24 = arith.constant 0 : index
      %37 = vector.load %arg7[%c0_23, %c0_24] : memref<1x512xf32, #tpu.memory_space<vmem>>, vector<1x512xf32>
      %38 = vector.broadcast %37 : vector<1x512xf32> to vector<8x512xf32>
      %39 = arith.addf %36, %38 : vector<8x512xf32>
      %cst_25 = arith.constant 0.000000e+00 : f32
      %40 = vector.broadcast %cst_25 : f32 to vector<8x512xf32>
      %41 = arith.maximumf %39, %40 : vector<8x512xf32>
      %42 = arith.truncf %41 : vector<8x512xf32> to vector<8x512xbf16>
      %c8_i32_26 = arith.constant 8 : i32
      %43 = arith.subi %arg0, %c8_i32_26 : i32
      %c4_i32 = arith.constant 4 : i32
      %44 = arith.subi %43, %c4_i32 : i32
      %45 = arith.index_cast %44 : i32 to index
      %c0_27 = arith.constant 0 : index
      %c0_28 = arith.constant 0 : index
      %46 = vector.load %arg13[%45, %c0_27, %c0_28] : memref<2x8x512xbf16, #tpu.memory_space<vmem>>, vector<1x8x512xbf16>
      %47 = vector.shape_cast %46 : vector<1x8x512xbf16> to vector<8x512xbf16>
      %48 = vector.shape_cast %42 : vector<8x512xbf16> to vector<1x8x512xbf16>
      tpu.vector_store %arg13[%45, %c0_27, %c0_28], %48 {strides = array<i32>} : memref<2x8x512xbf16, #tpu.memory_space<vmem>>, vector<1x8x512xbf16>,
    } else {
    }
    %c14_i32_4 = arith.constant 14 : i32
    %13 = arith.cmpi eq, %arg0, %c14_i32_4 : i32
    %14 = arith.extui %13 : i1 to i32
    %c0_i32_5 = arith.constant 0 : i32
    %15 = arith.cmpi ne, %14, %c0_i32_5 : i32
    scf.if %15 {
      %cst = arith.constant 0.000000e+00 : f32
      %16 = vector.broadcast %cst : f32 to vector<8x64xf32>
      %c0 = arith.constant 0 : index
      %c0_6 = arith.constant 0 : index
      %c0_7 = arith.constant 0 : index
      %17 = vector.load %arg13[%c0, %c0_6, %c0_7] : memref<2x8x512xbf16, #tpu.memory_space<vmem>>, vector<1x8x512xbf16>
      %18 = vector.shape_cast %17 : vector<1x8x512xbf16> to vector<8x512xbf16>
      %c0_8 = arith.constant 0 : index
      %c0_9 = arith.constant 0 : index
      %19 = vector.load %arg8[%c0_8, %c0_9] : memref<1024x64xbf16, #tpu.memory_space<vmem>>, vector<512x64xbf16>
      %cst_10 = arith.constant dense<0.000000e+00> : vector<8x64xf32>
      %20 = tpu.matmul %18, %19, %cst_10 {dimension_numbers = #tpu.dot_dimension_numbers<[1], [0], [0], [1], [0, 0, 1, 1], [], []>} : vector<8x512xbf16>, vector<512x64xbf16>, vector<8x64xf32> -> vector<8x64xf32>
      %21 = arith.addf %16, %20 : vector<8x64xf32>
      %c1 = arith.constant 1 : index
      %c0_11 = arith.constant 0 : index
      %c0_12 = arith.constant 0 : index
      %22 = vector.load %arg13[%c1, %c0_11, %c0_12] : memref<2x8x512xbf16, #tpu.memory_space<vmem>>, vector<1x8x512xbf16>
      %23 = vector.shape_cast %22 : vector<1x8x512xbf16> to vector<8x512xbf16>
      %c512 = arith.constant 512 : index
      %c0_13 = arith.constant 0 : index
      %24 = vector.load %arg8[%c512, %c0_13] : memref<1024x64xbf16, #tpu.memory_space<vmem>>, vector<512x64xbf16>
      %cst_14 = arith.constant dense<0.000000e+00> : vector<8x64xf32>
      %25 = tpu.matmul %23, %24, %cst_14 {dimension_numbers = #tpu.dot_dimension_numbers<[1], [0], [0], [1], [0, 0, 1, 1], [], []>} : vector<8x512xbf16>, vector<512x64xbf16>, vector<8x64xf32> -> vector<8x64xf32>
      %26 = arith.addf %21, %25 : vector<8x64xf32>
      %c0_15 = arith.constant 0 : index
      %c0_16 = arith.constant 0 : index
      %27 = vector.load %arg9[%c0_15, %c0_16] : memref<1x64xf32, #tpu.memory_space<vmem>>, vector<1x64xf32>
      %28 = vector.broadcast %27 : vector<1x64xf32> to vector<8x64xf32>
      %29 = arith.addf %26, %28 : vector<8x64xf32>
      %30 = arith.mulf %29, %29 : vector<8x64xf32>
      %cst_17 = arith.constant dense<0.000000e+00> : vector<8xf32>
      %31 = vector.multi_reduction <add>, %30, %cst_17 [1] : vector<8x64xf32> to vector<8xf32>
      %32 = vector.shape_cast %31 : vector<8xf32> to vector<8x1xf32>
      %33 = math.rsqrt %32 : vector<8x1xf32>
      %34 = vector.broadcast %33 : vector<8x1xf32> to vector<8x64xf32>
      %35 = arith.mulf %29, %34 : vector<8x64xf32>
      %c0_18 = arith.constant 0 : index
      %c0_19 = arith.constant 0 : index
      %36 = vector.load %arg10[%c0_18, %c0_19] : memref<8x64xf32, #tpu.memory_space<vmem>>, vector<8x64xf32>
      tpu.vector_store %arg10[%c0_18, %c0_19], %35 {strides = array<i32>} : memref<8x64xf32, #tpu.memory_space<vmem>>, vector<8x64xf32>,
    } else {
    }
    return
  }
  func.func @transform_0(%arg0: i32) -> (i32, i32) {
    %c0_i32 = arith.constant 0 : i32
    %c0_i32_0 = arith.constant 0 : i32
    %c0_i32_1 = arith.constant 0 : i32
    return %c0_i32, %c0_i32_0 : i32, i32
  }
  func.func @transform_1(%arg0: i32) -> (i32, i32) {
    %c7_i32 = arith.constant 7 : i32
    %0 = arith.minsi %arg0, %c7_i32 : i32
    %c0_i32 = arith.constant 0 : i32
    %c0_i32_0 = arith.constant 0 : i32
    return %c0_i32, %0 : i32, i32
  }
  func.func @transform_2(%arg0: i32) -> (i32, i32) {
    %c7_i32 = arith.constant 7 : i32
    %0 = arith.minsi %arg0, %c7_i32 : i32
    %c0_i32 = arith.constant 0 : i32
    %c0_i32_0 = arith.constant 0 : i32
    return %c0_i32, %0 : i32, i32
  }
  func.func @transform_3(%arg0: i32) -> (i32, i32) {
    %c8_i32 = arith.constant 8 : i32
    %0 = arith.subi %arg0, %c8_i32 : i32
    %c3_i32 = arith.constant 3 : i32
    %1 = arith.minsi %0, %c3_i32 : i32
    %c0_i32 = arith.constant 0 : i32
    %2 = arith.maxsi %1, %c0_i32 : i32
    %c0_i32_0 = arith.constant 0 : i32
    %c0_i32_1 = arith.constant 0 : i32
    return %c0_i32_0, %2 : i32, i32
  }
  func.func @transform_4(%arg0: i32) -> (i32, i32) {
    %c8_i32 = arith.constant 8 : i32
    %0 = arith.subi %arg0, %c8_i32 : i32
    %c3_i32 = arith.constant 3 : i32
    %1 = arith.minsi %0, %c3_i32 : i32
    %c0_i32 = arith.constant 0 : i32
    %2 = arith.maxsi %1, %c0_i32 : i32
    %c0_i32_0 = arith.constant 0 : i32
    %c0_i32_1 = arith.constant 0 : i32
    return %c0_i32_0, %2 : i32, i32
  }
  func.func @transform_5(%arg0: i32) -> (i32, i32) {
    %c8_i32 = arith.constant 8 : i32
    %0 = arith.subi %arg0, %c8_i32 : i32
    %c4_i32 = arith.constant 4 : i32
    %1 = arith.subi %0, %c4_i32 : i32
    %c1_i32 = arith.constant 1 : i32
    %2 = arith.minsi %1, %c1_i32 : i32
    %c0_i32 = arith.constant 0 : i32
    %3 = arith.maxsi %2, %c0_i32 : i32
    %c0_i32_0 = arith.constant 0 : i32
    %c0_i32_1 = arith.constant 0 : i32
    return %c0_i32_0, %3 : i32, i32
  }
  func.func @transform_6(%arg0: i32) -> (i32, i32) {
    %c8_i32 = arith.constant 8 : i32
    %0 = arith.subi %arg0, %c8_i32 : i32
    %c4_i32 = arith.constant 4 : i32
    %1 = arith.subi %0, %c4_i32 : i32
    %c1_i32 = arith.constant 1 : i32
    %2 = arith.minsi %1, %c1_i32 : i32
    %c0_i32 = arith.constant 0 : i32
    %3 = arith.maxsi %2, %c0_i32 : i32
    %c0_i32_0 = arith.constant 0 : i32
    %c0_i32_1 = arith.constant 0 : i32
    return %c0_i32_0, %3 : i32, i32
  }
  func.func @transform_7(%arg0: i32) -> (i32, i32) {
    %c0_i32 = arith.constant 0 : i32
    %c0_i32_0 = arith.constant 0 : i32
    %c0_i32_1 = arith.constant 0 : i32
    return %c0_i32, %c0_i32_0 : i32, i32
  }
  func.func @transform_8(%arg0: i32) -> (i32, i32) {
    %c0_i32 = arith.constant 0 : i32
    %c0_i32_0 = arith.constant 0 : i32
    %c0_i32_1 = arith.constant 0 : i32
    return %c0_i32, %c0_i32_0 : i32, i32
  }
  func.func @transform_9(%arg0: i32) -> (i32, i32) {
    %c0_i32 = arith.constant 0 : i32
    %c0_i32_0 = arith.constant 0 : i32
    %c0_i32_1 = arith.constant 0 : i32
    return %c0_i32, %c0_i32_0 : i32, i32
  }
}

</mosaic_0001>

<bundles_post_ra>
// kernel: image_net_forward.1
= control target key start
LH: loop header
LB: loop body
LE: loop exit
PB: predicated region body
PF: predicated region fallthrough
CT: control target
= control target key end

     0   :  { %s22132_s0 = inlined_call_operand.hbm [shape: f32[8,512], index: 0, kind: input, shape index: {}]   ;;  %s22133_s1 = inlined_call_operand.hbm [shape: bf16[512,4096], index: 1, kind: input, shape index: {}]   ;;  %s22134_s2 = inlined_call_operand.hbm [shape: f32[1,4096], index: 2, kind: input, shape index: {}]   ;;  %s22135_s3 = inlined_call_operand.hbm [shape: bf16[4096,2048], index: 3, kind: input, shape index: {}]   ;;  %s22136_s4 = inlined_call_operand.hbm [shape: f32[1,2048], index: 4, kind: input, shape index: {}]   ;;  %s22137_s5 = inlined_call_operand.hbm [shape: bf16[2048,1024], index: 5, kind: input, shape index: {}]   ;;  %s22138_s6 = inlined_call_operand.hbm [shape: f32[1,1024], index: 6, kind: input, shape index: {}]   ;;  %s22139_s7 = inlined_call_operand.vmem [shape: bf16[1024,64], index: 7, kind: input, shape index: {}]   ;;  %s22140_s8 = inlined_call_operand.hbm [shape: f32[1,64], index: 8, kind: input, shape index: {}]   ;;  %s22141_s9 = inlined_call_operand.hbm [shape: f32[8,64], index: 9, kind: output, shape index: {}]  }
   0x1   :  { %22177 = sst [smem:[#allocation34_spill]] %s22132_s0 }
   0x2   :  { %22178 = sst [smem:[#allocation35_spill]] %s22133_s1 }
   0x3   :  { %22179 = sst [smem:[#allocation36_spill]] %s22134_s2 }
   0x4   :  { %22180 = sst [smem:[#allocation37_spill]] %s22135_s3 }
   0x5   :  { %22181 = sst [smem:[#allocation38_spill]] %s22136_s4 }
   0x6   :  { %22182 = sst [smem:[#allocation39_spill]] %s22137_s5 }
   0x7   :  { %22183 = sst [smem:[#allocation40_spill]] %s22138_s6 }
   0x8   :  { %22184 = sst [smem:[#allocation41_spill]] %s22139_s7 }
   0x9   :  { %22185 = sst [smem:[#allocation42_spill]] %s22140_s8 }
   0xa   :  { %22186 = sst [smem:[#allocation43_spill]] %s22141_s9 }
   0xb   :  { %14 = vsyncpa [#allocation6], 0 }
   0xc   :  { %15 = vsyncpa [#allocation9], 0 }
   0xd   :  { %17 = vsyncpa [#allocation9 + $0x1], 0 }
   0xe   :  { %18 = vsyncpa [#allocation12], 0 }
   0xf   :  { %20 = vsyncpa [#allocation12 + $0x1], 0 }
  0x10   :  { %21 = vsyncpa [#allocation15], 0 }
  0x11   :  { %23 = vsyncpa [#allocation15 + $0x1], 0 }
  0x12   :  { %24 = vsyncpa [#allocation18], 0 }
  0x13   :  { %25 = vsyncpa [#allocation7], 0  ;;  %s19335_s30 = smov 0   ;;  %s19337_s10 = smov 0  }
  0x14   :  { %s19339_s11 = smov 0   ;;  %s19341_s12 = smov 0  }
  0x15   :  { %s19343_s13 = smov 0   ;;  %s19345_s14 = smov 0  }
  0x16   :  { %s19347_s15 = smov 0   ;;  %s19349_s16 = smov 0  }
  0x17   :  { %s19351_s17 = smov 0   ;;  %s19353_s18 = smov 0  }
  0x18 LB: > { %22187 = sst [smem:[#allocation26_spill]] %s19265_s17  ;;  %s19386_s19 = sadd.s32 1, %s19269_s18   ;;  %s19269_s18 = sphi %s19353_s18, %s22247_s18   ;;  %s19265_s17 = sphi %s19351_s17, %s22251_s17   ;;  %s19261_s16 = sphi %s19349_s16, %s22259_s16   ;;  %s19257_s15 = sphi %s19347_s15, %s22258_s15   ;;  %s19253_s14 = sphi %s19345_s14, %s22257_s14   ;;  %s19249_s13 = sphi %s19343_s13, %s22256_s13   ;;  %s19245_s12 = sphi %s19341_s12, %s22255_s12   ;;  %s19241_s11 = sphi %s19339_s11, %s22254_s11   ;;  %s19237_s10 = sphi %s19337_s10, %s22253_s10   ;;  %s19233_s30 = sphi %s19335_s30, %s22252_s30  }
  0x19   : > { %22188 = sst [smem:[#allocation27_spill]] %s19386_s19  ;;  %p56_p0 = scmp.lt.s32.totalorder %s19269_s18, 7 }
  0x1a   : > { %p58_p1 = scmp.lt.s32.totalorder %s19386_s19, 7  ;;  %s63_s20 = sadd.s32 1, %s19265_s17 }
  0x1b   : > { %s19392_s21 = scalar_select %p56_p0, %s19269_s18, 7 }
  0x1c   : > { %s59_s22 = scalar_select %p58_p1, %s19386_s19, 7 }
  0x1d   : > { %p70_p2 = scmp.ne.s32.totalorder %s19265_s17, %s19261_s16  ;;  %p22156_p3 = scmp.eq.s32.totalorder %s19269_s18, 0 }
  0x1e   : > { %s60_s23 = ssub.s32 %s19392_s21, %s59_s22  ;;  %p22146_p6 = scmp.lt.s32.totalorder %s19269_s18, 15 }
  0x1f   : > { %p61_p4 = scmp.eq.s32.totalorder %s60_s23, 0  ;;  %p72_p5 = por %p22156_p3, %p70_p2 }
  0x20   : > { %s19403_s24 = sand.u32 1, %s19269_s18   ;;  %s22145_s26 = sand.u32 1, %s19265_s17  }
  0x21   : > { %s19406_s25 = scalar_select %p61_p4, %s19265_s17, %s63_s20  }
  0x22   : > { %s14147_s27 = sshll.u32 %s22145_s26, 10  ;;  %s16019_s28 = sshll.u32 %s19392_s21, 8 }
  0x23   : > { %22189 = sst [smem:[#allocation28_spill]] %s19406_s25  ;;  %s22190_s1 = sld [smem:[#allocation35_spill]] }
  0x24   : > { %s366_s22 = scalar_lea.vmem [#allocation8], %s14147_s27  ;;  %p19419_p7 = pnand %p22146_p6, %p72_p5 }
  0x25   : > { %s375_s23 = sshll.u32 %s366_s22, 4  ;;  %s19423_s23 = int_to_ptr.vmem [resolvable:$true] %s375_s23 }
  0x26   : > { %s22191_s6 = scalar_select %p19419_p7, 1, 0 }
  0x27   : > { %p22155_p9 = pneg %p19419_p7 }
  0x28   : > { %22192 = sst [smem:[#allocation29_spill]] %s22191_s6 }
  0x29   : > { %s19415_s7 = scalar_lea.hbm %s22190_s1, %s16019_s28  ;;  %s18910_s28 = scalar_lea.hbm %s22190_s1, 131072 }
  0x2a   : > { %s18905_s26 = scalar_lea.hbm %s19415_s7, 16384  ;;  %p18911_p12 = scmp.lt.u32.totalorder %s19415_s7, %s22190_s1 }
  0x2b   : > { %p18906_p8 = scmp.ne.s32.totalorder %s19415_s7, %s18905_s26  ;;  %p18912_p13 = scmp.lt.u32.totalorder %s18910_s28, %s18905_s26 }
  0x2c   : > { %p18914_p1 = scmp.lt.u32.totalorder %s18905_s26, %s19415_s7 }
  0x2d   : > { %p18908_p10 = pnand %p22155_p9, %p18906_p8  ;;  %p18913_p0 = por %p18912_p13, %p18911_p12 }
  0x2f   : > { %p18909_p11 = pneg %p18908_p10  ;;  %p18915_p2 = por %p18914_p1, %p18913_p0 }
  0x31   : > { %p18916_p4 = pnand %p18915_p2, %p18909_p11 }
  0x33   : > { %18919 = shalt.err (!%p18916_p4)
}
  0x34   : > { %s18920_s20 = scalar_lea.vmem %s19423_s23, 16384  ;;  %s19271_s9 = smov [#allocation8]  }
  0x35   : > { %p18921_p5 = scmp.ne.s32.totalorder %s19423_s23, %s18920_s20  ;;  %s18925_s27 = sshll.u32 %s19271_s9, 4  ;;  %s18926_s27 = int_to_ptr.vmem [resolvable:$false] %s18925_s27 }
  0x36   : > { %s18927_s29 = scalar_lea.vmem %s18926_s27, 32768  ;;  %p18928_p6 = scmp.lt.s32.totalorder %s19423_s23, %s18926_s27 }
  0x37   : > { %p18923_p8 = pnand %p18921_p5, %p22155_p9  ;;  %p18929_p12 = scmp.lt.s32.totalorder %s18927_s29, %s18920_s20 }
  0x39   : > { %p18924_p10 = pneg %p18923_p8  ;;  %p18930_p13 = por %p18929_p12, %p18928_p6 }
  0x3b   : > { %p18931_p0 = pnand %p18930_p13, %p18924_p10 }
  0x3d   : > { %18934 = shalt.err (!%p18931_p0)
}
  0x3e   : > { %s19272_s26 = smov 2048   ;;  %s22147_s28 = smov 256  }
  0x3f   : > { %s22149_s22 = smov 16   ;;  %s22193_s20 = scalar_lea.sflag [#allocation9], %s19403_s24 }
  0x40   : > { %16176 = dma.hbm_to_vmem [thread:$0]  (!%p19419_p7), %s19415_s7, 16384, %s19423_s23, %s22193_s20, %s19272_s26, %s22147_s28, %s22149_s22  }
  0x41   : > { %s14095_s9 = sadd.s32 4294967288, %s19269_s18  ;;  %s14101_s27 = sadd.s32 4294967288, %s19386_s19 }
  0x42   : > { %p117_p6 = scmp.lt.s32.totalorder %s14095_s9, 3  ;;  %p14096_p11 = scmp.gt.s32.totalorder %s14095_s9, 0 }
  0x43   : > { %s129_s29 = sadd.s32 1, %s19253_s14  ;;  %p122_p1 = scmp.lt.s32.totalorder %s14101_s27, 3 }
  0x44   : > { %s22261_s9 = smov (!%p117_p6, %s14095_s9), 3  ;;  %p14102_p2 = scmp.gt.s32.totalorder %s14101_s27, 0 }
  0x45   : > { %s22263_s9 = smov (!%p14096_p11, %s22261_s9), 0  ;;  %s22265_s27 = smov (!%p122_p1, %s14101_s27), 3 }
  0x46   : > { %22194 = sst [smem:[#allocation30_spill]] %s22263_s9  ;;  %p136_p4 = scmp.ne.s32.totalorder %s19253_s14, %s19249_s13 }
  0x47   : > { %s22267_s27 = smov (!%p14102_p2, %s22265_s27), 0  ;;  %s22154_s7 = sand.u32 1, %s19253_s14  }
  0x48   : > { %p138_p5 = por %p136_p4, %p22156_p3  ;;  %s126_s23 = ssub.s32 %s22263_s9, %s22267_s27 }
  0x49   : > { %s14153_s26 = sshll.u32 %s22154_s7, 13  ;;  %p127_p8 = scmp.eq.s32.totalorder %s126_s23, 0 }
  0x4a   : > { %s16023_s20 = sshll.u32 %s22263_s9, 8  ;;  %s410_s28 = scalar_lea.vmem [#allocation11], %s14153_s26 }
  0x4b   : > { %s422_s22 = sshll.u32 %s410_s28, 4  ;;  %s22196_s3 = sld [smem:[#allocation37_spill]]  ;;  %s19477_s22 = int_to_ptr.vmem [resolvable:$true] %s422_s22 }
  0x4c   : > { %s19470_s1 = scalar_select %p127_p8, %s19253_s14, %s129_s29  }
  0x4d   : > { %p22197_p10 = scmp.lt.s32.totalorder %s19269_s18, 15  ;;  %s22157_s28 = scalar_lea.sflag [#allocation12], %s19403_s24 }
  0x4e   : > { %22195 = sst [smem:[#allocation31_spill]] %s19470_s1 }
  0x4f   : > { %p19481_p12 = pnand %p22197_p10, %p138_p5 }
  0x51   : > { %s19475_s6 = scalar_lea.hbm %s22196_s3, %s16023_s20  ;;  %p22164_p0 = pneg %p19481_p12 }
  0x52   : > { %s22198_s27 = scalar_select %p19481_p12, 1, 0 }
  0x53   : > { %s18935_s29 = scalar_lea.hbm %s19475_s6, 131072  ;;  %s18940_s23 = scalar_lea.hbm %s22196_s3, 524288 }
  0x54   : > { %22199 = sst [smem:[#allocation32_spill]] %s22198_s27  ;;  %p18936_p13 = scmp.ne.s32.totalorder %s19475_s6, %s18935_s29 }
  0x55   : > { %p18941_p1 = scmp.lt.u32.totalorder %s19475_s6, %s22196_s3  ;;  %p18942_p2 = scmp.lt.u32.totalorder %s18940_s23, %s18935_s29 }
  0x56   : > { %p18938_p6 = pnand %p22164_p0, %p18936_p13  ;;  %p18944_p5 = scmp.lt.u32.totalorder %s18935_s29, %s19475_s6 }
  0x57   : > { %p18943_p4 = por %p18942_p2, %p18941_p1 }
  0x58   : > { %p18939_p11 = pneg %p18938_p6 }
  0x59   : > { %p18945_p8 = por %p18944_p5, %p18943_p4 }
  0x5b   : > { %p18946_p10 = pnand %p18945_p8, %p18939_p11 }
  0x5d   : > { %18949 = shalt.err (!%p18946_p10)
}
  0x5e   : > { %s18950_s7 = scalar_lea.vmem %s19477_s22, 131072  ;;  %s19275_s4 = smov [#allocation11]  }
  0x5f   : > { %p18951_p13 = scmp.ne.s32.totalorder %s19477_s22, %s18950_s7  ;;  %s18955_s25 = sshll.u32 %s19275_s4, 4  ;;  %s18956_s25 = int_to_ptr.vmem [resolvable:$false] %s18955_s25 }
  0x60   : > { %s18957_s26 = scalar_lea.vmem %s18956_s25, 262144  ;;  %p18958_p3 = scmp.lt.s32.totalorder %s19477_s22, %s18956_s25 }
  0x61   : > { %p18953_p6 = pnand %p18951_p13, %p22164_p0  ;;  %p18959_p1 = scmp.lt.s32.totalorder %s18957_s26, %s18950_s7 }
  0x63   : > { %p18954_p9 = pneg %p18953_p6  ;;  %p18960_p2 = por %p18959_p1, %p18958_p3 }
  0x65   : > { %p18961_p4 = pnand %p18960_p2, %p18954_p9 }
  0x67   : > { %18964 = shalt.err (!%p18961_p4)
}
  0x68   : > { %s19276_s29 = smov 1024   ;;  %s22200_s23 = smov 16  }
  0x69   : > { %s22201_s20 = smov 256   ;;  %s14119_s7 = sadd.s32 4294967284, %s19269_s18 }
  0x6a   : > { %16182 = dma.hbm_to_vmem [thread:$0]  (!%p19481_p12), %s19475_s6, 131072, %s19477_s22, %s22157_s28, %s19276_s29, %s22201_s20, %s22200_s23  }
  0x6b   : > { %p189_p3 = scmp.lt.s32.totalorder %s14119_s7, 1  ;;  %p14120_p9 = scmp.gt.s32.totalorder %s14119_s7, 0 }
  0x6c   : > { %s14125_s4 = sadd.s32 4294967284, %s19386_s19  ;;  %s201_s25 = sadd.s32 1, %s19241_s11 }
  0x6d   : > { %s22269_s7 = smov (!%p189_p3, %s14119_s7), 1  ;;  %p194_p11 = scmp.lt.s32.totalorder %s14125_s4, 1 }
  0x6e   : > { %p14126_p5 = scmp.gt.s32.totalorder %s14125_s4, 0  ;;  %s22271_s7 = smov (!%p14120_p9, %s22269_s7), 0 }
  0x6f   : > { %s22273_s4 = smov (!%p194_p11, %s14125_s4), 1  ;;  %p208_p8 = scmp.ne.s32.totalorder %s19241_s11, %s19237_s10 }
  0x70   : > { %s22275_s4 = smov (!%p14126_p5, %s22273_s4), 0  ;;  %p22202_p10 = scmp.eq.s32.totalorder %s19269_s18, 0 }
  0x71   : > { %s22163_s6 = sand.u32 1, %s19241_s11   ;;  %s198_s22 = ssub.s32 %s22271_s7, %s22275_s4 }
  0x72   : > { %p210_p13 = por %p208_p8, %p22202_p10  ;;  %s14171_s26 = sshll.u32 %s22163_s6, 12 }
  0x73   : > { %p199_p6 = scmp.eq.s32.totalorder %s198_s22, 0  ;;  %s16029_s29 = sshll.u32 %s22271_s7, 8 }
  0x74   : > { %s460_s28 = scalar_lea.vmem [#allocation14], %s14171_s26  ;;  %s22204_s5 = sld [smem:[#allocation39_spill]] }
  0x75   : > { %s472_s3 = sshll.u32 %s460_s28, 4  ;;  %p22205_p1 = scmp.lt.s32.totalorder %s19269_s18, 15  ;;  %s19537_s3 = int_to_ptr.vmem [resolvable:$true] %s472_s3 }
  0x76   : > { %s19530_s1 = scalar_select %p199_p6, %s19241_s11, %s201_s25  }
  0x77   : > { %p19541_p2 = pnand %p22205_p1, %p210_p13  ;;  %s22167_s28 = scalar_lea.sflag [#allocation15], %s19403_s24 }
  0x78   : > { %22203 = sst [smem:[#allocation33_spill]] %s19530_s1 }
  0x79   : > { %s22206_s4 = scalar_select %p19541_p2, 1, 0 }
  0x7a   : > { %s19535_s9 = scalar_lea.hbm %s22204_s5, %s16029_s29  ;;  %p22170_p3 = pneg %p19541_p2 }
  0x7b   : > { %s18965_s25 = scalar_lea.hbm %s19535_s9, 65536  ;;  %s18970_s22 = scalar_lea.hbm %s22204_s5, 131072 }
  0x7c   : > { %p18966_p4 = scmp.ne.s32.totalorder %s19535_s9, %s18965_s25  ;;  %p18971_p5 = scmp.lt.u32.totalorder %s19535_s9, %s22204_s5 }
  0x7d   : > { %p18972_p8 = scmp.lt.u32.totalorder %s18970_s22, %s18965_s25  ;;  %p18974_p13 = scmp.lt.u32.totalorder %s18965_s25, %s19535_s9 }
  0x7e   : > { %p18968_p9 = pnand %p22170_p3, %p18966_p4 }
  0x7f   : > { %p18973_p10 = por %p18972_p8, %p18971_p5 }
  0x80   : > { %p18969_p11 = pneg %p18968_p9 }
  0x81   : > { %p18975_p6 = por %p18974_p13, %p18973_p10 }
  0x83   : > { %p18976_p1 = pnand %p18975_p6, %p18969_p11 }
  0x85   : > { %18979 = shalt.err (!%p18976_p1)
}
  0x86   : > { %s18980_s6 = scalar_lea.vmem %s19537_s3, 65536  ;;  %s19277_s19 = smov [#allocation14]  }
  0x87   : > { %p18981_p4 = scmp.ne.s32.totalorder %s19537_s3, %s18980_s6  ;;  %s18985_s27 = sshll.u32 %s19277_s19, 4  ;;  %s18986_s27 = int_to_ptr.vmem [resolvable:$false] %s18985_s27 }
  0x88   : > { %s18987_s26 = scalar_lea.vmem %s18986_s27, 131072  ;;  %p18988_p12 = scmp.lt.s32.totalorder %s19537_s3, %s18986_s27 }
  0x89   : > { %p18983_p9 = pnand %p18981_p4, %p22170_p3  ;;  %p18989_p5 = scmp.lt.s32.totalorder %s18987_s26, %s18980_s6 }
  0x8b   : > { %p18984_p0 = pneg %p18983_p9  ;;  %p18990_p8 = por %p18989_p5, %p18988_p12 }
  0x8d   : > { %p18991_p10 = pnand %p18990_p8, %p18984_p0 }
  0x8f   : > { %18994 = shalt.err (!%p18991_p10)
}
  0x90   : > { %s19278_s25 = smov 512   ;;  %s19576_s6 = sadd.s32 4294967295, %s19269_s18  }
  0x91   : > { %16188 = dma.hbm_to_vmem [thread:$0]  (!%p19541_p2), %s19535_s9, 65536, %s19537_s3, %s22167_s28, %s19278_s25, %s22201_s20, %s22200_s23  }
  0x92   : > { %p76_p12 = scmp.ne.s32.totalorder %s19261_s16, %s19257_s15  ;;  %p22169_p0 = scmp.eq.s32.totalorder %s19576_s6, 0 }
  0x93   : > { %p142_p11 = scmp.ne.s32.totalorder %s19249_s13, %s19245_s12  ;;  %p214_p13 = scmp.ne.s32.totalorder %s19237_s10, %s19233_s30 }
  0x94   : > { %p19587_p6 = por %p22169_p0, %p76_p12  ;;  %p14143_p1 = scmp.ge.s32.totalorder %s19269_s18, 1 }
  0x95   : > { %p19594_p4 = por %p142_p11, %p22169_p0  ;;  %p19600_p9 = por %p214_p13, %p22169_p0 }
  0x96   : > { %s22207_s22 = scalar_select %p19587_p6, 1, 0 }
  0x97   : > { %s22208_s3 = scalar_select %p19594_p4, 1, 0 }
  0x98   : > { %s22209_s15 = scalar_select %p19600_p9, 1, 0 }
  0x99   : > { %p324_p5 = scmp.lt.s32.totalorder %s19269_s18, 16  ;;  %s19279_s12 = smov [#allocation5]  }
  0x9a   : > { %s337_s9 = sshll.u32 %s19279_s12, 4  ;;  %s19280_s23 = smov [#allocation17]   ;;  %s19609_s9 = int_to_ptr.vmem [resolvable:$true] %s337_s9 }
  0x9b   : > { %p19605_p8 = pnand %p14143_p1, %p324_p5  ;;  %s351_s20 = sshll.u32 %s19280_s23, 4  ;;  %s19613_s20 = int_to_ptr.vmem [resolvable:$true] %s351_s20 }
  0x9c   : > { %s22211_s29 = sand.u32 1, %s19265_s17   ;;  %s16020_s27 = sshll.u32 %s19392_s21, 6 }
  0x9d   : > { %s22210_s30 = scalar_select %p19605_p8, 1, 0 }
  0x9e   : > { %p16166_p10 = pneg %p19605_p8  ;;  %s14150_s19 = sshll.u32 %s22211_s29, 2 }
  0x9f   : > { %s22213_s2 = sld [smem:[#allocation36_spill]]  ;;  %s389_s23 = scalar_lea.vmem [#allocation10], %s14150_s19 }
  0xa0   : > { %p19620_p12 = pnand %p16166_p10, %p22169_p0  ;;  %s399_s28 = sshll.u32 %s389_s23, 4  ;;  %s19629_s28 = int_to_ptr.vmem [resolvable:$true] %s399_s28 }
  0xa1   : > { %s22214_s0 = sld [smem:[#allocation34_spill]] }
  0xa2   : > { %p18997_p13 = pneg %p19620_p12 }
  0xa5   : > { %s19627_s12 = scalar_lea.hbm %s22213_s2, %s16020_s27 }
  0xa7   : > { %s18995_s21 = scalar_lea.hbm %s22214_s0, 512 }
  0xa8   : > { %p18996_p11 = scmp.ne.s32.totalorder %s22214_s0, %s18995_s21  ;;  %p19002_p10 = scmp.lt.u32.totalorder %s18995_s21, %s22214_s0 }
  0xaa   : > { %p18998_p1 = pnand %p18997_p13, %p18996_p11 }
  0xac   : > { %p18999_p5 = pneg %p18998_p1 }
  0xae   : > { %p19004_p0 = pnand %p19002_p10, %p18999_p5 }
  0xb0   : > { %19007 = shalt.err (!%p19004_p0)
}
  0xb1   : > { %s19008_s5 = scalar_lea.vmem %s19609_s9, 512  ;;  %p19016_p6 = scmp.lt.s32.totalorder %s19609_s9, %s19609_s9 }
  0xb2   : > { %p19009_p3 = scmp.ne.s32.totalorder %s19609_s9, %s19008_s5  ;;  %p19017_p11 = scmp.lt.s32.totalorder %s19008_s5, %s19008_s5 }
  0xb4   : > { %p19011_p9 = pnand %p19009_p3, %p18997_p13  ;;  %p19018_p1 = por %p19017_p11, %p19016_p6 }
  0xb6   : > { %p19012_p4 = pneg %p19011_p9 }
  0xb8   : > { %p19019_p8 = pnand %p19018_p1, %p19012_p4 }
  0xba   : > { %19022 = shalt.err (!%p19019_p8)
}
  0xbb   : > { %16169 = dma.hbm_to_vmem [thread:$0]  (!%p19620_p12), %s22214_s0, 512, %s19609_s9, [#allocation6]  }
  0xbc   : > { %s22215_s8 = sld [smem:[#allocation42_spill]] }
  0xc2   : > { %s19023_s23 = scalar_lea.hbm %s22215_s8, 16 }
  0xc3   : > { %p19024_p3 = scmp.ne.s32.totalorder %s22215_s8, %s19023_s23  ;;  %p19030_p4 = scmp.lt.u32.totalorder %s19023_s23, %s22215_s8 }
  0xc5   : > { %p19026_p0 = pnand %p19024_p3, %p18997_p13 }
  0xc7   : > { %p19027_p6 = pneg %p19026_p0 }
  0xc9   : > { %p19032_p9 = pnand %p19030_p4, %p19027_p6 }
  0xcb   : > { %19035 = shalt.err (!%p19032_p9)
}
  0xcc   : > { %s19036_s9 = scalar_lea.vmem %s19613_s20, 16  ;;  %s19043_s5 = scalar_lea.vmem %s19613_s20, 32 }
  0xcd   : > { %p19037_p8 = scmp.ne.s32.totalorder %s19613_s20, %s19036_s9  ;;  %p19044_p11 = scmp.lt.s32.totalorder %s19613_s20, %s19613_s20 }
  0xce   : > { %p19045_p1 = scmp.lt.s32.totalorder %s19043_s5, %s19036_s9 }
  0xcf   : > { %p19039_p5 = pnand %p19037_p8, %p18997_p13 }
  0xd0   : > { %p19046_p3 = por %p19045_p1, %p19044_p11 }
  0xd1   : > { %p19040_p10 = pneg %p19039_p5 }
  0xd3   : > { %p19047_p0 = pnand %p19046_p3, %p19040_p10 }
  0xd5   : > { %19050 = shalt.err (!%p19047_p0)
}
  0xd6   : > { %16172 = dma.hbm_to_vmem [thread:$0]  (!%p19620_p12), %s22215_s8, 16, %s19613_s20, [#allocation18]  }
  0xd7   : > { %s19051_s25 = scalar_lea.hbm %s19627_s12, 64  ;;  %p22217_p6 = pneg %p19419_p7 }
  0xd8   : > { %p19052_p13 = scmp.ne.s32.totalorder %s19627_s12, %s19051_s25  ;;  %s19056_s18 = scalar_lea.hbm %s22213_s2, 512 }
  0xd9   : > { %p19057_p8 = scmp.lt.u32.totalorder %s19627_s12, %s22213_s2  ;;  %p19058_p5 = scmp.lt.u32.totalorder %s19056_s18, %s19051_s25 }
  0xda   : > { %p19054_p4 = pnand %p19052_p13, %p22217_p6  ;;  %p19060_p11 = scmp.lt.u32.totalorder %s19051_s25, %s19627_s12 }
  0xdb   : > { %p19059_p10 = por %p19058_p5, %p19057_p8 }
  0xdc   : > { %p19055_p9 = pneg %p19054_p4 }
  0xdd   : > { %p19061_p1 = por %p19060_p11, %p19059_p10 }
  0xdf   : > { %p19062_p3 = pnand %p19061_p1, %p19055_p9 }
  0xe1   : > { %19065 = shalt.err (!%p19062_p3)
}
  0xe2   : > { %s19066_s20 = scalar_lea.vmem %s19629_s28, 64  ;;  %p22218_p0 = pmov %p22217_p6 }
  0xe3   : > { %p19067_p12 = scmp.ne.s32.totalorder %s19629_s28, %s19066_s20  ;;  %s19281_s26 = smov [#allocation10]  }
  0xe4   : > { %s19071_s9 = sshll.u32 %s19281_s26, 4  ;;  %s19072_s9 = int_to_ptr.vmem [resolvable:$false] %s19071_s9 }
  0xe5   : > { %p19069_p13 = pnand %p19067_p12, %p22218_p0  ;;  %s19073_s5 = scalar_lea.vmem %s19072_s9, 128 }
  0xe6   : > { %p19074_p4 = scmp.lt.s32.totalorder %s19629_s28, %s19072_s9  ;;  %p19075_p8 = scmp.lt.s32.totalorder %s19073_s5, %s19066_s20 }
  0xe7   : > { %p19070_p6 = pneg %p19069_p13 }
  0xe8   : > { %p19076_p5 = por %p19075_p8, %p19074_p4 }
  0xea   : > { %p19077_p10 = pnand %p19076_p5, %p19070_p6 }
  0xec   : > { %19080 = shalt.err (!%p19077_p10)
}
  0xed   : > { %s22219_s1 = scalar_lea.sflag [#allocation9], %s19403_s24  ;;  %s22220_s17 = sld [smem:[#allocation30_spill]] }
  0xee   : > { %s22221_s25 = sld [smem:[#allocation32_spill]]  ;;  %s22222_s23 = sand.u32 1, %s19253_s14  }
  0xef   : > { %16179 = dma.hbm_to_vmem [thread:$0]  (!%p19419_p7), %s19627_s12, 64, %s19629_s28, %s22219_s1  }
  0xf0   : > { %s14162_s21 = sshll.u32 %s22222_s23, 2  ;;  %s22223_s20 = sld [smem:[#allocation38_spill]] }
  0xf1   : > { %s436_s19 = scalar_lea.vmem [#allocation13], %s14162_s21  ;;  %s22224_s5 = sand.u32 1, %s19241_s11  }
  0xf2   : > { %s449_s9 = sshll.u32 %s436_s19, 4  ;;  %s19719_s0 = sshll.u32 %s22224_s5, 2  ;;  %s450_s9 = int_to_ptr.vmem [resolvable:$true] %s449_s9 }
  0xf3   : > { %s16026_s18 = sshll.u32 %s22220_s17, 6 }
  0xf4   : > { %p22225_p9 = scmp.ne.s32.totalorder %s22221_s25, 0 }
  0xf6   : > { %s19715_s26 = scalar_lea.hbm %s22223_s20, %s16026_s18  ;;  %p22226_p11 = pneg %p22225_p9 }
  0xf7   : > { %s19081_s2 = scalar_lea.hbm %s19715_s26, 64  ;;  %s19086_s1 = scalar_lea.hbm %s22223_s20, 256 }
  0xf8   : > { %p19082_p7 = scmp.ne.s32.totalorder %s19715_s26, %s19081_s2  ;;  %p19087_p12 = scmp.lt.u32.totalorder %s19715_s26, %s22223_s20 }
  0xf9   : > { %p19088_p0 = scmp.lt.u32.totalorder %s19086_s1, %s19081_s2  ;;  %p19090_p6 = scmp.lt.u32.totalorder %s19081_s2, %s19715_s26 }
  0xfa   : > { %p19084_p1 = pnand %p19082_p7, %p22226_p11 }
  0xfb   : > { %p19089_p13 = por %p19088_p0, %p19087_p12 }
  0xfc   : > { %p19085_p3 = pneg %p19084_p1 }
  0xfd   : > { %p19091_p4 = por %p19090_p6, %p19089_p13 }
  0xff   : > { %p19092_p8 = pnand %p19091_p4, %p19085_p3 }
 0x101   : > { %19095 = shalt.err (!%p19092_p8)
}
 0x102   : > { %s19096_s21 = scalar_lea.vmem %s450_s9, 64  ;;  %p22227_p10 = pmov %p22226_p11 }
 0x103   : > { %p19097_p5 = scmp.ne.s32.totalorder %s450_s9, %s19096_s21  ;;  %s19282_s18 = smov [#allocation13]  }
 0x104   : > { %s19101_s29 = sshll.u32 %s19282_s18, 4  ;;  %s19102_s29 = int_to_ptr.vmem [resolvable:$false] %s19101_s29 }
 0x105   : > { %p19099_p7 = pnand %p19097_p5, %p22227_p10  ;;  %s19103_s27 = scalar_lea.vmem %s19102_s29, 128 }
 0x106   : > { %p19104_p1 = scmp.lt.s32.totalorder %s450_s9, %s19102_s29  ;;  %p19105_p2 = scmp.lt.s32.totalorder %s19103_s27, %s19096_s21 }
 0x107   : > { %p19100_p11 = pneg %p19099_p7 }
 0x108   : > { %p19106_p0 = por %p19105_p2, %p19104_p1 }
 0x10a   : > { %p19107_p12 = pnand %p19106_p0, %p19100_p11 }
 0x10c   : > { %19110 = shalt.err (!%p19107_p12)
}
 0x10d   : > { %s22228_s2 = scalar_lea.sflag [#allocation12], %s19403_s24  ;;  %s16032_s19 = sshll.u32 %s22271_s7, 6 }
 0x10e   : > { %16185 = dma.hbm_to_vmem [thread:$0]  (!%p22225_p9), %s19715_s26, 64, %s450_s9, %s22228_s2  }
 0x10f   : > { %s486_s5 = scalar_lea.vmem [#allocation16], %s19719_s0  ;;  %s22229_s17 = sld [smem:[#allocation40_spill]] }
 0x110   : > { %s499_s28 = sshll.u32 %s486_s5, 4  ;;  %p22231_p3 = scmp.ne.s32.totalorder %s22206_s4, 0  ;;  %s500_s28 = int_to_ptr.vmem [resolvable:$true] %s499_s28 }
 0x112   : > { %p22232_p13 = pneg %p22231_p3 }
 0x115   : > { %s22230_s23 = smov %s22229_s17  ;;  %s497_s18 = scalar_lea.hbm %s22229_s17, %s16032_s19 }
 0x116   : > { %s19111_s21 = scalar_lea.hbm %s497_s18, 64  ;;  %s19116_s27 = scalar_lea.hbm %s22230_s23, 128 }
 0x117   : > { %p19112_p2 = scmp.ne.s32.totalorder %s497_s18, %s19111_s21  ;;  %p19117_p9 = scmp.lt.u32.totalorder %s497_s18, %s22230_s23 }
 0x118   : > { %p19118_p8 = scmp.lt.u32.totalorder %s19116_s27, %s19111_s21  ;;  %p19120_p10 = scmp.lt.u32.totalorder %s19111_s21, %s497_s18 }
 0x119   : > { %p19114_p6 = pnand %p19112_p2, %p22232_p13 }
 0x11a   : > { %p19119_p5 = por %p19118_p8, %p19117_p9 }
 0x11b   : > { %p19115_p4 = pneg %p19114_p6 }
 0x11c   : > { %p19121_p7 = por %p19120_p10, %p19119_p5 }
 0x11e   : > { %p19122_p11 = pnand %p19121_p7, %p19115_p4 }
 0x120   : > { %19125 = shalt.err (!%p19122_p11)
}
 0x121   : > { %s19126_s0 = scalar_lea.vmem %s500_s28, 64  ;;  %p22233_p0 = pmov %p22232_p13 }
 0x122   : > { %p19127_p1 = scmp.ne.s32.totalorder %s500_s28, %s19126_s0  ;;  %s19283_s7 = smov [#allocation16]  }
 0x123   : > { %s19131_s9 = sshll.u32 %s19283_s7, 4  ;;  %s19132_s9 = int_to_ptr.vmem [resolvable:$false] %s19131_s9 }
 0x124   : > { %p19129_p12 = pnand %p19127_p1, %p22233_p0  ;;  %s19133_s2 = scalar_lea.vmem %s19132_s9, 128 }
 0x125   : > { %p19134_p13 = scmp.lt.s32.totalorder %s500_s28, %s19132_s9  ;;  %p19135_p6 = scmp.lt.s32.totalorder %s19133_s2, %s19126_s0 }
 0x126   : > { %p19130_p2 = pneg %p19129_p12 }
 0x127   : > { %p19136_p8 = por %p19135_p6, %p19134_p13 }
 0x129   : > { %p19137_p9 = pnand %p19136_p8, %p19130_p2 }
 0x12b   : > { %19140 = shalt.err (!%p19137_p9)
}
 0x12c   : > { %s22234_s8 = scalar_lea.sflag [#allocation15], %s19403_s24  ;;  %p22235_p4 = scmp.ne.s32.totalorder %s22210_s30, 0 }
 0x12d   : > { %16191 = dma.hbm_to_vmem [thread:$0]  (!%p22231_p3), %s497_s18, 64, %s500_s28, %s22234_s8  }
 0x12e   : > { %508 = sbr.rel (%p22235_p4) target bundleno = 3158 (0xc56), region = 56  ;;  %p22236_p5 = scmp.eq.s32.totalorder (!%p22235_p4), %s19576_s6, 0 }
 0x135   : > { %19208 = dma.done.wait (%p22236_p5), [#allocation6], 512   ;;  %p22237_p10 = pmov %p22236_p5 }
 0x136   : > { %s514_s19 = sand.u32 1, %s19576_s6   ;;  %s516_s5 = sand.u32 1, %s19261_s16  }
 0x137   : > { %19210 = vsyncadd (%p22237_p10), [#allocation6], 4294966784  ;;  %s14191_s12 = sshll.u32 %s516_s5, 10  ;;  %s515_s1 = scalar_lea.sflag [#allocation9], %s514_s19 }
 0x138   : > { %s19771_s4 = scalar_lea.vmem [#allocation8], %s14191_s12  ;;  %p22238_p7 = scmp.ne.s32.totalorder %s22207_s22, 0 }
 0x13a   : > { %19212 = dma.done.wait (%p22238_p7), %s515_s1, 16448  }
 0x13b   : > { %19214 = vsyncadd (%p22238_p7), %s515_s1, 4294950848  ;;  %s19777_s24 = sshll.u32 %s516_s5, 2  ;;  %s534_s30 = sand.u32 1, %s19249_s13  }
 0x13c   : > { %s14193_s28 = sshll.u32 %s534_s30, 13  ;;  %s527_s17 = scalar_lea.vmem [#allocation10], %s19777_s24 }
 0x13d   : > { %s533_s18 = scalar_lea.sflag [#allocation12], %s514_s19  ;;  %s19781_s21 = scalar_lea.vmem [#allocation11], %s14193_s28 }
 0x13e   : > { %p22239_p3 = scmp.ne.s32.totalorder %s22208_s3, 0 }
 0x140   : > { %19216 = dma.done.wait (%p22239_p3), %s533_s18, 131136  }
 0x141   : > { %19218 = vsyncadd (%p22239_p3), %s533_s18, 4294836160  ;;  %s19787_s22 = sshll.u32 %s534_s30, 2  ;;  %s552_s25 = sand.u32 1, %s19237_s10  }
 0x142   : > { %s14195_s29 = sshll.u32 %s552_s25, 12  ;;  %s545_s27 = scalar_lea.vmem [#allocation13], %s19787_s22 }
 0x143   : > { %s551_s26 = scalar_lea.sflag [#allocation15], %s514_s19  ;;  %s19791_s0 = scalar_lea.vmem [#allocation14], %s14195_s29 }
 0x144   : > { %p22240_p11 = scmp.ne.s32.totalorder %s22209_s15, 0 }
 0x146   : > { %19220 = dma.done.wait (%p22240_p11), %s551_s26, 65600  }
 0x147   : > { %19222 = vsyncadd (%p22240_p11), %s551_s26, 4294901696  ;;  %s19797_s7 = sshll.u32 %s552_s25, 2  ;;  %p22241_p1 = pmov %p22236_p5 }
 0x148   : > { %s563_s3 = scalar_lea.vmem [#allocation16], %s19797_s7 }
 0x149   : > { %19224 = dma.done.wait (%p22241_p1), [#allocation18], 16   ;;  %p22242_p0 = pmov %p22241_p1 }
 0x14a   : > { %p14198_p12 = scmp.ge.s32.totalorder %s19576_s6, 8 }
 0x14b   : > { %19226 = vsyncadd (%p22242_p0), [#allocation18], 4294967280  ;;  %v16287_v0 = vld [vmem:[%s19771_s4 + $0x4] ss:$16 sps:$4 sm:$0xff] (!%p14198_p12)   ;;  %v16289_v1 = vld [vmem:[%s19771_s4 + $0xc] ss:$16 sps:$4 sm:$0xff] (!%p14198_p12)  }
 0x14c   : > { %656 = sbr.rel (%p14198_p12) target bundleno = 680 (0x2a8), region = 92  ;;  %1455 = vmatprep.subr.bf16.mxu0 (!%p14198_p12), %v16287_v0  ;;  %v16291_v2 = vld [vmem:[%s19771_s4] ss:$16 sps:$4 sm:$0xff] (!%p14198_p12)   ;;  %v16292_v3 = vld [vmem:[%s19771_s4 + $0x8] ss:$16 sps:$4 sm:$0xff] (!%p14198_p12)   ;;  %1537 = vmatprep.subr.bf16.mxu1 (!%p14198_p12), %v16289_v1  ;;  %s16035_s15 = sshll.u32 (!%p14198_p12), %s19576_s6, 4 }
 0x14d   : > { %v16293_v4 = vld [vmem:[%s19771_s4 + $0x24] ss:$16 sps:$4 sm:$0xff] (!%p14198_p12)   ;;  %1456 = vmatpush1.bf16.msra.mxu0 (!%p14198_p12), %v16291_v2  ;;  %1538 = vmatpush1.bf16.msra.mxu1 (!%p14198_p12), %v16292_v3  ;;  %v16295_v5 = vld [vmem:[%s19771_s4 + $0x2c] ss:$16 sps:$4 sm:$0xff] (!%p14198_p12)   ;;  %v16297_v6 = vld [vmem:[%s19771_s4 + $0x20] ss:$16 sps:$4 sm:$0xff] (!%p14198_p12)  }
 0x14e   : > { %1457 = vmatprep.subr.bf16.mxu0 (!%p14198_p12), %v16293_v4  ;;  %v16298_v7 = vld [vmem:[%s19771_s4 + $0x28] ss:$16 sps:$4 sm:$0xff] (!%p14198_p12)   ;;  %1539 = vmatprep.subr.bf16.mxu1 (!%p14198_p12), %v16295_v5  ;;  %v16299_v8 = vld [vmem:[%s19771_s4 + $0x44] ss:$16 sps:$4 sm:$0xff] (!%p14198_p12)   ;;  %v16301_v9 = vld [vmem:[%s19771_s4 + $0x4c] ss:$16 sps:$4 sm:$0xff] (!%p14198_p12)  }
 0x14f   : > { %v16303_v10 = vld [vmem:[%s19771_s4 + $0x40] ss:$16 sps:$4 sm:$0xff] (!%p14198_p12)   ;;  %v16304_v11 = vld [vmem:[%s19771_s4 + $0x48] ss:$16 sps:$4 sm:$0xff] (!%p14198_p12)   ;;  %v16305_v12 = vld [vmem:[%s19771_s4 + $0x64] ss:$16 sps:$4 sm:$0xff] (!%p14198_p12)  }
 0x150   : > { %v16307_v13 = vld [vmem:[%s19771_s4 + $0x6c] ss:$16 sps:$4 sm:$0xff] (!%p14198_p12)   ;;  %v16309_v14 = vld [vmem:[%s19771_s4 + $0x60] ss:$16 sps:$4 sm:$0xff] (!%p14198_p12)   ;;  %v16310_v15 = vld [vmem:[%s19771_s4 + $0x68] ss:$16 sps:$4 sm:$0xff] (!%p14198_p12)  }
 0x151   : > { %1458 = vmatpush1.bf16.msra.mxu0 (!%p14198_p12), %v16297_v6  ;;  %1540 = vmatpush1.bf16.msra.mxu1 (!%p14198_p12), %v16298_v7  ;;  %v16311_v16 = vld [vmem:[%s19771_s4 + $0x84] ss:$16 sps:$4 sm:$0xff] (!%p14198_p12)   ;;  %v16313_v17 = vld [vmem:[%s19771_s4 + $0x8c] ss:$16 sps:$4 sm:$0xff] (!%p14198_p12)   ;;  %v16315_v18 = vld [vmem:[%s19771_s4 + $0x80] ss:$16 sps:$4 sm:$0xff] (!%p14198_p12)  }
 0x152   : > { %1459 = vmatprep.subr.bf16.mxu0 (!%p14198_p12), %v16299_v8  ;;  %1541 = vmatprep.subr.bf16.mxu1 (!%p14198_p12), %v16301_v9  ;;  %v16316_v19 = vld [vmem:[%s19771_s4 + $0x88] ss:$16 sps:$4 sm:$0xff] (!%p14198_p12)   ;;  %v16317_v20 = vld [vmem:[%s19771_s4 + $0xa4] ss:$16 sps:$4 sm:$0xff] (!%p14198_p12)   ;;  %v16319_v21 = vld [vmem:[%s19771_s4 + $0xac] ss:$16 sps:$4 sm:$0xff] (!%p14198_p12)  }
 0x153   : > { %v16321_v22 = vld [vmem:[%s19771_s4 + $0xa0] ss:$16 sps:$4 sm:$0xff]   ;;  %v16322_v23 = vld [vmem:[%s19771_s4 + $0xa8] ss:$16 sps:$4 sm:$0xff]   ;;  %v16323_v24 = vld [vmem:[%s19771_s4 + $0xc4] ss:$16 sps:$4 sm:$0xff]  }
 0x154   : > { %v16325_v25 = vld [vmem:[%s19771_s4 + $0xcc] ss:$16 sps:$4 sm:$0xff]   ;;  %v16327_v26 = vld [vmem:[%s19771_s4 + $0xc0] ss:$16 sps:$4 sm:$0xff]   ;;  %v16328_v27 = vld [vmem:[%s19771_s4 + $0xc8] ss:$16 sps:$4 sm:$0xff]  }
 0x155   : > { %1460 = vmatpush1.bf16.msra.mxu0 %v16303_v10  ;;  %1542 = vmatpush1.bf16.msra.mxu1 %v16304_v11  ;;  %v16329_v28 = vld [vmem:[%s19771_s4 + $0xe4] ss:$16 sps:$4 sm:$0xff]   ;;  %v16331_v29 = vld [vmem:[%s19771_s4 + $0xec] ss:$16 sps:$4 sm:$0xff]   ;;  %v16333_v30 = vld [vmem:[%s19771_s4 + $0xe0] ss:$16 sps:$4 sm:$0xff]  }
 0x156   : > { %1461 = vmatprep.subr.bf16.mxu0 %v16305_v12  ;;  %1543 = vmatprep.subr.bf16.mxu1 %v16307_v13  ;;  %v16334_v31 = vld [vmem:[%s19771_s4 + $0xe8] ss:$16 sps:$4 sm:$0xff]   ;;  %v16335_v32 = vld [vmem:[%s19771_s4 + $0x104] ss:$16 sps:$4 sm:$0xff]   ;;  %v16337_v33 = vld [vmem:[%s19771_s4 + $0x10c] ss:$16 sps:$4 sm:$0xff]  }
 0x157   : > { %v16339_v34 = vld [vmem:[%s19771_s4 + $0x100] ss:$16 sps:$4 sm:$0xff]   ;;  %v16340_v35 = vld [vmem:[%s19771_s4 + $0x108] ss:$16 sps:$4 sm:$0xff]   ;;  %v16341_v36 = vld [vmem:[%s19771_s4 + $0x124] ss:$16 sps:$4 sm:$0xff]  }
 0x158   : > { %v16343_v37 = vld [vmem:[%s19771_s4 + $0x12c] ss:$16 sps:$4 sm:$0xff]   ;;  %v16345_v38 = vld [vmem:[%s19771_s4 + $0x120] ss:$16 sps:$4 sm:$0xff]   ;;  %v16346_v39 = vld [vmem:[%s19771_s4 + $0x128] ss:$16 sps:$4 sm:$0xff]  }
 0x159   : > { %1462 = vmatpush1.bf16.msra.mxu0 %v16309_v14  ;;  %1544 = vmatpush1.bf16.msra.mxu1 %v16310_v15  ;;  %v16347_v40 = vld [vmem:[%s19771_s4 + $0x144] ss:$16 sps:$4 sm:$0xff]   ;;  %v16349_v41 = vld [vmem:[%s19771_s4 + $0x14c] ss:$16 sps:$4 sm:$0xff]   ;;  %v16351_v42 = vld [vmem:[%s19771_s4 + $0x140] ss:$16 sps:$4 sm:$0xff]  }
 0x15a   : > { %1463 = vmatprep.subr.bf16.mxu0 %v16311_v16  ;;  %1545 = vmatprep.subr.bf16.mxu1 %v16313_v17  ;;  %v16352_v43 = vld [vmem:[%s19771_s4 + $0x148] ss:$16 sps:$4 sm:$0xff]   ;;  %v16353_v44 = vld [vmem:[%s19771_s4 + $0x164] ss:$16 sps:$4 sm:$0xff]   ;;  %v16355_v45 = vld [vmem:[%s19771_s4 + $0x16c] ss:$16 sps:$4 sm:$0xff]  }
 0x15b   : > { %v658_v46 = vld [vmem:[#allocation5 + $0x8] sm:$0xff]  ;;  %v16357_v47 = vld [vmem:[%s19771_s4 + $0x160] ss:$16 sps:$4 sm:$0xff]   ;;  %v16359_v50 = vld [vmem:[%s19771_s4 + $0x184] ss:$16 sps:$4 sm:$0xff]   ;;  %s1641_s9 = scalar_lea.vmem [#allocation2], %s16035_s15 }
 0x15c   : > { %v662_v48 = vpack.c.bf16 %v658_v46, %v658_v46  ;;  %v16358_v49 = vld [vmem:[%s19771_s4 + $0x168] ss:$16 sps:$4 sm:$0xff]   ;;  %v16361_v51 = vld [vmem:[%s19771_s4 + $0x18c] ss:$16 sps:$4 sm:$0xff]   ;;  %v16363_v52 = vld [vmem:[%s19771_s4 + $0x180] ss:$16 sps:$4 sm:$0xff]  }
 0x15d   : > { %1464 = vmatpush1.bf16.msra.mxu0 %v16315_v18  ;;  %1546 = vmatpush1.bf16.msra.mxu1 %v16316_v19  ;;  %v16364_v53 = vld [vmem:[%s19771_s4 + $0x188] ss:$16 sps:$4 sm:$0xff]   ;;  %v16365_v54 = vld [vmem:[%s19771_s4 + $0x1a4] ss:$16 sps:$4 sm:$0xff]   ;;  %v16367_v55 = vld [vmem:[%s19771_s4 + $0x1ac] ss:$16 sps:$4 sm:$0xff]  }
 0x15e   : > { %1465 = vmatprep.subr.bf16.mxu0 %v16317_v20  ;;  %1547 = vmatprep.subr.bf16.mxu1 %v16319_v21  ;;  %v16369_v56 = vld [vmem:[%s19771_s4 + $0x1a0] ss:$16 sps:$4 sm:$0xff]   ;;  %v16370_v57 = vld [vmem:[%s19771_s4 + $0x1a8] ss:$16 sps:$4 sm:$0xff]   ;;  %v16371_v58 = vld [vmem:[%s19771_s4 + $0x1c4] ss:$16 sps:$4 sm:$0xff]  }
 0x15f   : > { %1487 = vmatprep.mubr.bf16.mxu0 %v662_v48  ;;  %1569 = vmatprep.mubr.bf16.mxu1 %v662_v48  ;;  %v16373_v59 = vld [vmem:[%s19771_s4 + $0x1cc] ss:$16 sps:$4 sm:$0xff]   ;;  %v16375_v60 = vld [vmem:[%s19771_s4 + $0x1c0] ss:$16 sps:$4 sm:$0xff]   ;;  %v16376_v61 = vld [vmem:[%s19771_s4 + $0x1c8] ss:$16 sps:$4 sm:$0xff]  }
 0x160   : > { %v16377_v62 = vld [vmem:[%s19771_s4 + $0x1e4] ss:$16 sps:$4 sm:$0xff]   ;;  %v16379_v63 = vld [vmem:[%s19771_s4 + $0x1ec] ss:$16 sps:$4 sm:$0xff]   ;;  %v16381_v0 = vld [vmem:[%s19771_s4 + $0x1e0] ss:$16 sps:$4 sm:$0xff]  }
 0x161   : > { %1466 = vmatpush1.bf16.msra.mxu0 %v16321_v22  ;;  %1548 = vmatpush1.bf16.msra.mxu1 %v16322_v23  ;;  %v16382_v1 = vld [vmem:[%s19771_s4 + $0x1e8] ss:$16 sps:$4 sm:$0xff]   ;;  %v657_v2 = vld [vmem:[#allocation5] sm:$0xff]  ;;  %v16388_v4 = vld [vmem:[%s19771_s4 + $0x20c] ss:$16 sps:$4 sm:$0xff]  }
 0x162   : > { %1467 = vmatprep.subr.bf16.mxu0 %v16323_v24  ;;  %1549 = vmatprep.subr.bf16.mxu1 %v16325_v25  ;;  %v16385_v3 = vld [vmem:[%s19771_s4 + $0x204] ss:$16 sps:$4 sm:$0xff]   ;;  %v661_v5 = vpack.c.bf16 %v657_v2, %v657_v2  ;;  %v16383_v6 = vld [vmem:[%s19771_s4 + $0x200] ss:$16 sps:$4 sm:$0xff]   ;;  %v16386_v7 = vld [vmem:[%s19771_s4 + $0x208] ss:$16 sps:$4 sm:$0xff]  }
 0x163   : > { %v16391_v8 = vld [vmem:[%s19771_s4 + $0x224] ss:$16 sps:$4 sm:$0xff]   ;;  %v16394_v9 = vld [vmem:[%s19771_s4 + $0x22c] ss:$16 sps:$4 sm:$0xff]   ;;  %v16389_v10 = vld [vmem:[%s19771_s4 + $0x220] ss:$16 sps:$4 sm:$0xff]  }
 0x164   : > { %v16392_v11 = vld [vmem:[%s19771_s4 + $0x228] ss:$16 sps:$4 sm:$0xff]   ;;  %v16397_v12 = vld [vmem:[%s19771_s4 + $0x244] ss:$16 sps:$4 sm:$0xff]   ;;  %v16400_v13 = vld [vmem:[%s19771_s4 + $0x24c] ss:$16 sps:$4 sm:$0xff]  }
 0x165   : > { %1468 = vmatpush1.bf16.msra.mxu0 %v16327_v26  ;;  %1550 = vmatpush1.bf16.msra.mxu1 %v16328_v27  ;;  %v16395_v14 = vld [vmem:[%s19771_s4 + $0x240] ss:$16 sps:$4 sm:$0xff]   ;;  %v16398_v15 = vld [vmem:[%s19771_s4 + $0x248] ss:$16 sps:$4 sm:$0xff]   ;;  %v16403_v16 = vld [vmem:[%s19771_s4 + $0x264] ss:$16 sps:$4 sm:$0xff]  }
 0x166   : > { %1469 = vmatprep.subr.bf16.mxu0 %v16329_v28  ;;  %1551 = vmatprep.subr.bf16.mxu1 %v16331_v29  ;;  %v16406_v17 = vld [vmem:[%s19771_s4 + $0x26c] ss:$16 sps:$4 sm:$0xff]   ;;  %v16401_v18 = vld [vmem:[%s19771_s4 + $0x260] ss:$16 sps:$4 sm:$0xff]   ;;  %v16404_v19 = vld [vmem:[%s19771_s4 + $0x268] ss:$16 sps:$4 sm:$0xff]  }
 0x167   : > { %v16409_v20 = vld [vmem:[%s19771_s4 + $0x284] ss:$16 sps:$4 sm:$0xff]   ;;  %v16412_v21 = vld [vmem:[%s19771_s4 + $0x28c] ss:$16 sps:$4 sm:$0xff]   ;;  %v16407_v22 = vld [vmem:[%s19771_s4 + $0x280] ss:$16 sps:$4 sm:$0xff]  }
 0x168   : > { %v16410_v23 = vld [vmem:[%s19771_s4 + $0x288] ss:$16 sps:$4 sm:$0xff]   ;;  %v16415_v24 = vld [vmem:[%s19771_s4 + $0x2a4] ss:$16 sps:$4 sm:$0xff]   ;;  %v16418_v25 = vld [vmem:[%s19771_s4 + $0x2ac] ss:$16 sps:$4 sm:$0xff]  }
 0x169   : > { %1470 = vmatpush1.bf16.msra.mxu0 %v16333_v30  ;;  %1552 = vmatpush1.bf16.msra.mxu1 %v16334_v31  ;;  %v16413_v26 = vld [vmem:[%s19771_s4 + $0x2a0] ss:$16 sps:$4 sm:$0xff]   ;;  %v16416_v27 = vld [vmem:[%s19771_s4 + $0x2a8] ss:$16 sps:$4 sm:$0xff]   ;;  %v16421_v28 = vld [vmem:[%s19771_s4 + $0x2c4] ss:$16 sps:$4 sm:$0xff]  }
 0x16a   : > { %1471 = vmatprep.subr.bf16.mxu0 %v16335_v32  ;;  %1553 = vmatprep.subr.bf16.mxu1 %v16337_v33  ;;  %v16424_v29 = vld [vmem:[%s19771_s4 + $0x2cc] ss:$16 sps:$4 sm:$0xff]   ;;  %v16419_v32 = vld [vmem:[%s19771_s4 + $0x2c0] ss:$16 sps:$4 sm:$0xff]   ;;  %v16422_v33 = vld [vmem:[%s19771_s4 + $0x2c8] ss:$16 sps:$4 sm:$0xff]  }
 0x16b   : > { %v660_v30 = vld [vmem:[#allocation5 + $0x18] sm:$0xff]  ;;  %v16445_v46 = vld [vmem:[%s19771_s4 + $0x344] ss:$16 sps:$4 sm:$0xff]   ;;  %v16443_v48 = vld [vmem:[%s19771_s4 + $0x340] ss:$16 sps:$4 sm:$0xff]  }
 0x16c   : > { %v664_v31 = vpack.c.bf16 %v660_v30, %v660_v30  ;;  %v16475_v2 = vld [vmem:[%s19771_s4 + $0x3e4] ss:$16 sps:$4 sm:$0xff]  }
 0x16d   : > { %1472 = vmatpush1.bf16.msra.mxu0 %v16339_v34  ;;  %1554 = vmatpush1.bf16.msra.mxu1 %v16340_v35  ;;  %v16427_v34 = vld [vmem:[%s19771_s4 + $0x2e4] ss:$16 sps:$4 sm:$0xff]   ;;  %v16430_v35 = vld [vmem:[%s19771_s4 + $0x2ec] ss:$16 sps:$4 sm:$0xff]  }
 0x16e   : > { %1473 = vmatprep.subr.bf16.mxu0 %v16341_v36  ;;  %1555 = vmatprep.subr.bf16.mxu1 %v16343_v37  ;;  %v16425_v36 = vld [vmem:[%s19771_s4 + $0x2e0] ss:$16 sps:$4 sm:$0xff]   ;;  %v16428_v37 = vld [vmem:[%s19771_s4 + $0x2e8] ss:$16 sps:$4 sm:$0xff]  }
 0x171   : > { %1474 = vmatpush1.bf16.msra.mxu0 %v16345_v38  ;;  %1556 = vmatpush1.bf16.msra.mxu1 %v16346_v39  ;;  %v16433_v38 = vld [vmem:[%s19771_s4 + $0x304] ss:$16 sps:$4 sm:$0xff]   ;;  %v16436_v39 = vld [vmem:[%s19771_s4 + $0x30c] ss:$16 sps:$4 sm:$0xff]  }
 0x172   : > { %1475 = vmatprep.subr.bf16.mxu0 %v16347_v40  ;;  %1557 = vmatprep.subr.bf16.mxu1 %v16349_v41  ;;  %v16431_v40 = vld [vmem:[%s19771_s4 + $0x300] ss:$16 sps:$4 sm:$0xff]   ;;  %v16434_v41 = vld [vmem:[%s19771_s4 + $0x308] ss:$16 sps:$4 sm:$0xff]  }
 0x175   : > { %1476 = vmatpush1.bf16.msra.mxu0 %v16351_v42  ;;  %1558 = vmatpush1.bf16.msra.mxu1 %v16352_v43  ;;  %v16439_v42 = vld [vmem:[%s19771_s4 + $0x324] ss:$16 sps:$4 sm:$0xff]   ;;  %v16442_v43 = vld [vmem:[%s19771_s4 + $0x32c] ss:$16 sps:$4 sm:$0xff]  }
 0x176   : > { %1477 = vmatprep.subr.bf16.mxu0 %v16353_v44  ;;  %1559 = vmatprep.subr.bf16.mxu1 %v16355_v45  ;;  %v16437_v44 = vld [vmem:[%s19771_s4 + $0x320] ss:$16 sps:$4 sm:$0xff]   ;;  %v16440_v45 = vld [vmem:[%s19771_s4 + $0x328] ss:$16 sps:$4 sm:$0xff]  }
 0x179   : > { %1478 = vmatpush1.bf16.msra.mxu0 %v16357_v47  ;;  %1560 = vmatpush1.bf16.msra.mxu1 %v16358_v49  ;;  %v16448_v47 = vld [vmem:[%s19771_s4 + $0x34c] ss:$16 sps:$4 sm:$0xff]   ;;  %v16446_v49 = vld [vmem:[%s19771_s4 + $0x348] ss:$16 sps:$4 sm:$0xff]  }
 0x17a   : > { %1479 = vmatprep.subr.bf16.mxu0 %v16359_v50  ;;  %1561 = vmatprep.subr.bf16.mxu1 %v16361_v51  ;;  %v16451_v50 = vld [vmem:[%s19771_s4 + $0x364] ss:$16 sps:$4 sm:$0xff]   ;;  %v16454_v51 = vld [vmem:[%s19771_s4 + $0x36c] ss:$16 sps:$4 sm:$0xff]  }
 0x17d   : > { %1480 = vmatpush1.bf16.msra.mxu0 %v16363_v52  ;;  %1562 = vmatpush1.bf16.msra.mxu1 %v16364_v53  ;;  %v16449_v52 = vld [vmem:[%s19771_s4 + $0x360] ss:$16 sps:$4 sm:$0xff]   ;;  %v16452_v53 = vld [vmem:[%s19771_s4 + $0x368] ss:$16 sps:$4 sm:$0xff]  }
 0x17e   : > { %1481 = vmatprep.subr.bf16.mxu0 %v16365_v54  ;;  %1563 = vmatprep.subr.bf16.mxu1 %v16367_v55  ;;  %v16457_v54 = vld [vmem:[%s19771_s4 + $0x384] ss:$16 sps:$4 sm:$0xff]   ;;  %v16460_v55 = vld [vmem:[%s19771_s4 + $0x38c] ss:$16 sps:$4 sm:$0xff]  }
 0x181   : > { %1482 = vmatpush1.bf16.msra.mxu0 %v16369_v56  ;;  %1564 = vmatpush1.bf16.msra.mxu1 %v16370_v57  ;;  %v16455_v56 = vld [vmem:[%s19771_s4 + $0x380] ss:$16 sps:$4 sm:$0xff]   ;;  %v16458_v57 = vld [vmem:[%s19771_s4 + $0x388] ss:$16 sps:$4 sm:$0xff]  }
 0x182   : > { %1483 = vmatprep.subr.bf16.mxu0 %v16371_v58  ;;  %1565 = vmatprep.subr.bf16.mxu1 %v16373_v59  ;;  %v16463_v58 = vld [vmem:[%s19771_s4 + $0x3a4] ss:$16 sps:$4 sm:$0xff]   ;;  %v16466_v59 = vld [vmem:[%s19771_s4 + $0x3ac] ss:$16 sps:$4 sm:$0xff]  }
 0x185   : > { %1484 = vmatpush1.bf16.msra.mxu0 %v16375_v60  ;;  %1566 = vmatpush1.bf16.msra.mxu1 %v16376_v61  ;;  %v16461_v60 = vld [vmem:[%s19771_s4 + $0x3a0] ss:$16 sps:$4 sm:$0xff]   ;;  %v16464_v61 = vld [vmem:[%s19771_s4 + $0x3a8] ss:$16 sps:$4 sm:$0xff]  }
 0x186   : > { %1485 = vmatprep.subr.bf16.mxu0 %v16377_v62  ;;  %1567 = vmatprep.subr.bf16.mxu1 %v16379_v63  ;;  %v16469_v62 = vld [vmem:[%s19771_s4 + $0x3c4] ss:$16 sps:$4 sm:$0xff]   ;;  %v16472_v63 = vld [vmem:[%s19771_s4 + $0x3cc] ss:$16 sps:$4 sm:$0xff]  }
 0x189   : > { %1486 = vmatpush1.bf16.msra.mxu0 %v16381_v0  ;;  %1568 = vmatpush1.bf16.msra.mxu1 %v16382_v1  ;;  %v16467_v0 = vld [vmem:[%s19771_s4 + $0x3c0] ss:$16 sps:$4 sm:$0xff]   ;;  %v16470_v1 = vld [vmem:[%s19771_s4 + $0x3c8] ss:$16 sps:$4 sm:$0xff]  }
 0x18a   : > { %1496 = vmatprep.subr.bf16.mxu0 %v16385_v3  ;;  %1578 = vmatprep.subr.bf16.mxu1 %v16388_v4  ;;  %v16478_v3 = vld [vmem:[%s19771_s4 + $0x3ec] ss:$16 sps:$4 sm:$0xff]   ;;  %v16473_v4 = vld [vmem:[%s19771_s4 + $0x3e0] ss:$16 sps:$4 sm:$0xff]  }
 0x18c   : > { %1488 = vmatmul.mubr.bf16.vlgmr.msra.gmra.mrb[0].mxu0 %v661_v5  ;;  %1570 = vmatmul.mubr.bf16.vlgmr.msra.gmra.mrb[0].mxu1 %v661_v5  ;;  %v16476_v5 = vld [vmem:[%s19771_s4 + $0x3e8] ss:$16 sps:$4 sm:$0xff]  }
 0x18d   : > { %1497 = vmatpush1.bf16.msra.mxu0 %v16383_v6  ;;  %1579 = vmatpush1.bf16.msra.mxu1 %v16386_v7  ;;  %v659_v6 = vld [vmem:[#allocation5 + $0x10] sm:$0xff] }
 0x18e   : > { %1498 = vmatprep.subr.bf16.mxu0 %v16391_v8  ;;  %1580 = vmatprep.subr.bf16.mxu1 %v16394_v9  ;;  %v663_v7 = vpack.c.bf16 %v659_v6, %v659_v6  ;;  %v795_v8 = vlaneseq }
 0x18f   : > { %1528 = vmatprep.mubr.bf16.mxu0 %v664_v31  ;;  %1610 = vmatprep.mubr.bf16.mxu1 %v664_v31 }
 0x190   : > { %v796_v9 = vshrl.u32 %v795_v8, 7 }
 0x191   : > { %1499 = vmatpush1.bf16.msra.mxu0 %v16389_v10  ;;  %1581 = vmatpush1.bf16.msra.mxu1 %v16392_v11 }
 0x192   : > { %1500 = vmatprep.subr.bf16.mxu0 %v16397_v12  ;;  %1582 = vmatprep.subr.bf16.mxu1 %v16400_v13  ;;  %v797_v10 = vsub.s32 0, %v796_v9  ;;  %v805_v11 = vsub.s32 2, %v796_v9  ;;  %v793_v12 = vld [vmem:[%s527_s17] sm:$0xf]  ;;  %v801_v13 = vsub.s32 1, %v796_v9 }
 0x195   : > { %1501 = vmatpush1.bf16.msra.mxu0 %v16395_v14  ;;  %1583 = vmatpush1.bf16.msra.mxu1 %v16398_v15  ;;  %v809_v14 = vsub.s32 3, %v796_v9  ;;  %v798_v15 = vrot.slane %v793_v12, %v797_v10 }
 0x196   : > { %1502 = vmatprep.subr.bf16.mxu0 %v16403_v16  ;;  %1584 = vmatprep.subr.bf16.mxu1 %v16406_v17  ;;  %v806_v16 = vrot.slane %v793_v12, %v805_v11  ;;  %v802_v17 = vrot.slane %v793_v12, %v801_v13 }
 0x199   : > { %1503 = vmatpush1.bf16.msra.mxu0 %v16401_v18  ;;  %1585 = vmatpush1.bf16.msra.mxu1 %v16404_v19  ;;  %v810_v18 = vrot.slane %v793_v12, %v809_v14 }
 0x19a   : > { %1504 = vmatprep.subr.bf16.mxu0 %v16409_v20  ;;  %1586 = vmatprep.subr.bf16.mxu1 %v16412_v21 }
 0x19d   : > { %1505 = vmatpush1.bf16.msra.mxu0 %v16407_v22  ;;  %1587 = vmatpush1.bf16.msra.mxu1 %v16410_v23 }
 0x19e   : > { %1506 = vmatprep.subr.bf16.mxu0 %v16415_v24  ;;  %1588 = vmatprep.subr.bf16.mxu1 %v16418_v25 }
 0x1a1   : > { %1507 = vmatpush1.bf16.msra.mxu0 %v16413_v26  ;;  %1589 = vmatpush1.bf16.msra.mxu1 %v16416_v27 }
 0x1a2   : > { %1508 = vmatprep.subr.bf16.mxu0 %v16421_v28  ;;  %1590 = vmatprep.subr.bf16.mxu1 %v16424_v29 }
 0x1a5   : > { %1509 = vmatpush1.bf16.msra.mxu0 %v16419_v32  ;;  %1591 = vmatpush1.bf16.msra.mxu1 %v16422_v33 }
 0x1a6   : > { %1510 = vmatprep.subr.bf16.mxu0 %v16427_v34  ;;  %1592 = vmatprep.subr.bf16.mxu1 %v16430_v35 }
 0x1a9   : > { %1511 = vmatpush1.bf16.msra.mxu0 %v16425_v36  ;;  %1593 = vmatpush1.bf16.msra.mxu1 %v16428_v37 }
 0x1aa   : > { %1512 = vmatprep.subr.bf16.mxu0 %v16433_v38  ;;  %1594 = vmatprep.subr.bf16.mxu1 %v16436_v39 }
 0x1ad   : > { %1513 = vmatpush1.bf16.msra.mxu0 %v16431_v40  ;;  %1595 = vmatpush1.bf16.msra.mxu1 %v16434_v41 }
 0x1ae   : > { %1514 = vmatprep.subr.bf16.mxu0 %v16439_v42  ;;  %1596 = vmatprep.subr.bf16.mxu1 %v16442_v43 }
 0x1b1   : > { %1515 = vmatpush1.bf16.msra.mxu0 %v16437_v44  ;;  %1597 = vmatpush1.bf16.msra.mxu1 %v16440_v45 }
 0x1b2   : > { %1516 = vmatprep.subr.bf16.mxu0 %v16445_v46  ;;  %1598 = vmatprep.subr.bf16.mxu1 %v16448_v47 }
 0x1b5   : > { %1517 = vmatpush1.bf16.msra.mxu0 %v16443_v48  ;;  %1599 = vmatpush1.bf16.msra.mxu1 %v16446_v49 }
 0x1b6   : > { %1518 = vmatprep.subr.bf16.mxu0 %v16451_v50  ;;  %1600 = vmatprep.subr.bf16.mxu1 %v16454_v51 }
 0x1b9   : > { %1519 = vmatpush1.bf16.msra.mxu0 %v16449_v52  ;;  %1601 = vmatpush1.bf16.msra.mxu1 %v16452_v53 }
 0x1ba   : > { %1520 = vmatprep.subr.bf16.mxu0 %v16457_v54  ;;  %1602 = vmatprep.subr.bf16.mxu1 %v16460_v55 }
 0x1bd   : > { %1521 = vmatpush1.bf16.msra.mxu0 %v16455_v56  ;;  %1603 = vmatpush1.bf16.msra.mxu1 %v16458_v57 }
 0x1be   : > { %1522 = vmatprep.subr.bf16.mxu0 %v16463_v58  ;;  %1604 = vmatprep.subr.bf16.mxu1 %v16466_v59 }
 0x1c1   : > { %1523 = vmatpush1.bf16.msra.mxu0 %v16461_v60  ;;  %1605 = vmatpush1.bf16.msra.mxu1 %v16464_v61 }
 0x1c2   : > { %1524 = vmatprep.subr.bf16.mxu0 %v16469_v62  ;;  %1606 = vmatprep.subr.bf16.mxu1 %v16472_v63 }
 0x1c5   : > { %1525 = vmatpush1.bf16.msra.mxu0 %v16467_v0  ;;  %1607 = vmatpush1.bf16.msra.mxu1 %v16470_v1 }
 0x1c6   : > { %1526 = vmatprep.subr.bf16.mxu0 %v16475_v2  ;;  %1608 = vmatprep.subr.bf16.mxu1 %v16478_v3 }
 0x1c9   : > { %1527 = vmatpush1.bf16.msra.mxu0 %v16473_v4  ;;  %1609 = vmatpush1.bf16.msra.mxu1 %v16476_v5 }
 0x1cc   : > { %1529 = vmatmul.mubr.bf16.vlgmr.msra.gmra.mrb[0].mxu0 %v663_v7  ;;  %1611 = vmatmul.mubr.bf16.vlgmr.msra.gmra.mrb[0].mxu1 %v663_v7 }
 0x29f   : > { %v1530_v19 = vpop.f32.mrb[0].mxu0  ;;  %v1612_v20 = vpop.f32.mrb[0].mxu1 }
 0x2a0   : > { %v16130_v21 = vadd.f32 %v1530_v19, %v798_v15  ;;  %v16132_v22 = vadd.f32 %v1612_v20, %v806_v16  ;;  %v1532_v23 = vpop.f32.mrb[1].mxu0  ;;  %v1614_v24 = vpop.f32.mrb[1].mxu1 }
 0x2a1   : > { %v16131_v25 = vadd.f32 %v1532_v23, %v802_v17  ;;  %v16133_v26 = vadd.f32 %v1614_v24, %v810_v18  ;;  %v1534_v27 = vpop.f32.mrb[2].mxu0  ;;  %v1616_v28 = vpop.f32.mrb[2].mxu1 }
 0x2a2   : > { %v1619_v29 = vmax.f32 %v16130_v21, 0.0  ;;  %v1621_v30 = vmax.f32 %v16132_v22, 0.0  ;;  %v1535_v31 = vpop.f32.mrb[3].mxu0  ;;  %v1617_v32 = vpop.f32.mrb[3].mxu1 }
 0x2a3   : > { %v1620_v33 = vmax.f32 %v16131_v25, 0.0  ;;  %v1622_v34 = vmax.f32 %v16133_v26, 0.0 }
 0x2a5   : > { %v16033_v35 = vpack.c.bf16 %v1620_v33, %v1619_v29  ;;  %v16034_v36 = vpack.c.bf16 %v1622_v34, %v1621_v30 }
 0x2a7   : > { %1642 = vst [vmem:[%s1641_s9] sm:$0xff] %v16033_v35  ;;  %1643 = vst [vmem:[%s1641_s9 + $0x8] sm:$0xff] %v16034_v36 }
 0x2a8 PF: > { %p1645_p2 = scmp.lt.s32.totalorder %s19576_s6, 12 }
 0x2aa   : > { %p1646_p13 = pnand %p14198_p12, %p1645_p2 }
 0x2ab   : > { %v16479_v37 = vld [vmem:[%s19781_s21 + $0x404] ss:$16 sps:$4 sm:$0xff] (!%p1646_p13)   ;;  %v16483_v39 = vld [vmem:[%s19781_s21 + $0x400] ss:$16 sps:$4 sm:$0xff] (!%p1646_p13)   ;;  %s15387_s2 = sadd.s32 (!%p1646_p13), 4294967288, %s19576_s6 }
 0x2ac   : > { %1649 = sbr.rel (%p1646_p13) target bundleno = 1933 (0x78d), region = 96  ;;  %v16481_v38 = vld [vmem:[%s19781_s21 + $0x604] ss:$16 sps:$4 sm:$0xff] (!%p1646_p13)   ;;  %2565 = vmatprep.subr.bf16.mxu0 (!%p1646_p13), %v16479_v37  ;;  %v16484_v40 = vld [vmem:[%s19781_s21 + $0x600] ss:$16 sps:$4 sm:$0xff] (!%p1646_p13)   ;;  %s16038_s8 = sshll.u32 (!%p1646_p13), %s15387_s2, 4 }
 0x2ad   : > { %2606 = vmatprep.subr.bf16.mxu1 (!%p1646_p13), %v16481_v38  ;;  %v16485_v41 = vld [vmem:[%s19781_s21 + $0x424] ss:$16 sps:$4 sm:$0xff] (!%p1646_p13)   ;;  %2566 = vmatpush1.bf16.msra.mxu0 (!%p1646_p13), %v16483_v39  ;;  %v16489_v43 = vld [vmem:[%s19781_s21 + $0x420] ss:$16 sps:$4 sm:$0xff] (!%p1646_p13)   ;;  %s9314_s19 = scalar_lea.vmem (!%p1646_p13), [#allocation3], %s16038_s8 }
 0x2ae   : > { %2607 = vmatpush1.bf16.msra.mxu1 (!%p1646_p13), %v16484_v40  ;;  %v16487_v42 = vld [vmem:[%s19781_s21 + $0x624] ss:$16 sps:$4 sm:$0xff] (!%p1646_p13)   ;;  %2567 = vmatprep.subr.bf16.mxu0 (!%p1646_p13), %v16485_v41  ;;  %v16490_v44 = vld [vmem:[%s19781_s21 + $0x620] ss:$16 sps:$4 sm:$0xff] (!%p1646_p13)   ;;  %v1781_v19 = vld [vmem:[#allocation2 + $0x10] sm:$0xff] (!%p1646_p13) }
 0x2af   : > { %2608 = vmatprep.subr.bf16.mxu1 (!%p1646_p13), %v16487_v42  ;;  %v16491_v45 = vld [vmem:[%s19781_s21 + $0x444] ss:$16 sps:$4 sm:$0xff] (!%p1646_p13)   ;;  %v16495_v47 = vld [vmem:[%s19781_s21 + $0x440] ss:$16 sps:$4 sm:$0xff] (!%p1646_p13)   ;;  %v19987_v20 = vcombine.high (!%p1646_p13), %v1781_v19, %v1781_v19  ;;  %v16581_v41 = vld [vmem:[%s19781_s21 + $0x40c] ss:$16 sps:$4 sm:$0xff] (!%p1646_p13)  }
 0x2b0   : > { %v16493_v46 = vld [vmem:[%s19781_s21 + $0x644] ss:$16 sps:$4 sm:$0xff] (!%p1646_p13)   ;;  %v16496_v48 = vld [vmem:[%s19781_s21 + $0x640] ss:$16 sps:$4 sm:$0xff] (!%p1646_p13)   ;;  %v16584_v42 = vld [vmem:[%s19781_s21 + $0x60c] ss:$16 sps:$4 sm:$0xff] (!%p1646_p13)  }
 0x2b1   : > { %2568 = vmatpush1.bf16.msra.mxu0 (!%p1646_p13), %v16489_v43  ;;  %v16497_v49 = vld [vmem:[%s19781_s21 + $0x464] ss:$16 sps:$4 sm:$0xff] (!%p1646_p13)   ;;  %v16501_v51 = vld [vmem:[%s19781_s21 + $0x460] ss:$16 sps:$4 sm:$0xff] (!%p1646_p13)   ;;  %2597 = vmatprep.mubr.bf16.mxu0 (!%p1646_p13), %v19987_v20  ;;  %v20010_v43 = vcombine.low (!%p1646_p13), %v1781_v19, %v1781_v19  ;;  %v16641_v19 = vld [vmem:[%s19781_s21 + $0x54c] ss:$16 sps:$4 sm:$0xff] (!%p1646_p13)  }
 0x2b2   : > { %2609 = vmatpush1.bf16.msra.mxu1 (!%p1646_p13), %v16490_v44  ;;  %2569 = vmatprep.subr.bf16.mxu0 (!%p1646_p13), %v16491_v45  ;;  %v16499_v50 = vld [vmem:[%s19781_s21 + $0x664] ss:$16 sps:$4 sm:$0xff] (!%p1646_p13)   ;;  %v16502_v52 = vld [vmem:[%s19781_s21 + $0x660] ss:$16 sps:$4 sm:$0xff] (!%p1646_p13)   ;;  %v16579_v45 = vld [vmem:[%s19781_s21 + $0x408] ss:$16 sps:$4 sm:$0xff] (!%p1646_p13)  }
 0x2b3   : > { %2610 = vmatprep.subr.bf16.mxu1 %v16493_v46  ;;  %v16503_v53 = vld [vmem:[%s19781_s21 + $0x484] ss:$16 sps:$4 sm:$0xff]   ;;  %v16507_v55 = vld [vmem:[%s19781_s21 + $0x480] ss:$16 sps:$4 sm:$0xff]   ;;  %v16582_v46 = vld [vmem:[%s19781_s21 + $0x608] ss:$16 sps:$4 sm:$0xff]  }
 0x2b4   : > { %v16505_v54 = vld [vmem:[%s19781_s21 + $0x684] ss:$16 sps:$4 sm:$0xff]   ;;  %v16508_v56 = vld [vmem:[%s19781_s21 + $0x680] ss:$16 sps:$4 sm:$0xff]  }
 0x2b5   : > { %2570 = vmatpush1.bf16.msra.mxu0 %v16495_v47  ;;  %v16509_v57 = vld [vmem:[%s19781_s21 + $0x4a4] ss:$16 sps:$4 sm:$0xff]   ;;  %v16513_v59 = vld [vmem:[%s19781_s21 + $0x4a0] ss:$16 sps:$4 sm:$0xff]   ;;  %v16587_v47 = vld [vmem:[%s19781_s21 + $0x42c] ss:$16 sps:$4 sm:$0xff]  }
 0x2b6   : > { %2611 = vmatpush1.bf16.msra.mxu1 %v16496_v48  ;;  %2571 = vmatprep.subr.bf16.mxu0 %v16497_v49  ;;  %v16511_v58 = vld [vmem:[%s19781_s21 + $0x6a4] ss:$16 sps:$4 sm:$0xff]   ;;  %v16514_v60 = vld [vmem:[%s19781_s21 + $0x6a0] ss:$16 sps:$4 sm:$0xff]   ;;  %v16590_v48 = vld [vmem:[%s19781_s21 + $0x62c] ss:$16 sps:$4 sm:$0xff]  }
 0x2b7   : > { %2612 = vmatprep.subr.bf16.mxu1 %v16499_v50  ;;  %v16515_v61 = vld [vmem:[%s19781_s21 + $0x4c4] ss:$16 sps:$4 sm:$0xff]   ;;  %v16519_v63 = vld [vmem:[%s19781_s21 + $0x4c0] ss:$16 sps:$4 sm:$0xff]   ;;  %v16585_v49 = vld [vmem:[%s19781_s21 + $0x428] ss:$16 sps:$4 sm:$0xff]  }
 0x2b8   : > { %v16517_v62 = vld [vmem:[%s19781_s21 + $0x6c4] ss:$16 sps:$4 sm:$0xff]   ;;  %v16520_v0 = vld [vmem:[%s19781_s21 + $0x6c0] ss:$16 sps:$4 sm:$0xff]   ;;  %v16588_v50 = vld [vmem:[%s19781_s21 + $0x628] ss:$16 sps:$4 sm:$0xff]  }
 0x2b9   : > { %2572 = vmatpush1.bf16.msra.mxu0 %v16501_v51  ;;  %v16521_v1 = vld [vmem:[%s19781_s21 + $0x4e4] ss:$16 sps:$4 sm:$0xff]   ;;  %v16525_v3 = vld [vmem:[%s19781_s21 + $0x4e0] ss:$16 sps:$4 sm:$0xff]   ;;  %v16593_v51 = vld [vmem:[%s19781_s21 + $0x44c] ss:$16 sps:$4 sm:$0xff]  }
 0x2ba   : > { %2613 = vmatpush1.bf16.msra.mxu1 %v16502_v52  ;;  %2573 = vmatprep.subr.bf16.mxu0 %v16503_v53  ;;  %v16523_v2 = vld [vmem:[%s19781_s21 + $0x6e4] ss:$16 sps:$4 sm:$0xff]   ;;  %v16526_v4 = vld [vmem:[%s19781_s21 + $0x6e0] ss:$16 sps:$4 sm:$0xff]   ;;  %v16596_v52 = vld [vmem:[%s19781_s21 + $0x64c] ss:$16 sps:$4 sm:$0xff]  }
 0x2bb   : > { %2614 = vmatprep.subr.bf16.mxu1 %v16505_v54  ;;  %v16527_v5 = vld [vmem:[%s19781_s21 + $0x504] ss:$16 sps:$4 sm:$0xff]   ;;  %v16531_v7 = vld [vmem:[%s19781_s21 + $0x500] ss:$16 sps:$4 sm:$0xff]   ;;  %v16591_v53 = vld [vmem:[%s19781_s21 + $0x448] ss:$16 sps:$4 sm:$0xff]  }
 0x2bc   : > { %v16529_v6 = vld [vmem:[%s19781_s21 + $0x704] ss:$16 sps:$4 sm:$0xff]   ;;  %v16532_v8 = vld [vmem:[%s19781_s21 + $0x700] ss:$16 sps:$4 sm:$0xff]   ;;  %v16594_v54 = vld [vmem:[%s19781_s21 + $0x648] ss:$16 sps:$4 sm:$0xff]  }
 0x2bd   : > { %2574 = vmatpush1.bf16.msra.mxu0 %v16507_v55  ;;  %v16533_v9 = vld [vmem:[%s19781_s21 + $0x524] ss:$16 sps:$4 sm:$0xff]   ;;  %v16537_v11 = vld [vmem:[%s19781_s21 + $0x520] ss:$16 sps:$4 sm:$0xff]   ;;  %v16599_v55 = vld [vmem:[%s19781_s21 + $0x46c] ss:$16 sps:$4 sm:$0xff]  }
 0x2be   : > { %2615 = vmatpush1.bf16.msra.mxu1 %v16508_v56  ;;  %2575 = vmatprep.subr.bf16.mxu0 %v16509_v57  ;;  %v16535_v10 = vld [vmem:[%s19781_s21 + $0x724] ss:$16 sps:$4 sm:$0xff]   ;;  %v16538_v12 = vld [vmem:[%s19781_s21 + $0x720] ss:$16 sps:$4 sm:$0xff]   ;;  %v16602_v56 = vld [vmem:[%s19781_s21 + $0x66c] ss:$16 sps:$4 sm:$0xff]  }
 0x2bf   : > { %2616 = vmatprep.subr.bf16.mxu1 %v16511_v58  ;;  %v16539_v13 = vld [vmem:[%s19781_s21 + $0x544] ss:$16 sps:$4 sm:$0xff]   ;;  %v16543_v15 = vld [vmem:[%s19781_s21 + $0x540] ss:$16 sps:$4 sm:$0xff]   ;;  %v16597_v57 = vld [vmem:[%s19781_s21 + $0x468] ss:$16 sps:$4 sm:$0xff]  }
 0x2c0   : > { %v16541_v14 = vld [vmem:[%s19781_s21 + $0x744] ss:$16 sps:$4 sm:$0xff]   ;;  %v16544_v16 = vld [vmem:[%s19781_s21 + $0x740] ss:$16 sps:$4 sm:$0xff]   ;;  %v16600_v58 = vld [vmem:[%s19781_s21 + $0x668] ss:$16 sps:$4 sm:$0xff]  }
 0x2c1   : > { %2576 = vmatpush1.bf16.msra.mxu0 %v16513_v59  ;;  %v16545_v17 = vld [vmem:[%s19781_s21 + $0x564] ss:$16 sps:$4 sm:$0xff]   ;;  %v16549_v22 = vld [vmem:[%s19781_s21 + $0x560] ss:$16 sps:$4 sm:$0xff]   ;;  %v16605_v59 = vld [vmem:[%s19781_s21 + $0x48c] ss:$16 sps:$4 sm:$0xff]  }
 0x2c2   : > { %2617 = vmatpush1.bf16.msra.mxu1 %v16514_v60  ;;  %2577 = vmatprep.subr.bf16.mxu0 %v16515_v61  ;;  %v16547_v18 = vld [vmem:[%s19781_s21 + $0x764] ss:$16 sps:$4 sm:$0xff]   ;;  %v16550_v23 = vld [vmem:[%s19781_s21 + $0x760] ss:$16 sps:$4 sm:$0xff]   ;;  %v16608_v60 = vld [vmem:[%s19781_s21 + $0x68c] ss:$16 sps:$4 sm:$0xff]  }
 0x2c3   : > { %2618 = vmatprep.subr.bf16.mxu1 %v16517_v62  ;;  %v1782_v21 = vld [vmem:[#allocation2 + $0x18] sm:$0xff]  ;;  %v16603_v61 = vld [vmem:[%s19781_s21 + $0x488] ss:$16 sps:$4 sm:$0xff]  }
 0x2c4   : > { %v14334_v24 = vcombine.high %v1782_v21, %v1782_v21  ;;  %v16551_v25 = vld [vmem:[%s19781_s21 + $0x584] ss:$16 sps:$4 sm:$0xff]   ;;  %v16555_v27 = vld [vmem:[%s19781_s21 + $0x580] ss:$16 sps:$4 sm:$0xff]   ;;  %v20012_v44 = vcombine.low %v1782_v21, %v1782_v21  ;;  %v16606_v62 = vld [vmem:[%s19781_s21 + $0x688] ss:$16 sps:$4 sm:$0xff]  }
 0x2c5   : > { %2578 = vmatpush1.bf16.msra.mxu0 %v16519_v63  ;;  %v16553_v26 = vld [vmem:[%s19781_s21 + $0x784] ss:$16 sps:$4 sm:$0xff]   ;;  %v16556_v28 = vld [vmem:[%s19781_s21 + $0x780] ss:$16 sps:$4 sm:$0xff]   ;;  %v16611_v63 = vld [vmem:[%s19781_s21 + $0x4ac] ss:$16 sps:$4 sm:$0xff]  }
 0x2c6   : > { %2619 = vmatpush1.bf16.msra.mxu1 %v16520_v0  ;;  %2579 = vmatprep.subr.bf16.mxu0 %v16521_v1  ;;  %v16557_v29 = vld [vmem:[%s19781_s21 + $0x5a4] ss:$16 sps:$4 sm:$0xff]   ;;  %v16561_v31 = vld [vmem:[%s19781_s21 + $0x5a0] ss:$16 sps:$4 sm:$0xff]   ;;  %v16614_v0 = vld [vmem:[%s19781_s21 + $0x6ac] ss:$16 sps:$4 sm:$0xff]  }
 0x2c7   : > { %2620 = vmatprep.subr.bf16.mxu1 %v16523_v2  ;;  %2638 = vmatprep.mubr.bf16.mxu1 %v14334_v24  ;;  %v16559_v30 = vld [vmem:[%s19781_s21 + $0x7a4] ss:$16 sps:$4 sm:$0xff]   ;;  %v16562_v32 = vld [vmem:[%s19781_s21 + $0x7a0] ss:$16 sps:$4 sm:$0xff]   ;;  %v16609_v1 = vld [vmem:[%s19781_s21 + $0x4a8] ss:$16 sps:$4 sm:$0xff]  }
 0x2c8   : > { %v16563_v33 = vld [vmem:[%s19781_s21 + $0x5c4] ss:$16 sps:$4 sm:$0xff]   ;;  %v16567_v35 = vld [vmem:[%s19781_s21 + $0x5c0] ss:$16 sps:$4 sm:$0xff]   ;;  %v16612_v2 = vld [vmem:[%s19781_s21 + $0x6a8] ss:$16 sps:$4 sm:$0xff]  }
 0x2c9   : > { %2580 = vmatpush1.bf16.msra.mxu0 %v16525_v3  ;;  %v16565_v34 = vld [vmem:[%s19781_s21 + $0x7c4] ss:$16 sps:$4 sm:$0xff]   ;;  %v16568_v36 = vld [vmem:[%s19781_s21 + $0x7c0] ss:$16 sps:$4 sm:$0xff]   ;;  %v16617_v3 = vld [vmem:[%s19781_s21 + $0x4cc] ss:$16 sps:$4 sm:$0xff]  }
 0x2ca   : > { %2621 = vmatpush1.bf16.msra.mxu1 %v16526_v4  ;;  %2581 = vmatprep.subr.bf16.mxu0 %v16527_v5  ;;  %v16569_v37 = vld [vmem:[%s19781_s21 + $0x5e4] ss:$16 sps:$4 sm:$0xff]   ;;  %v16573_v39 = vld [vmem:[%s19781_s21 + $0x5e0] ss:$16 sps:$4 sm:$0xff]   ;;  %v16620_v4 = vld [vmem:[%s19781_s21 + $0x6cc] ss:$16 sps:$4 sm:$0xff]  }
 0x2cb   : > { %2622 = vmatprep.subr.bf16.mxu1 %v16529_v6  ;;  %v16571_v38 = vld [vmem:[%s19781_s21 + $0x7e4] ss:$16 sps:$4 sm:$0xff]   ;;  %v16574_v40 = vld [vmem:[%s19781_s21 + $0x7e0] ss:$16 sps:$4 sm:$0xff]   ;;  %v16615_v5 = vld [vmem:[%s19781_s21 + $0x4c8] ss:$16 sps:$4 sm:$0xff]  }
 0x2cc   : > { %v16618_v6 = vld [vmem:[%s19781_s21 + $0x6c8] ss:$16 sps:$4 sm:$0xff]  }
 0x2cd   : > { %2582 = vmatpush1.bf16.msra.mxu0 %v16531_v7  ;;  %v16623_v7 = vld [vmem:[%s19781_s21 + $0x4ec] ss:$16 sps:$4 sm:$0xff]   ;;  %v16639_v21 = vld [vmem:[%s19781_s21 + $0x548] ss:$16 sps:$4 sm:$0xff]  }
 0x2ce   : > { %2623 = vmatpush1.bf16.msra.mxu1 %v16532_v8  ;;  %2583 = vmatprep.subr.bf16.mxu0 %v16533_v9  ;;  %v16626_v8 = vld [vmem:[%s19781_s21 + $0x6ec] ss:$16 sps:$4 sm:$0xff]   ;;  %v16621_v9 = vld [vmem:[%s19781_s21 + $0x4e8] ss:$16 sps:$4 sm:$0xff]  }
 0x2cf   : > { %2624 = vmatprep.subr.bf16.mxu1 %v16535_v10  ;;  %v16624_v10 = vld [vmem:[%s19781_s21 + $0x6e8] ss:$16 sps:$4 sm:$0xff]  }
 0x2d1   : > { %2584 = vmatpush1.bf16.msra.mxu0 %v16537_v11  ;;  %v16629_v11 = vld [vmem:[%s19781_s21 + $0x50c] ss:$16 sps:$4 sm:$0xff]  }
 0x2d2   : > { %2625 = vmatpush1.bf16.msra.mxu1 %v16538_v12  ;;  %2585 = vmatprep.subr.bf16.mxu0 %v16539_v13  ;;  %v16632_v12 = vld [vmem:[%s19781_s21 + $0x70c] ss:$16 sps:$4 sm:$0xff]   ;;  %v16627_v13 = vld [vmem:[%s19781_s21 + $0x508] ss:$16 sps:$4 sm:$0xff]  }
 0x2d3   : > { %2626 = vmatprep.subr.bf16.mxu1 %v16541_v14  ;;  %v16630_v14 = vld [vmem:[%s19781_s21 + $0x708] ss:$16 sps:$4 sm:$0xff]  }
 0x2d5   : > { %2586 = vmatpush1.bf16.msra.mxu0 %v16543_v15  ;;  %v16635_v15 = vld [vmem:[%s19781_s21 + $0x52c] ss:$16 sps:$4 sm:$0xff]  }
 0x2d6   : > { %2627 = vmatpush1.bf16.msra.mxu1 %v16544_v16  ;;  %2587 = vmatprep.subr.bf16.mxu0 %v16545_v17  ;;  %v16638_v16 = vld [vmem:[%s19781_s21 + $0x72c] ss:$16 sps:$4 sm:$0xff]   ;;  %v16633_v17 = vld [vmem:[%s19781_s21 + $0x528] ss:$16 sps:$4 sm:$0xff]  }
 0x2d7   : > { %2628 = vmatprep.subr.bf16.mxu1 %v16547_v18  ;;  %v16636_v18 = vld [vmem:[%s19781_s21 + $0x728] ss:$16 sps:$4 sm:$0xff]  }
 0x2d9   : > { %2588 = vmatpush1.bf16.msra.mxu0 %v16549_v22  ;;  %v16642_v22 = vld [vmem:[%s19781_s21 + $0x748] ss:$16 sps:$4 sm:$0xff]  }
 0x2da   : > { %2629 = vmatpush1.bf16.msra.mxu1 %v16550_v23  ;;  %2589 = vmatprep.subr.bf16.mxu0 %v16551_v25  ;;  %v16647_v23 = vld [vmem:[%s19781_s21 + $0x56c] ss:$16 sps:$4 sm:$0xff]   ;;  %v16645_v25 = vld [vmem:[%s19781_s21 + $0x568] ss:$16 sps:$4 sm:$0xff]  }
 0x2db   : > { %2630 = vmatprep.subr.bf16.mxu1 %v16553_v26  ;;  %v16648_v26 = vld [vmem:[%s19781_s21 + $0x768] ss:$16 sps:$4 sm:$0xff]  }
 0x2dd   : > { %2590 = vmatpush1.bf16.msra.mxu0 %v16555_v27  ;;  %v16653_v27 = vld [vmem:[%s19781_s21 + $0x58c] ss:$16 sps:$4 sm:$0xff]  }
 0x2de   : > { %2631 = vmatpush1.bf16.msra.mxu1 %v16556_v28  ;;  %2591 = vmatprep.subr.bf16.mxu0 %v16557_v29  ;;  %v16656_v28 = vld [vmem:[%s19781_s21 + $0x78c] ss:$16 sps:$4 sm:$0xff]   ;;  %v16651_v29 = vld [vmem:[%s19781_s21 + $0x588] ss:$16 sps:$4 sm:$0xff]  }
 0x2df   : > { %2632 = vmatprep.subr.bf16.mxu1 %v16559_v30  ;;  %v16654_v30 = vld [vmem:[%s19781_s21 + $0x788] ss:$16 sps:$4 sm:$0xff]  }
 0x2e1   : > { %2592 = vmatpush1.bf16.msra.mxu0 %v16561_v31  ;;  %v16659_v31 = vld [vmem:[%s19781_s21 + $0x5ac] ss:$16 sps:$4 sm:$0xff]  }
 0x2e2   : > { %2633 = vmatpush1.bf16.msra.mxu1 %v16562_v32  ;;  %2593 = vmatprep.subr.bf16.mxu0 %v16563_v33  ;;  %v16662_v32 = vld [vmem:[%s19781_s21 + $0x7ac] ss:$16 sps:$4 sm:$0xff]   ;;  %v16657_v33 = vld [vmem:[%s19781_s21 + $0x5a8] ss:$16 sps:$4 sm:$0xff]  }
 0x2e3   : > { %2634 = vmatprep.subr.bf16.mxu1 %v16565_v34  ;;  %v16660_v34 = vld [vmem:[%s19781_s21 + $0x7a8] ss:$16 sps:$4 sm:$0xff]  }
 0x2e5   : > { %2594 = vmatpush1.bf16.msra.mxu0 %v16567_v35  ;;  %v16665_v35 = vld [vmem:[%s19781_s21 + $0x5cc] ss:$16 sps:$4 sm:$0xff]  }
 0x2e6   : > { %2635 = vmatpush1.bf16.msra.mxu1 %v16568_v36  ;;  %2595 = vmatprep.subr.bf16.mxu0 %v16569_v37  ;;  %v16668_v36 = vld [vmem:[%s19781_s21 + $0x7cc] ss:$16 sps:$4 sm:$0xff]   ;;  %v16663_v37 = vld [vmem:[%s19781_s21 + $0x5c8] ss:$16 sps:$4 sm:$0xff]  }
 0x2e7   : > { %2636 = vmatprep.subr.bf16.mxu1 %v16571_v38  ;;  %v16666_v38 = vld [vmem:[%s19781_s21 + $0x7c8] ss:$16 sps:$4 sm:$0xff]  }
 0x2e9   : > { %2596 = vmatpush1.bf16.msra.mxu0 %v16573_v39  ;;  %v16671_v39 = vld [vmem:[%s19781_s21 + $0x5ec] ss:$16 sps:$4 sm:$0xff]  }
 0x2ea   : > { %2637 = vmatpush1.bf16.msra.mxu1 %v16574_v40  ;;  %2647 = vmatprep.subr.bf16.mxu0 %v16581_v41  ;;  %v16674_v40 = vld [vmem:[%s19781_s21 + $0x7ec] ss:$16 sps:$4 sm:$0xff]   ;;  %v16669_v41 = vld [vmem:[%s19781_s21 + $0x5e8] ss:$16 sps:$4 sm:$0xff]  }
 0x2eb   : > { %2688 = vmatprep.subr.bf16.mxu1 %v16584_v42  ;;  %v16672_v42 = vld [vmem:[%s19781_s21 + $0x7e8] ss:$16 sps:$4 sm:$0xff]  }
 0x2ec   : > { %2598 = vmatmul.mubr.bf16.vlgmr.msra.gmra.mrb[0].mxu0 %v20010_v43 }
 0x2ed   : > { %2639 = vmatmul.mubr.bf16.vlgmr.msra.gmra.mrb[0].mxu1 %v20012_v44  ;;  %2648 = vmatpush1.bf16.msra.mxu0 %v16579_v45  ;;  %v16677_v45 = vld [vmem:[%s19781_s21 + $0x4] ss:$16 sps:$4 sm:$0xff]  }
 0x2ee   : > { %2689 = vmatpush1.bf16.msra.mxu1 %v16582_v46  ;;  %2649 = vmatprep.subr.bf16.mxu0 %v16587_v47  ;;  %v16680_v46 = vld [vmem:[%s19781_s21 + $0x204] ss:$16 sps:$4 sm:$0xff]   ;;  %v16675_v47 = vld [vmem:[%s19781_s21] ss:$16 sps:$4 sm:$0xff]  }
 0x2ef   : > { %2690 = vmatprep.subr.bf16.mxu1 %v16590_v48  ;;  %2679 = vmatprep.mubr.bf16.mxu0 %v19987_v20  ;;  %v16644_v20 = vld [vmem:[%s19781_s21 + $0x74c] ss:$16 sps:$4 sm:$0xff]   ;;  %v16678_v48 = vld [vmem:[%s19781_s21 + $0x200] ss:$16 sps:$4 sm:$0xff]  }
 0x2f0   : > { %2720 = vmatprep.mubr.bf16.mxu1 %v14334_v24  ;;  %v16650_v24 = vld [vmem:[%s19781_s21 + $0x76c] ss:$16 sps:$4 sm:$0xff]  }
 0x2f1   : > { %2650 = vmatpush1.bf16.msra.mxu0 %v16585_v49  ;;  %v16683_v49 = vld [vmem:[%s19781_s21 + $0x24] ss:$16 sps:$4 sm:$0xff]  }
 0x2f2   : > { %2691 = vmatpush1.bf16.msra.mxu1 %v16588_v50  ;;  %2651 = vmatprep.subr.bf16.mxu0 %v16593_v51  ;;  %v16686_v50 = vld [vmem:[%s19781_s21 + $0x224] ss:$16 sps:$4 sm:$0xff]   ;;  %v20085_v51 = vld [vmem:[#allocation2] sm:$0xff] }
 0x2f3   : > { %2692 = vmatprep.subr.bf16.mxu1 %v16596_v52  ;;  %v20087_v52 = vld [vmem:[#allocation2 + $0x8] sm:$0xff] }
 0x2f5   : > { %2652 = vmatpush1.bf16.msra.mxu0 %v16591_v53  ;;  %v20091_v53 = vcombine.high %v20085_v51, %v20085_v51 }
 0x2f6   : > { %2693 = vmatpush1.bf16.msra.mxu1 %v16594_v54  ;;  %2653 = vmatprep.subr.bf16.mxu0 %v16599_v55  ;;  %v20095_v54 = vcombine.high %v20087_v52, %v20087_v52  ;;  %v16681_v55 = vld [vmem:[%s19781_s21 + $0x20] ss:$16 sps:$4 sm:$0xff]  }
 0x2f7   : > { %2694 = vmatprep.subr.bf16.mxu1 %v16602_v56  ;;  %v16684_v56 = vld [vmem:[%s19781_s21 + $0x220] ss:$16 sps:$4 sm:$0xff]  }
 0x2f9   : > { %2654 = vmatpush1.bf16.msra.mxu0 %v16597_v57  ;;  %v16689_v57 = vld [vmem:[%s19781_s21 + $0x44] ss:$16 sps:$4 sm:$0xff]  }
 0x2fa   : > { %2695 = vmatpush1.bf16.msra.mxu1 %v16600_v58  ;;  %2655 = vmatprep.subr.bf16.mxu0 %v16605_v59  ;;  %v16692_v58 = vld [vmem:[%s19781_s21 + $0x244] ss:$16 sps:$4 sm:$0xff]  }
 0x2fb   : > { %2696 = vmatprep.subr.bf16.mxu1 %v16608_v60  ;;  %v16695_v59 = vld [vmem:[%s19781_s21 + $0x64] ss:$16 sps:$4 sm:$0xff]  }
 0x2fc   : > { %v16698_v60 = vld [vmem:[%s19781_s21 + $0x264] ss:$16 sps:$4 sm:$0xff]  }
 0x2fd   : > { %2656 = vmatpush1.bf16.msra.mxu0 %v16603_v61  ;;  %v16693_v61 = vld [vmem:[%s19781_s21 + $0x60] ss:$16 sps:$4 sm:$0xff]  }
 0x2fe   : > { %2697 = vmatpush1.bf16.msra.mxu1 %v16606_v62  ;;  %2657 = vmatprep.subr.bf16.mxu0 %v16611_v63  ;;  %v16696_v62 = vld [vmem:[%s19781_s21 + $0x260] ss:$16 sps:$4 sm:$0xff]   ;;  %v16701_v63 = vld [vmem:[%s19781_s21 + $0x84] ss:$16 sps:$4 sm:$0xff]  }
 0x2ff   : > { %2698 = vmatprep.subr.bf16.mxu1 %v16614_v0  ;;  %v16704_v0 = vld [vmem:[%s19781_s21 + $0x284] ss:$16 sps:$4 sm:$0xff]  }
 0x301   : > { %2658 = vmatpush1.bf16.msra.mxu0 %v16609_v1  ;;  %v16699_v1 = vld [vmem:[%s19781_s21 + $0x80] ss:$16 sps:$4 sm:$0xff]  }
 0x302   : > { %2699 = vmatpush1.bf16.msra.mxu1 %v16612_v2  ;;  %2659 = vmatprep.subr.bf16.mxu0 %v16617_v3  ;;  %v16702_v2 = vld [vmem:[%s19781_s21 + $0x280] ss:$16 sps:$4 sm:$0xff]   ;;  %v16707_v3 = vld [vmem:[%s19781_s21 + $0xa4] ss:$16 sps:$4 sm:$0xff]  }
 0x303   : > { %2700 = vmatprep.subr.bf16.mxu1 %v16620_v4  ;;  %v16710_v4 = vld [vmem:[%s19781_s21 + $0x2a4] ss:$16 sps:$4 sm:$0xff]  }
 0x305   : > { %2660 = vmatpush1.bf16.msra.mxu0 %v16615_v5  ;;  %v16705_v5 = vld [vmem:[%s19781_s21 + $0xa0] ss:$16 sps:$4 sm:$0xff]  }
 0x306   : > { %2701 = vmatpush1.bf16.msra.mxu1 %v16618_v6  ;;  %2661 = vmatprep.subr.bf16.mxu0 %v16623_v7  ;;  %v16708_v6 = vld [vmem:[%s19781_s21 + $0x2a0] ss:$16 sps:$4 sm:$0xff]   ;;  %v16713_v7 = vld [vmem:[%s19781_s21 + $0xc4] ss:$16 sps:$4 sm:$0xff]  }
 0x307   : > { %2702 = vmatprep.subr.bf16.mxu1 %v16626_v8  ;;  %v16716_v8 = vld [vmem:[%s19781_s21 + $0x2c4] ss:$16 sps:$4 sm:$0xff]  }
 0x309   : > { %2662 = vmatpush1.bf16.msra.mxu0 %v16621_v9  ;;  %v16711_v9 = vld [vmem:[%s19781_s21 + $0xc0] ss:$16 sps:$4 sm:$0xff]  }
 0x30a   : > { %2703 = vmatpush1.bf16.msra.mxu1 %v16624_v10  ;;  %2663 = vmatprep.subr.bf16.mxu0 %v16629_v11  ;;  %v16714_v10 = vld [vmem:[%s19781_s21 + $0x2c0] ss:$16 sps:$4 sm:$0xff]   ;;  %v16719_v11 = vld [vmem:[%s19781_s21 + $0xe4] ss:$16 sps:$4 sm:$0xff]  }
 0x30b   : > { %2704 = vmatprep.subr.bf16.mxu1 %v16632_v12  ;;  %v16722_v12 = vld [vmem:[%s19781_s21 + $0x2e4] ss:$16 sps:$4 sm:$0xff]  }
 0x30d   : > { %2664 = vmatpush1.bf16.msra.mxu0 %v16627_v13  ;;  %v16717_v13 = vld [vmem:[%s19781_s21 + $0xe0] ss:$16 sps:$4 sm:$0xff]  }
 0x30e   : > { %2705 = vmatpush1.bf16.msra.mxu1 %v16630_v14  ;;  %2665 = vmatprep.subr.bf16.mxu0 %v16635_v15  ;;  %v16720_v14 = vld [vmem:[%s19781_s21 + $0x2e0] ss:$16 sps:$4 sm:$0xff]   ;;  %v16725_v15 = vld [vmem:[%s19781_s21 + $0x104] ss:$16 sps:$4 sm:$0xff]  }
 0x30f   : > { %2706 = vmatprep.subr.bf16.mxu1 %v16638_v16  ;;  %v16728_v16 = vld [vmem:[%s19781_s21 + $0x304] ss:$16 sps:$4 sm:$0xff]  }
 0x311   : > { %2666 = vmatpush1.bf16.msra.mxu0 %v16633_v17  ;;  %v16723_v17 = vld [vmem:[%s19781_s21 + $0x100] ss:$16 sps:$4 sm:$0xff]  }
 0x312   : > { %2707 = vmatpush1.bf16.msra.mxu1 %v16636_v18  ;;  %2667 = vmatprep.subr.bf16.mxu0 %v16641_v19  ;;  %v16726_v18 = vld [vmem:[%s19781_s21 + $0x300] ss:$16 sps:$4 sm:$0xff]   ;;  %v16731_v19 = vld [vmem:[%s19781_s21 + $0x124] ss:$16 sps:$4 sm:$0xff]  }
 0x313   : > { %2708 = vmatprep.subr.bf16.mxu1 %v16644_v20  ;;  %v16734_v20 = vld [vmem:[%s19781_s21 + $0x324] ss:$16 sps:$4 sm:$0xff]  }
 0x315   : > { %2668 = vmatpush1.bf16.msra.mxu0 %v16639_v21  ;;  %v16729_v21 = vld [vmem:[%s19781_s21 + $0x120] ss:$16 sps:$4 sm:$0xff]  }
 0x316   : > { %2709 = vmatpush1.bf16.msra.mxu1 %v16642_v22  ;;  %2669 = vmatprep.subr.bf16.mxu0 %v16647_v23  ;;  %v16732_v22 = vld [vmem:[%s19781_s21 + $0x320] ss:$16 sps:$4 sm:$0xff]   ;;  %v16737_v23 = vld [vmem:[%s19781_s21 + $0x144] ss:$16 sps:$4 sm:$0xff]  }
 0x317   : > { %2710 = vmatprep.subr.bf16.mxu1 %v16650_v24  ;;  %v16740_v24 = vld [vmem:[%s19781_s21 + $0x344] ss:$16 sps:$4 sm:$0xff]  }
 0x319   : > { %2670 = vmatpush1.bf16.msra.mxu0 %v16645_v25  ;;  %v16735_v25 = vld [vmem:[%s19781_s21 + $0x140] ss:$16 sps:$4 sm:$0xff]  }
 0x31a   : > { %2711 = vmatpush1.bf16.msra.mxu1 %v16648_v26  ;;  %2671 = vmatprep.subr.bf16.mxu0 %v16653_v27  ;;  %v16738_v26 = vld [vmem:[%s19781_s21 + $0x340] ss:$16 sps:$4 sm:$0xff]   ;;  %v16743_v27 = vld [vmem:[%s19781_s21 + $0x164] ss:$16 sps:$4 sm:$0xff]  }
 0x31b   : > { %2712 = vmatprep.subr.bf16.mxu1 %v16656_v28  ;;  %v16746_v28 = vld [vmem:[%s19781_s21 + $0x364] ss:$16 sps:$4 sm:$0xff]  }
 0x31d   : > { %2672 = vmatpush1.bf16.msra.mxu0 %v16651_v29  ;;  %v16741_v29 = vld [vmem:[%s19781_s21 + $0x160] ss:$16 sps:$4 sm:$0xff]  }
 0x31e   : > { %2713 = vmatpush1.bf16.msra.mxu1 %v16654_v30  ;;  %2673 = vmatprep.subr.bf16.mxu0 %v16659_v31  ;;  %v16744_v30 = vld [vmem:[%s19781_s21 + $0x360] ss:$16 sps:$4 sm:$0xff]   ;;  %v16749_v31 = vld [vmem:[%s19781_s21 + $0x184] ss:$16 sps:$4 sm:$0xff]  }
 0x31f   : > { %2714 = vmatprep.subr.bf16.mxu1 %v16662_v32  ;;  %v16752_v32 = vld [vmem:[%s19781_s21 + $0x384] ss:$16 sps:$4 sm:$0xff]  }
 0x321   : > { %2674 = vmatpush1.bf16.msra.mxu0 %v16657_v33  ;;  %v16747_v33 = vld [vmem:[%s19781_s21 + $0x180] ss:$16 sps:$4 sm:$0xff]  }
 0x322   : > { %2715 = vmatpush1.bf16.msra.mxu1 %v16660_v34  ;;  %2675 = vmatprep.subr.bf16.mxu0 %v16665_v35  ;;  %v16750_v34 = vld [vmem:[%s19781_s21 + $0x380] ss:$16 sps:$4 sm:$0xff]   ;;  %v16755_v35 = vld [vmem:[%s19781_s21 + $0x1a4] ss:$16 sps:$4 sm:$0xff]  }
 0x323   : > { %2716 = vmatprep.subr.bf16.mxu1 %v16668_v36  ;;  %v16758_v36 = vld [vmem:[%s19781_s21 + $0x3a4] ss:$16 sps:$4 sm:$0xff]  }
 0x325   : > { %2676 = vmatpush1.bf16.msra.mxu0 %v16663_v37  ;;  %v16753_v37 = vld [vmem:[%s19781_s21 + $0x1a0] ss:$16 sps:$4 sm:$0xff]  }
 0x326   : > { %2717 = vmatpush1.bf16.msra.mxu1 %v16666_v38  ;;  %2677 = vmatprep.subr.bf16.mxu0 %v16671_v39  ;;  %v16756_v38 = vld [vmem:[%s19781_s21 + $0x3a0] ss:$16 sps:$4 sm:$0xff]   ;;  %v16761_v39 = vld [vmem:[%s19781_s21 + $0x1c4] ss:$16 sps:$4 sm:$0xff]  }
 0x327   : > { %2718 = vmatprep.subr.bf16.mxu1 %v16674_v40  ;;  %v16764_v40 = vld [vmem:[%s19781_s21 + $0x3c4] ss:$16 sps:$4 sm:$0xff]  }
 0x329   : > { %2678 = vmatpush1.bf16.msra.mxu0 %v16669_v41  ;;  %v16759_v41 = vld [vmem:[%s19781_s21 + $0x1c0] ss:$16 sps:$4 sm:$0xff]  }
 0x32a   : > { %2719 = vmatpush1.bf16.msra.mxu1 %v16672_v42  ;;  %3383 = vmatprep.subr.bf16.mxu0 %v16677_v45  ;;  %v16762_v42 = vld [vmem:[%s19781_s21 + $0x3c0] ss:$16 sps:$4 sm:$0xff]   ;;  %v16767_v45 = vld [vmem:[%s19781_s21 + $0x1e4] ss:$16 sps:$4 sm:$0xff]  }
 0x32b   : > { %3424 = vmatprep.subr.bf16.mxu1 %v16680_v46  ;;  %v16770_v46 = vld [vmem:[%s19781_s21 + $0x3e4] ss:$16 sps:$4 sm:$0xff]  }
 0x32c   : > { %2680 = vmatmul.mubr.bf16.vlgmr.msra.gmra.mrb[4].mxu0 %v20010_v43  ;;  %v16687_v43 = vld [vmem:[%s19781_s21 + $0x40] ss:$16 sps:$4 sm:$0xff]  }
 0x32d   : > { %2721 = vmatmul.mubr.bf16.vlgmr.msra.gmra.mrb[4].mxu1 %v20012_v44  ;;  %3384 = vmatpush1.bf16.msra.mxu0 %v16675_v47  ;;  %v16690_v44 = vld [vmem:[%s19781_s21 + $0x240] ss:$16 sps:$4 sm:$0xff]  }
 0x32e   : > { %3425 = vmatpush1.bf16.msra.mxu1 %v16678_v48  ;;  %3385 = vmatprep.subr.bf16.mxu0 %v16683_v49  ;;  %v16765_v47 = vld [vmem:[%s19781_s21 + $0x1e0] ss:$16 sps:$4 sm:$0xff]   ;;  %v16777_v49 = vld [vmem:[%s19781_s21 + $0xc] ss:$16 sps:$4 sm:$0xff]  }
 0x32f   : > { %3426 = vmatprep.subr.bf16.mxu1 %v16686_v50  ;;  %3415 = vmatprep.mubr.bf16.mxu0 %v20091_v53  ;;  %v16768_v48 = vld [vmem:[%s19781_s21 + $0x3e0] ss:$16 sps:$4 sm:$0xff]   ;;  %v16780_v50 = vld [vmem:[%s19781_s21 + $0x20c] ss:$16 sps:$4 sm:$0xff]  }
 0x330   : > { %3456 = vmatprep.mubr.bf16.mxu1 %v20095_v54 }
 0x331   : > { %3386 = vmatpush1.bf16.msra.mxu0 %v16681_v55  ;;  %v20163_v55 = vcombine.low %v20085_v51, %v20085_v51  ;;  %v16781_v51 = vld [vmem:[%s19781_s21 + $0x28] ss:$16 sps:$4 sm:$0xff]  }
 0x332   : > { %3427 = vmatpush1.bf16.msra.mxu1 %v16684_v56  ;;  %3387 = vmatprep.subr.bf16.mxu0 %v16689_v57  ;;  %v20167_v56 = vcombine.low %v20087_v52, %v20087_v52  ;;  %v16775_v57 = vld [vmem:[%s19781_s21 + $0x8] ss:$16 sps:$4 sm:$0xff]   ;;  %v16789_v52 = vld [vmem:[%s19781_s21 + $0x4c] ss:$16 sps:$4 sm:$0xff]  }
 0x333   : > { %3428 = vmatprep.subr.bf16.mxu1 %v16692_v58  ;;  %v16778_v58 = vld [vmem:[%s19781_s21 + $0x208] ss:$16 sps:$4 sm:$0xff]  }
 0x335   : > { %3388 = vmatpush1.bf16.msra.mxu0 %v16687_v43  ;;  %v16783_v43 = vld [vmem:[%s19781_s21 + $0x2c] ss:$16 sps:$4 sm:$0xff]  }
 0x336   : > { %3429 = vmatpush1.bf16.msra.mxu1 %v16690_v44  ;;  %3389 = vmatprep.subr.bf16.mxu0 %v16695_v59  ;;  %v16786_v44 = vld [vmem:[%s19781_s21 + $0x22c] ss:$16 sps:$4 sm:$0xff]   ;;  %v16784_v59 = vld [vmem:[%s19781_s21 + $0x228] ss:$16 sps:$4 sm:$0xff]  }
 0x337   : > { %3430 = vmatprep.subr.bf16.mxu1 %v16698_v60  ;;  %v16792_v60 = vld [vmem:[%s19781_s21 + $0x24c] ss:$16 sps:$4 sm:$0xff]  }
 0x339   : > { %3390 = vmatpush1.bf16.msra.mxu0 %v16693_v61  ;;  %v16787_v61 = vld [vmem:[%s19781_s21 + $0x48] ss:$16 sps:$4 sm:$0xff]  }
 0x33a   : > { %3431 = vmatpush1.bf16.msra.mxu1 %v16696_v62  ;;  %3391 = vmatprep.subr.bf16.mxu0 %v16701_v63  ;;  %v16790_v62 = vld [vmem:[%s19781_s21 + $0x248] ss:$16 sps:$4 sm:$0xff]   ;;  %v16795_v63 = vld [vmem:[%s19781_s21 + $0x6c] ss:$16 sps:$4 sm:$0xff]  }
 0x33b   : > { %3432 = vmatprep.subr.bf16.mxu1 %v16704_v0  ;;  %v16798_v0 = vld [vmem:[%s19781_s21 + $0x26c] ss:$16 sps:$4 sm:$0xff]  }
 0x33d   : > { %3392 = vmatpush1.bf16.msra.mxu0 %v16699_v1  ;;  %v16793_v1 = vld [vmem:[%s19781_s21 + $0x68] ss:$16 sps:$4 sm:$0xff]  }
 0x33e   : > { %3433 = vmatpush1.bf16.msra.mxu1 %v16702_v2  ;;  %3393 = vmatprep.subr.bf16.mxu0 %v16707_v3  ;;  %v16796_v2 = vld [vmem:[%s19781_s21 + $0x268] ss:$16 sps:$4 sm:$0xff]  }
 0x33f   : > { %3434 = vmatprep.subr.bf16.mxu1 %v16710_v4  ;;  %v16799_v3 = vld [vmem:[%s19781_s21 + $0x88] ss:$16 sps:$4 sm:$0xff]  }
 0x340   : > { %v16802_v4 = vld [vmem:[%s19781_s21 + $0x288] ss:$16 sps:$4 sm:$0xff]  }
 0x341   : > { %3394 = vmatpush1.bf16.msra.mxu0 %v16705_v5  ;;  %v16807_v5 = vld [vmem:[%s19781_s21 + $0xac] ss:$16 sps:$4 sm:$0xff]  }
 0x342   : > { %3435 = vmatpush1.bf16.msra.mxu1 %v16708_v6  ;;  %3395 = vmatprep.subr.bf16.mxu0 %v16713_v7  ;;  %v16810_v6 = vld [vmem:[%s19781_s21 + $0x2ac] ss:$16 sps:$4 sm:$0xff]   ;;  %v16805_v7 = vld [vmem:[%s19781_s21 + $0xa8] ss:$16 sps:$4 sm:$0xff]  }
 0x343   : > { %3436 = vmatprep.subr.bf16.mxu1 %v16716_v8  ;;  %v16808_v8 = vld [vmem:[%s19781_s21 + $0x2a8] ss:$16 sps:$4 sm:$0xff]  }
 0x345   : > { %3396 = vmatpush1.bf16.msra.mxu0 %v16711_v9  ;;  %v16813_v9 = vld [vmem:[%s19781_s21 + $0xcc] ss:$16 sps:$4 sm:$0xff]  }
 0x346   : > { %3437 = vmatpush1.bf16.msra.mxu1 %v16714_v10  ;;  %3397 = vmatprep.subr.bf16.mxu0 %v16719_v11  ;;  %v16816_v10 = vld [vmem:[%s19781_s21 + $0x2cc] ss:$16 sps:$4 sm:$0xff]   ;;  %v16811_v11 = vld [vmem:[%s19781_s21 + $0xc8] ss:$16 sps:$4 sm:$0xff]  }
 0x347   : > { %3438 = vmatprep.subr.bf16.mxu1 %v16722_v12  ;;  %v16814_v12 = vld [vmem:[%s19781_s21 + $0x2c8] ss:$16 sps:$4 sm:$0xff]  }
 0x349   : > { %3398 = vmatpush1.bf16.msra.mxu0 %v16717_v13  ;;  %v16819_v13 = vld [vmem:[%s19781_s21 + $0xec] ss:$16 sps:$4 sm:$0xff]  }
 0x34a   : > { %3439 = vmatpush1.bf16.msra.mxu1 %v16720_v14  ;;  %3399 = vmatprep.subr.bf16.mxu0 %v16725_v15  ;;  %v16822_v14 = vld [vmem:[%s19781_s21 + $0x2ec] ss:$16 sps:$4 sm:$0xff]   ;;  %v16817_v15 = vld [vmem:[%s19781_s21 + $0xe8] ss:$16 sps:$4 sm:$0xff]  }
 0x34b   : > { %3440 = vmatprep.subr.bf16.mxu1 %v16728_v16  ;;  %v16820_v16 = vld [vmem:[%s19781_s21 + $0x2e8] ss:$16 sps:$4 sm:$0xff]  }
 0x34d   : > { %3400 = vmatpush1.bf16.msra.mxu0 %v16723_v17  ;;  %v16825_v17 = vld [vmem:[%s19781_s21 + $0x10c] ss:$16 sps:$4 sm:$0xff]  }
 0x34e   : > { %3441 = vmatpush1.bf16.msra.mxu1 %v16726_v18  ;;  %3401 = vmatprep.subr.bf16.mxu0 %v16731_v19  ;;  %v16828_v18 = vld [vmem:[%s19781_s21 + $0x30c] ss:$16 sps:$4 sm:$0xff]   ;;  %v16823_v19 = vld [vmem:[%s19781_s21 + $0x108] ss:$16 sps:$4 sm:$0xff]  }
 0x34f   : > { %3442 = vmatprep.subr.bf16.mxu1 %v16734_v20  ;;  %v16826_v20 = vld [vmem:[%s19781_s21 + $0x308] ss:$16 sps:$4 sm:$0xff]  }
 0x351   : > { %3402 = vmatpush1.bf16.msra.mxu0 %v16729_v21  ;;  %v16831_v21 = vld [vmem:[%s19781_s21 + $0x12c] ss:$16 sps:$4 sm:$0xff]  }
 0x352   : > { %3443 = vmatpush1.bf16.msra.mxu1 %v16732_v22  ;;  %3403 = vmatprep.subr.bf16.mxu0 %v16737_v23  ;;  %v16834_v22 = vld [vmem:[%s19781_s21 + $0x32c] ss:$16 sps:$4 sm:$0xff]   ;;  %v16829_v23 = vld [vmem:[%s19781_s21 + $0x128] ss:$16 sps:$4 sm:$0xff]  }
 0x353   : > { %3444 = vmatprep.subr.bf16.mxu1 %v16740_v24  ;;  %v16832_v24 = vld [vmem:[%s19781_s21 + $0x328] ss:$16 sps:$4 sm:$0xff]  }
 0x355   : > { %3404 = vmatpush1.bf16.msra.mxu0 %v16735_v25  ;;  %v16837_v25 = vld [vmem:[%s19781_s21 + $0x14c] ss:$16 sps:$4 sm:$0xff]  }
 0x356   : > { %3445 = vmatpush1.bf16.msra.mxu1 %v16738_v26  ;;  %3405 = vmatprep.subr.bf16.mxu0 %v16743_v27  ;;  %v16840_v26 = vld [vmem:[%s19781_s21 + $0x34c] ss:$16 sps:$4 sm:$0xff]   ;;  %v16835_v27 = vld [vmem:[%s19781_s21 + $0x148] ss:$16 sps:$4 sm:$0xff]  }
 0x357   : > { %3446 = vmatprep.subr.bf16.mxu1 %v16746_v28  ;;  %v16838_v28 = vld [vmem:[%s19781_s21 + $0x348] ss:$16 sps:$4 sm:$0xff]  }
 0x359   : > { %3406 = vmatpush1.bf16.msra.mxu0 %v16741_v29  ;;  %v16843_v29 = vld [vmem:[%s19781_s21 + $0x16c] ss:$16 sps:$4 sm:$0xff]  }
 0x35a   : > { %3447 = vmatpush1.bf16.msra.mxu1 %v16744_v30  ;;  %3407 = vmatprep.subr.bf16.mxu0 %v16749_v31  ;;  %v16846_v30 = vld [vmem:[%s19781_s21 + $0x36c] ss:$16 sps:$4 sm:$0xff]   ;;  %v16841_v31 = vld [vmem:[%s19781_s21 + $0x168] ss:$16 sps:$4 sm:$0xff]  }
 0x35b   : > { %3448 = vmatprep.subr.bf16.mxu1 %v16752_v32  ;;  %v16844_v32 = vld [vmem:[%s19781_s21 + $0x368] ss:$16 sps:$4 sm:$0xff]  }
 0x35d   : > { %3408 = vmatpush1.bf16.msra.mxu0 %v16747_v33  ;;  %v16849_v33 = vld [vmem:[%s19781_s21 + $0x18c] ss:$16 sps:$4 sm:$0xff]  }
 0x35e   : > { %3449 = vmatpush1.bf16.msra.mxu1 %v16750_v34  ;;  %3409 = vmatprep.subr.bf16.mxu0 %v16755_v35  ;;  %v16852_v34 = vld [vmem:[%s19781_s21 + $0x38c] ss:$16 sps:$4 sm:$0xff]   ;;  %v16847_v35 = vld [vmem:[%s19781_s21 + $0x188] ss:$16 sps:$4 sm:$0xff]  }
 0x35f   : > { %3450 = vmatprep.subr.bf16.mxu1 %v16758_v36  ;;  %v16850_v36 = vld [vmem:[%s19781_s21 + $0x388] ss:$16 sps:$4 sm:$0xff]  }
 0x361   : > { %3410 = vmatpush1.bf16.msra.mxu0 %v16753_v37  ;;  %v16855_v37 = vld [vmem:[%s19781_s21 + $0x1ac] ss:$16 sps:$4 sm:$0xff]  }
 0x362   : > { %3451 = vmatpush1.bf16.msra.mxu1 %v16756_v38  ;;  %3411 = vmatprep.subr.bf16.mxu0 %v16761_v39  ;;  %v16858_v38 = vld [vmem:[%s19781_s21 + $0x3ac] ss:$16 sps:$4 sm:$0xff]   ;;  %v16853_v39 = vld [vmem:[%s19781_s21 + $0x1a8] ss:$16 sps:$4 sm:$0xff]  }
 0x363   : > { %3452 = vmatprep.subr.bf16.mxu1 %v16764_v40  ;;  %v16856_v40 = vld [vmem:[%s19781_s21 + $0x3a8] ss:$16 sps:$4 sm:$0xff]  }
 0x365   : > { %3412 = vmatpush1.bf16.msra.mxu0 %v16759_v41  ;;  %v16861_v41 = vld [vmem:[%s19781_s21 + $0x1cc] ss:$16 sps:$4 sm:$0xff]  }
 0x366   : > { %3453 = vmatpush1.bf16.msra.mxu1 %v16762_v42  ;;  %3413 = vmatprep.subr.bf16.mxu0 %v16767_v45  ;;  %v16864_v42 = vld [vmem:[%s19781_s21 + $0x3cc] ss:$16 sps:$4 sm:$0xff]   ;;  %v16859_v45 = vld [vmem:[%s19781_s21 + $0x1c8] ss:$16 sps:$4 sm:$0xff]  }
 0x367   : > { %3454 = vmatprep.subr.bf16.mxu1 %v16770_v46  ;;  %v16862_v46 = vld [vmem:[%s19781_s21 + $0x3c8] ss:$16 sps:$4 sm:$0xff]  }
 0x369   : > { %3414 = vmatpush1.bf16.msra.mxu0 %v16765_v47  ;;  %v16867_v47 = vld [vmem:[%s19781_s21 + $0x1ec] ss:$16 sps:$4 sm:$0xff]  }
 0x36a   : > { %3455 = vmatpush1.bf16.msra.mxu1 %v16768_v48  ;;  %3465 = vmatprep.subr.bf16.mxu0 %v16777_v49  ;;  %v16870_v48 = vld [vmem:[%s19781_s21 + $0x3ec] ss:$16 sps:$4 sm:$0xff]   ;;  %v16865_v49 = vld [vmem:[%s19781_s21 + $0x1e8] ss:$16 sps:$4 sm:$0xff]  }
 0x36b   : > { %3506 = vmatprep.subr.bf16.mxu1 %v16780_v50  ;;  %v16868_v50 = vld [vmem:[%s19781_s21 + $0x3e8] ss:$16 sps:$4 sm:$0xff]  }
 0x36c   : > { %3416 = vmatmul.mubr.bf16.vlgmr.msra.gmra.mrb[8].mxu0 %v20163_v55 }
 0x36d   : > { %3457 = vmatmul.mubr.bf16.vlgmr.msra.gmra.mrb[8].mxu1 %v20167_v56  ;;  %3466 = vmatpush1.bf16.msra.mxu0 %v16775_v57  ;;  %v16873_v57 = vld [vmem:[%s19781_s21 + $0x804] ss:$16 sps:$4 sm:$0xff]  }
 0x36e   : > { %3507 = vmatpush1.bf16.msra.mxu1 %v16778_v58  ;;  %3467 = vmatprep.subr.bf16.mxu0 %v16783_v43  ;;  %v16876_v58 = vld [vmem:[%s19781_s21 + $0xa04] ss:$16 sps:$4 sm:$0xff]   ;;  %v20237_v43 = vld [vmem:[#allocation2 + $0x20] sm:$0xff] }
 0x36f   : > { %3508 = vmatprep.subr.bf16.mxu1 %v16786_v44  ;;  %3497 = vmatprep.mubr.bf16.mxu0 %v20091_v53  ;;  %v16801_v53 = vld [vmem:[%s19781_s21 + $0x8c] ss:$16 sps:$4 sm:$0xff]   ;;  %v20239_v44 = vld [vmem:[#allocation2 + $0x28] sm:$0xff] }
 0x370   : > { %3538 = vmatprep.mubr.bf16.mxu1 %v20095_v54  ;;  %v16804_v54 = vld [vmem:[%s19781_s21 + $0x28c] ss:$16 sps:$4 sm:$0xff]  }
 0x371   : > { %3468 = vmatpush1.bf16.msra.mxu0 %v16781_v51  ;;  %v16871_v51 = vld [vmem:[%s19781_s21 + $0x800] ss:$16 sps:$4 sm:$0xff]  }
 0x372   : > { %3509 = vmatpush1.bf16.msra.mxu1 %v16784_v59  ;;  %3469 = vmatprep.subr.bf16.mxu0 %v16789_v52  ;;  %v16874_v59 = vld [vmem:[%s19781_s21 + $0xa00] ss:$16 sps:$4 sm:$0xff]   ;;  %v16879_v52 = vld [vmem:[%s19781_s21 + $0x824] ss:$16 sps:$4 sm:$0xff]  }
 0x373   : > { %3510 = vmatprep.subr.bf16.mxu1 %v16792_v60  ;;  %v16882_v60 = vld [vmem:[%s19781_s21 + $0xa24] ss:$16 sps:$4 sm:$0xff]  }
 0x375   : > { %3470 = vmatpush1.bf16.msra.mxu0 %v16787_v61  ;;  %v20247_v61 = vcombine.high %v20237_v43, %v20237_v43 }
 0x376   : > { %3511 = vmatpush1.bf16.msra.mxu1 %v16790_v62  ;;  %3471 = vmatprep.subr.bf16.mxu0 %v16795_v63  ;;  %v20251_v62 = vcombine.high %v20239_v44, %v20239_v44  ;;  %v16877_v63 = vld [vmem:[%s19781_s21 + $0x820] ss:$16 sps:$4 sm:$0xff]  }
 0x377   : > { %3512 = vmatprep.subr.bf16.mxu1 %v16798_v0  ;;  %v16880_v0 = vld [vmem:[%s19781_s21 + $0xa20] ss:$16 sps:$4 sm:$0xff]  }
 0x379   : > { %3472 = vmatpush1.bf16.msra.mxu0 %v16793_v1  ;;  %v16885_v1 = vld [vmem:[%s19781_s21 + $0x844] ss:$16 sps:$4 sm:$0xff]  }
 0x37a   : > { %3513 = vmatpush1.bf16.msra.mxu1 %v16796_v2  ;;  %3473 = vmatprep.subr.bf16.mxu0 %v16801_v53  ;;  %v16888_v2 = vld [vmem:[%s19781_s21 + $0xa44] ss:$16 sps:$4 sm:$0xff]  }
 0x37b   : > { %3514 = vmatprep.subr.bf16.mxu1 %v16804_v54  ;;  %v16891_v53 = vld [vmem:[%s19781_s21 + $0x864] ss:$16 sps:$4 sm:$0xff]  }
 0x37c   : > { %v16894_v54 = vld [vmem:[%s19781_s21 + $0xa64] ss:$16 sps:$4 sm:$0xff]  }
 0x37d   : > { %3474 = vmatpush1.bf16.msra.mxu0 %v16799_v3  ;;  %v16889_v3 = vld [vmem:[%s19781_s21 + $0x860] ss:$16 sps:$4 sm:$0xff]  }
 0x37e   : > { %3515 = vmatpush1.bf16.msra.mxu1 %v16802_v4  ;;  %3475 = vmatprep.subr.bf16.mxu0 %v16807_v5  ;;  %v16892_v4 = vld [vmem:[%s19781_s21 + $0xa60] ss:$16 sps:$4 sm:$0xff]   ;;  %v16897_v5 = vld [vmem:[%s19781_s21 + $0x884] ss:$16 sps:$4 sm:$0xff]  }
 0x37f   : > { %3516 = vmatprep.subr.bf16.mxu1 %v16810_v6  ;;  %v16900_v6 = vld [vmem:[%s19781_s21 + $0xa84] ss:$16 sps:$4 sm:$0xff]  }
 0x381   : > { %3476 = vmatpush1.bf16.msra.mxu0 %v16805_v7  ;;  %v16895_v7 = vld [vmem:[%s19781_s21 + $0x880] ss:$16 sps:$4 sm:$0xff]  }
 0x382   : > { %3517 = vmatpush1.bf16.msra.mxu1 %v16808_v8  ;;  %3477 = vmatprep.subr.bf16.mxu0 %v16813_v9  ;;  %v16898_v8 = vld [vmem:[%s19781_s21 + $0xa80] ss:$16 sps:$4 sm:$0xff]   ;;  %v16903_v9 = vld [vmem:[%s19781_s21 + $0x8a4] ss:$16 sps:$4 sm:$0xff]  }
 0x383   : > { %3518 = vmatprep.subr.bf16.mxu1 %v16816_v10  ;;  %v16906_v10 = vld [vmem:[%s19781_s21 + $0xaa4] ss:$16 sps:$4 sm:$0xff]  }
 0x385   : > { %3478 = vmatpush1.bf16.msra.mxu0 %v16811_v11  ;;  %v16901_v11 = vld [vmem:[%s19781_s21 + $0x8a0] ss:$16 sps:$4 sm:$0xff]  }
 0x386   : > { %3519 = vmatpush1.bf16.msra.mxu1 %v16814_v12  ;;  %3479 = vmatprep.subr.bf16.mxu0 %v16819_v13  ;;  %v16904_v12 = vld [vmem:[%s19781_s21 + $0xaa0] ss:$16 sps:$4 sm:$0xff]   ;;  %v16909_v13 = vld [vmem:[%s19781_s21 + $0x8c4] ss:$16 sps:$4 sm:$0xff]  }
 0x387   : > { %3520 = vmatprep.subr.bf16.mxu1 %v16822_v14  ;;  %v16912_v14 = vld [vmem:[%s19781_s21 + $0xac4] ss:$16 sps:$4 sm:$0xff]  }
 0x389   : > { %3480 = vmatpush1.bf16.msra.mxu0 %v16817_v15 }
 0x38a   : > { %3521 = vmatpush1.bf16.msra.mxu1 %v16820_v16  ;;  %3481 = vmatprep.subr.bf16.mxu0 %v16825_v17  ;;  %v16907_v17 = vld [vmem:[%s19781_s21 + $0x8c0] ss:$16 sps:$4 sm:$0xff]  }
 0x38b   : > { %3522 = vmatprep.subr.bf16.mxu1 %v16828_v18  ;;  %v16910_v18 = vld [vmem:[%s19781_s21 + $0xac0] ss:$16 sps:$4 sm:$0xff]  }
 0x38d   : > { %3482 = vmatpush1.bf16.msra.mxu0 %v16823_v19 }
 0x38e   : > { %3523 = vmatpush1.bf16.msra.mxu1 %v16826_v20  ;;  %3483 = vmatprep.subr.bf16.mxu0 %v16831_v21 }
 0x38f   : > { %3524 = vmatprep.subr.bf16.mxu1 %v16834_v22 }
 0x391   : > { %3484 = vmatpush1.bf16.msra.mxu0 %v16829_v23 }
 0x392   : > { %3525 = vmatpush1.bf16.msra.mxu1 %v16832_v24  ;;  %3485 = vmatprep.subr.bf16.mxu0 %v16837_v25 }
 0x393   : > { %3526 = vmatprep.subr.bf16.mxu1 %v16840_v26 }
 0x395   : > { %3486 = vmatpush1.bf16.msra.mxu0 %v16835_v27  ;;  %v16915_v27 = vld [vmem:[%s19781_s21 + $0x8e4] ss:$16 sps:$4 sm:$0xff]  }
 0x396   : > { %3527 = vmatpush1.bf16.msra.mxu1 %v16838_v28  ;;  %3487 = vmatprep.subr.bf16.mxu0 %v16843_v29  ;;  %v16918_v28 = vld [vmem:[%s19781_s21 + $0xae4] ss:$16 sps:$4 sm:$0xff]   ;;  %v16913_v29 = vld [vmem:[%s19781_s21 + $0x8e0] ss:$16 sps:$4 sm:$0xff]  }
 0x397   : > { %3528 = vmatprep.subr.bf16.mxu1 %v16846_v30  ;;  %v16916_v30 = vld [vmem:[%s19781_s21 + $0xae0] ss:$16 sps:$4 sm:$0xff]  }
 0x399   : > { %3488 = vmatpush1.bf16.msra.mxu0 %v16841_v31  ;;  %v16921_v31 = vld [vmem:[%s19781_s21 + $0x904] ss:$16 sps:$4 sm:$0xff]  }
 0x39a   : > { %3529 = vmatpush1.bf16.msra.mxu1 %v16844_v32  ;;  %3489 = vmatprep.subr.bf16.mxu0 %v16849_v33  ;;  %v16924_v32 = vld [vmem:[%s19781_s21 + $0xb04] ss:$16 sps:$4 sm:$0xff]   ;;  %v16919_v33 = vld [vmem:[%s19781_s21 + $0x900] ss:$16 sps:$4 sm:$0xff]  }
 0x39b   : > { %3530 = vmatprep.subr.bf16.mxu1 %v16852_v34  ;;  %v16922_v34 = vld [vmem:[%s19781_s21 + $0xb00] ss:$16 sps:$4 sm:$0xff]  }
 0x39d   : > { %3490 = vmatpush1.bf16.msra.mxu0 %v16847_v35  ;;  %v16927_v35 = vld [vmem:[%s19781_s21 + $0x924] ss:$16 sps:$4 sm:$0xff]  }
 0x39e   : > { %3531 = vmatpush1.bf16.msra.mxu1 %v16850_v36  ;;  %3491 = vmatprep.subr.bf16.mxu0 %v16855_v37  ;;  %v16930_v36 = vld [vmem:[%s19781_s21 + $0xb24] ss:$16 sps:$4 sm:$0xff]   ;;  %v16925_v37 = vld [vmem:[%s19781_s21 + $0x920] ss:$16 sps:$4 sm:$0xff]  }
 0x39f   : > { %3532 = vmatprep.subr.bf16.mxu1 %v16858_v38  ;;  %v16928_v38 = vld [vmem:[%s19781_s21 + $0xb20] ss:$16 sps:$4 sm:$0xff]  }
 0x3a1   : > { %3492 = vmatpush1.bf16.msra.mxu0 %v16853_v39  ;;  %v16933_v39 = vld [vmem:[%s19781_s21 + $0x944] ss:$16 sps:$4 sm:$0xff]  }
 0x3a2   : > { %3533 = vmatpush1.bf16.msra.mxu1 %v16856_v40  ;;  %3493 = vmatprep.subr.bf16.mxu0 %v16861_v41  ;;  %v16936_v40 = vld [vmem:[%s19781_s21 + $0xb44] ss:$16 sps:$4 sm:$0xff]   ;;  %v16931_v41 = vld [vmem:[%s19781_s21 + $0x940] ss:$16 sps:$4 sm:$0xff]  }
 0x3a3   : > { %3534 = vmatprep.subr.bf16.mxu1 %v16864_v42  ;;  %v16934_v42 = vld [vmem:[%s19781_s21 + $0xb40] ss:$16 sps:$4 sm:$0xff]  }
 0x3a5   : > { %3494 = vmatpush1.bf16.msra.mxu0 %v16859_v45  ;;  %v16939_v45 = vld [vmem:[%s19781_s21 + $0x964] ss:$16 sps:$4 sm:$0xff]  }
 0x3a6   : > { %3535 = vmatpush1.bf16.msra.mxu1 %v16862_v46  ;;  %3495 = vmatprep.subr.bf16.mxu0 %v16867_v47  ;;  %v16942_v46 = vld [vmem:[%s19781_s21 + $0xb64] ss:$16 sps:$4 sm:$0xff]   ;;  %v16937_v47 = vld [vmem:[%s19781_s21 + $0x960] ss:$16 sps:$4 sm:$0xff]  }
 0x3a7   : > { %3536 = vmatprep.subr.bf16.mxu1 %v16870_v48  ;;  %v16940_v48 = vld [vmem:[%s19781_s21 + $0xb60] ss:$16 sps:$4 sm:$0xff]  }
 0x3a9   : > { %3496 = vmatpush1.bf16.msra.mxu0 %v16865_v49  ;;  %v16945_v49 = vld [vmem:[%s19781_s21 + $0x984] ss:$16 sps:$4 sm:$0xff]  }
 0x3aa   : > { %3537 = vmatpush1.bf16.msra.mxu1 %v16868_v50  ;;  %4332 = vmatprep.subr.bf16.mxu0 %v16873_v57  ;;  %v16948_v50 = vld [vmem:[%s19781_s21 + $0xb84] ss:$16 sps:$4 sm:$0xff]   ;;  %v16943_v57 = vld [vmem:[%s19781_s21 + $0x980] ss:$16 sps:$4 sm:$0xff]  }
 0x3ab   : > { %4373 = vmatprep.subr.bf16.mxu1 %v16876_v58  ;;  %v16946_v58 = vld [vmem:[%s19781_s21 + $0xb80] ss:$16 sps:$4 sm:$0xff]  }
 0x3ac   : > { %3498 = vmatmul.mubr.bf16.vlgmr.msra.gmra.mrb[12].mxu0 %v20163_v55  ;;  %v16883_v55 = vld [vmem:[%s19781_s21 + $0x840] ss:$16 sps:$4 sm:$0xff]  }
 0x3ad   : > { %3539 = vmatmul.mubr.bf16.vlgmr.msra.gmra.mrb[12].mxu1 %v20167_v56  ;;  %4333 = vmatpush1.bf16.msra.mxu0 %v16871_v51  ;;  %v16886_v56 = vld [vmem:[%s19781_s21 + $0xa40] ss:$16 sps:$4 sm:$0xff]   ;;  %v16951_v51 = vld [vmem:[%s19781_s21 + $0x9a4] ss:$16 sps:$4 sm:$0xff]  }
 0x3ae   : > { %4374 = vmatpush1.bf16.msra.mxu1 %v16874_v59  ;;  %4334 = vmatprep.subr.bf16.mxu0 %v16879_v52  ;;  %v16954_v59 = vld [vmem:[%s19781_s21 + $0xba4] ss:$16 sps:$4 sm:$0xff]   ;;  %v16949_v52 = vld [vmem:[%s19781_s21 + $0x9a0] ss:$16 sps:$4 sm:$0xff]  }
 0x3af   : > { %4375 = vmatprep.subr.bf16.mxu1 %v16882_v60  ;;  %4364 = vmatprep.mubr.bf16.mxu0 %v20247_v61  ;;  %v16952_v60 = vld [vmem:[%s19781_s21 + $0xba0] ss:$16 sps:$4 sm:$0xff]  }
 0x3b0   : > { %4405 = vmatprep.mubr.bf16.mxu1 %v20251_v62 }
 0x3b1   : > { %4335 = vmatpush1.bf16.msra.mxu0 %v16877_v63  ;;  %v16957_v63 = vld [vmem:[%s19781_s21 + $0x9c4] ss:$16 sps:$4 sm:$0xff]  }
 0x3b2   : > { %4376 = vmatpush1.bf16.msra.mxu1 %v16880_v0  ;;  %4336 = vmatprep.subr.bf16.mxu0 %v16885_v1  ;;  %v16960_v0 = vld [vmem:[%s19781_s21 + $0xbc4] ss:$16 sps:$4 sm:$0xff]   ;;  %v16955_v1 = vld [vmem:[%s19781_s21 + $0x9c0] ss:$16 sps:$4 sm:$0xff]  }
 0x3b3   : > { %4377 = vmatprep.subr.bf16.mxu1 %v16888_v2  ;;  %v16958_v2 = vld [vmem:[%s19781_s21 + $0xbc0] ss:$16 sps:$4 sm:$0xff]  }
 0x3b5   : > { %4337 = vmatpush1.bf16.msra.mxu0 %v16883_v55  ;;  %v16963_v55 = vld [vmem:[%s19781_s21 + $0x9e4] ss:$16 sps:$4 sm:$0xff]  }
 0x3b6   : > { %4378 = vmatpush1.bf16.msra.mxu1 %v16886_v56  ;;  %4338 = vmatprep.subr.bf16.mxu0 %v16891_v53  ;;  %v16966_v56 = vld [vmem:[%s19781_s21 + $0xbe4] ss:$16 sps:$4 sm:$0xff]   ;;  %v16961_v53 = vld [vmem:[%s19781_s21 + $0x9e0] ss:$16 sps:$4 sm:$0xff]  }
 0x3b7   : > { %4379 = vmatprep.subr.bf16.mxu1 %v16894_v54  ;;  %v16964_v54 = vld [vmem:[%s19781_s21 + $0xbe0] ss:$16 sps:$4 sm:$0xff]  }
 0x3b9   : > { %4339 = vmatpush1.bf16.msra.mxu0 %v16889_v3  ;;  %v16973_v3 = vld [vmem:[%s19781_s21 + $0x80c] ss:$16 sps:$4 sm:$0xff]  }
 0x3ba   : > { %4380 = vmatpush1.bf16.msra.mxu1 %v16892_v4  ;;  %4340 = vmatprep.subr.bf16.mxu0 %v16897_v5  ;;  %v16976_v4 = vld [vmem:[%s19781_s21 + $0xa0c] ss:$16 sps:$4 sm:$0xff]   ;;  %v20323_v5 = vcombine.low %v20237_v43, %v20237_v43  ;;  %v16977_v43 = vld [vmem:[%s19781_s21 + $0x828] ss:$16 sps:$4 sm:$0xff]  }
 0x3bb   : > { %4381 = vmatprep.subr.bf16.mxu1 %v16900_v6  ;;  %v20327_v6 = vcombine.low %v20239_v44, %v20239_v44  ;;  %v16980_v44 = vld [vmem:[%s19781_s21 + $0xa28] ss:$16 sps:$4 sm:$0xff]  }
 0x3bd   : > { %4341 = vmatpush1.bf16.msra.mxu0 %v16895_v7  ;;  %v16971_v7 = vld [vmem:[%s19781_s21 + $0x808] ss:$16 sps:$4 sm:$0xff]  }
 0x3be   : > { %4382 = vmatpush1.bf16.msra.mxu1 %v16898_v8  ;;  %4342 = vmatprep.subr.bf16.mxu0 %v16903_v9  ;;  %v16974_v8 = vld [vmem:[%s19781_s21 + $0xa08] ss:$16 sps:$4 sm:$0xff]   ;;  %v16979_v9 = vld [vmem:[%s19781_s21 + $0x82c] ss:$16 sps:$4 sm:$0xff]  }
 0x3bf   : > { %4383 = vmatprep.subr.bf16.mxu1 %v16906_v10  ;;  %v2599_v15 = vpop.f32.mrb[0].mxu0  ;;  %v16982_v10 = vld [vmem:[%s19781_s21 + $0xa2c] ss:$16 sps:$4 sm:$0xff]  }
 0x3c0   : > { %v2640_v16 = vpop.f32.mrb[0].mxu1  ;;  %v2601_v20 = vpop.f32.mrb[1].mxu0 }
 0x3c1   : > { %v20279_v19 = vadd.f32 %v2640_v16, %v2599_v15  ;;  %v2642_v21 = vpop.f32.mrb[1].mxu1  ;;  %v2603_v23 = vpop.f32.mrb[2].mxu0  ;;  %4343 = vmatpush1.bf16.msra.mxu0 %v16901_v11  ;;  %v16985_v11 = vld [vmem:[%s19781_s21 + $0x84c] ss:$16 sps:$4 sm:$0xff]  }
 0x3c2   : > { %v20281_v22 = vadd.f32 %v2642_v21, %v2601_v20  ;;  %v2644_v24 = vpop.f32.mrb[2].mxu1  ;;  %4384 = vmatpush1.bf16.msra.mxu1 %v16904_v12  ;;  %v2604_v25 = vpop.f32.mrb[3].mxu0  ;;  %4344 = vmatprep.subr.bf16.mxu0 %v16909_v13  ;;  %v16988_v12 = vld [vmem:[%s19781_s21 + $0xa4c] ss:$16 sps:$4 sm:$0xff]   ;;  %v16983_v13 = vld [vmem:[%s19781_s21 + $0x848] ss:$16 sps:$4 sm:$0xff]  }
 0x3c3   : > { %v2645_v26 = vpop.f32.mrb[3].mxu1  ;;  %4385 = vmatprep.subr.bf16.mxu1 %v16912_v14  ;;  %v16986_v14 = vld [vmem:[%s19781_s21 + $0xa48] ss:$16 sps:$4 sm:$0xff]   ;;  %v16991_v15 = vld [vmem:[%s19781_s21 + $0x86c] ss:$16 sps:$4 sm:$0xff]  }
 0x3c4   : > { %v16994_v16 = vld [vmem:[%s19781_s21 + $0xa6c] ss:$16 sps:$4 sm:$0xff]   ;;  %v16995_v20 = vld [vmem:[%s19781_s21 + $0x888] ss:$16 sps:$4 sm:$0xff]  }
 0x3c5   : > { %4345 = vmatpush1.bf16.msra.mxu0 %v16907_v17  ;;  %v16992_v17 = vld [vmem:[%s19781_s21 + $0xa68] ss:$16 sps:$4 sm:$0xff]   ;;  %v17003_v23 = vld [vmem:[%s19781_s21 + $0x8ac] ss:$16 sps:$4 sm:$0xff]  }
 0x3c6   : > { %4386 = vmatpush1.bf16.msra.mxu1 %v16910_v18  ;;  %4346 = vmatprep.subr.bf16.mxu0 %v16915_v27  ;;  %v17000_v18 = vld [vmem:[%s19781_s21 + $0xa8c] ss:$16 sps:$4 sm:$0xff]   ;;  %v16998_v21 = vld [vmem:[%s19781_s21 + $0xa88] ss:$16 sps:$4 sm:$0xff]  }
 0x3c7   : > { %4387 = vmatprep.subr.bf16.mxu1 %v16918_v28  ;;  %v17006_v24 = vld [vmem:[%s19781_s21 + $0xaac] ss:$16 sps:$4 sm:$0xff]   ;;  %v17001_v25 = vld [vmem:[%s19781_s21 + $0x8a8] ss:$16 sps:$4 sm:$0xff]  }
 0x3c8   : > { %v17004_v26 = vld [vmem:[%s19781_s21 + $0xaa8] ss:$16 sps:$4 sm:$0xff]   ;;  %v17009_v27 = vld [vmem:[%s19781_s21 + $0x8cc] ss:$16 sps:$4 sm:$0xff]  }
 0x3c9   : > { %4347 = vmatpush1.bf16.msra.mxu0 %v16913_v29  ;;  %v17012_v28 = vld [vmem:[%s19781_s21 + $0xacc] ss:$16 sps:$4 sm:$0xff]  }
 0x3ca   : > { %4388 = vmatpush1.bf16.msra.mxu1 %v16916_v30  ;;  %4348 = vmatprep.subr.bf16.mxu0 %v16921_v31  ;;  %v17007_v31 = vld [vmem:[%s19781_s21 + $0x8c8] ss:$16 sps:$4 sm:$0xff]  }
 0x3cb   : > { %4389 = vmatprep.subr.bf16.mxu1 %v16924_v32  ;;  %v17010_v32 = vld [vmem:[%s19781_s21 + $0xac8] ss:$16 sps:$4 sm:$0xff]  }
 0x3cd   : > { %4349 = vmatpush1.bf16.msra.mxu0 %v16919_v33 }
 0x3ce   : > { %4390 = vmatpush1.bf16.msra.mxu1 %v16922_v34  ;;  %4350 = vmatprep.subr.bf16.mxu0 %v16927_v35 }
 0x3cf   : > { %4391 = vmatprep.subr.bf16.mxu1 %v16930_v36 }
 0x3d1   : > { %4351 = vmatpush1.bf16.msra.mxu0 %v16925_v37 }
 0x3d2   : > { %4392 = vmatpush1.bf16.msra.mxu1 %v16928_v38  ;;  %4352 = vmatprep.subr.bf16.mxu0 %v16933_v39 }
 0x3d3   : > { %4393 = vmatprep.subr.bf16.mxu1 %v16936_v40 }
 0x3d5   : > { %4353 = vmatpush1.bf16.msra.mxu0 %v16931_v41  ;;  %v17015_v41 = vld [vmem:[%s19781_s21 + $0x8ec] ss:$16 sps:$4 sm:$0xff]  }
 0x3d6   : > { %4394 = vmatpush1.bf16.msra.mxu1 %v16934_v42  ;;  %4354 = vmatprep.subr.bf16.mxu0 %v16939_v45  ;;  %v17018_v42 = vld [vmem:[%s19781_s21 + $0xaec] ss:$16 sps:$4 sm:$0xff]   ;;  %v17013_v45 = vld [vmem:[%s19781_s21 + $0x8e8] ss:$16 sps:$4 sm:$0xff]  }
 0x3d7   : > { %4395 = vmatprep.subr.bf16.mxu1 %v16942_v46  ;;  %v17016_v46 = vld [vmem:[%s19781_s21 + $0xae8] ss:$16 sps:$4 sm:$0xff]  }
 0x3d9   : > { %4355 = vmatpush1.bf16.msra.mxu0 %v16937_v47  ;;  %v17021_v47 = vld [vmem:[%s19781_s21 + $0x90c] ss:$16 sps:$4 sm:$0xff]  }
 0x3da   : > { %4396 = vmatpush1.bf16.msra.mxu1 %v16940_v48  ;;  %4356 = vmatprep.subr.bf16.mxu0 %v16945_v49  ;;  %v17024_v48 = vld [vmem:[%s19781_s21 + $0xb0c] ss:$16 sps:$4 sm:$0xff]   ;;  %v17019_v49 = vld [vmem:[%s19781_s21 + $0x908] ss:$16 sps:$4 sm:$0xff]  }
 0x3db   : > { %4397 = vmatprep.subr.bf16.mxu1 %v16948_v50  ;;  %v17022_v50 = vld [vmem:[%s19781_s21 + $0xb08] ss:$16 sps:$4 sm:$0xff]  }
 0x3dd   : > { %4357 = vmatpush1.bf16.msra.mxu0 %v16943_v57  ;;  %v17027_v57 = vld [vmem:[%s19781_s21 + $0x92c] ss:$16 sps:$4 sm:$0xff]  }
 0x3de   : > { %4398 = vmatpush1.bf16.msra.mxu1 %v16946_v58  ;;  %4358 = vmatprep.subr.bf16.mxu0 %v16951_v51  ;;  %v17030_v58 = vld [vmem:[%s19781_s21 + $0xb2c] ss:$16 sps:$4 sm:$0xff]   ;;  %v17025_v51 = vld [vmem:[%s19781_s21 + $0x928] ss:$16 sps:$4 sm:$0xff]  }
 0x3df   : > { %4399 = vmatprep.subr.bf16.mxu1 %v16954_v59  ;;  %v17028_v59 = vld [vmem:[%s19781_s21 + $0xb28] ss:$16 sps:$4 sm:$0xff]  }
 0x3e1   : > { %4359 = vmatpush1.bf16.msra.mxu0 %v16949_v52  ;;  %v17033_v52 = vld [vmem:[%s19781_s21 + $0x94c] ss:$16 sps:$4 sm:$0xff]  }
 0x3e2   : > { %4400 = vmatpush1.bf16.msra.mxu1 %v16952_v60  ;;  %4360 = vmatprep.subr.bf16.mxu0 %v16957_v63  ;;  %v17036_v60 = vld [vmem:[%s19781_s21 + $0xb4c] ss:$16 sps:$4 sm:$0xff]   ;;  %v17031_v63 = vld [vmem:[%s19781_s21 + $0x948] ss:$16 sps:$4 sm:$0xff]  }
 0x3e3   : > { %4401 = vmatprep.subr.bf16.mxu1 %v16960_v0  ;;  %v17034_v0 = vld [vmem:[%s19781_s21 + $0xb48] ss:$16 sps:$4 sm:$0xff]  }
 0x3e5   : > { %4361 = vmatpush1.bf16.msra.mxu0 %v16955_v1  ;;  %v17039_v1 = vld [vmem:[%s19781_s21 + $0x96c] ss:$16 sps:$4 sm:$0xff]  }
 0x3e6   : > { %4402 = vmatpush1.bf16.msra.mxu1 %v16958_v2  ;;  %4362 = vmatprep.subr.bf16.mxu0 %v16963_v55  ;;  %v17042_v2 = vld [vmem:[%s19781_s21 + $0xb6c] ss:$16 sps:$4 sm:$0xff]   ;;  %v17037_v55 = vld [vmem:[%s19781_s21 + $0x968] ss:$16 sps:$4 sm:$0xff]  }
 0x3e7   : > { %4403 = vmatprep.subr.bf16.mxu1 %v16966_v56  ;;  %v17040_v56 = vld [vmem:[%s19781_s21 + $0xb68] ss:$16 sps:$4 sm:$0xff]  }
 0x3e9   : > { %4363 = vmatpush1.bf16.msra.mxu0 %v16961_v53  ;;  %v17045_v53 = vld [vmem:[%s19781_s21 + $0x98c] ss:$16 sps:$4 sm:$0xff]  }
 0x3ea   : > { %4404 = vmatpush1.bf16.msra.mxu1 %v16964_v54  ;;  %4414 = vmatprep.subr.bf16.mxu0 %v16973_v3  ;;  %v17048_v54 = vld [vmem:[%s19781_s21 + $0xb8c] ss:$16 sps:$4 sm:$0xff]   ;;  %v17043_v3 = vld [vmem:[%s19781_s21 + $0x988] ss:$16 sps:$4 sm:$0xff]  }
 0x3eb   : > { %4455 = vmatprep.subr.bf16.mxu1 %v16976_v4  ;;  %v17046_v4 = vld [vmem:[%s19781_s21 + $0xb88] ss:$16 sps:$4 sm:$0xff]  }
 0x3ec   : > { %4365 = vmatmul.mubr.bf16.vlgmr.msra.gmra.mrb[16].mxu0 %v20323_v5 }
 0x3ed   : > { %4406 = vmatmul.mubr.bf16.vlgmr.msra.gmra.mrb[16].mxu1 %v20327_v6  ;;  %4415 = vmatpush1.bf16.msra.mxu0 %v16971_v7  ;;  %v17051_v7 = vld [vmem:[%s19781_s21 + $0x9ac] ss:$16 sps:$4 sm:$0xff]  }
 0x3ee   : > { %4456 = vmatpush1.bf16.msra.mxu1 %v16974_v8  ;;  %4416 = vmatprep.subr.bf16.mxu0 %v16979_v9  ;;  %v17054_v8 = vld [vmem:[%s19781_s21 + $0xbac] ss:$16 sps:$4 sm:$0xff]   ;;  %v17049_v9 = vld [vmem:[%s19781_s21 + $0x9a8] ss:$16 sps:$4 sm:$0xff]  }
 0x3ef   : > { %4457 = vmatprep.subr.bf16.mxu1 %v16982_v10  ;;  %4446 = vmatprep.mubr.bf16.mxu0 %v20247_v61  ;;  %v16989_v61 = vld [vmem:[%s19781_s21 + $0x868] ss:$16 sps:$4 sm:$0xff]  }
 0x3f0   : > { %4487 = vmatprep.mubr.bf16.mxu1 %v20251_v62  ;;  %v16997_v62 = vld [vmem:[%s19781_s21 + $0x88c] ss:$16 sps:$4 sm:$0xff]   ;;  %v17052_v10 = vld [vmem:[%s19781_s21 + $0xba8] ss:$16 sps:$4 sm:$0xff]  }
 0x3f1   : > { %4417 = vmatpush1.bf16.msra.mxu0 %v16977_v43  ;;  %v17057_v43 = vld [vmem:[%s19781_s21 + $0x9cc] ss:$16 sps:$4 sm:$0xff]  }
 0x3f2   : > { %4458 = vmatpush1.bf16.msra.mxu1 %v16980_v44  ;;  %4418 = vmatprep.subr.bf16.mxu0 %v16985_v11  ;;  %v17060_v44 = vld [vmem:[%s19781_s21 + $0xbcc] ss:$16 sps:$4 sm:$0xff]   ;;  %v17055_v11 = vld [vmem:[%s19781_s21 + $0x9c8] ss:$16 sps:$4 sm:$0xff]  }
 0x3f3   : > { %4459 = vmatprep.subr.bf16.mxu1 %v16988_v12  ;;  %v17058_v12 = vld [vmem:[%s19781_s21 + $0xbc8] ss:$16 sps:$4 sm:$0xff]  }
 0x3f5   : > { %4419 = vmatpush1.bf16.msra.mxu0 %v16983_v13  ;;  %v17063_v13 = vld [vmem:[%s19781_s21 + $0x9ec] ss:$16 sps:$4 sm:$0xff]  }
 0x3f6   : > { %4460 = vmatpush1.bf16.msra.mxu1 %v16986_v14  ;;  %4420 = vmatprep.subr.bf16.mxu0 %v16991_v15  ;;  %v17066_v14 = vld [vmem:[%s19781_s21 + $0xbec] ss:$16 sps:$4 sm:$0xff]   ;;  %v17061_v15 = vld [vmem:[%s19781_s21 + $0x9e8] ss:$16 sps:$4 sm:$0xff]  }
 0x3f7   : > { %4461 = vmatprep.subr.bf16.mxu1 %v16994_v16  ;;  %v17064_v16 = vld [vmem:[%s19781_s21 + $0xbe8] ss:$16 sps:$4 sm:$0xff]  }
 0x3f9   : > { %4421 = vmatpush1.bf16.msra.mxu0 %v16989_v61  ;;  %v17069_v61 = vld [vmem:[%s19781_s21 + $0xc04] ss:$16 sps:$4 sm:$0xff]  }
 0x3fa   : > { %4462 = vmatpush1.bf16.msra.mxu1 %v16992_v17  ;;  %4422 = vmatprep.subr.bf16.mxu0 %v16997_v62  ;;  %v17072_v17 = vld [vmem:[%s19781_s21 + $0xe04] ss:$16 sps:$4 sm:$0xff]   ;;  %v20401_v62 = vld [vmem:[#allocation2 + $0x30] sm:$0xff] }
 0x3fb   : > { %4463 = vmatprep.subr.bf16.mxu1 %v17000_v18  ;;  %v20403_v18 = vld [vmem:[#allocation2 + $0x38] sm:$0xff] }
 0x3fd   : > { %4423 = vmatpush1.bf16.msra.mxu0 %v16995_v20  ;;  %v17067_v20 = vld [vmem:[%s19781_s21 + $0xc00] ss:$16 sps:$4 sm:$0xff]  }
 0x3fe   : > { %4464 = vmatpush1.bf16.msra.mxu1 %v16998_v21  ;;  %4424 = vmatprep.subr.bf16.mxu0 %v17003_v23  ;;  %v17070_v21 = vld [vmem:[%s19781_s21 + $0xe00] ss:$16 sps:$4 sm:$0xff]   ;;  %v17075_v23 = vld [vmem:[%s19781_s21 + $0xc24] ss:$16 sps:$4 sm:$0xff]  }
 0x3ff   : > { %4465 = vmatprep.subr.bf16.mxu1 %v17006_v24  ;;  %v2681_v29 = vpop.f32.mrb[4].mxu0  ;;  %v17078_v24 = vld [vmem:[%s19781_s21 + $0xe24] ss:$16 sps:$4 sm:$0xff]  }
 0x400   : > { %v2722_v30 = vpop.f32.mrb[4].mxu1  ;;  %v2683_v34 = vpop.f32.mrb[5].mxu0 }
 0x401   : > { %v20359_v33 = vadd.f32 %v2722_v30, %v2681_v29  ;;  %v2724_v35 = vpop.f32.mrb[5].mxu1  ;;  %v2685_v37 = vpop.f32.mrb[6].mxu0  ;;  %4425 = vmatpush1.bf16.msra.mxu0 %v17001_v25  ;;  %v20411_v25 = vcombine.high %v20401_v62, %v20401_v62  ;;  %v17081_v29 = vld [vmem:[%s19781_s21 + $0xc44] ss:$16 sps:$4 sm:$0xff]  }
 0x402   : > { %v20361_v36 = vadd.f32 %v2724_v35, %v2683_v34  ;;  %v2726_v38 = vpop.f32.mrb[6].mxu1  ;;  %4466 = vmatpush1.bf16.msra.mxu1 %v17004_v26  ;;  %v2686_v39 = vpop.f32.mrb[7].mxu0  ;;  %4426 = vmatprep.subr.bf16.mxu0 %v17009_v27  ;;  %v20415_v26 = vcombine.high %v20403_v18, %v20403_v18  ;;  %v17073_v27 = vld [vmem:[%s19781_s21 + $0xc20] ss:$16 sps:$4 sm:$0xff]   ;;  %v17084_v30 = vld [vmem:[%s19781_s21 + $0xe44] ss:$16 sps:$4 sm:$0xff]  }
 0x403   : > { %v2727_v40 = vpop.f32.mrb[7].mxu1  ;;  %4467 = vmatprep.subr.bf16.mxu1 %v17012_v28  ;;  %v17076_v28 = vld [vmem:[%s19781_s21 + $0xe20] ss:$16 sps:$4 sm:$0xff]   ;;  %v17093_v37 = vld [vmem:[%s19781_s21 + $0xc84] ss:$16 sps:$4 sm:$0xff]  }
 0x404   : > { %v17085_v34 = vld [vmem:[%s19781_s21 + $0xc60] ss:$16 sps:$4 sm:$0xff]   ;;  %v17096_v38 = vld [vmem:[%s19781_s21 + $0xe84] ss:$16 sps:$4 sm:$0xff]  }
 0x405   : > { %4427 = vmatpush1.bf16.msra.mxu0 %v17007_v31  ;;  %v17087_v31 = vld [vmem:[%s19781_s21 + $0xc64] ss:$16 sps:$4 sm:$0xff]   ;;  %v17088_v35 = vld [vmem:[%s19781_s21 + $0xe60] ss:$16 sps:$4 sm:$0xff]  }
 0x406   : > { %4468 = vmatpush1.bf16.msra.mxu1 %v17010_v32  ;;  %4428 = vmatprep.subr.bf16.mxu0 %v17015_v41  ;;  %v17090_v32 = vld [vmem:[%s19781_s21 + $0xe64] ss:$16 sps:$4 sm:$0xff]   ;;  %v17091_v39 = vld [vmem:[%s19781_s21 + $0xc80] ss:$16 sps:$4 sm:$0xff]  }
 0x407   : > { %4469 = vmatprep.subr.bf16.mxu1 %v17018_v42  ;;  %v17094_v40 = vld [vmem:[%s19781_s21 + $0xe80] ss:$16 sps:$4 sm:$0xff]   ;;  %v17099_v41 = vld [vmem:[%s19781_s21 + $0xca4] ss:$16 sps:$4 sm:$0xff]  }
 0x408   : > { %v17102_v42 = vld [vmem:[%s19781_s21 + $0xea4] ss:$16 sps:$4 sm:$0xff]  }
 0x409   : > { %4429 = vmatpush1.bf16.msra.mxu0 %v17013_v45  ;;  %v17097_v45 = vld [vmem:[%s19781_s21 + $0xca0] ss:$16 sps:$4 sm:$0xff]  }
 0x40a   : > { %4470 = vmatpush1.bf16.msra.mxu1 %v17016_v46  ;;  %4430 = vmatprep.subr.bf16.mxu0 %v17021_v47  ;;  %v17100_v46 = vld [vmem:[%s19781_s21 + $0xea0] ss:$16 sps:$4 sm:$0xff]   ;;  %v17105_v47 = vld [vmem:[%s19781_s21 + $0xcc4] ss:$16 sps:$4 sm:$0xff]  }
 0x40b   : > { %4471 = vmatprep.subr.bf16.mxu1 %v17024_v48  ;;  %v17108_v48 = vld [vmem:[%s19781_s21 + $0xec4] ss:$16 sps:$4 sm:$0xff]  }
 0x40d   : > { %4431 = vmatpush1.bf16.msra.mxu0 %v17019_v49 }
 0x40e   : > { %4472 = vmatpush1.bf16.msra.mxu1 %v17022_v50  ;;  %4432 = vmatprep.subr.bf16.mxu0 %v17027_v57  ;;  %v17103_v57 = vld [vmem:[%s19781_s21 + $0xcc0] ss:$16 sps:$4 sm:$0xff]  }
 0x40f   : > { %4473 = vmatprep.subr.bf16.mxu1 %v17030_v58  ;;  %v17106_v58 = vld [vmem:[%s19781_s21 + $0xec0] ss:$16 sps:$4 sm:$0xff]  }
 0x411   : > { %4433 = vmatpush1.bf16.msra.mxu0 %v17025_v51 }
 0x412   : > { %4474 = vmatpush1.bf16.msra.mxu1 %v17028_v59  ;;  %4434 = vmatprep.subr.bf16.mxu0 %v17033_v52 }
 0x413   : > { %4475 = vmatprep.subr.bf16.mxu1 %v17036_v60 }
 0x415   : > { %4435 = vmatpush1.bf16.msra.mxu0 %v17031_v63 }
 0x416   : > { %4476 = vmatpush1.bf16.msra.mxu1 %v17034_v0  ;;  %4436 = vmatprep.subr.bf16.mxu0 %v17039_v1 }
 0x417   : > { %4477 = vmatprep.subr.bf16.mxu1 %v17042_v2 }
 0x419   : > { %4437 = vmatpush1.bf16.msra.mxu0 %v17037_v55 }
 0x41a   : > { %4478 = vmatpush1.bf16.msra.mxu1 %v17040_v56  ;;  %4438 = vmatprep.subr.bf16.mxu0 %v17045_v53  ;;  %v17114_v56 = vld [vmem:[%s19781_s21 + $0xee4] ss:$16 sps:$4 sm:$0xff]  }
 0x41b   : > { %4479 = vmatprep.subr.bf16.mxu1 %v17048_v54  ;;  %v17112_v54 = vld [vmem:[%s19781_s21 + $0xee0] ss:$16 sps:$4 sm:$0xff]  }
 0x41d   : > { %4439 = vmatpush1.bf16.msra.mxu0 %v17043_v3  ;;  %v17117_v3 = vld [vmem:[%s19781_s21 + $0xd04] ss:$16 sps:$4 sm:$0xff]  }
 0x41e   : > { %4480 = vmatpush1.bf16.msra.mxu1 %v17046_v4  ;;  %4440 = vmatprep.subr.bf16.mxu0 %v17051_v7  ;;  %v17120_v4 = vld [vmem:[%s19781_s21 + $0xf04] ss:$16 sps:$4 sm:$0xff]   ;;  %v17115_v7 = vld [vmem:[%s19781_s21 + $0xd00] ss:$16 sps:$4 sm:$0xff]  }
 0x41f   : > { %4481 = vmatprep.subr.bf16.mxu1 %v17054_v8  ;;  %v17118_v8 = vld [vmem:[%s19781_s21 + $0xf00] ss:$16 sps:$4 sm:$0xff]  }
 0x421   : > { %4441 = vmatpush1.bf16.msra.mxu0 %v17049_v9  ;;  %v17123_v9 = vld [vmem:[%s19781_s21 + $0xd24] ss:$16 sps:$4 sm:$0xff]  }
 0x422   : > { %4482 = vmatpush1.bf16.msra.mxu1 %v17052_v10  ;;  %4442 = vmatprep.subr.bf16.mxu0 %v17057_v43  ;;  %v17126_v10 = vld [vmem:[%s19781_s21 + $0xf24] ss:$16 sps:$4 sm:$0xff]   ;;  %v17121_v43 = vld [vmem:[%s19781_s21 + $0xd20] ss:$16 sps:$4 sm:$0xff]  }
 0x423   : > { %4483 = vmatprep.subr.bf16.mxu1 %v17060_v44  ;;  %v17124_v44 = vld [vmem:[%s19781_s21 + $0xf20] ss:$16 sps:$4 sm:$0xff]  }
 0x425   : > { %4443 = vmatpush1.bf16.msra.mxu0 %v17055_v11  ;;  %v17129_v11 = vld [vmem:[%s19781_s21 + $0xd44] ss:$16 sps:$4 sm:$0xff]  }
 0x426   : > { %4484 = vmatpush1.bf16.msra.mxu1 %v17058_v12  ;;  %4444 = vmatprep.subr.bf16.mxu0 %v17063_v13  ;;  %v17132_v12 = vld [vmem:[%s19781_s21 + $0xf44] ss:$16 sps:$4 sm:$0xff]   ;;  %v17127_v13 = vld [vmem:[%s19781_s21 + $0xd40] ss:$16 sps:$4 sm:$0xff]  }
 0x427   : > { %4485 = vmatprep.subr.bf16.mxu1 %v17066_v14  ;;  %v17130_v14 = vld [vmem:[%s19781_s21 + $0xf40] ss:$16 sps:$4 sm:$0xff]  }
 0x429   : > { %4445 = vmatpush1.bf16.msra.mxu0 %v17061_v15  ;;  %v17135_v15 = vld [vmem:[%s19781_s21 + $0xd64] ss:$16 sps:$4 sm:$0xff]  }
 0x42a   : > { %4486 = vmatpush1.bf16.msra.mxu1 %v17064_v16  ;;  %5285 = vmatprep.subr.bf16.mxu0 %v17069_v61  ;;  %v17138_v16 = vld [vmem:[%s19781_s21 + $0xf64] ss:$16 sps:$4 sm:$0xff]   ;;  %v17133_v61 = vld [vmem:[%s19781_s21 + $0xd60] ss:$16 sps:$4 sm:$0xff]  }
 0x42b   : > { %5326 = vmatprep.subr.bf16.mxu1 %v17072_v17  ;;  %v17136_v17 = vld [vmem:[%s19781_s21 + $0xf60] ss:$16 sps:$4 sm:$0xff]  }
 0x42c   : > { %4447 = vmatmul.mubr.bf16.vlgmr.msra.gmra.mrb[20].mxu0 %v20323_v5  ;;  %v17079_v5 = vld [vmem:[%s19781_s21 + $0xc40] ss:$16 sps:$4 sm:$0xff]  }
 0x42d   : > { %4488 = vmatmul.mubr.bf16.vlgmr.msra.gmra.mrb[20].mxu1 %v20327_v6  ;;  %5286 = vmatpush1.bf16.msra.mxu0 %v17067_v20  ;;  %v17082_v6 = vld [vmem:[%s19781_s21 + $0xe40] ss:$16 sps:$4 sm:$0xff]   ;;  %v17141_v20 = vld [vmem:[%s19781_s21 + $0xd84] ss:$16 sps:$4 sm:$0xff]  }
 0x42e   : > { %5327 = vmatpush1.bf16.msra.mxu1 %v17070_v21  ;;  %5287 = vmatprep.subr.bf16.mxu0 %v17075_v23  ;;  %v17144_v21 = vld [vmem:[%s19781_s21 + $0xf84] ss:$16 sps:$4 sm:$0xff]   ;;  %v17139_v23 = vld [vmem:[%s19781_s21 + $0xd80] ss:$16 sps:$4 sm:$0xff]  }
 0x42f   : > { %5328 = vmatprep.subr.bf16.mxu1 %v17078_v24  ;;  %5317 = vmatprep.mubr.bf16.mxu0 %v20411_v25  ;;  %v17142_v24 = vld [vmem:[%s19781_s21 + $0xf80] ss:$16 sps:$4 sm:$0xff]  }
 0x430   : > { %5358 = vmatprep.mubr.bf16.mxu1 %v20415_v26 }
 0x431   : > { %5288 = vmatpush1.bf16.msra.mxu0 %v17073_v27  ;;  %v17147_v27 = vld [vmem:[%s19781_s21 + $0xda4] ss:$16 sps:$4 sm:$0xff]  }
 0x432   : > { %5329 = vmatpush1.bf16.msra.mxu1 %v17076_v28  ;;  %5289 = vmatprep.subr.bf16.mxu0 %v17081_v29  ;;  %v17150_v28 = vld [vmem:[%s19781_s21 + $0xfa4] ss:$16 sps:$4 sm:$0xff]   ;;  %v17145_v29 = vld [vmem:[%s19781_s21 + $0xda0] ss:$16 sps:$4 sm:$0xff]  }
 0x433   : > { %5330 = vmatprep.subr.bf16.mxu1 %v17084_v30  ;;  %v17148_v30 = vld [vmem:[%s19781_s21 + $0xfa0] ss:$16 sps:$4 sm:$0xff]  }
 0x435   : > { %5290 = vmatpush1.bf16.msra.mxu0 %v17079_v5  ;;  %v17153_v5 = vld [vmem:[%s19781_s21 + $0xdc4] ss:$16 sps:$4 sm:$0xff]  }
 0x436   : > { %5331 = vmatpush1.bf16.msra.mxu1 %v17082_v6  ;;  %5291 = vmatprep.subr.bf16.mxu0 %v17087_v31  ;;  %v17156_v6 = vld [vmem:[%s19781_s21 + $0xfc4] ss:$16 sps:$4 sm:$0xff]   ;;  %v17151_v31 = vld [vmem:[%s19781_s21 + $0xdc0] ss:$16 sps:$4 sm:$0xff]  }
 0x437   : > { %5332 = vmatprep.subr.bf16.mxu1 %v17090_v32  ;;  %v17154_v32 = vld [vmem:[%s19781_s21 + $0xfc0] ss:$16 sps:$4 sm:$0xff]  }
 0x439   : > { %5292 = vmatpush1.bf16.msra.mxu0 %v17085_v34  ;;  %v17159_v34 = vld [vmem:[%s19781_s21 + $0xde4] ss:$16 sps:$4 sm:$0xff]  }
 0x43a   : > { %5333 = vmatpush1.bf16.msra.mxu1 %v17088_v35  ;;  %5293 = vmatprep.subr.bf16.mxu0 %v17093_v37  ;;  %v17162_v35 = vld [vmem:[%s19781_s21 + $0xfe4] ss:$16 sps:$4 sm:$0xff]   ;;  %v17157_v37 = vld [vmem:[%s19781_s21 + $0xde0] ss:$16 sps:$4 sm:$0xff]  }
 0x43b   : > { %5334 = vmatprep.subr.bf16.mxu1 %v17096_v38  ;;  %v17160_v38 = vld [vmem:[%s19781_s21 + $0xfe0] ss:$16 sps:$4 sm:$0xff]  }
 0x43d   : > { %5294 = vmatpush1.bf16.msra.mxu0 %v17091_v39  ;;  %v17169_v39 = vld [vmem:[%s19781_s21 + $0xc0c] ss:$16 sps:$4 sm:$0xff]  }
 0x43e   : > { %5335 = vmatpush1.bf16.msra.mxu1 %v17094_v40  ;;  %5295 = vmatprep.subr.bf16.mxu0 %v17099_v41  ;;  %v17172_v40 = vld [vmem:[%s19781_s21 + $0xe0c] ss:$16 sps:$4 sm:$0xff]   ;;  %v20489_v41 = vcombine.low %v20401_v62, %v20401_v62  ;;  %v17173_v62 = vld [vmem:[%s19781_s21 + $0xc28] ss:$16 sps:$4 sm:$0xff]  }
 0x43f   : > { %5336 = vmatprep.subr.bf16.mxu1 %v17102_v42  ;;  %v3417_v49 = vpop.f32.mrb[8].mxu0  ;;  %v20493_v42 = vcombine.low %v20403_v18, %v20403_v18  ;;  %v17176_v18 = vld [vmem:[%s19781_s21 + $0xe28] ss:$16 sps:$4 sm:$0xff]  }
 0x440   : > { %v3458_v50 = vpop.f32.mrb[8].mxu1  ;;  %v3418_v51 = vadd.f32 %v3417_v49, %v20279_v19  ;;  %v3419_v59 = vpop.f32.mrb[9].mxu0  ;;  %v17111_v19 = vld [vmem:[%s19781_s21 + $0xce4] ss:$16 sps:$4 sm:$0xff]   ;;  %v17181_v49 = vld [vmem:[%s19781_s21 + $0xc4c] ss:$16 sps:$4 sm:$0xff]  }
 0x441   : > { %v3460_v52 = vpop.f32.mrb[9].mxu1  ;;  %v3420_v60 = vadd.f32 %v3419_v59, %v20281_v22  ;;  %v3421_v63 = vpop.f32.mrb[10].mxu0  ;;  %5296 = vmatpush1.bf16.msra.mxu0 %v17097_v45  ;;  %v17109_v22 = vld [vmem:[%s19781_s21 + $0xce0] ss:$16 sps:$4 sm:$0xff]   ;;  %v17167_v45 = vld [vmem:[%s19781_s21 + $0xc08] ss:$16 sps:$4 sm:$0xff]  }
 0x442   : > { %v3462_v0 = vpop.f32.mrb[10].mxu1  ;;  %5337 = vmatpush1.bf16.msra.mxu1 %v17100_v46  ;;  %v20445_v1 = vadd.f32 %v3458_v50, %v3418_v51  ;;  %v3422_v2 = vpop.f32.mrb[11].mxu0  ;;  %5297 = vmatprep.subr.bf16.mxu0 %v17105_v47  ;;  %v17170_v46 = vld [vmem:[%s19781_s21 + $0xe08] ss:$16 sps:$4 sm:$0xff]   ;;  %v17175_v47 = vld [vmem:[%s19781_s21 + $0xc2c] ss:$16 sps:$4 sm:$0xff]  }
 0x443   : > { %v3463_v55 = vpop.f32.mrb[11].mxu1  ;;  %5338 = vmatprep.subr.bf16.mxu1 %v17108_v48  ;;  %v20449_v53 = vadd.f32 %v3460_v52, %v3420_v60  ;;  %v17178_v48 = vld [vmem:[%s19781_s21 + $0xe2c] ss:$16 sps:$4 sm:$0xff]   ;;  %v17188_v52 = vld [vmem:[%s19781_s21 + $0xe68] ss:$16 sps:$4 sm:$0xff]  }
 0x444   : > { %v17184_v50 = vld [vmem:[%s19781_s21 + $0xe4c] ss:$16 sps:$4 sm:$0xff]   ;;  %v17191_v63 = vld [vmem:[%s19781_s21 + $0xc88] ss:$16 sps:$4 sm:$0xff]  }
 0x445   : > { %5298 = vmatpush1.bf16.msra.mxu0 %v17103_v57  ;;  %v17179_v57 = vld [vmem:[%s19781_s21 + $0xc48] ss:$16 sps:$4 sm:$0xff]   ;;  %v17187_v51 = vld [vmem:[%s19781_s21 + $0xc6c] ss:$16 sps:$4 sm:$0xff]  }
 0x446   : > { %5339 = vmatpush1.bf16.msra.mxu1 %v17106_v58  ;;  %5299 = vmatprep.subr.bf16.mxu0 %v17111_v19  ;;  %v17182_v58 = vld [vmem:[%s19781_s21 + $0xe48] ss:$16 sps:$4 sm:$0xff]   ;;  %v17190_v59 = vld [vmem:[%s19781_s21 + $0xe6c] ss:$16 sps:$4 sm:$0xff]  }
 0x447   : > { %5340 = vmatprep.subr.bf16.mxu1 %v17114_v56  ;;  %v17196_v60 = vld [vmem:[%s19781_s21 + $0xe8c] ss:$16 sps:$4 sm:$0xff]   ;;  %v17194_v0 = vld [vmem:[%s19781_s21 + $0xe88] ss:$16 sps:$4 sm:$0xff]  }
 0x448   : > { %v17199_v2 = vld [vmem:[%s19781_s21 + $0xcac] ss:$16 sps:$4 sm:$0xff]   ;;  %v17197_v19 = vld [vmem:[%s19781_s21 + $0xca8] ss:$16 sps:$4 sm:$0xff]  }
 0x449   : > { %5300 = vmatpush1.bf16.msra.mxu0 %v17109_v22  ;;  %v17202_v55 = vld [vmem:[%s19781_s21 + $0xeac] ss:$16 sps:$4 sm:$0xff]   ;;  %v17200_v56 = vld [vmem:[%s19781_s21 + $0xea8] ss:$16 sps:$4 sm:$0xff]  }
 0x44a   : > { %5341 = vmatpush1.bf16.msra.mxu1 %v17112_v54  ;;  %5301 = vmatprep.subr.bf16.mxu0 %v17117_v3  ;;  %v17205_v22 = vld [vmem:[%s19781_s21 + $0xccc] ss:$16 sps:$4 sm:$0xff]  }
 0x44b   : > { %5342 = vmatprep.subr.bf16.mxu1 %v17120_v4  ;;  %v17208_v54 = vld [vmem:[%s19781_s21 + $0xecc] ss:$16 sps:$4 sm:$0xff]  }
 0x44d   : > { %5302 = vmatpush1.bf16.msra.mxu0 %v17115_v7  ;;  %v17203_v7 = vld [vmem:[%s19781_s21 + $0xcc8] ss:$16 sps:$4 sm:$0xff]  }
 0x44e   : > { %5343 = vmatpush1.bf16.msra.mxu1 %v17118_v8  ;;  %5303 = vmatprep.subr.bf16.mxu0 %v17123_v9  ;;  %v17206_v8 = vld [vmem:[%s19781_s21 + $0xec8] ss:$16 sps:$4 sm:$0xff]  }
 0x44f   : > { %5344 = vmatprep.subr.bf16.mxu1 %v17126_v10 }
 0x451   : > { %5304 = vmatpush1.bf16.msra.mxu0 %v17121_v43 }
 0x452   : > { %5345 = vmatpush1.bf16.msra.mxu1 %v17124_v44  ;;  %5305 = vmatprep.subr.bf16.mxu0 %v17129_v11 }
 0x453   : > { %5346 = vmatprep.subr.bf16.mxu1 %v17132_v12 }
 0x455   : > { %5306 = vmatpush1.bf16.msra.mxu0 %v17127_v13 }
 0x456   : > { %5347 = vmatpush1.bf16.msra.mxu1 %v17130_v14  ;;  %5307 = vmatprep.subr.bf16.mxu0 %v17135_v15 }
 0x457   : > { %5348 = vmatprep.subr.bf16.mxu1 %v17138_v16  ;;  %v17214_v16 = vld [vmem:[%s19781_s21 + $0xeec] ss:$16 sps:$4 sm:$0xff]  }
 0x459   : > { %5308 = vmatpush1.bf16.msra.mxu0 %v17133_v61 }
 0x45a   : > { %5349 = vmatpush1.bf16.msra.mxu1 %v17136_v17  ;;  %5309 = vmatprep.subr.bf16.mxu0 %v17141_v20  ;;  %v17212_v17 = vld [vmem:[%s19781_s21 + $0xee8] ss:$16 sps:$4 sm:$0xff]   ;;  %v17217_v20 = vld [vmem:[%s19781_s21 + $0xd0c] ss:$16 sps:$4 sm:$0xff]  }
 0x45b   : > { %5350 = vmatprep.subr.bf16.mxu1 %v17144_v21  ;;  %v17220_v21 = vld [vmem:[%s19781_s21 + $0xf0c] ss:$16 sps:$4 sm:$0xff]  }
 0x45d   : > { %5310 = vmatpush1.bf16.msra.mxu0 %v17139_v23  ;;  %v17215_v23 = vld [vmem:[%s19781_s21 + $0xd08] ss:$16 sps:$4 sm:$0xff]  }
 0x45e   : > { %5351 = vmatpush1.bf16.msra.mxu1 %v17142_v24  ;;  %5311 = vmatprep.subr.bf16.mxu0 %v17147_v27  ;;  %v17218_v24 = vld [vmem:[%s19781_s21 + $0xf08] ss:$16 sps:$4 sm:$0xff]   ;;  %v17223_v27 = vld [vmem:[%s19781_s21 + $0xd2c] ss:$16 sps:$4 sm:$0xff]  }
 0x45f   : > { %5352 = vmatprep.subr.bf16.mxu1 %v17150_v28  ;;  %v17226_v28 = vld [vmem:[%s19781_s21 + $0xf2c] ss:$16 sps:$4 sm:$0xff]  }
 0x461   : > { %5312 = vmatpush1.bf16.msra.mxu0 %v17145_v29  ;;  %v17221_v29 = vld [vmem:[%s19781_s21 + $0xd28] ss:$16 sps:$4 sm:$0xff]  }
 0x462   : > { %5353 = vmatpush1.bf16.msra.mxu1 %v17148_v30  ;;  %5313 = vmatprep.subr.bf16.mxu0 %v17153_v5  ;;  %v17224_v30 = vld [vmem:[%s19781_s21 + $0xf28] ss:$16 sps:$4 sm:$0xff]   ;;  %v17229_v5 = vld [vmem:[%s19781_s21 + $0xd4c] ss:$16 sps:$4 sm:$0xff]  }
 0x463   : > { %5354 = vmatprep.subr.bf16.mxu1 %v17156_v6  ;;  %v17232_v6 = vld [vmem:[%s19781_s21 + $0xf4c] ss:$16 sps:$4 sm:$0xff]  }
 0x465   : > { %5314 = vmatpush1.bf16.msra.mxu0 %v17151_v31  ;;  %v17227_v31 = vld [vmem:[%s19781_s21 + $0xd48] ss:$16 sps:$4 sm:$0xff]  }
 0x466   : > { %5355 = vmatpush1.bf16.msra.mxu1 %v17154_v32  ;;  %5315 = vmatprep.subr.bf16.mxu0 %v17159_v34  ;;  %v17230_v32 = vld [vmem:[%s19781_s21 + $0xf48] ss:$16 sps:$4 sm:$0xff]   ;;  %v17235_v34 = vld [vmem:[%s19781_s21 + $0xd6c] ss:$16 sps:$4 sm:$0xff]  }
 0x467   : > { %5356 = vmatprep.subr.bf16.mxu1 %v17162_v35  ;;  %v17238_v35 = vld [vmem:[%s19781_s21 + $0xf6c] ss:$16 sps:$4 sm:$0xff]  }
 0x469   : > { %5316 = vmatpush1.bf16.msra.mxu0 %v17157_v37  ;;  %v17233_v37 = vld [vmem:[%s19781_s21 + $0xd68] ss:$16 sps:$4 sm:$0xff]  }
 0x46a   : > { %5357 = vmatpush1.bf16.msra.mxu1 %v17160_v38  ;;  %5367 = vmatprep.subr.bf16.mxu0 %v17169_v39  ;;  %v17236_v38 = vld [vmem:[%s19781_s21 + $0xf68] ss:$16 sps:$4 sm:$0xff]   ;;  %v17241_v39 = vld [vmem:[%s19781_s21 + $0xd8c] ss:$16 sps:$4 sm:$0xff]  }
 0x46b   : > { %5408 = vmatprep.subr.bf16.mxu1 %v17172_v40  ;;  %v17244_v40 = vld [vmem:[%s19781_s21 + $0xf8c] ss:$16 sps:$4 sm:$0xff]  }
 0x46c   : > { %5318 = vmatmul.mubr.bf16.vlgmr.msra.gmra.mrb[24].mxu0 %v20489_v41 }
 0x46d   : > { %5359 = vmatmul.mubr.bf16.vlgmr.msra.gmra.mrb[24].mxu1 %v20493_v42  ;;  %5368 = vmatpush1.bf16.msra.mxu0 %v17167_v45  ;;  %v17239_v45 = vld [vmem:[%s19781_s21 + $0xd88] ss:$16 sps:$4 sm:$0xff]  }
 0x46e   : > { %5409 = vmatpush1.bf16.msra.mxu1 %v17170_v46  ;;  %5369 = vmatprep.subr.bf16.mxu0 %v17175_v47  ;;  %v17242_v46 = vld [vmem:[%s19781_s21 + $0xf88] ss:$16 sps:$4 sm:$0xff]   ;;  %v17247_v47 = vld [vmem:[%s19781_s21 + $0xdac] ss:$16 sps:$4 sm:$0xff]  }
 0x46f   : > { %5410 = vmatprep.subr.bf16.mxu1 %v17178_v48  ;;  %5399 = vmatprep.mubr.bf16.mxu0 %v20411_v25  ;;  %v17185_v25 = vld [vmem:[%s19781_s21 + $0xc68] ss:$16 sps:$4 sm:$0xff]   ;;  %v17250_v48 = vld [vmem:[%s19781_s21 + $0xfac] ss:$16 sps:$4 sm:$0xff]  }
 0x470   : > { %5440 = vmatprep.mubr.bf16.mxu1 %v20415_v26  ;;  %v17193_v26 = vld [vmem:[%s19781_s21 + $0xc8c] ss:$16 sps:$4 sm:$0xff]  }
 0x471   : > { %5370 = vmatpush1.bf16.msra.mxu0 %v17173_v62  ;;  %v17245_v62 = vld [vmem:[%s19781_s21 + $0xda8] ss:$16 sps:$4 sm:$0xff]  }
 0x472   : > { %5411 = vmatpush1.bf16.msra.mxu1 %v17176_v18  ;;  %5371 = vmatprep.subr.bf16.mxu0 %v17181_v49  ;;  %v17248_v18 = vld [vmem:[%s19781_s21 + $0xfa8] ss:$16 sps:$4 sm:$0xff]   ;;  %v17253_v49 = vld [vmem:[%s19781_s21 + $0xdcc] ss:$16 sps:$4 sm:$0xff]  }
 0x473   : > { %5412 = vmatprep.subr.bf16.mxu1 %v17184_v50  ;;  %v17256_v50 = vld [vmem:[%s19781_s21 + $0xfcc] ss:$16 sps:$4 sm:$0xff]  }
 0x475   : > { %5372 = vmatpush1.bf16.msra.mxu0 %v17179_v57  ;;  %v17251_v57 = vld [vmem:[%s19781_s21 + $0xdc8] ss:$16 sps:$4 sm:$0xff]  }
 0x476   : > { %5413 = vmatpush1.bf16.msra.mxu1 %v17182_v58  ;;  %5373 = vmatprep.subr.bf16.mxu0 %v17187_v51  ;;  %v17254_v58 = vld [vmem:[%s19781_s21 + $0xfc8] ss:$16 sps:$4 sm:$0xff]   ;;  %v17259_v51 = vld [vmem:[%s19781_s21 + $0xdec] ss:$16 sps:$4 sm:$0xff]  }
 0x477   : > { %5414 = vmatprep.subr.bf16.mxu1 %v17190_v59  ;;  %v17262_v59 = vld [vmem:[%s19781_s21 + $0xfec] ss:$16 sps:$4 sm:$0xff]  }
 0x479   : > { %5374 = vmatpush1.bf16.msra.mxu0 %v17185_v25  ;;  %v17257_v25 = vld [vmem:[%s19781_s21 + $0xde8] ss:$16 sps:$4 sm:$0xff]  }
 0x47a   : > { %5415 = vmatpush1.bf16.msra.mxu1 %v17188_v52  ;;  %5375 = vmatprep.subr.bf16.mxu0 %v17193_v26  ;;  %v17260_v52 = vld [vmem:[%s19781_s21 + $0xfe8] ss:$16 sps:$4 sm:$0xff]   ;;  %v17265_v26 = vld [vmem:[%s19781_s21 + $0x1004] ss:$16 sps:$4 sm:$0xff]  }
 0x47b   : > { %5416 = vmatprep.subr.bf16.mxu1 %v17196_v60  ;;  %v17268_v60 = vld [vmem:[%s19781_s21 + $0x1204] ss:$16 sps:$4 sm:$0xff]  }
 0x47d   : > { %5376 = vmatpush1.bf16.msra.mxu0 %v17191_v63  ;;  %v20569_v63 = vld [vmem:[#allocation2 + $0x40] sm:$0xff] }
 0x47e   : > { %5417 = vmatpush1.bf16.msra.mxu1 %v17194_v0  ;;  %5377 = vmatprep.subr.bf16.mxu0 %v17199_v2  ;;  %v20571_v0 = vld [vmem:[#allocation2 + $0x48] sm:$0xff] }
 0x47f   : > { %5418 = vmatprep.subr.bf16.mxu1 %v17202_v55  ;;  %v3499_v3 = vpop.f32.mrb[12].mxu0  ;;  %v17263_v2 = vld [vmem:[%s19781_s21 + $0x1000] ss:$16 sps:$4 sm:$0xff]  }
 0x480   : > { %v3540_v4 = vpop.f32.mrb[12].mxu1  ;;  %v3500_v9 = vadd.f32 %v3499_v3, %v20359_v33  ;;  %v3501_v10 = vpop.f32.mrb[13].mxu0  ;;  %v17211_v33 = vld [vmem:[%s19781_s21 + $0xcec] ss:$16 sps:$4 sm:$0xff]   ;;  %v17266_v55 = vld [vmem:[%s19781_s21 + $0x1200] ss:$16 sps:$4 sm:$0xff]  }
 0x481   : > { %v3542_v43 = vpop.f32.mrb[13].mxu1  ;;  %v3502_v44 = vadd.f32 %v3501_v10, %v20361_v36  ;;  %v3503_v11 = vpop.f32.mrb[14].mxu0  ;;  %5378 = vmatpush1.bf16.msra.mxu0 %v17197_v19  ;;  %v17209_v36 = vld [vmem:[%s19781_s21 + $0xce8] ss:$16 sps:$4 sm:$0xff]   ;;  %v17271_v19 = vld [vmem:[%s19781_s21 + $0x1024] ss:$16 sps:$4 sm:$0xff]  }
 0x482   : > { %v3544_v12 = vpop.f32.mrb[14].mxu1  ;;  %5419 = vmatpush1.bf16.msra.mxu1 %v17200_v56  ;;  %v20527_v13 = vadd.f32 %v3540_v4, %v3500_v9  ;;  %v3504_v14 = vpop.f32.mrb[15].mxu0  ;;  %5379 = vmatprep.subr.bf16.mxu0 %v17205_v22  ;;  %v17274_v56 = vld [vmem:[%s19781_s21 + $0x1224] ss:$16 sps:$4 sm:$0xff]   ;;  %v20579_v22 = vcombine.high %v20569_v63, %v20569_v63  ;;  %v17269_v3 = vld [vmem:[%s19781_s21 + $0x1020] ss:$16 sps:$4 sm:$0xff]  }
 0x483   : > { %v3545_v15 = vpop.f32.mrb[15].mxu1  ;;  %5420 = vmatprep.subr.bf16.mxu1 %v17208_v54  ;;  %v20531_v61 = vadd.f32 %v3542_v43, %v3502_v44  ;;  %v20583_v54 = vcombine.high %v20571_v0, %v20571_v0  ;;  %v17272_v4 = vld [vmem:[%s19781_s21 + $0x1220] ss:$16 sps:$4 sm:$0xff]   ;;  %v17283_v9 = vld [vmem:[%s19781_s21 + $0x1064] ss:$16 sps:$4 sm:$0xff]  }
 0x484   : > { %v17286_v10 = vld [vmem:[%s19781_s21 + $0x1264] ss:$16 sps:$4 sm:$0xff]   ;;  %v17281_v43 = vld [vmem:[%s19781_s21 + $0x1060] ss:$16 sps:$4 sm:$0xff]  }
 0x485   : > { %5380 = vmatpush1.bf16.msra.mxu0 %v17203_v7  ;;  %v17277_v7 = vld [vmem:[%s19781_s21 + $0x1044] ss:$16 sps:$4 sm:$0xff]   ;;  %v17284_v44 = vld [vmem:[%s19781_s21 + $0x1260] ss:$16 sps:$4 sm:$0xff]  }
 0x486   : > { %5421 = vmatpush1.bf16.msra.mxu1 %v17206_v8  ;;  %5381 = vmatprep.subr.bf16.mxu0 %v17211_v33  ;;  %v17280_v8 = vld [vmem:[%s19781_s21 + $0x1244] ss:$16 sps:$4 sm:$0xff]   ;;  %v17287_v14 = vld [vmem:[%s19781_s21 + $0x1080] ss:$16 sps:$4 sm:$0xff]  }
 0x487   : > { %5422 = vmatprep.subr.bf16.mxu1 %v17214_v16  ;;  %v17289_v11 = vld [vmem:[%s19781_s21 + $0x1084] ss:$16 sps:$4 sm:$0xff]   ;;  %v17290_v15 = vld [vmem:[%s19781_s21 + $0x1280] ss:$16 sps:$4 sm:$0xff]  }
 0x488   : > { %v17292_v12 = vld [vmem:[%s19781_s21 + $0x1284] ss:$16 sps:$4 sm:$0xff]  }
 0x489   : > { %5382 = vmatpush1.bf16.msra.mxu0 %v17209_v36  ;;  %v17295_v33 = vld [vmem:[%s19781_s21 + $0x10a4] ss:$16 sps:$4 sm:$0xff]   ;;  %v17293_v36 = vld [vmem:[%s19781_s21 + $0x10a0] ss:$16 sps:$4 sm:$0xff]  }
 0x48a   : > { %5423 = vmatpush1.bf16.msra.mxu1 %v17212_v17  ;;  %5383 = vmatprep.subr.bf16.mxu0 %v17217_v20  ;;  %v17298_v16 = vld [vmem:[%s19781_s21 + $0x12a4] ss:$16 sps:$4 sm:$0xff]   ;;  %v17296_v17 = vld [vmem:[%s19781_s21 + $0x12a0] ss:$16 sps:$4 sm:$0xff]  }
 0x48b   : > { %5424 = vmatprep.subr.bf16.mxu1 %v17220_v21  ;;  %v17301_v20 = vld [vmem:[%s19781_s21 + $0x10c4] ss:$16 sps:$4 sm:$0xff]  }
 0x48c   : > { %v17304_v21 = vld [vmem:[%s19781_s21 + $0x12c4] ss:$16 sps:$4 sm:$0xff]  }
 0x48d   : > { %5384 = vmatpush1.bf16.msra.mxu0 %v17215_v23 }
 0x48e   : > { %5425 = vmatpush1.bf16.msra.mxu1 %v17218_v24  ;;  %5385 = vmatprep.subr.bf16.mxu0 %v17223_v27  ;;  %v17299_v27 = vld [vmem:[%s19781_s21 + $0x10c0] ss:$16 sps:$4 sm:$0xff]  }
 0x48f   : > { %5426 = vmatprep.subr.bf16.mxu1 %v17226_v28  ;;  %v17302_v28 = vld [vmem:[%s19781_s21 + $0x12c0] ss:$16 sps:$4 sm:$0xff]  }
 0x491   : > { %5386 = vmatpush1.bf16.msra.mxu0 %v17221_v29 }
 0x492   : > { %5427 = vmatpush1.bf16.msra.mxu1 %v17224_v30  ;;  %5387 = vmatprep.subr.bf16.mxu0 %v17229_v5 }
 0x493   : > { %5428 = vmatprep.subr.bf16.mxu1 %v17232_v6 }
 0x495   : > { %5388 = vmatpush1.bf16.msra.mxu0 %v17227_v31 }
 0x496   : > { %5429 = vmatpush1.bf16.msra.mxu1 %v17230_v32  ;;  %5389 = vmatprep.subr.bf16.mxu0 %v17235_v34 }
 0x497   : > { %5430 = vmatprep.subr.bf16.mxu1 %v17238_v35 }
 0x499   : > { %5390 = vmatpush1.bf16.msra.mxu0 %v17233_v37 }
 0x49a   : > { %5431 = vmatpush1.bf16.msra.mxu1 %v17236_v38  ;;  %5391 = vmatprep.subr.bf16.mxu0 %v17241_v39  ;;  %v17307_v38 = vld [vmem:[%s19781_s21 + $0x10e4] ss:$16 sps:$4 sm:$0xff]  }
 0x49b   : > { %5432 = vmatprep.subr.bf16.mxu1 %v17244_v40  ;;  %v17310_v39 = vld [vmem:[%s19781_s21 + $0x12e4] ss:$16 sps:$4 sm:$0xff]  }
 0x49d   : > { %5392 = vmatpush1.bf16.msra.mxu0 %v17239_v45  ;;  %v17305_v45 = vld [vmem:[%s19781_s21 + $0x10e0] ss:$16 sps:$4 sm:$0xff]  }
 0x49e   : > { %5433 = vmatpush1.bf16.msra.mxu1 %v17242_v46  ;;  %5393 = vmatprep.subr.bf16.mxu0 %v17247_v47  ;;  %v17308_v46 = vld [vmem:[%s19781_s21 + $0x12e0] ss:$16 sps:$4 sm:$0xff]   ;;  %v17316_v47 = vld [vmem:[%s19781_s21 + $0x1304] ss:$16 sps:$4 sm:$0xff]  }
 0x49f   : > { %5434 = vmatprep.subr.bf16.mxu1 %v17250_v48  ;;  %v17311_v48 = vld [vmem:[%s19781_s21 + $0x1100] ss:$16 sps:$4 sm:$0xff]  }
 0x4a1   : > { %5394 = vmatpush1.bf16.msra.mxu0 %v17245_v62  ;;  %v17314_v62 = vld [vmem:[%s19781_s21 + $0x1300] ss:$16 sps:$4 sm:$0xff]  }
 0x4a2   : > { %5435 = vmatpush1.bf16.msra.mxu1 %v17248_v18  ;;  %5395 = vmatprep.subr.bf16.mxu0 %v17253_v49  ;;  %v17322_v18 = vld [vmem:[%s19781_s21 + $0x1324] ss:$16 sps:$4 sm:$0xff]   ;;  %v17317_v49 = vld [vmem:[%s19781_s21 + $0x1120] ss:$16 sps:$4 sm:$0xff]  }
 0x4a3   : > { %5436 = vmatprep.subr.bf16.mxu1 %v17256_v50  ;;  %v17320_v50 = vld [vmem:[%s19781_s21 + $0x1320] ss:$16 sps:$4 sm:$0xff]  }
 0x4a5   : > { %5396 = vmatpush1.bf16.msra.mxu0 %v17251_v57  ;;  %v17325_v57 = vld [vmem:[%s19781_s21 + $0x1144] ss:$16 sps:$4 sm:$0xff]  }
 0x4a6   : > { %5437 = vmatpush1.bf16.msra.mxu1 %v17254_v58  ;;  %5397 = vmatprep.subr.bf16.mxu0 %v17259_v51  ;;  %v17328_v58 = vld [vmem:[%s19781_s21 + $0x1344] ss:$16 sps:$4 sm:$0xff]   ;;  %v17323_v51 = vld [vmem:[%s19781_s21 + $0x1140] ss:$16 sps:$4 sm:$0xff]  }
 0x4a7   : > { %5438 = vmatprep.subr.bf16.mxu1 %v17262_v59  ;;  %v17326_v59 = vld [vmem:[%s19781_s21 + $0x1340] ss:$16 sps:$4 sm:$0xff]  }
 0x4a9   : > { %5398 = vmatpush1.bf16.msra.mxu0 %v17257_v25  ;;  %v17331_v25 = vld [vmem:[%s19781_s21 + $0x1164] ss:$16 sps:$4 sm:$0xff]  }
 0x4aa   : > { %5439 = vmatpush1.bf16.msra.mxu1 %v17260_v52  ;;  %6238 = vmatprep.subr.bf16.mxu0 %v17265_v26  ;;  %v17334_v52 = vld [vmem:[%s19781_s21 + $0x1364] ss:$16 sps:$4 sm:$0xff]   ;;  %v17329_v26 = vld [vmem:[%s19781_s21 + $0x1160] ss:$16 sps:$4 sm:$0xff]  }
 0x4ab   : > { %6279 = vmatprep.subr.bf16.mxu1 %v17268_v60  ;;  %v17332_v60 = vld [vmem:[%s19781_s21 + $0x1360] ss:$16 sps:$4 sm:$0xff]  }
 0x4ac   : > { %5400 = vmatmul.mubr.bf16.vlgmr.msra.gmra.mrb[28].mxu0 %v20489_v41  ;;  %v17275_v41 = vld [vmem:[%s19781_s21 + $0x1040] ss:$16 sps:$4 sm:$0xff]  }
 0x4ad   : > { %5441 = vmatmul.mubr.bf16.vlgmr.msra.gmra.mrb[28].mxu1 %v20493_v42  ;;  %6239 = vmatpush1.bf16.msra.mxu0 %v17263_v2  ;;  %v17278_v42 = vld [vmem:[%s19781_s21 + $0x1240] ss:$16 sps:$4 sm:$0xff]   ;;  %v17337_v2 = vld [vmem:[%s19781_s21 + $0x1184] ss:$16 sps:$4 sm:$0xff]  }
 0x4ae   : > { %6280 = vmatpush1.bf16.msra.mxu1 %v17266_v55  ;;  %6240 = vmatprep.subr.bf16.mxu0 %v17271_v19  ;;  %v17340_v55 = vld [vmem:[%s19781_s21 + $0x1384] ss:$16 sps:$4 sm:$0xff]   ;;  %v17335_v19 = vld [vmem:[%s19781_s21 + $0x1180] ss:$16 sps:$4 sm:$0xff]  }
 0x4af   : > { %6281 = vmatprep.subr.bf16.mxu1 %v17274_v56  ;;  %6270 = vmatprep.mubr.bf16.mxu0 %v20579_v22  ;;  %v17338_v56 = vld [vmem:[%s19781_s21 + $0x1380] ss:$16 sps:$4 sm:$0xff]  }
 0x4b0   : > { %6311 = vmatprep.mubr.bf16.mxu1 %v20583_v54 }
 0x4b1   : > { %6241 = vmatpush1.bf16.msra.mxu0 %v17269_v3  ;;  %v17343_v3 = vld [vmem:[%s19781_s21 + $0x11a4] ss:$16 sps:$4 sm:$0xff]  }
 0x4b2   : > { %6282 = vmatpush1.bf16.msra.mxu1 %v17272_v4  ;;  %6242 = vmatprep.subr.bf16.mxu0 %v17277_v7  ;;  %v17346_v4 = vld [vmem:[%s19781_s21 + $0x13a4] ss:$16 sps:$4 sm:$0xff]   ;;  %v17341_v7 = vld [vmem:[%s19781_s21 + $0x11a0] ss:$16 sps:$4 sm:$0xff]  }
 0x4b3   : > { %6283 = vmatprep.subr.bf16.mxu1 %v17280_v8  ;;  %v17344_v8 = vld [vmem:[%s19781_s21 + $0x13a0] ss:$16 sps:$4 sm:$0xff]  }
 0x4b5   : > { %6243 = vmatpush1.bf16.msra.mxu0 %v17275_v41  ;;  %v17349_v41 = vld [vmem:[%s19781_s21 + $0x11c4] ss:$16 sps:$4 sm:$0xff]  }
 0x4b6   : > { %6284 = vmatpush1.bf16.msra.mxu1 %v17278_v42  ;;  %6244 = vmatprep.subr.bf16.mxu0 %v17283_v9  ;;  %v17352_v42 = vld [vmem:[%s19781_s21 + $0x13c4] ss:$16 sps:$4 sm:$0xff]   ;;  %v17347_v9 = vld [vmem:[%s19781_s21 + $0x11c0] ss:$16 sps:$4 sm:$0xff]  }
 0x4b7   : > { %6285 = vmatprep.subr.bf16.mxu1 %v17286_v10  ;;  %v17350_v10 = vld [vmem:[%s19781_s21 + $0x13c0] ss:$16 sps:$4 sm:$0xff]  }
 0x4b9   : > { %6245 = vmatpush1.bf16.msra.mxu0 %v17281_v43  ;;  %v17355_v43 = vld [vmem:[%s19781_s21 + $0x11e4] ss:$16 sps:$4 sm:$0xff]  }
 0x4ba   : > { %6286 = vmatpush1.bf16.msra.mxu1 %v17284_v44  ;;  %6246 = vmatprep.subr.bf16.mxu0 %v17289_v11  ;;  %v17358_v44 = vld [vmem:[%s19781_s21 + $0x13e4] ss:$16 sps:$4 sm:$0xff]   ;;  %v17353_v11 = vld [vmem:[%s19781_s21 + $0x11e0] ss:$16 sps:$4 sm:$0xff]  }
 0x4bb   : > { %6287 = vmatprep.subr.bf16.mxu1 %v17292_v12  ;;  %v17356_v12 = vld [vmem:[%s19781_s21 + $0x13e0] ss:$16 sps:$4 sm:$0xff]  }
 0x4bd   : > { %6247 = vmatpush1.bf16.msra.mxu0 %v17287_v14  ;;  %v17365_v14 = vld [vmem:[%s19781_s21 + $0x100c] ss:$16 sps:$4 sm:$0xff]  }
 0x4be   : > { %6288 = vmatpush1.bf16.msra.mxu1 %v17290_v15  ;;  %6248 = vmatprep.subr.bf16.mxu0 %v17295_v33  ;;  %v17368_v15 = vld [vmem:[%s19781_s21 + $0x120c] ss:$16 sps:$4 sm:$0xff]   ;;  %v20657_v33 = vcombine.low %v20569_v63, %v20569_v63  ;;  %v17369_v63 = vld [vmem:[%s19781_s21 + $0x1028] ss:$16 sps:$4 sm:$0xff]  }
 0x4bf   : > { %6289 = vmatprep.subr.bf16.mxu1 %v17298_v16  ;;  %v4366_v23 = vpop.f32.mrb[16].mxu0  ;;  %v20661_v16 = vcombine.low %v20571_v0, %v20571_v0  ;;  %v17372_v0 = vld [vmem:[%s19781_s21 + $0x1228] ss:$16 sps:$4 sm:$0xff]  }
 0x4c0   : > { %v4407_v24 = vpop.f32.mrb[16].mxu1  ;;  %v4368_v30 = vpop.f32.mrb[17].mxu0 }
 0x4c1   : > { %v4408_v29 = vadd.f32 %v4407_v24, %v4366_v23  ;;  %v4409_v5 = vpop.f32.mrb[17].mxu1  ;;  %v4370_v31 = vpop.f32.mrb[18].mxu0  ;;  %6249 = vmatpush1.bf16.msra.mxu0 %v17293_v36  ;;  %v17363_v36 = vld [vmem:[%s19781_s21 + $0x1008] ss:$16 sps:$4 sm:$0xff]   ;;  %v17377_v23 = vld [vmem:[%s19781_s21 + $0x104c] ss:$16 sps:$4 sm:$0xff]  }
 0x4c2   : > { %v4410_v6 = vadd.f32 %v4409_v5, %v4368_v30  ;;  %v4411_v32 = vpop.f32.mrb[18].mxu1  ;;  %6290 = vmatpush1.bf16.msra.mxu1 %v17296_v17  ;;  %v4371_v35 = vpop.f32.mrb[19].mxu0  ;;  %6250 = vmatprep.subr.bf16.mxu0 %v17301_v20  ;;  %v17366_v17 = vld [vmem:[%s19781_s21 + $0x1208] ss:$16 sps:$4 sm:$0xff]   ;;  %v17371_v20 = vld [vmem:[%s19781_s21 + $0x102c] ss:$16 sps:$4 sm:$0xff]  }
 0x4c3   : > { %v20612_v34 = vadd.f32 %v4408_v29, %v20445_v1  ;;  %v4412_v37 = vpop.f32.mrb[19].mxu1  ;;  %6291 = vmatprep.subr.bf16.mxu1 %v17304_v21  ;;  %v17313_v1 = vld [vmem:[%s19781_s21 + $0x1104] ss:$16 sps:$4 sm:$0xff]   ;;  %v17374_v21 = vld [vmem:[%s19781_s21 + $0x122c] ss:$16 sps:$4 sm:$0xff]  }
 0x4c4   : > { %v20617_v40 = vadd.f32 %v4410_v6, %v20449_v53  ;;  %v17319_v53 = vld [vmem:[%s19781_s21 + $0x1124] ss:$16 sps:$4 sm:$0xff]   ;;  %v17380_v24 = vld [vmem:[%s19781_s21 + $0x124c] ss:$16 sps:$4 sm:$0xff]   ;;  %v17381_v5 = vld [vmem:[%s19781_s21 + $0x1068] ss:$16 sps:$4 sm:$0xff]  }
 0x4c5   : > { %6251 = vmatpush1.bf16.msra.mxu0 %v17299_v27  ;;  %v17375_v27 = vld [vmem:[%s19781_s21 + $0x1048] ss:$16 sps:$4 sm:$0xff]   ;;  %v17383_v29 = vld [vmem:[%s19781_s21 + $0x106c] ss:$16 sps:$4 sm:$0xff]  }
 0x4c6   : > { %6292 = vmatpush1.bf16.msra.mxu1 %v17302_v28  ;;  %6252 = vmatprep.subr.bf16.mxu0 %v17307_v38  ;;  %v17378_v28 = vld [vmem:[%s19781_s21 + $0x1248] ss:$16 sps:$4 sm:$0xff]   ;;  %v17386_v30 = vld [vmem:[%s19781_s21 + $0x126c] ss:$16 sps:$4 sm:$0xff]  }
 0x4c7   : > { %6293 = vmatprep.subr.bf16.mxu1 %v17310_v39  ;;  %v17392_v6 = vld [vmem:[%s19781_s21 + $0x128c] ss:$16 sps:$4 sm:$0xff]   ;;  %v17387_v31 = vld [vmem:[%s19781_s21 + $0x1088] ss:$16 sps:$4 sm:$0xff]  }
 0x4c8   : > { %v17390_v32 = vld [vmem:[%s19781_s21 + $0x1288] ss:$16 sps:$4 sm:$0xff]   ;;  %v17395_v35 = vld [vmem:[%s19781_s21 + $0x10ac] ss:$16 sps:$4 sm:$0xff]  }
 0x4c9   : > { %6253 = vmatpush1.bf16.msra.mxu0 %v17305_v45  ;;  %v17398_v37 = vld [vmem:[%s19781_s21 + $0x12ac] ss:$16 sps:$4 sm:$0xff]   ;;  %v17393_v38 = vld [vmem:[%s19781_s21 + $0x10a8] ss:$16 sps:$4 sm:$0xff]  }
 0x4ca   : > { %6294 = vmatpush1.bf16.msra.mxu1 %v17308_v46  ;;  %6254 = vmatprep.subr.bf16.mxu0 %v17313_v1  ;;  %v17396_v39 = vld [vmem:[%s19781_s21 + $0x12a8] ss:$16 sps:$4 sm:$0xff]   ;;  %v17401_v45 = vld [vmem:[%s19781_s21 + $0x10cc] ss:$16 sps:$4 sm:$0xff]  }
 0x4cb   : > { %6295 = vmatprep.subr.bf16.mxu1 %v17316_v47  ;;  %v17404_v46 = vld [vmem:[%s19781_s21 + $0x12cc] ss:$16 sps:$4 sm:$0xff]  }
 0x4cd   : > { %6255 = vmatpush1.bf16.msra.mxu0 %v17311_v48 }
 0x4ce   : > { %6296 = vmatpush1.bf16.msra.mxu1 %v17314_v62  ;;  %6256 = vmatprep.subr.bf16.mxu0 %v17319_v53 }
 0x4cf   : > { %6297 = vmatprep.subr.bf16.mxu1 %v17322_v18 }
 0x4d1   : > { %6257 = vmatpush1.bf16.msra.mxu0 %v17317_v49 }
 0x4d2   : > { %6298 = vmatpush1.bf16.msra.mxu1 %v17320_v50  ;;  %6258 = vmatprep.subr.bf16.mxu0 %v17325_v57  ;;  %v17399_v57 = vld [vmem:[%s19781_s21 + $0x10c8] ss:$16 sps:$4 sm:$0xff]  }
 0x4d3   : > { %6299 = vmatprep.subr.bf16.mxu1 %v17328_v58  ;;  %v17402_v58 = vld [vmem:[%s19781_s21 + $0x12c8] ss:$16 sps:$4 sm:$0xff]  }
 0x4d5   : > { %6259 = vmatpush1.bf16.msra.mxu0 %v17323_v51 }
 0x4d6   : > { %6300 = vmatpush1.bf16.msra.mxu1 %v17326_v59  ;;  %6260 = vmatprep.subr.bf16.mxu0 %v17331_v25 }
 0x4d7   : > { %6301 = vmatprep.subr.bf16.mxu1 %v17334_v52  ;;  %v17407_v52 = vld [vmem:[%s19781_s21 + $0x10ec] ss:$16 sps:$4 sm:$0xff]  }
 0x4d9   : > { %6261 = vmatpush1.bf16.msra.mxu0 %v17329_v26  ;;  %v17410_v26 = vld [vmem:[%s19781_s21 + $0x12ec] ss:$16 sps:$4 sm:$0xff]  }
 0x4da   : > { %6302 = vmatpush1.bf16.msra.mxu1 %v17332_v60  ;;  %6262 = vmatprep.subr.bf16.mxu0 %v17337_v2  ;;  %v17405_v2 = vld [vmem:[%s19781_s21 + $0x10e8] ss:$16 sps:$4 sm:$0xff]  }
 0x4db   : > { %6303 = vmatprep.subr.bf16.mxu1 %v17340_v55  ;;  %v17408_v55 = vld [vmem:[%s19781_s21 + $0x12e8] ss:$16 sps:$4 sm:$0xff]  }
 0x4dd   : > { %6263 = vmatpush1.bf16.msra.mxu0 %v17335_v19  ;;  %v17416_v19 = vld [vmem:[%s19781_s21 + $0x130c] ss:$16 sps:$4 sm:$0xff]  }
 0x4de   : > { %6304 = vmatpush1.bf16.msra.mxu1 %v17338_v56  ;;  %6264 = vmatprep.subr.bf16.mxu0 %v17343_v3  ;;  %v17411_v56 = vld [vmem:[%s19781_s21 + $0x1108] ss:$16 sps:$4 sm:$0xff]  }
 0x4df   : > { %6305 = vmatprep.subr.bf16.mxu1 %v17346_v4  ;;  %v17414_v3 = vld [vmem:[%s19781_s21 + $0x1308] ss:$16 sps:$4 sm:$0xff]   ;;  %v17422_v4 = vld [vmem:[%s19781_s21 + $0x132c] ss:$16 sps:$4 sm:$0xff]  }
 0x4e1   : > { %6265 = vmatpush1.bf16.msra.mxu0 %v17341_v7  ;;  %v17417_v7 = vld [vmem:[%s19781_s21 + $0x1128] ss:$16 sps:$4 sm:$0xff]  }
 0x4e2   : > { %6306 = vmatpush1.bf16.msra.mxu1 %v17344_v8  ;;  %6266 = vmatprep.subr.bf16.mxu0 %v17349_v41  ;;  %v17420_v8 = vld [vmem:[%s19781_s21 + $0x1328] ss:$16 sps:$4 sm:$0xff]   ;;  %v17425_v41 = vld [vmem:[%s19781_s21 + $0x114c] ss:$16 sps:$4 sm:$0xff]  }
 0x4e3   : > { %6307 = vmatprep.subr.bf16.mxu1 %v17352_v42  ;;  %v17428_v42 = vld [vmem:[%s19781_s21 + $0x134c] ss:$16 sps:$4 sm:$0xff]  }
 0x4e5   : > { %6267 = vmatpush1.bf16.msra.mxu0 %v17347_v9  ;;  %v17423_v9 = vld [vmem:[%s19781_s21 + $0x1148] ss:$16 sps:$4 sm:$0xff]  }
 0x4e6   : > { %6308 = vmatpush1.bf16.msra.mxu1 %v17350_v10  ;;  %6268 = vmatprep.subr.bf16.mxu0 %v17355_v43  ;;  %v17426_v10 = vld [vmem:[%s19781_s21 + $0x1348] ss:$16 sps:$4 sm:$0xff]   ;;  %v17431_v43 = vld [vmem:[%s19781_s21 + $0x116c] ss:$16 sps:$4 sm:$0xff]  }
 0x4e7   : > { %6309 = vmatprep.subr.bf16.mxu1 %v17358_v44  ;;  %v17434_v44 = vld [vmem:[%s19781_s21 + $0x136c] ss:$16 sps:$4 sm:$0xff]  }
 0x4e9   : > { %6269 = vmatpush1.bf16.msra.mxu0 %v17353_v11  ;;  %v17429_v11 = vld [vmem:[%s19781_s21 + $0x1168] ss:$16 sps:$4 sm:$0xff]  }
 0x4ea   : > { %6310 = vmatpush1.bf16.msra.mxu1 %v17356_v12  ;;  %6320 = vmatprep.subr.bf16.mxu0 %v17365_v14  ;;  %v17432_v12 = vld [vmem:[%s19781_s21 + $0x1368] ss:$16 sps:$4 sm:$0xff]   ;;  %v17437_v14 = vld [vmem:[%s19781_s21 + $0x118c] ss:$16 sps:$4 sm:$0xff]  }
 0x4eb   : > { %6361 = vmatprep.subr.bf16.mxu1 %v17368_v15  ;;  %v17440_v15 = vld [vmem:[%s19781_s21 + $0x138c] ss:$16 sps:$4 sm:$0xff]  }
 0x4ec   : > { %6271 = vmatmul.mubr.bf16.vlgmr.msra.gmra.mrb[32].mxu0 %v20657_v33 }
 0x4ed   : > { %6312 = vmatmul.mubr.bf16.vlgmr.msra.gmra.mrb[32].mxu1 %v20661_v16  ;;  %6321 = vmatpush1.bf16.msra.mxu0 %v17363_v36  ;;  %v17435_v36 = vld [vmem:[%s19781_s21 + $0x1188] ss:$16 sps:$4 sm:$0xff]  }
 0x4ee   : > { %6362 = vmatpush1.bf16.msra.mxu1 %v17366_v17  ;;  %6322 = vmatprep.subr.bf16.mxu0 %v17371_v20  ;;  %v17438_v17 = vld [vmem:[%s19781_s21 + $0x1388] ss:$16 sps:$4 sm:$0xff]   ;;  %v17443_v20 = vld [vmem:[%s19781_s21 + $0x11ac] ss:$16 sps:$4 sm:$0xff]  }
 0x4ef   : > { %6363 = vmatprep.subr.bf16.mxu1 %v17374_v21  ;;  %6352 = vmatprep.mubr.bf16.mxu0 %v20579_v22  ;;  %v17384_v22 = vld [vmem:[%s19781_s21 + $0x1268] ss:$16 sps:$4 sm:$0xff]   ;;  %v17446_v21 = vld [vmem:[%s19781_s21 + $0x13ac] ss:$16 sps:$4 sm:$0xff]  }
 0x4f0   : > { %6393 = vmatprep.mubr.bf16.mxu1 %v20583_v54  ;;  %v17389_v54 = vld [vmem:[%s19781_s21 + $0x108c] ss:$16 sps:$4 sm:$0xff]  }
 0x4f1   : > { %6323 = vmatpush1.bf16.msra.mxu0 %v17369_v63  ;;  %v17441_v63 = vld [vmem:[%s19781_s21 + $0x11a8] ss:$16 sps:$4 sm:$0xff]  }
 0x4f2   : > { %6364 = vmatpush1.bf16.msra.mxu1 %v17372_v0  ;;  %6324 = vmatprep.subr.bf16.mxu0 %v17377_v23  ;;  %v17444_v0 = vld [vmem:[%s19781_s21 + $0x13a8] ss:$16 sps:$4 sm:$0xff]   ;;  %v17449_v23 = vld [vmem:[%s19781_s21 + $0x11cc] ss:$16 sps:$4 sm:$0xff]  }
 0x4f3   : > { %6365 = vmatprep.subr.bf16.mxu1 %v17380_v24  ;;  %v17452_v24 = vld [vmem:[%s19781_s21 + $0x13cc] ss:$16 sps:$4 sm:$0xff]  }
 0x4f5   : > { %6325 = vmatpush1.bf16.msra.mxu0 %v17375_v27  ;;  %v17447_v27 = vld [vmem:[%s19781_s21 + $0x11c8] ss:$16 sps:$4 sm:$0xff]  }
 0x4f6   : > { %6366 = vmatpush1.bf16.msra.mxu1 %v17378_v28  ;;  %6326 = vmatprep.subr.bf16.mxu0 %v17383_v29  ;;  %v17450_v28 = vld [vmem:[%s19781_s21 + $0x13c8] ss:$16 sps:$4 sm:$0xff]   ;;  %v17455_v29 = vld [vmem:[%s19781_s21 + $0x11ec] ss:$16 sps:$4 sm:$0xff]  }
 0x4f7   : > { %6367 = vmatprep.subr.bf16.mxu1 %v17386_v30  ;;  %v17458_v30 = vld [vmem:[%s19781_s21 + $0x13ec] ss:$16 sps:$4 sm:$0xff]  }
 0x4f9   : > { %6327 = vmatpush1.bf16.msra.mxu0 %v17381_v5  ;;  %v17453_v5 = vld [vmem:[%s19781_s21 + $0x11e8] ss:$16 sps:$4 sm:$0xff]  }
 0x4fa   : > { %6368 = vmatpush1.bf16.msra.mxu1 %v17384_v22  ;;  %6328 = vmatprep.subr.bf16.mxu0 %v17389_v54  ;;  %v17456_v22 = vld [vmem:[%s19781_s21 + $0x13e8] ss:$16 sps:$4 sm:$0xff]   ;;  %v17461_v54 = vld [vmem:[%s19781_s21 + $0x1404] ss:$16 sps:$4 sm:$0xff]  }
 0x4fb   : > { %6369 = vmatprep.subr.bf16.mxu1 %v17392_v6  ;;  %v17464_v6 = vld [vmem:[%s19781_s21 + $0x1604] ss:$16 sps:$4 sm:$0xff]  }
 0x4fd   : > { %6329 = vmatpush1.bf16.msra.mxu0 %v17387_v31  ;;  %v20737_v31 = vld [vmem:[#allocation2 + $0x50] sm:$0xff] }
 0x4fe   : > { %6370 = vmatpush1.bf16.msra.mxu1 %v17390_v32  ;;  %6330 = vmatprep.subr.bf16.mxu0 %v17395_v35  ;;  %v20739_v32 = vld [vmem:[#allocation2 + $0x58] sm:$0xff] }
 0x4ff   : > { %6371 = vmatprep.subr.bf16.mxu1 %v17398_v37  ;;  %v4448_v1 = vpop.f32.mrb[20].mxu0  ;;  %v17459_v35 = vld [vmem:[%s19781_s21 + $0x1400] ss:$16 sps:$4 sm:$0xff]  }
 0x500   : > { %v4489_v47 = vpop.f32.mrb[20].mxu1  ;;  %v4450_v62 = vpop.f32.mrb[21].mxu0  ;;  %v17462_v37 = vld [vmem:[%s19781_s21 + $0x1600] ss:$16 sps:$4 sm:$0xff]  }
 0x501   : > { %v4490_v48 = vadd.f32 %v4489_v47, %v4448_v1  ;;  %v4491_v53 = vpop.f32.mrb[21].mxu1  ;;  %v4452_v49 = vpop.f32.mrb[22].mxu0  ;;  %6331 = vmatpush1.bf16.msra.mxu0 %v17393_v38  ;;  %v17467_v38 = vld [vmem:[%s19781_s21 + $0x1424] ss:$16 sps:$4 sm:$0xff]   ;;  %v17465_v1 = vld [vmem:[%s19781_s21 + $0x1420] ss:$16 sps:$4 sm:$0xff]  }
 0x502   : > { %v4492_v18 = vadd.f32 %v4491_v53, %v4450_v62  ;;  %v4493_v50 = vpop.f32.mrb[22].mxu1  ;;  %6372 = vmatpush1.bf16.msra.mxu1 %v17396_v39  ;;  %v4453_v59 = vpop.f32.mrb[23].mxu0  ;;  %6332 = vmatprep.subr.bf16.mxu0 %v17401_v45  ;;  %v17470_v39 = vld [vmem:[%s19781_s21 + $0x1624] ss:$16 sps:$4 sm:$0xff]   ;;  %v20747_v45 = vcombine.high %v20737_v31, %v20737_v31  ;;  %v17468_v47 = vld [vmem:[%s19781_s21 + $0x1620] ss:$16 sps:$4 sm:$0xff]  }
 0x503   : > { %v20694_v51 = vadd.f32 %v4490_v48, %v20527_v13  ;;  %v4494_v25 = vpop.f32.mrb[23].mxu1  ;;  %6373 = vmatprep.subr.bf16.mxu1 %v17404_v46  ;;  %v17413_v13 = vld [vmem:[%s19781_s21 + $0x110c] ss:$16 sps:$4 sm:$0xff]   ;;  %v20751_v46 = vcombine.high %v20739_v32, %v20739_v32  ;;  %v17473_v48 = vld [vmem:[%s19781_s21 + $0x1444] ss:$16 sps:$4 sm:$0xff]  }
 0x504   : > { %v20699_v60 = vadd.f32 %v4492_v18, %v20531_v61  ;;  %v17419_v61 = vld [vmem:[%s19781_s21 + $0x112c] ss:$16 sps:$4 sm:$0xff]   ;;  %v17476_v62 = vld [vmem:[%s19781_s21 + $0x1644] ss:$16 sps:$4 sm:$0xff]   ;;  %v17477_v49 = vld [vmem:[%s19781_s21 + $0x1460] ss:$16 sps:$4 sm:$0xff]  }
 0x505   : > { %6333 = vmatpush1.bf16.msra.mxu0 %v17399_v57  ;;  %v17479_v53 = vld [vmem:[%s19781_s21 + $0x1464] ss:$16 sps:$4 sm:$0xff]   ;;  %v17480_v50 = vld [vmem:[%s19781_s21 + $0x1660] ss:$16 sps:$4 sm:$0xff]  }
 0x506   : > { %6374 = vmatpush1.bf16.msra.mxu1 %v17402_v58  ;;  %6334 = vmatprep.subr.bf16.mxu0 %v17407_v52  ;;  %v17482_v18 = vld [vmem:[%s19781_s21 + $0x1664] ss:$16 sps:$4 sm:$0xff]   ;;  %v17483_v59 = vld [vmem:[%s19781_s21 + $0x1480] ss:$16 sps:$4 sm:$0xff]  }
 0x507   : > { %6375 = vmatprep.subr.bf16.mxu1 %v17410_v26  ;;  %v17485_v57 = vld [vmem:[%s19781_s21 + $0x1484] ss:$16 sps:$4 sm:$0xff]   ;;  %v17486_v25 = vld [vmem:[%s19781_s21 + $0x1680] ss:$16 sps:$4 sm:$0xff]  }
 0x508   : > { %v17488_v58 = vld [vmem:[%s19781_s21 + $0x1684] ss:$16 sps:$4 sm:$0xff]  }
 0x509   : > { %6335 = vmatpush1.bf16.msra.mxu0 %v17405_v2  ;;  %v17491_v52 = vld [vmem:[%s19781_s21 + $0x14a4] ss:$16 sps:$4 sm:$0xff]   ;;  %v17489_v2 = vld [vmem:[%s19781_s21 + $0x14a0] ss:$16 sps:$4 sm:$0xff]  }
 0x50a   : > { %6376 = vmatpush1.bf16.msra.mxu1 %v17408_v55  ;;  %6336 = vmatprep.subr.bf16.mxu0 %v17413_v13  ;;  %v17494_v26 = vld [vmem:[%s19781_s21 + $0x16a4] ss:$16 sps:$4 sm:$0xff]   ;;  %v17492_v55 = vld [vmem:[%s19781_s21 + $0x16a0] ss:$16 sps:$4 sm:$0xff]  }
 0x50b   : > { %6377 = vmatprep.subr.bf16.mxu1 %v17416_v19  ;;  %v17497_v13 = vld [vmem:[%s19781_s21 + $0x14c4] ss:$16 sps:$4 sm:$0xff]  }
 0x50c   : > { %v17500_v19 = vld [vmem:[%s19781_s21 + $0x16c4] ss:$16 sps:$4 sm:$0xff]  }
 0x50d   : > { %6337 = vmatpush1.bf16.msra.mxu0 %v17411_v56 }
 0x50e   : > { %6378 = vmatpush1.bf16.msra.mxu1 %v17414_v3  ;;  %6338 = vmatprep.subr.bf16.mxu0 %v17419_v61 }
 0x50f   : > { %6379 = vmatprep.subr.bf16.mxu1 %v17422_v4 }
 0x511   : > { %6339 = vmatpush1.bf16.msra.mxu0 %v17417_v7 }
 0x512   : > { %6380 = vmatpush1.bf16.msra.mxu1 %v17420_v8  ;;  %6340 = vmatprep.subr.bf16.mxu0 %v17425_v41 }
 0x513   : > { %6381 = vmatprep.subr.bf16.mxu1 %v17428_v42 }
 0x515   : > { %6341 = vmatpush1.bf16.msra.mxu0 %v17423_v9  ;;  %v17495_v9 = vld [vmem:[%s19781_s21 + $0x14c0] ss:$16 sps:$4 sm:$0xff]  }
 0x516   : > { %6382 = vmatpush1.bf16.msra.mxu1 %v17426_v10  ;;  %6342 = vmatprep.subr.bf16.mxu0 %v17431_v43  ;;  %v17498_v10 = vld [vmem:[%s19781_s21 + $0x16c0] ss:$16 sps:$4 sm:$0xff]  }
 0x517   : > { %6383 = vmatprep.subr.bf16.mxu1 %v17434_v44 }
 0x519   : > { %6343 = vmatpush1.bf16.msra.mxu0 %v17429_v11 }
 0x51a   : > { %6384 = vmatpush1.bf16.msra.mxu1 %v17432_v12  ;;  %6344 = vmatprep.subr.bf16.mxu0 %v17437_v14  ;;  %v17503_v12 = vld [vmem:[%s19781_s21 + $0x14e4] ss:$16 sps:$4 sm:$0xff]  }
 0x51b   : > { %6385 = vmatprep.subr.bf16.mxu1 %v17440_v15  ;;  %v17506_v14 = vld [vmem:[%s19781_s21 + $0x16e4] ss:$16 sps:$4 sm:$0xff]  }
 0x51d   : > { %6345 = vmatpush1.bf16.msra.mxu0 %v17435_v36  ;;  %v17501_v36 = vld [vmem:[%s19781_s21 + $0x14e0] ss:$16 sps:$4 sm:$0xff]  }
 0x51e   : > { %6386 = vmatpush1.bf16.msra.mxu1 %v17438_v17  ;;  %6346 = vmatprep.subr.bf16.mxu0 %v17443_v20  ;;  %v17504_v17 = vld [vmem:[%s19781_s21 + $0x16e0] ss:$16 sps:$4 sm:$0xff]   ;;  %v17512_v20 = vld [vmem:[%s19781_s21 + $0x1704] ss:$16 sps:$4 sm:$0xff]  }
 0x51f   : > { %6387 = vmatprep.subr.bf16.mxu1 %v17446_v21  ;;  %v17507_v21 = vld [vmem:[%s19781_s21 + $0x1500] ss:$16 sps:$4 sm:$0xff]  }
 0x521   : > { %6347 = vmatpush1.bf16.msra.mxu0 %v17441_v63  ;;  %v17510_v63 = vld [vmem:[%s19781_s21 + $0x1700] ss:$16 sps:$4 sm:$0xff]  }
 0x522   : > { %6388 = vmatpush1.bf16.msra.mxu1 %v17444_v0  ;;  %6348 = vmatprep.subr.bf16.mxu0 %v17449_v23  ;;  %v17518_v0 = vld [vmem:[%s19781_s21 + $0x1724] ss:$16 sps:$4 sm:$0xff]   ;;  %v17513_v23 = vld [vmem:[%s19781_s21 + $0x1520] ss:$16 sps:$4 sm:$0xff]  }
 0x523   : > { %6389 = vmatprep.subr.bf16.mxu1 %v17452_v24  ;;  %v17516_v24 = vld [vmem:[%s19781_s21 + $0x1720] ss:$16 sps:$4 sm:$0xff]  }
 0x525   : > { %6349 = vmatpush1.bf16.msra.mxu0 %v17447_v27  ;;  %v17521_v27 = vld [vmem:[%s19781_s21 + $0x1544] ss:$16 sps:$4 sm:$0xff]  }
 0x526   : > { %6390 = vmatpush1.bf16.msra.mxu1 %v17450_v28  ;;  %6350 = vmatprep.subr.bf16.mxu0 %v17455_v29  ;;  %v17524_v28 = vld [vmem:[%s19781_s21 + $0x1744] ss:$16 sps:$4 sm:$0xff]   ;;  %v17519_v29 = vld [vmem:[%s19781_s21 + $0x1540] ss:$16 sps:$4 sm:$0xff]  }
 0x527   : > { %6391 = vmatprep.subr.bf16.mxu1 %v17458_v30  ;;  %v17522_v30 = vld [vmem:[%s19781_s21 + $0x1740] ss:$16 sps:$4 sm:$0xff]  }
 0x529   : > { %6351 = vmatpush1.bf16.msra.mxu0 %v17453_v5  ;;  %v17527_v5 = vld [vmem:[%s19781_s21 + $0x1564] ss:$16 sps:$4 sm:$0xff]  }
 0x52a   : > { %6392 = vmatpush1.bf16.msra.mxu1 %v17456_v22  ;;  %7191 = vmatprep.subr.bf16.mxu0 %v17461_v54  ;;  %v17530_v22 = vld [vmem:[%s19781_s21 + $0x1764] ss:$16 sps:$4 sm:$0xff]   ;;  %v17525_v54 = vld [vmem:[%s19781_s21 + $0x1560] ss:$16 sps:$4 sm:$0xff]  }
 0x52b   : > { %7232 = vmatprep.subr.bf16.mxu1 %v17464_v6  ;;  %v17528_v6 = vld [vmem:[%s19781_s21 + $0x1760] ss:$16 sps:$4 sm:$0xff]  }
 0x52c   : > { %6353 = vmatmul.mubr.bf16.vlgmr.msra.gmra.mrb[36].mxu0 %v20657_v33  ;;  %v17471_v33 = vld [vmem:[%s19781_s21 + $0x1440] ss:$16 sps:$4 sm:$0xff]  }
 0x52d   : > { %6394 = vmatmul.mubr.bf16.vlgmr.msra.gmra.mrb[36].mxu1 %v20661_v16  ;;  %7192 = vmatpush1.bf16.msra.mxu0 %v17459_v35  ;;  %v17474_v16 = vld [vmem:[%s19781_s21 + $0x1640] ss:$16 sps:$4 sm:$0xff]   ;;  %v17533_v35 = vld [vmem:[%s19781_s21 + $0x1584] ss:$16 sps:$4 sm:$0xff]  }
 0x52e   : > { %7233 = vmatpush1.bf16.msra.mxu1 %v17462_v37  ;;  %7193 = vmatprep.subr.bf16.mxu0 %v17467_v38  ;;  %v17536_v37 = vld [vmem:[%s19781_s21 + $0x1784] ss:$16 sps:$4 sm:$0xff]   ;;  %v17531_v38 = vld [vmem:[%s19781_s21 + $0x1580] ss:$16 sps:$4 sm:$0xff]  }
 0x52f   : > { %7234 = vmatprep.subr.bf16.mxu1 %v17470_v39  ;;  %7223 = vmatprep.mubr.bf16.mxu0 %v20747_v45  ;;  %v17534_v39 = vld [vmem:[%s19781_s21 + $0x1780] ss:$16 sps:$4 sm:$0xff]  }
 0x530   : > { %7264 = vmatprep.mubr.bf16.mxu1 %v20751_v46 }
 0x531   : > { %7194 = vmatpush1.bf16.msra.mxu0 %v17465_v1  ;;  %v17539_v1 = vld [vmem:[%s19781_s21 + $0x15a4] ss:$16 sps:$4 sm:$0xff]  }
 0x532   : > { %7235 = vmatpush1.bf16.msra.mxu1 %v17468_v47  ;;  %7195 = vmatprep.subr.bf16.mxu0 %v17473_v48  ;;  %v17542_v47 = vld [vmem:[%s19781_s21 + $0x17a4] ss:$16 sps:$4 sm:$0xff]   ;;  %v17537_v48 = vld [vmem:[%s19781_s21 + $0x15a0] ss:$16 sps:$4 sm:$0xff]  }
 0x533   : > { %7236 = vmatprep.subr.bf16.mxu1 %v17476_v62  ;;  %v17540_v62 = vld [vmem:[%s19781_s21 + $0x17a0] ss:$16 sps:$4 sm:$0xff]  }
 0x535   : > { %7196 = vmatpush1.bf16.msra.mxu0 %v17471_v33  ;;  %v17545_v33 = vld [vmem:[%s19781_s21 + $0x15c4] ss:$16 sps:$4 sm:$0xff]  }
 0x536   : > { %7237 = vmatpush1.bf16.msra.mxu1 %v17474_v16  ;;  %7197 = vmatprep.subr.bf16.mxu0 %v17479_v53  ;;  %v17548_v16 = vld [vmem:[%s19781_s21 + $0x17c4] ss:$16 sps:$4 sm:$0xff]   ;;  %v17543_v53 = vld [vmem:[%s19781_s21 + $0x15c0] ss:$16 sps:$4 sm:$0xff]  }
 0x537   : > { %7238 = vmatprep.subr.bf16.mxu1 %v17482_v18  ;;  %v17546_v18 = vld [vmem:[%s19781_s21 + $0x17c0] ss:$16 sps:$4 sm:$0xff]  }
 0x539   : > { %7198 = vmatpush1.bf16.msra.mxu0 %v17477_v49  ;;  %v17551_v49 = vld [vmem:[%s19781_s21 + $0x15e4] ss:$16 sps:$4 sm:$0xff]  }
 0x53a   : > { %7239 = vmatpush1.bf16.msra.mxu1 %v17480_v50  ;;  %7199 = vmatprep.subr.bf16.mxu0 %v17485_v57  ;;  %v17554_v50 = vld [vmem:[%s19781_s21 + $0x17e4] ss:$16 sps:$4 sm:$0xff]   ;;  %v17549_v57 = vld [vmem:[%s19781_s21 + $0x15e0] ss:$16 sps:$4 sm:$0xff]  }
 0x53b   : > { %7240 = vmatprep.subr.bf16.mxu1 %v17488_v58  ;;  %v17552_v58 = vld [vmem:[%s19781_s21 + $0x17e0] ss:$16 sps:$4 sm:$0xff]  }
 0x53d   : > { %7200 = vmatpush1.bf16.msra.mxu0 %v17483_v59  ;;  %v17561_v59 = vld [vmem:[%s19781_s21 + $0x140c] ss:$16 sps:$4 sm:$0xff]  }
 0x53e   : > { %7241 = vmatpush1.bf16.msra.mxu1 %v17486_v25  ;;  %7201 = vmatprep.subr.bf16.mxu0 %v17491_v52  ;;  %v17564_v25 = vld [vmem:[%s19781_s21 + $0x160c] ss:$16 sps:$4 sm:$0xff]   ;;  %v20825_v52 = vcombine.low %v20737_v31, %v20737_v31  ;;  %v17565_v31 = vld [vmem:[%s19781_s21 + $0x1428] ss:$16 sps:$4 sm:$0xff]  }
 0x53f   : > { %7242 = vmatprep.subr.bf16.mxu1 %v17494_v26  ;;  %v5319_v56 = vpop.f32.mrb[24].mxu0  ;;  %v20829_v26 = vcombine.low %v20739_v32, %v20739_v32  ;;  %v17568_v32 = vld [vmem:[%s19781_s21 + $0x1628] ss:$16 sps:$4 sm:$0xff]  }
 0x540   : > { %v5360_v3 = vpop.f32.mrb[24].mxu1  ;;  %v5321_v4 = vpop.f32.mrb[25].mxu0 }
 0x541   : > { %v5361_v61 = vadd.f32 %v5360_v3, %v5319_v56  ;;  %v5362_v7 = vpop.f32.mrb[25].mxu1  ;;  %v5323_v41 = vpop.f32.mrb[26].mxu0  ;;  %7202 = vmatpush1.bf16.msra.mxu0 %v17489_v2  ;;  %v17559_v2 = vld [vmem:[%s19781_s21 + $0x1408] ss:$16 sps:$4 sm:$0xff]   ;;  %v17573_v56 = vld [vmem:[%s19781_s21 + $0x144c] ss:$16 sps:$4 sm:$0xff]  }
 0x542   : > { %v5363_v8 = vadd.f32 %v5362_v7, %v5321_v4  ;;  %v5364_v42 = vpop.f32.mrb[26].mxu1  ;;  %7243 = vmatpush1.bf16.msra.mxu1 %v17492_v55  ;;  %v5324_v44 = vpop.f32.mrb[27].mxu0  ;;  %7203 = vmatprep.subr.bf16.mxu0 %v17497_v13  ;;  %v17562_v55 = vld [vmem:[%s19781_s21 + $0x1608] ss:$16 sps:$4 sm:$0xff]   ;;  %v17567_v13 = vld [vmem:[%s19781_s21 + $0x142c] ss:$16 sps:$4 sm:$0xff]  }
 0x543   : > { %v20780_v43 = vadd.f32 %v5361_v61, %v20612_v34  ;;  %v5365_v11 = vpop.f32.mrb[27].mxu1  ;;  %7244 = vmatprep.subr.bf16.mxu1 %v17500_v19  ;;  %v17509_v34 = vld [vmem:[%s19781_s21 + $0x1504] ss:$16 sps:$4 sm:$0xff]   ;;  %v17570_v19 = vld [vmem:[%s19781_s21 + $0x162c] ss:$16 sps:$4 sm:$0xff]  }
 0x544   : > { %v20785_v15 = vadd.f32 %v5363_v8, %v20617_v40  ;;  %v17515_v40 = vld [vmem:[%s19781_s21 + $0x1524] ss:$16 sps:$4 sm:$0xff]   ;;  %v17576_v3 = vld [vmem:[%s19781_s21 + $0x164c] ss:$16 sps:$4 sm:$0xff]   ;;  %v17571_v61 = vld [vmem:[%s19781_s21 + $0x1448] ss:$16 sps:$4 sm:$0xff]  }
 0x545   : > { %7204 = vmatpush1.bf16.msra.mxu0 %v17495_v9  ;;  %v17574_v4 = vld [vmem:[%s19781_s21 + $0x1648] ss:$16 sps:$4 sm:$0xff]   ;;  %v17579_v7 = vld [vmem:[%s19781_s21 + $0x146c] ss:$16 sps:$4 sm:$0xff]  }
 0x546   : > { %7245 = vmatpush1.bf16.msra.mxu1 %v17498_v10  ;;  %7205 = vmatprep.subr.bf16.mxu0 %v17503_v12  ;;  %v17582_v8 = vld [vmem:[%s19781_s21 + $0x166c] ss:$16 sps:$4 sm:$0xff]   ;;  %v17577_v41 = vld [vmem:[%s19781_s21 + $0x1468] ss:$16 sps:$4 sm:$0xff]  }
 0x547   : > { %7246 = vmatprep.subr.bf16.mxu1 %v17506_v14  ;;  %v17588_v42 = vld [vmem:[%s19781_s21 + $0x168c] ss:$16 sps:$4 sm:$0xff]   ;;  %v17583_v9 = vld [vmem:[%s19781_s21 + $0x1488] ss:$16 sps:$4 sm:$0xff]  }
 0x548   : > { %v17586_v10 = vld [vmem:[%s19781_s21 + $0x1688] ss:$16 sps:$4 sm:$0xff]   ;;  %v17591_v44 = vld [vmem:[%s19781_s21 + $0x14ac] ss:$16 sps:$4 sm:$0xff]  }
 0x549   : > { %7206 = vmatpush1.bf16.msra.mxu0 %v17501_v36  ;;  %v17594_v11 = vld [vmem:[%s19781_s21 + $0x16ac] ss:$16 sps:$4 sm:$0xff]   ;;  %v17589_v12 = vld [vmem:[%s19781_s21 + $0x14a8] ss:$16 sps:$4 sm:$0xff]  }
 0x54a   : > { %7247 = vmatpush1.bf16.msra.mxu1 %v17504_v17  ;;  %7207 = vmatprep.subr.bf16.mxu0 %v17509_v34  ;;  %v17592_v14 = vld [vmem:[%s19781_s21 + $0x16a8] ss:$16 sps:$4 sm:$0xff]   ;;  %v17597_v36 = vld [vmem:[%s19781_s21 + $0x14cc] ss:$16 sps:$4 sm:$0xff]  }
 0x54b   : > { %7248 = vmatprep.subr.bf16.mxu1 %v17512_v20  ;;  %v17600_v17 = vld [vmem:[%s19781_s21 + $0x16cc] ss:$16 sps:$4 sm:$0xff]  }
 0x54d   : > { %7208 = vmatpush1.bf16.msra.mxu0 %v17507_v21 }
 0x54e   : > { %7249 = vmatpush1.bf16.msra.mxu1 %v17510_v63  ;;  %7209 = vmatprep.subr.bf16.mxu0 %v17515_v40 }
 0x54f   : > { %7250 = vmatprep.subr.bf16.mxu1 %v17518_v0 }
 0x551   : > { %7210 = vmatpush1.bf16.msra.mxu0 %v17513_v23 }
 0x552   : > { %7251 = vmatpush1.bf16.msra.mxu1 %v17516_v24  ;;  %7211 = vmatprep.subr.bf16.mxu0 %v17521_v27  ;;  %v17595_v27 = vld [vmem:[%s19781_s21 + $0x14c8] ss:$16 sps:$4 sm:$0xff]  }
 0x553   : > { %7252 = vmatprep.subr.bf16.mxu1 %v17524_v28  ;;  %v17598_v28 = vld [vmem:[%s19781_s21 + $0x16c8] ss:$16 sps:$4 sm:$0xff]  }
 0x555   : > { %7212 = vmatpush1.bf16.msra.mxu0 %v17519_v29 }
 0x556   : > { %7253 = vmatpush1.bf16.msra.mxu1 %v17522_v30  ;;  %7213 = vmatprep.subr.bf16.mxu0 %v17527_v5 }
 0x557   : > { %7254 = vmatprep.subr.bf16.mxu1 %v17530_v22  ;;  %v17603_v22 = vld [vmem:[%s19781_s21 + $0x14ec] ss:$16 sps:$4 sm:$0xff]  }
 0x559   : > { %7214 = vmatpush1.bf16.msra.mxu0 %v17525_v54  ;;  %v17606_v54 = vld [vmem:[%s19781_s21 + $0x16ec] ss:$16 sps:$4 sm:$0xff]  }
 0x55a   : > { %7255 = vmatpush1.bf16.msra.mxu1 %v17528_v6  ;;  %7215 = vmatprep.subr.bf16.mxu0 %v17533_v35  ;;  %v17601_v35 = vld [vmem:[%s19781_s21 + $0x14e8] ss:$16 sps:$4 sm:$0xff]  }
 0x55b   : > { %7256 = vmatprep.subr.bf16.mxu1 %v17536_v37  ;;  %v17604_v37 = vld [vmem:[%s19781_s21 + $0x16e8] ss:$16 sps:$4 sm:$0xff]  }
 0x55d   : > { %7216 = vmatpush1.bf16.msra.mxu0 %v17531_v38  ;;  %v17612_v38 = vld [vmem:[%s19781_s21 + $0x170c] ss:$16 sps:$4 sm:$0xff]  }
 0x55e   : > { %7257 = vmatpush1.bf16.msra.mxu1 %v17534_v39  ;;  %7217 = vmatprep.subr.bf16.mxu0 %v17539_v1  ;;  %v17607_v39 = vld [vmem:[%s19781_s21 + $0x1508] ss:$16 sps:$4 sm:$0xff]  }
 0x55f   : > { %7258 = vmatprep.subr.bf16.mxu1 %v17542_v47  ;;  %v17610_v1 = vld [vmem:[%s19781_s21 + $0x1708] ss:$16 sps:$4 sm:$0xff]   ;;  %v17618_v47 = vld [vmem:[%s19781_s21 + $0x172c] ss:$16 sps:$4 sm:$0xff]  }
 0x561   : > { %7218 = vmatpush1.bf16.msra.mxu0 %v17537_v48  ;;  %v17613_v48 = vld [vmem:[%s19781_s21 + $0x1528] ss:$16 sps:$4 sm:$0xff]  }
 0x562   : > { %7259 = vmatpush1.bf16.msra.mxu1 %v17540_v62  ;;  %7219 = vmatprep.subr.bf16.mxu0 %v17545_v33  ;;  %v17616_v62 = vld [vmem:[%s19781_s21 + $0x1728] ss:$16 sps:$4 sm:$0xff]   ;;  %v17621_v33 = vld [vmem:[%s19781_s21 + $0x154c] ss:$16 sps:$4 sm:$0xff]  }
 0x563   : > { %7260 = vmatprep.subr.bf16.mxu1 %v17548_v16  ;;  %v17624_v16 = vld [vmem:[%s19781_s21 + $0x174c] ss:$16 sps:$4 sm:$0xff]  }
 0x565   : > { %7220 = vmatpush1.bf16.msra.mxu0 %v17543_v53  ;;  %v17619_v53 = vld [vmem:[%s19781_s21 + $0x1548] ss:$16 sps:$4 sm:$0xff]  }
 0x566   : > { %7261 = vmatpush1.bf16.msra.mxu1 %v17546_v18  ;;  %7221 = vmatprep.subr.bf16.mxu0 %v17551_v49  ;;  %v17622_v18 = vld [vmem:[%s19781_s21 + $0x1748] ss:$16 sps:$4 sm:$0xff]   ;;  %v17627_v49 = vld [vmem:[%s19781_s21 + $0x156c] ss:$16 sps:$4 sm:$0xff]  }
 0x567   : > { %7262 = vmatprep.subr.bf16.mxu1 %v17554_v50  ;;  %v17630_v50 = vld [vmem:[%s19781_s21 + $0x176c] ss:$16 sps:$4 sm:$0xff]  }
 0x569   : > { %7222 = vmatpush1.bf16.msra.mxu0 %v17549_v57  ;;  %v17625_v57 = vld [vmem:[%s19781_s21 + $0x1568] ss:$16 sps:$4 sm:$0xff]  }
 0x56a   : > { %7263 = vmatpush1.bf16.msra.mxu1 %v17552_v58  ;;  %7273 = vmatprep.subr.bf16.mxu0 %v17561_v59  ;;  %v17628_v58 = vld [vmem:[%s19781_s21 + $0x1768] ss:$16 sps:$4 sm:$0xff]   ;;  %v17633_v59 = vld [vmem:[%s19781_s21 + $0x158c] ss:$16 sps:$4 sm:$0xff]  }
 0x56b   : > { %7314 = vmatprep.subr.bf16.mxu1 %v17564_v25  ;;  %v17636_v25 = vld [vmem:[%s19781_s21 + $0x178c] ss:$16 sps:$4 sm:$0xff]  }
 0x56c   : > { %7224 = vmatmul.mubr.bf16.vlgmr.msra.gmra.mrb[40].mxu0 %v20825_v52 }
 0x56d   : > { %7265 = vmatmul.mubr.bf16.vlgmr.msra.gmra.mrb[40].mxu1 %v20829_v26  ;;  %7274 = vmatpush1.bf16.msra.mxu0 %v17559_v2  ;;  %v17631_v2 = vld [vmem:[%s19781_s21 + $0x1588] ss:$16 sps:$4 sm:$0xff]  }
 0x56e   : > { %7315 = vmatpush1.bf16.msra.mxu1 %v17562_v55  ;;  %7275 = vmatprep.subr.bf16.mxu0 %v17567_v13  ;;  %v17634_v55 = vld [vmem:[%s19781_s21 + $0x1788] ss:$16 sps:$4 sm:$0xff]   ;;  %v17639_v13 = vld [vmem:[%s19781_s21 + $0x15ac] ss:$16 sps:$4 sm:$0xff]  }
 0x56f   : > { %7316 = vmatprep.subr.bf16.mxu1 %v17570_v19  ;;  %7305 = vmatprep.mubr.bf16.mxu0 %v20747_v45  ;;  %v17580_v45 = vld [vmem:[%s19781_s21 + $0x1668] ss:$16 sps:$4 sm:$0xff]   ;;  %v17642_v19 = vld [vmem:[%s19781_s21 + $0x17ac] ss:$16 sps:$4 sm:$0xff]  }
 0x570   : > { %7346 = vmatprep.mubr.bf16.mxu1 %v20751_v46  ;;  %v17585_v46 = vld [vmem:[%s19781_s21 + $0x148c] ss:$16 sps:$4 sm:$0xff]  }
 0x571   : > { %7276 = vmatpush1.bf16.msra.mxu0 %v17565_v31  ;;  %v17637_v31 = vld [vmem:[%s19781_s21 + $0x15a8] ss:$16 sps:$4 sm:$0xff]  }
 0x572   : > { %7317 = vmatpush1.bf16.msra.mxu1 %v17568_v32  ;;  %7277 = vmatprep.subr.bf16.mxu0 %v17573_v56  ;;  %v17640_v32 = vld [vmem:[%s19781_s21 + $0x17a8] ss:$16 sps:$4 sm:$0xff]   ;;  %v17645_v56 = vld [vmem:[%s19781_s21 + $0x15cc] ss:$16 sps:$4 sm:$0xff]  }
 0x573   : > { %7318 = vmatprep.subr.bf16.mxu1 %v17576_v3  ;;  %v17648_v3 = vld [vmem:[%s19781_s21 + $0x17cc] ss:$16 sps:$4 sm:$0xff]  }
 0x575   : > { %7278 = vmatpush1.bf16.msra.mxu0 %v17571_v61  ;;  %v17643_v61 = vld [vmem:[%s19781_s21 + $0x15c8] ss:$16 sps:$4 sm:$0xff]  }
 0x576   : > { %7319 = vmatpush1.bf16.msra.mxu1 %v17574_v4  ;;  %7279 = vmatprep.subr.bf16.mxu0 %v17579_v7  ;;  %v17646_v4 = vld [vmem:[%s19781_s21 + $0x17c8] ss:$16 sps:$4 sm:$0xff]   ;;  %v17651_v7 = vld [vmem:[%s19781_s21 + $0x15ec] ss:$16 sps:$4 sm:$0xff]  }
 0x577   : > { %7320 = vmatprep.subr.bf16.mxu1 %v17582_v8  ;;  %v17654_v8 = vld [vmem:[%s19781_s21 + $0x17ec] ss:$16 sps:$4 sm:$0xff]  }
 0x579   : > { %7280 = vmatpush1.bf16.msra.mxu0 %v17577_v41  ;;  %v17649_v41 = vld [vmem:[%s19781_s21 + $0x15e8] ss:$16 sps:$4 sm:$0xff]  }
 0x57a   : > { %7321 = vmatpush1.bf16.msra.mxu1 %v17580_v45  ;;  %7281 = vmatprep.subr.bf16.mxu0 %v17585_v46  ;;  %v17652_v45 = vld [vmem:[%s19781_s21 + $0x17e8] ss:$16 sps:$4 sm:$0xff]   ;;  %v17657_v46 = vld [vmem:[%s19781_s21 + $0x1804] ss:$16 sps:$4 sm:$0xff]  }
 0x57b   : > { %7322 = vmatprep.subr.bf16.mxu1 %v17588_v42  ;;  %v17660_v42 = vld [vmem:[%s19781_s21 + $0x1a04] ss:$16 sps:$4 sm:$0xff]  }
 0x57d   : > { %7282 = vmatpush1.bf16.msra.mxu0 %v17583_v9  ;;  %v20905_v9 = vld [vmem:[#allocation2 + $0x60] sm:$0xff] }
 0x57e   : > { %7323 = vmatpush1.bf16.msra.mxu1 %v17586_v10  ;;  %7283 = vmatprep.subr.bf16.mxu0 %v17591_v44  ;;  %v20907_v10 = vld [vmem:[#allocation2 + $0x68] sm:$0xff] }
 0x57f   : > { %7324 = vmatprep.subr.bf16.mxu1 %v17594_v11  ;;  %v5401_v34 = vpop.f32.mrb[28].mxu0  ;;  %v17655_v44 = vld [vmem:[%s19781_s21 + $0x1800] ss:$16 sps:$4 sm:$0xff]  }
 0x580   : > { %v5442_v20 = vpop.f32.mrb[28].mxu1  ;;  %v5403_v63 = vpop.f32.mrb[29].mxu0  ;;  %v17658_v11 = vld [vmem:[%s19781_s21 + $0x1a00] ss:$16 sps:$4 sm:$0xff]  }
 0x581   : > { %v5443_v21 = vadd.f32 %v5442_v20, %v5401_v34  ;;  %v5444_v40 = vpop.f32.mrb[29].mxu1  ;;  %v5405_v23 = vpop.f32.mrb[30].mxu0  ;;  %7284 = vmatpush1.bf16.msra.mxu0 %v17589_v12  ;;  %v17663_v12 = vld [vmem:[%s19781_s21 + $0x1824] ss:$16 sps:$4 sm:$0xff]   ;;  %v17661_v34 = vld [vmem:[%s19781_s21 + $0x1820] ss:$16 sps:$4 sm:$0xff]  }
 0x582   : > { %v5445_v0 = vadd.f32 %v5444_v40, %v5403_v63  ;;  %v5446_v24 = vpop.f32.mrb[30].mxu1  ;;  %7325 = vmatpush1.bf16.msra.mxu1 %v17592_v14  ;;  %v5406_v30 = vpop.f32.mrb[31].mxu0  ;;  %7285 = vmatprep.subr.bf16.mxu0 %v17597_v36  ;;  %v17666_v14 = vld [vmem:[%s19781_s21 + $0x1a24] ss:$16 sps:$4 sm:$0xff]   ;;  %v20915_v36 = vcombine.high %v20905_v9, %v20905_v9  ;;  %v17664_v20 = vld [vmem:[%s19781_s21 + $0x1a20] ss:$16 sps:$4 sm:$0xff]  }
 0x583   : > { %v20862_v29 = vadd.f32 %v5443_v21, %v20694_v51  ;;  %v5447_v5 = vpop.f32.mrb[31].mxu1  ;;  %7326 = vmatprep.subr.bf16.mxu1 %v17600_v17  ;;  %v17609_v51 = vld [vmem:[%s19781_s21 + $0x150c] ss:$16 sps:$4 sm:$0xff]   ;;  %v20919_v17 = vcombine.high %v20907_v10, %v20907_v10  ;;  %v17669_v21 = vld [vmem:[%s19781_s21 + $0x1844] ss:$16 sps:$4 sm:$0xff]  }
 0x584   : > { %v20867_v6 = vadd.f32 %v5445_v0, %v20699_v60  ;;  %v17615_v60 = vld [vmem:[%s19781_s21 + $0x152c] ss:$16 sps:$4 sm:$0xff]   ;;  %v17672_v63 = vld [vmem:[%s19781_s21 + $0x1a44] ss:$16 sps:$4 sm:$0xff]   ;;  %v17673_v23 = vld [vmem:[%s19781_s21 + $0x1860] ss:$16 sps:$4 sm:$0xff]  }
 0x585   : > { %7286 = vmatpush1.bf16.msra.mxu0 %v17595_v27  ;;  %v17675_v40 = vld [vmem:[%s19781_s21 + $0x1864] ss:$16 sps:$4 sm:$0xff]   ;;  %v17676_v24 = vld [vmem:[%s19781_s21 + $0x1a60] ss:$16 sps:$4 sm:$0xff]  }
 0x586   : > { %7327 = vmatpush1.bf16.msra.mxu1 %v17598_v28  ;;  %7287 = vmatprep.subr.bf16.mxu0 %v17603_v22  ;;  %v17678_v0 = vld [vmem:[%s19781_s21 + $0x1a64] ss:$16 sps:$4 sm:$0xff]   ;;  %v17679_v30 = vld [vmem:[%s19781_s21 + $0x1880] ss:$16 sps:$4 sm:$0xff]  }
 0x587   : > { %7328 = vmatprep.subr.bf16.mxu1 %v17606_v54  ;;  %v17681_v27 = vld [vmem:[%s19781_s21 + $0x1884] ss:$16 sps:$4 sm:$0xff]   ;;  %v17682_v5 = vld [vmem:[%s19781_s21 + $0x1a80] ss:$16 sps:$4 sm:$0xff]  }
 0x588   : > { %v17684_v28 = vld [vmem:[%s19781_s21 + $0x1a84] ss:$16 sps:$4 sm:$0xff]  }
 0x589   : > { %7288 = vmatpush1.bf16.msra.mxu0 %v17601_v35  ;;  %v17687_v22 = vld [vmem:[%s19781_s21 + $0x18a4] ss:$16 sps:$4 sm:$0xff]   ;;  %v17685_v35 = vld [vmem:[%s19781_s21 + $0x18a0] ss:$16 sps:$4 sm:$0xff]  }
 0x58a   : > { %7329 = vmatpush1.bf16.msra.mxu1 %v17604_v37  ;;  %7289 = vmatprep.subr.bf16.mxu0 %v17609_v51  ;;  %v17690_v54 = vld [vmem:[%s19781_s21 + $0x1aa4] ss:$16 sps:$4 sm:$0xff]   ;;  %v17688_v37 = vld [vmem:[%s19781_s21 + $0x1aa0] ss:$16 sps:$4 sm:$0xff]  }
 0x58b   : > { %7330 = vmatprep.subr.bf16.mxu1 %v17612_v38  ;;  %v17693_v51 = vld [vmem:[%s19781_s21 + $0x18c4] ss:$16 sps:$4 sm:$0xff]  }
 0x58c   : > { %v17696_v38 = vld [vmem:[%s19781_s21 + $0x1ac4] ss:$16 sps:$4 sm:$0xff]  }
 0x58d   : > { %7290 = vmatpush1.bf16.msra.mxu0 %v17607_v39 }
 0x58e   : > { %7331 = vmatpush1.bf16.msra.mxu1 %v17610_v1  ;;  %7291 = vmatprep.subr.bf16.mxu0 %v17615_v60 }
 0x58f   : > { %7332 = vmatprep.subr.bf16.mxu1 %v17618_v47 }
 0x591   : > { %7292 = vmatpush1.bf16.msra.mxu0 %v17613_v48 }
 0x592   : > { %7333 = vmatpush1.bf16.msra.mxu1 %v17616_v62  ;;  %7293 = vmatprep.subr.bf16.mxu0 %v17621_v33 }
 0x593   : > { %7334 = vmatprep.subr.bf16.mxu1 %v17624_v16 }
 0x595   : > { %7294 = vmatpush1.bf16.msra.mxu0 %v17619_v53  ;;  %v17691_v53 = vld [vmem:[%s19781_s21 + $0x18c0] ss:$16 sps:$4 sm:$0xff]  }
 0x596   : > { %7335 = vmatpush1.bf16.msra.mxu1 %v17622_v18  ;;  %7295 = vmatprep.subr.bf16.mxu0 %v17627_v49  ;;  %v17694_v18 = vld [vmem:[%s19781_s21 + $0x1ac0] ss:$16 sps:$4 sm:$0xff]  }
 0x597   : > { %7336 = vmatprep.subr.bf16.mxu1 %v17630_v50 }
 0x599   : > { %7296 = vmatpush1.bf16.msra.mxu0 %v17625_v57 }
 0x59a   : > { %7337 = vmatpush1.bf16.msra.mxu1 %v17628_v58  ;;  %7297 = vmatprep.subr.bf16.mxu0 %v17633_v59  ;;  %v17699_v58 = vld [vmem:[%s19781_s21 + $0x18e4] ss:$16 sps:$4 sm:$0xff]  }
 0x59b   : > { %7338 = vmatprep.subr.bf16.mxu1 %v17636_v25  ;;  %v17702_v59 = vld [vmem:[%s19781_s21 + $0x1ae4] ss:$16 sps:$4 sm:$0xff]  }
 0x59d   : > { %7298 = vmatpush1.bf16.msra.mxu0 %v17631_v2  ;;  %v17697_v2 = vld [vmem:[%s19781_s21 + $0x18e0] ss:$16 sps:$4 sm:$0xff]  }
 0x59e   : > { %7339 = vmatpush1.bf16.msra.mxu1 %v17634_v55  ;;  %7299 = vmatprep.subr.bf16.mxu0 %v17639_v13  ;;  %v17700_v55 = vld [vmem:[%s19781_s21 + $0x1ae0] ss:$16 sps:$4 sm:$0xff]   ;;  %v17708_v13 = vld [vmem:[%s19781_s21 + $0x1b04] ss:$16 sps:$4 sm:$0xff]  }
 0x59f   : > { %7340 = vmatprep.subr.bf16.mxu1 %v17642_v19  ;;  %v17703_v19 = vld [vmem:[%s19781_s21 + $0x1900] ss:$16 sps:$4 sm:$0xff]  }
 0x5a1   : > { %7300 = vmatpush1.bf16.msra.mxu0 %v17637_v31  ;;  %v17706_v31 = vld [vmem:[%s19781_s21 + $0x1b00] ss:$16 sps:$4 sm:$0xff]  }
 0x5a2   : > { %7341 = vmatpush1.bf16.msra.mxu1 %v17640_v32  ;;  %7301 = vmatprep.subr.bf16.mxu0 %v17645_v56  ;;  %v17714_v32 = vld [vmem:[%s19781_s21 + $0x1b24] ss:$16 sps:$4 sm:$0xff]   ;;  %v17709_v56 = vld [vmem:[%s19781_s21 + $0x1920] ss:$16 sps:$4 sm:$0xff]  }
 0x5a3   : > { %7342 = vmatprep.subr.bf16.mxu1 %v17648_v3  ;;  %v17712_v3 = vld [vmem:[%s19781_s21 + $0x1b20] ss:$16 sps:$4 sm:$0xff]  }
 0x5a5   : > { %7302 = vmatpush1.bf16.msra.mxu0 %v17643_v61  ;;  %v17717_v61 = vld [vmem:[%s19781_s21 + $0x1944] ss:$16 sps:$4 sm:$0xff]  }
 0x5a6   : > { %7343 = vmatpush1.bf16.msra.mxu1 %v17646_v4  ;;  %7303 = vmatprep.subr.bf16.mxu0 %v17651_v7  ;;  %v17720_v4 = vld [vmem:[%s19781_s21 + $0x1b44] ss:$16 sps:$4 sm:$0xff]   ;;  %v17715_v7 = vld [vmem:[%s19781_s21 + $0x1940] ss:$16 sps:$4 sm:$0xff]  }
 0x5a7   : > { %7344 = vmatprep.subr.bf16.mxu1 %v17654_v8  ;;  %v17718_v8 = vld [vmem:[%s19781_s21 + $0x1b40] ss:$16 sps:$4 sm:$0xff]  }
 0x5a9   : > { %7304 = vmatpush1.bf16.msra.mxu0 %v17649_v41  ;;  %v17723_v41 = vld [vmem:[%s19781_s21 + $0x1964] ss:$16 sps:$4 sm:$0xff]  }
 0x5aa   : > { %7345 = vmatpush1.bf16.msra.mxu1 %v17652_v45  ;;  %8144 = vmatprep.subr.bf16.mxu0 %v17657_v46  ;;  %v17726_v45 = vld [vmem:[%s19781_s21 + $0x1b64] ss:$16 sps:$4 sm:$0xff]   ;;  %v17721_v46 = vld [vmem:[%s19781_s21 + $0x1960] ss:$16 sps:$4 sm:$0xff]  }
 0x5ab   : > { %8185 = vmatprep.subr.bf16.mxu1 %v17660_v42  ;;  %v17724_v42 = vld [vmem:[%s19781_s21 + $0x1b60] ss:$16 sps:$4 sm:$0xff]  }
 0x5ac   : > { %7306 = vmatmul.mubr.bf16.vlgmr.msra.gmra.mrb[44].mxu0 %v20825_v52  ;;  %v17667_v52 = vld [vmem:[%s19781_s21 + $0x1840] ss:$16 sps:$4 sm:$0xff]  }
 0x5ad   : > { %7347 = vmatmul.mubr.bf16.vlgmr.msra.gmra.mrb[44].mxu1 %v20829_v26  ;;  %8145 = vmatpush1.bf16.msra.mxu0 %v17655_v44  ;;  %v17670_v26 = vld [vmem:[%s19781_s21 + $0x1a40] ss:$16 sps:$4 sm:$0xff]   ;;  %v17729_v44 = vld [vmem:[%s19781_s21 + $0x1984] ss:$16 sps:$4 sm:$0xff]  }
 0x5ae   : > { %8186 = vmatpush1.bf16.msra.mxu1 %v17658_v11  ;;  %8146 = vmatprep.subr.bf16.mxu0 %v17663_v12  ;;  %v17732_v11 = vld [vmem:[%s19781_s21 + $0x1b84] ss:$16 sps:$4 sm:$0xff]   ;;  %v17727_v12 = vld [vmem:[%s19781_s21 + $0x1980] ss:$16 sps:$4 sm:$0xff]  }
 0x5af   : > { %8187 = vmatprep.subr.bf16.mxu1 %v17666_v14  ;;  %8176 = vmatprep.mubr.bf16.mxu0 %v20915_v36  ;;  %v17730_v14 = vld [vmem:[%s19781_s21 + $0x1b80] ss:$16 sps:$4 sm:$0xff]  }
 0x5b0   : > { %8217 = vmatprep.mubr.bf16.mxu1 %v20919_v17 }
 0x5b1   : > { %8147 = vmatpush1.bf16.msra.mxu0 %v17661_v34  ;;  %v17735_v34 = vld [vmem:[%s19781_s21 + $0x19a4] ss:$16 sps:$4 sm:$0xff]  }
 0x5b2   : > { %8188 = vmatpush1.bf16.msra.mxu1 %v17664_v20  ;;  %8148 = vmatprep.subr.bf16.mxu0 %v17669_v21  ;;  %v17738_v20 = vld [vmem:[%s19781_s21 + $0x1ba4] ss:$16 sps:$4 sm:$0xff]   ;;  %v17733_v21 = vld [vmem:[%s19781_s21 + $0x19a0] ss:$16 sps:$4 sm:$0xff]  }
 0x5b3   : > { %8189 = vmatprep.subr.bf16.mxu1 %v17672_v63  ;;  %v17736_v63 = vld [vmem:[%s19781_s21 + $0x1ba0] ss:$16 sps:$4 sm:$0xff]  }
 0x5b5   : > { %8149 = vmatpush1.bf16.msra.mxu0 %v17667_v52  ;;  %v17741_v52 = vld [vmem:[%s19781_s21 + $0x19c4] ss:$16 sps:$4 sm:$0xff]  }
 0x5b6   : > { %8190 = vmatpush1.bf16.msra.mxu1 %v17670_v26  ;;  %8150 = vmatprep.subr.bf16.mxu0 %v17675_v40  ;;  %v17744_v26 = vld [vmem:[%s19781_s21 + $0x1bc4] ss:$16 sps:$4 sm:$0xff]   ;;  %v17739_v40 = vld [vmem:[%s19781_s21 + $0x19c0] ss:$16 sps:$4 sm:$0xff]  }
 0x5b7   : > { %8191 = vmatprep.subr.bf16.mxu1 %v17678_v0  ;;  %v17742_v0 = vld [vmem:[%s19781_s21 + $0x1bc0] ss:$16 sps:$4 sm:$0xff]  }
 0x5b9   : > { %8151 = vmatpush1.bf16.msra.mxu0 %v17673_v23  ;;  %v17747_v23 = vld [vmem:[%s19781_s21 + $0x19e4] ss:$16 sps:$4 sm:$0xff]  }
 0x5ba   : > { %8192 = vmatpush1.bf16.msra.mxu1 %v17676_v24  ;;  %8152 = vmatprep.subr.bf16.mxu0 %v17681_v27  ;;  %v17750_v24 = vld [vmem:[%s19781_s21 + $0x1be4] ss:$16 sps:$4 sm:$0xff]   ;;  %v17745_v27 = vld [vmem:[%s19781_s21 + $0x19e0] ss:$16 sps:$4 sm:$0xff]  }
 0x5bb   : > { %8193 = vmatprep.subr.bf16.mxu1 %v17684_v28  ;;  %v17748_v28 = vld [vmem:[%s19781_s21 + $0x1be0] ss:$16 sps:$4 sm:$0xff]  }
 0x5bd   : > { %8153 = vmatpush1.bf16.msra.mxu0 %v17679_v30  ;;  %v17757_v30 = vld [vmem:[%s19781_s21 + $0x180c] ss:$16 sps:$4 sm:$0xff]  }
 0x5be   : > { %8194 = vmatpush1.bf16.msra.mxu1 %v17682_v5  ;;  %8154 = vmatprep.subr.bf16.mxu0 %v17687_v22  ;;  %v17760_v5 = vld [vmem:[%s19781_s21 + $0x1a0c] ss:$16 sps:$4 sm:$0xff]   ;;  %v20993_v22 = vcombine.low %v20905_v9, %v20905_v9  ;;  %v17761_v9 = vld [vmem:[%s19781_s21 + $0x1828] ss:$16 sps:$4 sm:$0xff]  }
 0x5bf   : > { %8195 = vmatprep.subr.bf16.mxu1 %v17690_v54  ;;  %v6272_v39 = vpop.f32.mrb[32].mxu0  ;;  %v20997_v54 = vcombine.low %v20907_v10, %v20907_v10  ;;  %v17764_v10 = vld [vmem:[%s19781_s21 + $0x1a28] ss:$16 sps:$4 sm:$0xff]  }
 0x5c0   : > { %v6313_v1 = vpop.f32.mrb[32].mxu1  ;;  %v6274_v47 = vpop.f32.mrb[33].mxu0 }
 0x5c1   : > { %v6314_v60 = vadd.f32 %v6313_v1, %v6272_v39  ;;  %v6315_v48 = vpop.f32.mrb[33].mxu1  ;;  %v6276_v33 = vpop.f32.mrb[34].mxu0  ;;  %8155 = vmatpush1.bf16.msra.mxu0 %v17685_v35  ;;  %v17755_v35 = vld [vmem:[%s19781_s21 + $0x1808] ss:$16 sps:$4 sm:$0xff]   ;;  %v17769_v39 = vld [vmem:[%s19781_s21 + $0x184c] ss:$16 sps:$4 sm:$0xff]  }
 0x5c2   : > { %v6316_v62 = vadd.f32 %v6315_v48, %v6274_v47  ;;  %v6317_v16 = vpop.f32.mrb[34].mxu1  ;;  %8196 = vmatpush1.bf16.msra.mxu1 %v17688_v37  ;;  %v6277_v50 = vpop.f32.mrb[35].mxu0  ;;  %8156 = vmatprep.subr.bf16.mxu0 %v17693_v51  ;;  %v17758_v37 = vld [vmem:[%s19781_s21 + $0x1a08] ss:$16 sps:$4 sm:$0xff]   ;;  %v17763_v51 = vld [vmem:[%s19781_s21 + $0x182c] ss:$16 sps:$4 sm:$0xff]  }
 0x5c3   : > { %v20948_v49 = vadd.f32 %v6314_v60, %v20780_v43  ;;  %v6318_v57 = vpop.f32.mrb[35].mxu1  ;;  %8197 = vmatprep.subr.bf16.mxu1 %v17696_v38  ;;  %v17705_v43 = vld [vmem:[%s19781_s21 + $0x1904] ss:$16 sps:$4 sm:$0xff]   ;;  %v17766_v38 = vld [vmem:[%s19781_s21 + $0x1a2c] ss:$16 sps:$4 sm:$0xff]  }
 0x5c4   : > { %v20953_v25 = vadd.f32 %v6316_v62, %v20785_v15  ;;  %v17711_v15 = vld [vmem:[%s19781_s21 + $0x1924] ss:$16 sps:$4 sm:$0xff]   ;;  %v17772_v1 = vld [vmem:[%s19781_s21 + $0x1a4c] ss:$16 sps:$4 sm:$0xff]   ;;  %v17767_v60 = vld [vmem:[%s19781_s21 + $0x1848] ss:$16 sps:$4 sm:$0xff]  }
 0x5c5   : > { %8157 = vmatpush1.bf16.msra.mxu0 %v17691_v53  ;;  %v17770_v47 = vld [vmem:[%s19781_s21 + $0x1a48] ss:$16 sps:$4 sm:$0xff]   ;;  %v17775_v48 = vld [vmem:[%s19781_s21 + $0x186c] ss:$16 sps:$4 sm:$0xff]  }
 0x5c6   : > { %8198 = vmatpush1.bf16.msra.mxu1 %v17694_v18  ;;  %8158 = vmatprep.subr.bf16.mxu0 %v17699_v58  ;;  %v17778_v62 = vld [vmem:[%s19781_s21 + $0x1a6c] ss:$16 sps:$4 sm:$0xff]   ;;  %v17773_v33 = vld [vmem:[%s19781_s21 + $0x1868] ss:$16 sps:$4 sm:$0xff]  }
 0x5c7   : > { %8199 = vmatprep.subr.bf16.mxu1 %v17702_v59  ;;  %v17784_v16 = vld [vmem:[%s19781_s21 + $0x1a8c] ss:$16 sps:$4 sm:$0xff]   ;;  %v17779_v53 = vld [vmem:[%s19781_s21 + $0x1888] ss:$16 sps:$4 sm:$0xff]  }
 0x5c8   : > { %v17782_v18 = vld [vmem:[%s19781_s21 + $0x1a88] ss:$16 sps:$4 sm:$0xff]   ;;  %v17787_v50 = vld [vmem:[%s19781_s21 + $0x18ac] ss:$16 sps:$4 sm:$0xff]  }
 0x5c9   : > { %8159 = vmatpush1.bf16.msra.mxu0 %v17697_v2  ;;  %v17790_v57 = vld [vmem:[%s19781_s21 + $0x1aac] ss:$16 sps:$4 sm:$0xff]   ;;  %v17785_v58 = vld [vmem:[%s19781_s21 + $0x18a8] ss:$16 sps:$4 sm:$0xff]  }
 0x5ca   : > { %8200 = vmatpush1.bf16.msra.mxu1 %v17700_v55  ;;  %8160 = vmatprep.subr.bf16.mxu0 %v17705_v43  ;;  %v17788_v59 = vld [vmem:[%s19781_s21 + $0x1aa8] ss:$16 sps:$4 sm:$0xff]   ;;  %v17793_v2 = vld [vmem:[%s19781_s21 + $0x18cc] ss:$16 sps:$4 sm:$0xff]  }
 0x5cb   : > { %8201 = vmatprep.subr.bf16.mxu1 %v17708_v13  ;;  %v17796_v55 = vld [vmem:[%s19781_s21 + $0x1acc] ss:$16 sps:$4 sm:$0xff]  }
 0x5cd   : > { %8161 = vmatpush1.bf16.msra.mxu0 %v17703_v19 }
 0x5ce   : > { %8202 = vmatpush1.bf16.msra.mxu1 %v17706_v31  ;;  %8162 = vmatprep.subr.bf16.mxu0 %v17711_v15 }
 0x5cf   : > { %8203 = vmatprep.subr.bf16.mxu1 %v17714_v32 }
 0x5d1   : > { %8163 = vmatpush1.bf16.msra.mxu0 %v17709_v56 }
 0x5d2   : > { %8204 = vmatpush1.bf16.msra.mxu1 %v17712_v3  ;;  %8164 = vmatprep.subr.bf16.mxu0 %v17717_v61  ;;  %v17791_v61 = vld [vmem:[%s19781_s21 + $0x18c8] ss:$16 sps:$4 sm:$0xff]  }
 0x5d3   : > { %8205 = vmatprep.subr.bf16.mxu1 %v17720_v4  ;;  %v17794_v4 = vld [vmem:[%s19781_s21 + $0x1ac8] ss:$16 sps:$4 sm:$0xff]  }
 0x5d5   : > { %8165 = vmatpush1.bf16.msra.mxu0 %v17715_v7 }
 0x5d6   : > { %8206 = vmatpush1.bf16.msra.mxu1 %v17718_v8  ;;  %8166 = vmatprep.subr.bf16.mxu0 %v17723_v41 }
 0x5d7   : > { %8207 = vmatprep.subr.bf16.mxu1 %v17726_v45  ;;  %v17799_v45 = vld [vmem:[%s19781_s21 + $0x18ec] ss:$16 sps:$4 sm:$0xff]  }
 0x5d9   : > { %8167 = vmatpush1.bf16.msra.mxu0 %v17721_v46  ;;  %v17802_v46 = vld [vmem:[%s19781_s21 + $0x1aec] ss:$16 sps:$4 sm:$0xff]  }
 0x5da   : > { %8208 = vmatpush1.bf16.msra.mxu1 %v17724_v42  ;;  %8168 = vmatprep.subr.bf16.mxu0 %v17729_v44  ;;  %v17797_v44 = vld [vmem:[%s19781_s21 + $0x18e8] ss:$16 sps:$4 sm:$0xff]  }
 0x5db   : > { %8209 = vmatprep.subr.bf16.mxu1 %v17732_v11  ;;  %v17800_v11 = vld [vmem:[%s19781_s21 + $0x1ae8] ss:$16 sps:$4 sm:$0xff]  }
 0x5dd   : > { %8169 = vmatpush1.bf16.msra.mxu0 %v17727_v12  ;;  %v17808_v12 = vld [vmem:[%s19781_s21 + $0x1b0c] ss:$16 sps:$4 sm:$0xff]  }
 0x5de   : > { %8210 = vmatpush1.bf16.msra.mxu1 %v17730_v14  ;;  %8170 = vmatprep.subr.bf16.mxu0 %v17735_v34  ;;  %v17803_v14 = vld [vmem:[%s19781_s21 + $0x1908] ss:$16 sps:$4 sm:$0xff]  }
 0x5df   : > { %8211 = vmatprep.subr.bf16.mxu1 %v17738_v20  ;;  %v17806_v34 = vld [vmem:[%s19781_s21 + $0x1b08] ss:$16 sps:$4 sm:$0xff]   ;;  %v17814_v20 = vld [vmem:[%s19781_s21 + $0x1b2c] ss:$16 sps:$4 sm:$0xff]  }
 0x5e1   : > { %8171 = vmatpush1.bf16.msra.mxu0 %v17733_v21  ;;  %v17809_v21 = vld [vmem:[%s19781_s21 + $0x1928] ss:$16 sps:$4 sm:$0xff]  }
 0x5e2   : > { %8212 = vmatpush1.bf16.msra.mxu1 %v17736_v63  ;;  %8172 = vmatprep.subr.bf16.mxu0 %v17741_v52  ;;  %v17812_v63 = vld [vmem:[%s19781_s21 + $0x1b28] ss:$16 sps:$4 sm:$0xff]   ;;  %v17817_v52 = vld [vmem:[%s19781_s21 + $0x194c] ss:$16 sps:$4 sm:$0xff]  }
 0x5e3   : > { %8213 = vmatprep.subr.bf16.mxu1 %v17744_v26  ;;  %v17820_v26 = vld [vmem:[%s19781_s21 + $0x1b4c] ss:$16 sps:$4 sm:$0xff]  }
 0x5e5   : > { %8173 = vmatpush1.bf16.msra.mxu0 %v17739_v40  ;;  %v17815_v40 = vld [vmem:[%s19781_s21 + $0x1948] ss:$16 sps:$4 sm:$0xff]  }
 0x5e6   : > { %8214 = vmatpush1.bf16.msra.mxu1 %v17742_v0  ;;  %8174 = vmatprep.subr.bf16.mxu0 %v17747_v23  ;;  %v17818_v0 = vld [vmem:[%s19781_s21 + $0x1b48] ss:$16 sps:$4 sm:$0xff]   ;;  %v17823_v23 = vld [vmem:[%s19781_s21 + $0x196c] ss:$16 sps:$4 sm:$0xff]  }
 0x5e7   : > { %8215 = vmatprep.subr.bf16.mxu1 %v17750_v24  ;;  %v17826_v24 = vld [vmem:[%s19781_s21 + $0x1b6c] ss:$16 sps:$4 sm:$0xff]  }
 0x5e9   : > { %8175 = vmatpush1.bf16.msra.mxu0 %v17745_v27  ;;  %v17821_v27 = vld [vmem:[%s19781_s21 + $0x1968] ss:$16 sps:$4 sm:$0xff]  }
 0x5ea   : > { %8216 = vmatpush1.bf16.msra.mxu1 %v17748_v28  ;;  %8226 = vmatprep.subr.bf16.mxu0 %v17757_v30  ;;  %v17824_v28 = vld [vmem:[%s19781_s21 + $0x1b68] ss:$16 sps:$4 sm:$0xff]   ;;  %v17829_v30 = vld [vmem:[%s19781_s21 + $0x198c] ss:$16 sps:$4 sm:$0xff]  }
 0x5eb   : > { %8267 = vmatprep.subr.bf16.mxu1 %v17760_v5  ;;  %v17832_v5 = vld [vmem:[%s19781_s21 + $0x1b8c] ss:$16 sps:$4 sm:$0xff]  }
 0x5ec   : > { %8177 = vmatmul.mubr.bf16.vlgmr.msra.gmra.mrb[48].mxu0 %v20993_v22 }
 0x5ed   : > { %8218 = vmatmul.mubr.bf16.vlgmr.msra.gmra.mrb[48].mxu1 %v20997_v54  ;;  %8227 = vmatpush1.bf16.msra.mxu0 %v17755_v35  ;;  %v17827_v35 = vld [vmem:[%s19781_s21 + $0x1988] ss:$16 sps:$4 sm:$0xff]  }
 0x5ee   : > { %8268 = vmatpush1.bf16.msra.mxu1 %v17758_v37  ;;  %8228 = vmatprep.subr.bf16.mxu0 %v17763_v51  ;;  %v17830_v37 = vld [vmem:[%s19781_s21 + $0x1b88] ss:$16 sps:$4 sm:$0xff]   ;;  %v17835_v51 = vld [vmem:[%s19781_s21 + $0x19ac] ss:$16 sps:$4 sm:$0xff]  }
 0x5ef   : > { %8269 = vmatprep.subr.bf16.mxu1 %v17766_v38  ;;  %8258 = vmatprep.mubr.bf16.mxu0 %v20915_v36  ;;  %v17776_v36 = vld [vmem:[%s19781_s21 + $0x1a68] ss:$16 sps:$4 sm:$0xff]   ;;  %v17838_v38 = vld [vmem:[%s19781_s21 + $0x1bac] ss:$16 sps:$4 sm:$0xff]  }
 0x5f0   : > { %8299 = vmatprep.mubr.bf16.mxu1 %v20919_v17  ;;  %v17781_v17 = vld [vmem:[%s19781_s21 + $0x188c] ss:$16 sps:$4 sm:$0xff]  }
 0x5f1   : > { %8229 = vmatpush1.bf16.msra.mxu0 %v17761_v9  ;;  %v17833_v9 = vld [vmem:[%s19781_s21 + $0x19a8] ss:$16 sps:$4 sm:$0xff]  }
 0x5f2   : > { %8270 = vmatpush1.bf16.msra.mxu1 %v17764_v10  ;;  %8230 = vmatprep.subr.bf16.mxu0 %v17769_v39  ;;  %v17836_v10 = vld [vmem:[%s19781_s21 + $0x1ba8] ss:$16 sps:$4 sm:$0xff]   ;;  %v17841_v39 = vld [vmem:[%s19781_s21 + $0x19cc] ss:$16 sps:$4 sm:$0xff]  }
 0x5f3   : > { %8271 = vmatprep.subr.bf16.mxu1 %v17772_v1  ;;  %v17844_v1 = vld [vmem:[%s19781_s21 + $0x1bcc] ss:$16 sps:$4 sm:$0xff]  }
 0x5f5   : > { %8231 = vmatpush1.bf16.msra.mxu0 %v17767_v60  ;;  %v17839_v60 = vld [vmem:[%s19781_s21 + $0x19c8] ss:$16 sps:$4 sm:$0xff]  }
 0x5f6   : > { %8272 = vmatpush1.bf16.msra.mxu1 %v17770_v47  ;;  %8232 = vmatprep.subr.bf16.mxu0 %v17775_v48  ;;  %v17842_v47 = vld [vmem:[%s19781_s21 + $0x1bc8] ss:$16 sps:$4 sm:$0xff]   ;;  %v17847_v48 = vld [vmem:[%s19781_s21 + $0x19ec] ss:$16 sps:$4 sm:$0xff]  }
 0x5f7   : > { %8273 = vmatprep.subr.bf16.mxu1 %v17778_v62  ;;  %v17850_v62 = vld [vmem:[%s19781_s21 + $0x1bec] ss:$16 sps:$4 sm:$0xff]  }
 0x5f9   : > { %8233 = vmatpush1.bf16.msra.mxu0 %v17773_v33  ;;  %v17845_v33 = vld [vmem:[%s19781_s21 + $0x19e8] ss:$16 sps:$4 sm:$0xff]  }
 0x5fa   : > { %8274 = vmatpush1.bf16.msra.mxu1 %v17776_v36  ;;  %8234 = vmatprep.subr.bf16.mxu0 %v17781_v17  ;;  %v17848_v36 = vld [vmem:[%s19781_s21 + $0x1be8] ss:$16 sps:$4 sm:$0xff]   ;;  %v17853_v17 = vld [vmem:[%s19781_s21 + $0x1c04] ss:$16 sps:$4 sm:$0xff]  }
 0x5fb   : > { %8275 = vmatprep.subr.bf16.mxu1 %v17784_v16  ;;  %v17856_v16 = vld [vmem:[%s19781_s21 + $0x1e04] ss:$16 sps:$4 sm:$0xff]  }
 0x5fd   : > { %8235 = vmatpush1.bf16.msra.mxu0 %v17779_v53  ;;  %v21073_v53 = vld [vmem:[#allocation2 + $0x70] sm:$0xff] }
 0x5fe   : > { %8276 = vmatpush1.bf16.msra.mxu1 %v17782_v18  ;;  %8236 = vmatprep.subr.bf16.mxu0 %v17787_v50  ;;  %v21075_v18 = vld [vmem:[#allocation2 + $0x78] sm:$0xff] }
 0x5ff   : > { %8277 = vmatprep.subr.bf16.mxu1 %v17790_v57  ;;  %v6354_v43 = vpop.f32.mrb[36].mxu0  ;;  %v17851_v50 = vld [vmem:[%s19781_s21 + $0x1c00] ss:$16 sps:$4 sm:$0xff]  }
 0x600   : > { %v6395_v13 = vpop.f32.mrb[36].mxu1  ;;  %v6356_v31 = vpop.f32.mrb[37].mxu0  ;;  %v17854_v57 = vld [vmem:[%s19781_s21 + $0x1e00] ss:$16 sps:$4 sm:$0xff]  }
 0x601   : > { %v6396_v19 = vadd.f32 %v6395_v13, %v6354_v43  ;;  %v6397_v15 = vpop.f32.mrb[37].mxu1  ;;  %v6358_v56 = vpop.f32.mrb[38].mxu0  ;;  %8237 = vmatpush1.bf16.msra.mxu0 %v17785_v58  ;;  %v17859_v58 = vld [vmem:[%s19781_s21 + $0x1c24] ss:$16 sps:$4 sm:$0xff]   ;;  %v17857_v43 = vld [vmem:[%s19781_s21 + $0x1c20] ss:$16 sps:$4 sm:$0xff]  }
 0x602   : > { %v6398_v32 = vadd.f32 %v6397_v15, %v6356_v31  ;;  %v6399_v3 = vpop.f32.mrb[38].mxu1  ;;  %8278 = vmatpush1.bf16.msra.mxu1 %v17788_v59  ;;  %v6359_v8 = vpop.f32.mrb[39].mxu0  ;;  %8238 = vmatprep.subr.bf16.mxu0 %v17793_v2  ;;  %v17862_v59 = vld [vmem:[%s19781_s21 + $0x1e24] ss:$16 sps:$4 sm:$0xff]   ;;  %v21083_v2 = vcombine.high %v21073_v53, %v21073_v53  ;;  %v17860_v13 = vld [vmem:[%s19781_s21 + $0x1e20] ss:$16 sps:$4 sm:$0xff]  }
 0x603   : > { %v21030_v7 = vadd.f32 %v6396_v19, %v20862_v29  ;;  %v6400_v41 = vpop.f32.mrb[39].mxu1  ;;  %8279 = vmatprep.subr.bf16.mxu1 %v17796_v55  ;;  %v17805_v29 = vld [vmem:[%s19781_s21 + $0x190c] ss:$16 sps:$4 sm:$0xff]   ;;  %v21087_v55 = vcombine.high %v21075_v18, %v21075_v18  ;;  %v17865_v19 = vld [vmem:[%s19781_s21 + $0x1c44] ss:$16 sps:$4 sm:$0xff]  }
 0x604   : > { %v21035_v42 = vadd.f32 %v6398_v32, %v20867_v6  ;;  %v17811_v6 = vld [vmem:[%s19781_s21 + $0x192c] ss:$16 sps:$4 sm:$0xff]   ;;  %v17868_v31 = vld [vmem:[%s19781_s21 + $0x1e44] ss:$16 sps:$4 sm:$0xff]   ;;  %v17869_v56 = vld [vmem:[%s19781_s21 + $0x1c60] ss:$16 sps:$4 sm:$0xff]  }
 0x605   : > { %8239 = vmatpush1.bf16.msra.mxu0 %v17791_v61  ;;  %v17871_v15 = vld [vmem:[%s19781_s21 + $0x1c64] ss:$16 sps:$4 sm:$0xff]   ;;  %v17872_v3 = vld [vmem:[%s19781_s21 + $0x1e60] ss:$16 sps:$4 sm:$0xff]  }
 0x606   : > { %8280 = vmatpush1.bf16.msra.mxu1 %v17794_v4  ;;  %8240 = vmatprep.subr.bf16.mxu0 %v17799_v45  ;;  %v17874_v32 = vld [vmem:[%s19781_s21 + $0x1e64] ss:$16 sps:$4 sm:$0xff]   ;;  %v17875_v8 = vld [vmem:[%s19781_s21 + $0x1c80] ss:$16 sps:$4 sm:$0xff]  }
 0x607   : > { %8281 = vmatprep.subr.bf16.mxu1 %v17802_v46  ;;  %v17877_v61 = vld [vmem:[%s19781_s21 + $0x1c84] ss:$16 sps:$4 sm:$0xff]   ;;  %v17878_v41 = vld [vmem:[%s19781_s21 + $0x1e80] ss:$16 sps:$4 sm:$0xff]  }
 0x608   : > { %v17880_v4 = vld [vmem:[%s19781_s21 + $0x1e84] ss:$16 sps:$4 sm:$0xff]  }
 0x609   : > { %8241 = vmatpush1.bf16.msra.mxu0 %v17797_v44  ;;  %v17883_v45 = vld [vmem:[%s19781_s21 + $0x1ca4] ss:$16 sps:$4 sm:$0xff]   ;;  %v17881_v44 = vld [vmem:[%s19781_s21 + $0x1ca0] ss:$16 sps:$4 sm:$0xff]  }
 0x60a   : > { %8282 = vmatpush1.bf16.msra.mxu1 %v17800_v11  ;;  %8242 = vmatprep.subr.bf16.mxu0 %v17805_v29  ;;  %v17886_v46 = vld [vmem:[%s19781_s21 + $0x1ea4] ss:$16 sps:$4 sm:$0xff]   ;;  %v17884_v11 = vld [vmem:[%s19781_s21 + $0x1ea0] ss:$16 sps:$4 sm:$0xff]  }
 0x60b   : > { %8283 = vmatprep.subr.bf16.mxu1 %v17808_v12  ;;  %v17889_v29 = vld [vmem:[%s19781_s21 + $0x1cc4] ss:$16 sps:$4 sm:$0xff]  }
 0x60c   : > { %v17892_v12 = vld [vmem:[%s19781_s21 + $0x1ec4] ss:$16 sps:$4 sm:$0xff]  }
 0x60d   : > { %8243 = vmatpush1.bf16.msra.mxu0 %v17803_v14 }
 0x60e   : > { %8284 = vmatpush1.bf16.msra.mxu1 %v17806_v34  ;;  %8244 = vmatprep.subr.bf16.mxu0 %v17811_v6 }
 0x60f   : > { %8285 = vmatprep.subr.bf16.mxu1 %v17814_v20 }
 0x611   : > { %8245 = vmatpush1.bf16.msra.mxu0 %v17809_v21 }
 0x612   : > { %8286 = vmatpush1.bf16.msra.mxu1 %v17812_v63  ;;  %8246 = vmatprep.subr.bf16.mxu0 %v17817_v52 }
 0x613   : > { %8287 = vmatprep.subr.bf16.mxu1 %v17820_v26 }
 0x615   : > { %8247 = vmatpush1.bf16.msra.mxu0 %v17815_v40  ;;  %v17887_v40 = vld [vmem:[%s19781_s21 + $0x1cc0] ss:$16 sps:$4 sm:$0xff]  }
 0x616   : > { %8288 = vmatpush1.bf16.msra.mxu1 %v17818_v0  ;;  %8248 = vmatprep.subr.bf16.mxu0 %v17823_v23  ;;  %v17890_v0 = vld [vmem:[%s19781_s21 + $0x1ec0] ss:$16 sps:$4 sm:$0xff]  }
 0x617   : > { %8289 = vmatprep.subr.bf16.mxu1 %v17826_v24 }
 0x619   : > { %8249 = vmatpush1.bf16.msra.mxu0 %v17821_v27 }
 0x61a   : > { %8290 = vmatpush1.bf16.msra.mxu1 %v17824_v28  ;;  %8250 = vmatprep.subr.bf16.mxu0 %v17829_v30  ;;  %v17895_v28 = vld [vmem:[%s19781_s21 + $0x1ce4] ss:$16 sps:$4 sm:$0xff]  }
 0x61b   : > { %8291 = vmatprep.subr.bf16.mxu1 %v17832_v5  ;;  %v17898_v30 = vld [vmem:[%s19781_s21 + $0x1ee4] ss:$16 sps:$4 sm:$0xff]  }
 0x61d   : > { %8251 = vmatpush1.bf16.msra.mxu0 %v17827_v35  ;;  %v17893_v35 = vld [vmem:[%s19781_s21 + $0x1ce0] ss:$16 sps:$4 sm:$0xff]  }
 0x61e   : > { %8292 = vmatpush1.bf16.msra.mxu1 %v17830_v37  ;;  %8252 = vmatprep.subr.bf16.mxu0 %v17835_v51  ;;  %v17896_v37 = vld [vmem:[%s19781_s21 + $0x1ee0] ss:$16 sps:$4 sm:$0xff]   ;;  %v17904_v51 = vld [vmem:[%s19781_s21 + $0x1f04] ss:$16 sps:$4 sm:$0xff]  }
 0x61f   : > { %8293 = vmatprep.subr.bf16.mxu1 %v17838_v38  ;;  %v17899_v38 = vld [vmem:[%s19781_s21 + $0x1d00] ss:$16 sps:$4 sm:$0xff]  }
 0x621   : > { %8253 = vmatpush1.bf16.msra.mxu0 %v17833_v9  ;;  %v17902_v9 = vld [vmem:[%s19781_s21 + $0x1f00] ss:$16 sps:$4 sm:$0xff]  }
 0x622   : > { %8294 = vmatpush1.bf16.msra.mxu1 %v17836_v10  ;;  %8254 = vmatprep.subr.bf16.mxu0 %v17841_v39  ;;  %v17910_v10 = vld [vmem:[%s19781_s21 + $0x1f24] ss:$16 sps:$4 sm:$0xff]   ;;  %v17905_v39 = vld [vmem:[%s19781_s21 + $0x1d20] ss:$16 sps:$4 sm:$0xff]  }
 0x623   : > { %8295 = vmatprep.subr.bf16.mxu1 %v17844_v1  ;;  %v17908_v1 = vld [vmem:[%s19781_s21 + $0x1f20] ss:$16 sps:$4 sm:$0xff]  }
 0x625   : > { %8255 = vmatpush1.bf16.msra.mxu0 %v17839_v60  ;;  %v17913_v60 = vld [vmem:[%s19781_s21 + $0x1d44] ss:$16 sps:$4 sm:$0xff]  }
 0x626   : > { %8296 = vmatpush1.bf16.msra.mxu1 %v17842_v47  ;;  %8256 = vmatprep.subr.bf16.mxu0 %v17847_v48  ;;  %v17916_v47 = vld [vmem:[%s19781_s21 + $0x1f44] ss:$16 sps:$4 sm:$0xff]   ;;  %v17911_v48 = vld [vmem:[%s19781_s21 + $0x1d40] ss:$16 sps:$4 sm:$0xff]  }
 0x627   : > { %8297 = vmatprep.subr.bf16.mxu1 %v17850_v62  ;;  %v17914_v62 = vld [vmem:[%s19781_s21 + $0x1f40] ss:$16 sps:$4 sm:$0xff]  }
 0x629   : > { %8257 = vmatpush1.bf16.msra.mxu0 %v17845_v33  ;;  %v17919_v33 = vld [vmem:[%s19781_s21 + $0x1d64] ss:$16 sps:$4 sm:$0xff]  }
 0x62a   : > { %8298 = vmatpush1.bf16.msra.mxu1 %v17848_v36  ;;  %9097 = vmatprep.subr.bf16.mxu0 %v17853_v17  ;;  %v17922_v36 = vld [vmem:[%s19781_s21 + $0x1f64] ss:$16 sps:$4 sm:$0xff]   ;;  %v17917_v17 = vld [vmem:[%s19781_s21 + $0x1d60] ss:$16 sps:$4 sm:$0xff]  }
 0x62b   : > { %9138 = vmatprep.subr.bf16.mxu1 %v17856_v16  ;;  %v17920_v16 = vld [vmem:[%s19781_s21 + $0x1f60] ss:$16 sps:$4 sm:$0xff]  }
 0x62c   : > { %8259 = vmatmul.mubr.bf16.vlgmr.msra.gmra.mrb[52].mxu0 %v20993_v22  ;;  %v17863_v22 = vld [vmem:[%s19781_s21 + $0x1c40] ss:$16 sps:$4 sm:$0xff]  }
 0x62d   : > { %8300 = vmatmul.mubr.bf16.vlgmr.msra.gmra.mrb[52].mxu1 %v20997_v54  ;;  %9098 = vmatpush1.bf16.msra.mxu0 %v17851_v50  ;;  %v17866_v54 = vld [vmem:[%s19781_s21 + $0x1e40] ss:$16 sps:$4 sm:$0xff]   ;;  %v17925_v50 = vld [vmem:[%s19781_s21 + $0x1d84] ss:$16 sps:$4 sm:$0xff]  }
 0x62e   : > { %9139 = vmatpush1.bf16.msra.mxu1 %v17854_v57  ;;  %9099 = vmatprep.subr.bf16.mxu0 %v17859_v58  ;;  %v17928_v57 = vld [vmem:[%s19781_s21 + $0x1f84] ss:$16 sps:$4 sm:$0xff]   ;;  %v17923_v58 = vld [vmem:[%s19781_s21 + $0x1d80] ss:$16 sps:$4 sm:$0xff]  }
 0x62f   : > { %9140 = vmatprep.subr.bf16.mxu1 %v17862_v59  ;;  %9129 = vmatprep.mubr.bf16.mxu0 %v21083_v2  ;;  %v17926_v59 = vld [vmem:[%s19781_s21 + $0x1f80] ss:$16 sps:$4 sm:$0xff]  }
 0x630   : > { %9170 = vmatprep.mubr.bf16.mxu1 %v21087_v55 }
 0x631   : > { %9100 = vmatpush1.bf16.msra.mxu0 %v17857_v43  ;;  %v17931_v43 = vld [vmem:[%s19781_s21 + $0x1da4] ss:$16 sps:$4 sm:$0xff]  }
 0x632   : > { %9141 = vmatpush1.bf16.msra.mxu1 %v17860_v13  ;;  %9101 = vmatprep.subr.bf16.mxu0 %v17865_v19  ;;  %v17934_v13 = vld [vmem:[%s19781_s21 + $0x1fa4] ss:$16 sps:$4 sm:$0xff]   ;;  %v17929_v19 = vld [vmem:[%s19781_s21 + $0x1da0] ss:$16 sps:$4 sm:$0xff]  }
 0x633   : > { %9142 = vmatprep.subr.bf16.mxu1 %v17868_v31  ;;  %v17932_v31 = vld [vmem:[%s19781_s21 + $0x1fa0] ss:$16 sps:$4 sm:$0xff]  }
 0x635   : > { %9102 = vmatpush1.bf16.msra.mxu0 %v17863_v22  ;;  %v17937_v22 = vld [vmem:[%s19781_s21 + $0x1dc4] ss:$16 sps:$4 sm:$0xff]  }
 0x636   : > { %9143 = vmatpush1.bf16.msra.mxu1 %v17866_v54  ;;  %9103 = vmatprep.subr.bf16.mxu0 %v17871_v15  ;;  %v17940_v54 = vld [vmem:[%s19781_s21 + $0x1fc4] ss:$16 sps:$4 sm:$0xff]   ;;  %v17935_v15 = vld [vmem:[%s19781_s21 + $0x1dc0] ss:$16 sps:$4 sm:$0xff]  }
 0x637   : > { %9144 = vmatprep.subr.bf16.mxu1 %v17874_v32  ;;  %v17938_v32 = vld [vmem:[%s19781_s21 + $0x1fc0] ss:$16 sps:$4 sm:$0xff]  }
 0x639   : > { %9104 = vmatpush1.bf16.msra.mxu0 %v17869_v56  ;;  %v17943_v56 = vld [vmem:[%s19781_s21 + $0x1de4] ss:$16 sps:$4 sm:$0xff]  }
 0x63a   : > { %9145 = vmatpush1.bf16.msra.mxu1 %v17872_v3  ;;  %9105 = vmatprep.subr.bf16.mxu0 %v17877_v61  ;;  %v17946_v3 = vld [vmem:[%s19781_s21 + $0x1fe4] ss:$16 sps:$4 sm:$0xff]   ;;  %v17941_v61 = vld [vmem:[%s19781_s21 + $0x1de0] ss:$16 sps:$4 sm:$0xff]  }
 0x63b   : > { %9146 = vmatprep.subr.bf16.mxu1 %v17880_v4  ;;  %v17944_v4 = vld [vmem:[%s19781_s21 + $0x1fe0] ss:$16 sps:$4 sm:$0xff]  }
 0x63d   : > { %9106 = vmatpush1.bf16.msra.mxu0 %v17875_v8  ;;  %v17953_v8 = vld [vmem:[%s19781_s21 + $0x1c0c] ss:$16 sps:$4 sm:$0xff]  }
 0x63e   : > { %9147 = vmatpush1.bf16.msra.mxu1 %v17878_v41  ;;  %9107 = vmatprep.subr.bf16.mxu0 %v17883_v45  ;;  %v17956_v41 = vld [vmem:[%s19781_s21 + $0x1e0c] ss:$16 sps:$4 sm:$0xff]   ;;  %v21161_v45 = vcombine.low %v21073_v53, %v21073_v53  ;;  %v17957_v53 = vld [vmem:[%s19781_s21 + $0x1c28] ss:$16 sps:$4 sm:$0xff]  }
 0x63f   : > { %9148 = vmatprep.subr.bf16.mxu1 %v17886_v46  ;;  %v7225_v14 = vpop.f32.mrb[40].mxu0  ;;  %v21165_v46 = vcombine.low %v21075_v18, %v21075_v18  ;;  %v17960_v18 = vld [vmem:[%s19781_s21 + $0x1e28] ss:$16 sps:$4 sm:$0xff]  }
 0x640   : > { %v7266_v34 = vpop.f32.mrb[40].mxu1  ;;  %v7227_v20 = vpop.f32.mrb[41].mxu0 }
 0x641   : > { %v7267_v6 = vadd.f32 %v7266_v34, %v7225_v14  ;;  %v7268_v21 = vpop.f32.mrb[41].mxu1  ;;  %v7229_v52 = vpop.f32.mrb[42].mxu0  ;;  %9108 = vmatpush1.bf16.msra.mxu0 %v17881_v44  ;;  %v17951_v44 = vld [vmem:[%s19781_s21 + $0x1c08] ss:$16 sps:$4 sm:$0xff]   ;;  %v17965_v14 = vld [vmem:[%s19781_s21 + $0x1c4c] ss:$16 sps:$4 sm:$0xff]  }
 0x642   : > { %v7269_v63 = vadd.f32 %v7268_v21, %v7227_v20  ;;  %v7270_v26 = vpop.f32.mrb[42].mxu1  ;;  %9149 = vmatpush1.bf16.msra.mxu1 %v17884_v11  ;;  %v7230_v24 = vpop.f32.mrb[43].mxu0  ;;  %9109 = vmatprep.subr.bf16.mxu0 %v17889_v29  ;;  %v17954_v11 = vld [vmem:[%s19781_s21 + $0x1e08] ss:$16 sps:$4 sm:$0xff]   ;;  %v17959_v29 = vld [vmem:[%s19781_s21 + $0x1c2c] ss:$16 sps:$4 sm:$0xff]  }
 0x643   : > { %v21116_v23 = vadd.f32 %v7267_v6, %v20948_v49  ;;  %v7271_v27 = vpop.f32.mrb[43].mxu1  ;;  %9150 = vmatprep.subr.bf16.mxu1 %v17892_v12  ;;  %v17901_v49 = vld [vmem:[%s19781_s21 + $0x1d04] ss:$16 sps:$4 sm:$0xff]   ;;  %v17962_v12 = vld [vmem:[%s19781_s21 + $0x1e2c] ss:$16 sps:$4 sm:$0xff]  }
 0x644   : > { %v21121_v5 = vadd.f32 %v7269_v63, %v20953_v25  ;;  %v17907_v25 = vld [vmem:[%s19781_s21 + $0x1d24] ss:$16 sps:$4 sm:$0xff]   ;;  %v17968_v34 = vld [vmem:[%s19781_s21 + $0x1e4c] ss:$16 sps:$4 sm:$0xff]   ;;  %v17963_v6 = vld [vmem:[%s19781_s21 + $0x1c48] ss:$16 sps:$4 sm:$0xff]  }
 0x645   : > { %9110 = vmatpush1.bf16.msra.mxu0 %v17887_v40  ;;  %v17966_v20 = vld [vmem:[%s19781_s21 + $0x1e48] ss:$16 sps:$4 sm:$0xff]   ;;  %v17971_v21 = vld [vmem:[%s19781_s21 + $0x1c6c] ss:$16 sps:$4 sm:$0xff]  }
 0x646   : > { %9151 = vmatpush1.bf16.msra.mxu1 %v17890_v0  ;;  %9111 = vmatprep.subr.bf16.mxu0 %v17895_v28  ;;  %v17974_v63 = vld [vmem:[%s19781_s21 + $0x1e6c] ss:$16 sps:$4 sm:$0xff]   ;;  %v17969_v52 = vld [vmem:[%s19781_s21 + $0x1c68] ss:$16 sps:$4 sm:$0xff]  }
 0x647   : > { %9152 = vmatprep.subr.bf16.mxu1 %v17898_v30  ;;  %v17980_v26 = vld [vmem:[%s19781_s21 + $0x1e8c] ss:$16 sps:$4 sm:$0xff]   ;;  %v17975_v40 = vld [vmem:[%s19781_s21 + $0x1c88] ss:$16 sps:$4 sm:$0xff]  }
 0x648   : > { %v17978_v0 = vld [vmem:[%s19781_s21 + $0x1e88] ss:$16 sps:$4 sm:$0xff]   ;;  %v17983_v24 = vld [vmem:[%s19781_s21 + $0x1cac] ss:$16 sps:$4 sm:$0xff]  }
 0x649   : > { %9112 = vmatpush1.bf16.msra.mxu0 %v17893_v35  ;;  %v17986_v27 = vld [vmem:[%s19781_s21 + $0x1eac] ss:$16 sps:$4 sm:$0xff]   ;;  %v17981_v28 = vld [vmem:[%s19781_s21 + $0x1ca8] ss:$16 sps:$4 sm:$0xff]  }
 0x64a   : > { %9153 = vmatpush1.bf16.msra.mxu1 %v17896_v37  ;;  %9113 = vmatprep.subr.bf16.mxu0 %v17901_v49  ;;  %v17984_v30 = vld [vmem:[%s19781_s21 + $0x1ea8] ss:$16 sps:$4 sm:$0xff]   ;;  %v17989_v35 = vld [vmem:[%s19781_s21 + $0x1ccc] ss:$16 sps:$4 sm:$0xff]  }
 0x64b   : > { %9154 = vmatprep.subr.bf16.mxu1 %v17904_v51  ;;  %v17992_v37 = vld [vmem:[%s19781_s21 + $0x1ecc] ss:$16 sps:$4 sm:$0xff]  }
 0x64d   : > { %9114 = vmatpush1.bf16.msra.mxu0 %v17899_v38 }
 0x64e   : > { %9155 = vmatpush1.bf16.msra.mxu1 %v17902_v9  ;;  %9115 = vmatprep.subr.bf16.mxu0 %v17907_v25 }
 0x64f   : > { %9156 = vmatprep.subr.bf16.mxu1 %v17910_v10 }
 0x651   : > { %9116 = vmatpush1.bf16.msra.mxu0 %v17905_v39 }
 0x652   : > { %9157 = vmatpush1.bf16.msra.mxu1 %v17908_v1  ;;  %9117 = vmatprep.subr.bf16.mxu0 %v17913_v60  ;;  %v17987_v60 = vld [vmem:[%s19781_s21 + $0x1cc8] ss:$16 sps:$4 sm:$0xff]  }
 0x653   : > { %9158 = vmatprep.subr.bf16.mxu1 %v17916_v47  ;;  %v17990_v47 = vld [vmem:[%s19781_s21 + $0x1ec8] ss:$16 sps:$4 sm:$0xff]  }
 0x655   : > { %9118 = vmatpush1.bf16.msra.mxu0 %v17911_v48 }
 0x656   : > { %9159 = vmatpush1.bf16.msra.mxu1 %v17914_v62  ;;  %9119 = vmatprep.subr.bf16.mxu0 %v17919_v33 }
 0x657   : > { %9160 = vmatprep.subr.bf16.mxu1 %v17922_v36  ;;  %v17995_v36 = vld [vmem:[%s19781_s21 + $0x1cec] ss:$16 sps:$4 sm:$0xff]  }
 0x659   : > { %9120 = vmatpush1.bf16.msra.mxu0 %v17917_v17  ;;  %v17998_v17 = vld [vmem:[%s19781_s21 + $0x1eec] ss:$16 sps:$4 sm:$0xff]  }
 0x65a   : > { %9161 = vmatpush1.bf16.msra.mxu1 %v17920_v16  ;;  %9121 = vmatprep.subr.bf16.mxu0 %v17925_v50  ;;  %v17993_v50 = vld [vmem:[%s19781_s21 + $0x1ce8] ss:$16 sps:$4 sm:$0xff]  }
 0x65b   : > { %9162 = vmatprep.subr.bf16.mxu1 %v17928_v57  ;;  %v17996_v57 = vld [vmem:[%s19781_s21 + $0x1ee8] ss:$16 sps:$4 sm:$0xff]  }
 0x65d   : > { %9122 = vmatpush1.bf16.msra.mxu0 %v17923_v58  ;;  %v18004_v58 = vld [vmem:[%s19781_s21 + $0x1f0c] ss:$16 sps:$4 sm:$0xff]  }
 0x65e   : > { %9163 = vmatpush1.bf16.msra.mxu1 %v17926_v59  ;;  %9123 = vmatprep.subr.bf16.mxu0 %v17931_v43  ;;  %v17999_v59 = vld [vmem:[%s19781_s21 + $0x1d08] ss:$16 sps:$4 sm:$0xff]  }
 0x65f   : > { %9164 = vmatprep.subr.bf16.mxu1 %v17934_v13  ;;  %v18002_v43 = vld [vmem:[%s19781_s21 + $0x1f08] ss:$16 sps:$4 sm:$0xff]   ;;  %v18010_v13 = vld [vmem:[%s19781_s21 + $0x1f2c] ss:$16 sps:$4 sm:$0xff]  }
 0x661   : > { %9124 = vmatpush1.bf16.msra.mxu0 %v17929_v19  ;;  %v18005_v19 = vld [vmem:[%s19781_s21 + $0x1d28] ss:$16 sps:$4 sm:$0xff]  }
 0x662   : > { %9165 = vmatpush1.bf16.msra.mxu1 %v17932_v31  ;;  %9125 = vmatprep.subr.bf16.mxu0 %v17937_v22  ;;  %v18008_v31 = vld [vmem:[%s19781_s21 + $0x1f28] ss:$16 sps:$4 sm:$0xff]   ;;  %v18013_v22 = vld [vmem:[%s19781_s21 + $0x1d4c] ss:$16 sps:$4 sm:$0xff]  }
 0x663   : > { %9166 = vmatprep.subr.bf16.mxu1 %v17940_v54  ;;  %v18016_v54 = vld [vmem:[%s19781_s21 + $0x1f4c] ss:$16 sps:$4 sm:$0xff]  }
 0x665   : > { %9126 = vmatpush1.bf16.msra.mxu0 %v17935_v15  ;;  %v18011_v15 = vld [vmem:[%s19781_s21 + $0x1d48] ss:$16 sps:$4 sm:$0xff]  }
 0x666   : > { %9167 = vmatpush1.bf16.msra.mxu1 %v17938_v32  ;;  %9127 = vmatprep.subr.bf16.mxu0 %v17943_v56  ;;  %v18014_v32 = vld [vmem:[%s19781_s21 + $0x1f48] ss:$16 sps:$4 sm:$0xff]   ;;  %v18019_v56 = vld [vmem:[%s19781_s21 + $0x1d6c] ss:$16 sps:$4 sm:$0xff]  }
 0x667   : > { %9168 = vmatprep.subr.bf16.mxu1 %v17946_v3  ;;  %v18022_v3 = vld [vmem:[%s19781_s21 + $0x1f6c] ss:$16 sps:$4 sm:$0xff]  }
 0x669   : > { %9128 = vmatpush1.bf16.msra.mxu0 %v17941_v61  ;;  %v18017_v61 = vld [vmem:[%s19781_s21 + $0x1d68] ss:$16 sps:$4 sm:$0xff]  }
 0x66a   : > { %9169 = vmatpush1.bf16.msra.mxu1 %v17944_v4  ;;  %9179 = vmatprep.subr.bf16.mxu0 %v17953_v8  ;;  %v18020_v4 = vld [vmem:[%s19781_s21 + $0x1f68] ss:$16 sps:$4 sm:$0xff]   ;;  %v18025_v8 = vld [vmem:[%s19781_s21 + $0x1d8c] ss:$16 sps:$4 sm:$0xff]  }
 0x66b   : > { %9220 = vmatprep.subr.bf16.mxu1 %v17956_v41  ;;  %v18028_v41 = vld [vmem:[%s19781_s21 + $0x1f8c] ss:$16 sps:$4 sm:$0xff]  }
 0x66c   : > { %9130 = vmatmul.mubr.bf16.vlgmr.msra.gmra.mrb[56].mxu0 %v21161_v45 }
 0x66d   : > { %9171 = vmatmul.mubr.bf16.vlgmr.msra.gmra.mrb[56].mxu1 %v21165_v46  ;;  %9180 = vmatpush1.bf16.msra.mxu0 %v17951_v44  ;;  %v18023_v44 = vld [vmem:[%s19781_s21 + $0x1d88] ss:$16 sps:$4 sm:$0xff]  }
 0x66e   : > { %9221 = vmatpush1.bf16.msra.mxu1 %v17954_v11  ;;  %9181 = vmatprep.subr.bf16.mxu0 %v17959_v29  ;;  %v18026_v11 = vld [vmem:[%s19781_s21 + $0x1f88] ss:$16 sps:$4 sm:$0xff]   ;;  %v18031_v29 = vld [vmem:[%s19781_s21 + $0x1dac] ss:$16 sps:$4 sm:$0xff]  }
 0x66f   : > { %9222 = vmatprep.subr.bf16.mxu1 %v17962_v12  ;;  %9211 = vmatprep.mubr.bf16.mxu0 %v21083_v2  ;;  %v17972_v2 = vld [vmem:[%s19781_s21 + $0x1e68] ss:$16 sps:$4 sm:$0xff]   ;;  %v18034_v12 = vld [vmem:[%s19781_s21 + $0x1fac] ss:$16 sps:$4 sm:$0xff]  }
 0x670   : > { %9252 = vmatprep.mubr.bf16.mxu1 %v21087_v55  ;;  %v17977_v55 = vld [vmem:[%s19781_s21 + $0x1c8c] ss:$16 sps:$4 sm:$0xff]  }
 0x671   : > { %9182 = vmatpush1.bf16.msra.mxu0 %v17957_v53  ;;  %v18029_v53 = vld [vmem:[%s19781_s21 + $0x1da8] ss:$16 sps:$4 sm:$0xff]  }
 0x672   : > { %9223 = vmatpush1.bf16.msra.mxu1 %v17960_v18  ;;  %9183 = vmatprep.subr.bf16.mxu0 %v17965_v14  ;;  %v18032_v18 = vld [vmem:[%s19781_s21 + $0x1fa8] ss:$16 sps:$4 sm:$0xff]   ;;  %v18037_v14 = vld [vmem:[%s19781_s21 + $0x1dcc] ss:$16 sps:$4 sm:$0xff]  }
 0x673   : > { %9224 = vmatprep.subr.bf16.mxu1 %v17968_v34  ;;  %v18040_v34 = vld [vmem:[%s19781_s21 + $0x1fcc] ss:$16 sps:$4 sm:$0xff]  }
 0x675   : > { %9184 = vmatpush1.bf16.msra.mxu0 %v17963_v6  ;;  %v18035_v6 = vld [vmem:[%s19781_s21 + $0x1dc8] ss:$16 sps:$4 sm:$0xff]  }
 0x676   : > { %9225 = vmatpush1.bf16.msra.mxu1 %v17966_v20  ;;  %9185 = vmatprep.subr.bf16.mxu0 %v17971_v21  ;;  %v18038_v20 = vld [vmem:[%s19781_s21 + $0x1fc8] ss:$16 sps:$4 sm:$0xff]   ;;  %v18043_v21 = vld [vmem:[%s19781_s21 + $0x1dec] ss:$16 sps:$4 sm:$0xff]  }
 0x677   : > { %9226 = vmatprep.subr.bf16.mxu1 %v17974_v63  ;;  %v18046_v63 = vld [vmem:[%s19781_s21 + $0x1fec] ss:$16 sps:$4 sm:$0xff]  }
 0x679   : > { %9186 = vmatpush1.bf16.msra.mxu0 %v17969_v52  ;;  %v18041_v52 = vld [vmem:[%s19781_s21 + $0x1de8] ss:$16 sps:$4 sm:$0xff]  }
 0x67a   : > { %9227 = vmatpush1.bf16.msra.mxu1 %v17972_v2  ;;  %9187 = vmatprep.subr.bf16.mxu0 %v17977_v55  ;;  %v18044_v2 = vld [vmem:[%s19781_s21 + $0x1fe8] ss:$16 sps:$4 sm:$0xff]  }
 0x67b   : > { %9228 = vmatprep.subr.bf16.mxu1 %v17980_v26 }
 0x67d   : > { %9188 = vmatpush1.bf16.msra.mxu0 %v17975_v40 }
 0x67e   : > { %9229 = vmatpush1.bf16.msra.mxu1 %v17978_v0  ;;  %9189 = vmatprep.subr.bf16.mxu0 %v17983_v24 }
 0x67f   : > { %9230 = vmatprep.subr.bf16.mxu1 %v17986_v27  ;;  %v7307_v49 = vpop.f32.mrb[44].mxu0 }
 0x680   : > { %v7348_v51 = vpop.f32.mrb[44].mxu1  ;;  %v7309_v9 = vpop.f32.mrb[45].mxu0 }
 0x681   : > { %v7349_v38 = vadd.f32 %v7348_v51, %v7307_v49  ;;  %v7350_v25 = vpop.f32.mrb[45].mxu1  ;;  %v7311_v39 = vpop.f32.mrb[46].mxu0  ;;  %9190 = vmatpush1.bf16.msra.mxu0 %v17981_v28 }
 0x682   : > { %v7351_v10 = vadd.f32 %v7350_v25, %v7309_v9  ;;  %v7352_v1 = vpop.f32.mrb[46].mxu1  ;;  %9231 = vmatpush1.bf16.msra.mxu1 %v17984_v30  ;;  %v7312_v62 = vpop.f32.mrb[47].mxu0  ;;  %9191 = vmatprep.subr.bf16.mxu0 %v17989_v35 }
 0x683   : > { %v21198_v48 = vadd.f32 %v7349_v38, %v21030_v7  ;;  %v7353_v33 = vpop.f32.mrb[47].mxu1  ;;  %9232 = vmatprep.subr.bf16.mxu1 %v17992_v37  ;;  %v18001_v7 = vld [vmem:[%s19781_s21 + $0x1d0c] ss:$16 sps:$4 sm:$0xff]   ;;  %v9267_v38 = vlaneseq }
 0x684   : > { %v21203_v16 = vadd.f32 %v7351_v10, %v21035_v42  ;;  %v18007_v42 = vld [vmem:[%s19781_s21 + $0x1d2c] ss:$16 sps:$4 sm:$0xff]   ;;  %v9265_v33 = vld [vmem:[%s545_s27] sm:$0xf] }
 0x685   : > { %9192 = vmatpush1.bf16.msra.mxu0 %v17987_v60  ;;  %v9268_v9 = vshrl.u32 %v9267_v38, 7 }
 0x686   : > { %9233 = vmatpush1.bf16.msra.mxu1 %v17990_v47  ;;  %9193 = vmatprep.subr.bf16.mxu0 %v17995_v36 }
 0x687   : > { %9234 = vmatprep.subr.bf16.mxu1 %v17998_v17  ;;  %v9277_v1 = vsub.s32 2, %v9268_v9  ;;  %v9281_v36 = vsub.s32 3, %v9268_v9 }
 0x689   : > { %9194 = vmatpush1.bf16.msra.mxu0 %v17993_v50 }
 0x68a   : > { %9235 = vmatpush1.bf16.msra.mxu1 %v17996_v57  ;;  %9195 = vmatprep.subr.bf16.mxu0 %v18001_v7  ;;  %v9278_v57 = vrot.slane %v9265_v33, %v9277_v1  ;;  %v9282_v7 = vrot.slane %v9265_v33, %v9281_v36 }
 0x68b   : > { %9236 = vmatprep.subr.bf16.mxu1 %v18004_v58  ;;  %v9269_v58 = vsub.s32 0, %v9268_v9 }
 0x68d   : > { %9196 = vmatpush1.bf16.msra.mxu0 %v17999_v59  ;;  %v9273_v59 = vsub.s32 1, %v9268_v9 }
 0x68e   : > { %9237 = vmatpush1.bf16.msra.mxu1 %v18002_v43  ;;  %9197 = vmatprep.subr.bf16.mxu0 %v18007_v42 }
 0x68f   : > { %9238 = vmatprep.subr.bf16.mxu1 %v18010_v13 }
 0x691   : > { %9198 = vmatpush1.bf16.msra.mxu0 %v18005_v19  ;;  %v9270_v19 = vrot.slane %v9265_v33, %v9269_v58 }
 0x692   : > { %9239 = vmatpush1.bf16.msra.mxu1 %v18008_v31  ;;  %9199 = vmatprep.subr.bf16.mxu0 %v18013_v22 }
 0x693   : > { %9240 = vmatprep.subr.bf16.mxu1 %v18016_v54 }
 0x695   : > { %9200 = vmatpush1.bf16.msra.mxu0 %v18011_v15  ;;  %v9274_v15 = vrot.slane %v9265_v33, %v9273_v59 }
 0x696   : > { %9241 = vmatpush1.bf16.msra.mxu1 %v18014_v32  ;;  %9201 = vmatprep.subr.bf16.mxu0 %v18019_v56 }
 0x697   : > { %9242 = vmatprep.subr.bf16.mxu1 %v18022_v3 }
 0x699   : > { %9202 = vmatpush1.bf16.msra.mxu0 %v18017_v61 }
 0x69a   : > { %9243 = vmatpush1.bf16.msra.mxu1 %v18020_v4  ;;  %9203 = vmatprep.subr.bf16.mxu0 %v18025_v8 }
 0x69b   : > { %9244 = vmatprep.subr.bf16.mxu1 %v18028_v41 }
 0x69d   : > { %9204 = vmatpush1.bf16.msra.mxu0 %v18023_v44 }
 0x69e   : > { %9245 = vmatpush1.bf16.msra.mxu1 %v18026_v11  ;;  %9205 = vmatprep.subr.bf16.mxu0 %v18031_v29 }
 0x69f   : > { %9246 = vmatprep.subr.bf16.mxu1 %v18034_v12 }
 0x6a1   : > { %9206 = vmatpush1.bf16.msra.mxu0 %v18029_v53 }
 0x6a2   : > { %9247 = vmatpush1.bf16.msra.mxu1 %v18032_v18  ;;  %9207 = vmatprep.subr.bf16.mxu0 %v18037_v14 }
 0x6a3   : > { %9248 = vmatprep.subr.bf16.mxu1 %v18040_v34 }
 0x6a5   : > { %9208 = vmatpush1.bf16.msra.mxu0 %v18035_v6 }
 0x6a6   : > { %9249 = vmatpush1.bf16.msra.mxu1 %v18038_v20  ;;  %9209 = vmatprep.subr.bf16.mxu0 %v18043_v21 }
 0x6a7   : > { %9250 = vmatprep.subr.bf16.mxu1 %v18046_v63 }
 0x6a9   : > { %9210 = vmatpush1.bf16.msra.mxu0 %v18041_v52 }
 0x6aa   : > { %9251 = vmatpush1.bf16.msra.mxu1 %v18044_v2 }
 0x6ac   : > { %9212 = vmatmul.mubr.bf16.vlgmr.msra.gmra.mrb[60].mxu0 %v21161_v45 }
 0x6ad   : > { %9253 = vmatmul.mubr.bf16.vlgmr.msra.gmra.mrb[60].mxu1 %v21165_v46 }
 0x6bf   : > { %v8178_v55 = vpop.f32.mrb[48].mxu0 }
 0x6c0   : > { %v8219_v26 = vpop.f32.mrb[48].mxu1  ;;  %v8180_v0 = vpop.f32.mrb[49].mxu0 }
 0x6c1   : > { %v8220_v40 = vadd.f32 %v8219_v26, %v8178_v55  ;;  %v8221_v24 = vpop.f32.mrb[49].mxu1  ;;  %v8182_v28 = vpop.f32.mrb[50].mxu0 }
 0x6c2   : > { %v8222_v27 = vadd.f32 %v8221_v24, %v8180_v0  ;;  %v8223_v30 = vpop.f32.mrb[50].mxu1  ;;  %v8183_v37 = vpop.f32.mrb[51].mxu0 }
 0x6c3   : > { %v8308_v35 = vadd.f32 %v8220_v40, %v21116_v23  ;;  %v8224_v49 = vpop.f32.mrb[51].mxu1 }
 0x6c4   : > { %v8309_v51 = vadd.f32 %v8222_v27, %v21121_v5 }
 0x6ff   : > { %v8260_v45 = vpop.f32.mrb[52].mxu0 }
 0x700   : > { %v8301_v25 = vpop.f32.mrb[52].mxu1  ;;  %v8262_v10 = vpop.f32.mrb[53].mxu0 }
 0x701   : > { %v8302_v46 = vadd.f32 %v8301_v25, %v8260_v45  ;;  %v8303_v39 = vpop.f32.mrb[53].mxu1  ;;  %v8264_v47 = vpop.f32.mrb[54].mxu0 }
 0x702   : > { %v8304_v60 = vadd.f32 %v8303_v39, %v8262_v10  ;;  %v8305_v62 = vpop.f32.mrb[54].mxu1  ;;  %v8265_v17 = vpop.f32.mrb[55].mxu0 }
 0x703   : > { %v8310_v23 = vadd.f32 %v8302_v46, %v21198_v48  ;;  %v8306_v50 = vpop.f32.mrb[55].mxu1 }
 0x704   : > { %v8311_v5 = vadd.f32 %v8304_v60, %v21203_v16 }
 0x73f   : > { %v9131_v43 = vpop.f32.mrb[56].mxu0 }
 0x740   : > { %v9172_v42 = vpop.f32.mrb[56].mxu1  ;;  %v9133_v31 = vpop.f32.mrb[57].mxu0 }
 0x741   : > { %v9173_v13 = vadd.f32 %v9172_v42, %v9131_v43  ;;  %v9174_v22 = vpop.f32.mrb[57].mxu1  ;;  %v9135_v32 = vpop.f32.mrb[58].mxu0 }
 0x742   : > { %v9175_v54 = vadd.f32 %v9174_v22, %v9133_v31  ;;  %v9176_v56 = vpop.f32.mrb[58].mxu1  ;;  %v9136_v3 = vpop.f32.mrb[59].mxu0 }
 0x743   : > { %v9261_v48 = vadd.f32 %v9173_v13, %v8308_v35  ;;  %v9177_v61 = vpop.f32.mrb[59].mxu1 }
 0x744   : > { %v9262_v4 = vadd.f32 %v9175_v54, %v8309_v51 }
 0x745   : > { %v9287_v8 = vadd.f32 %v9270_v19, %v9261_v48 }
 0x746   : > { %v9288_v16 = vadd.f32 %v9274_v15, %v9262_v4 }
 0x747   : > { %v9291_v41 = vmax.f32 %v9287_v8, 0.0 }
 0x748   : > { %v9292_v44 = vmax.f32 %v9288_v16, 0.0 }
 0x74a   : > { %v16036_v11 = vpack.c.bf16 %v9292_v44, %v9291_v41 }
 0x74c   : > { %9315 = vst [vmem:[%s9314_s19] sm:$0xff] %v16036_v11 }
 0x77f   : > { %v9213_v29 = vpop.f32.mrb[60].mxu0 }
 0x780   : > { %v9254_v12 = vpop.f32.mrb[60].mxu1  ;;  %v9215_v18 = vpop.f32.mrb[61].mxu0 }
 0x781   : > { %v9255_v53 = vadd.f32 %v9254_v12, %v9213_v29  ;;  %v9256_v14 = vpop.f32.mrb[61].mxu1  ;;  %v9217_v6 = vpop.f32.mrb[62].mxu0 }
 0x782   : > { %v9257_v34 = vadd.f32 %v9256_v14, %v9215_v18  ;;  %v9258_v20 = vpop.f32.mrb[62].mxu1  ;;  %v9218_v63 = vpop.f32.mrb[63].mxu0 }
 0x783   : > { %v9263_v21 = vadd.f32 %v9255_v53, %v8310_v23  ;;  %v9259_v52 = vpop.f32.mrb[63].mxu1 }
 0x784   : > { %v9264_v2 = vadd.f32 %v9257_v34, %v8311_v5 }
 0x785   : > { %v9289_v55 = vadd.f32 %v9278_v57, %v9263_v21 }
 0x786   : > { %v9290_v26 = vadd.f32 %v9282_v7, %v9264_v2 }
 0x787   : > { %v9293_v40 = vmax.f32 %v9289_v55, 0.0 }
 0x788   : > { %v9294_v0 = vmax.f32 %v9290_v26, 0.0 }
 0x78a   : > { %v16037_v24 = vpack.c.bf16 %v9294_v0, %v9293_v40 }
 0x78c   : > { %9316 = vst [vmem:[%s9314_s19 + $0x8] sm:$0xff] %v16037_v24 }
 0x78d PF: > { %p9317_p6 = scmp.ge.s32.totalorder %s19576_s6, 12  ;;  %p9318_p8 = scmp.lt.s32.totalorder %s19576_s6, 14 }
 0x78f   : > { %p9319_p9 = pnand %p9318_p8, %p9317_p6 }
 0x790   : > { %v18047_v27 = vld [vmem:[%s19791_s0 + $0x404] ss:$16 sps:$4 sm:$0xff] (!%p9319_p9)   ;;  %v18051_v30 = vld [vmem:[%s19791_s0 + $0x400] ss:$16 sps:$4 sm:$0xff] (!%p9319_p9)   ;;  %s15920_s5 = sadd.s32 (!%p9319_p9), 4294967284, %s19576_s6 }
 0x791   : > { %9322 = sbr.rel (%p9319_p9) target bundleno = 2674 (0xa72), region = 100  ;;  %v18049_v28 = vld [vmem:[%s19791_s0 + $0x604] ss:$16 sps:$4 sm:$0xff] (!%p9319_p9)   ;;  %10238 = vmatprep.subr.bf16.mxu0 (!%p9319_p9), %v18047_v27  ;;  %v18052_v35 = vld [vmem:[%s19791_s0 + $0x600] ss:$16 sps:$4 sm:$0xff] (!%p9319_p9)   ;;  %s16041_s12 = sshll.u32 (!%p9319_p9), %s15920_s5, 4 }
 0x792   : > { %10279 = vmatprep.subr.bf16.mxu1 (!%p9319_p9), %v18049_v28  ;;  %v18053_v37 = vld [vmem:[%s19791_s0 + $0x424] ss:$16 sps:$4 sm:$0xff] (!%p9319_p9)   ;;  %10239 = vmatpush1.bf16.msra.mxu0 (!%p9319_p9), %v18051_v30  ;;  %v18057_v51 = vld [vmem:[%s19791_s0 + $0x420] ss:$16 sps:$4 sm:$0xff] (!%p9319_p9)   ;;  %s13175_s1 = scalar_lea.vmem (!%p9319_p9), [#allocation4], %s16041_s12 }
 0x793   : > { %10280 = vmatpush1.bf16.msra.mxu1 (!%p9319_p9), %v18052_v35  ;;  %v18055_v49 = vld [vmem:[%s19791_s0 + $0x624] ss:$16 sps:$4 sm:$0xff] (!%p9319_p9)   ;;  %10240 = vmatprep.subr.bf16.mxu0 (!%p9319_p9), %v18053_v37  ;;  %v18058_v38 = vld [vmem:[%s19791_s0 + $0x620] ss:$16 sps:$4 sm:$0xff] (!%p9319_p9)   ;;  %v9455_v12 = vld [vmem:[#allocation3 + $0x18] sm:$0xff] (!%p9319_p9) }
 0x794   : > { %10281 = vmatprep.subr.bf16.mxu1 (!%p9319_p9), %v18055_v49  ;;  %v18059_v9 = vld [vmem:[%s19791_s0 + $0x444] ss:$16 sps:$4 sm:$0xff] (!%p9319_p9)   ;;  %v18063_v25 = vld [vmem:[%s19791_s0 + $0x440] ss:$16 sps:$4 sm:$0xff] (!%p9319_p9)   ;;  %v15395_v14 = vcombine.high (!%p9319_p9), %v9455_v12, %v9455_v12  ;;  %v18149_v37 = vld [vmem:[%s19791_s0 + $0x40c] ss:$16 sps:$4 sm:$0xff] (!%p9319_p9)  }
 0x795   : > { %v18061_v45 = vld [vmem:[%s19791_s0 + $0x644] ss:$16 sps:$4 sm:$0xff] (!%p9319_p9)   ;;  %v18064_v46 = vld [vmem:[%s19791_s0 + $0x640] ss:$16 sps:$4 sm:$0xff] (!%p9319_p9)   ;;  %v18152_v49 = vld [vmem:[%s19791_s0 + $0x60c] ss:$16 sps:$4 sm:$0xff] (!%p9319_p9)  }
 0x796   : > { %10241 = vmatpush1.bf16.msra.mxu0 (!%p9319_p9), %v18057_v51  ;;  %v18065_v10 = vld [vmem:[%s19791_s0 + $0x464] ss:$16 sps:$4 sm:$0xff] (!%p9319_p9)   ;;  %v18069_v1 = vld [vmem:[%s19791_s0 + $0x460] ss:$16 sps:$4 sm:$0xff] (!%p9319_p9)   ;;  %10311 = vmatprep.mubr.bf16.mxu1 (!%p9319_p9), %v15395_v14 }
 0x797   : > { %10282 = vmatpush1.bf16.msra.mxu1 (!%p9319_p9), %v18058_v38  ;;  %10242 = vmatprep.subr.bf16.mxu0 (!%p9319_p9), %v18059_v9  ;;  %v18067_v39 = vld [vmem:[%s19791_s0 + $0x664] ss:$16 sps:$4 sm:$0xff] (!%p9319_p9)   ;;  %v18070_v60 = vld [vmem:[%s19791_s0 + $0x660] ss:$16 sps:$4 sm:$0xff] (!%p9319_p9)   ;;  %v21321_v38 = vcombine.low (!%p9319_p9), %v9455_v12, %v9455_v12  ;;  %v18147_v9 = vld [vmem:[%s19791_s0 + $0x408] ss:$16 sps:$4 sm:$0xff] (!%p9319_p9)  }
 0x798   : > { %10283 = vmatprep.subr.bf16.mxu1 %v18061_v45  ;;  %v18071_v47 = vld [vmem:[%s19791_s0 + $0x484] ss:$16 sps:$4 sm:$0xff]   ;;  %v18075_v33 = vld [vmem:[%s19791_s0 + $0x480] ss:$16 sps:$4 sm:$0xff]   ;;  %v18150_v45 = vld [vmem:[%s19791_s0 + $0x608] ss:$16 sps:$4 sm:$0xff]  }
 0x799   : > { %v18073_v62 = vld [vmem:[%s19791_s0 + $0x684] ss:$16 sps:$4 sm:$0xff]   ;;  %v18076_v36 = vld [vmem:[%s19791_s0 + $0x680] ss:$16 sps:$4 sm:$0xff]   ;;  %v18207_v12 = vld [vmem:[%s19791_s0 + $0x548] ss:$16 sps:$4 sm:$0xff]  }
 0x79a   : > { %10243 = vmatpush1.bf16.msra.mxu0 %v18063_v25  ;;  %v18077_v23 = vld [vmem:[%s19791_s0 + $0x4a4] ss:$16 sps:$4 sm:$0xff]   ;;  %v18081_v50 = vld [vmem:[%s19791_s0 + $0x4a0] ss:$16 sps:$4 sm:$0xff]   ;;  %v18155_v25 = vld [vmem:[%s19791_s0 + $0x42c] ss:$16 sps:$4 sm:$0xff]  }
 0x79b   : > { %10284 = vmatpush1.bf16.msra.mxu1 %v18064_v46  ;;  %10244 = vmatprep.subr.bf16.mxu0 %v18065_v10  ;;  %v18079_v17 = vld [vmem:[%s19791_s0 + $0x6a4] ss:$16 sps:$4 sm:$0xff]   ;;  %v18082_v57 = vld [vmem:[%s19791_s0 + $0x6a0] ss:$16 sps:$4 sm:$0xff]   ;;  %v18158_v46 = vld [vmem:[%s19791_s0 + $0x62c] ss:$16 sps:$4 sm:$0xff]  }
 0x79c   : > { %10285 = vmatprep.subr.bf16.mxu1 %v18067_v39  ;;  %v18083_v5 = vld [vmem:[%s19791_s0 + $0x4c4] ss:$16 sps:$4 sm:$0xff]   ;;  %v18087_v58 = vld [vmem:[%s19791_s0 + $0x4c0] ss:$16 sps:$4 sm:$0xff]   ;;  %v18153_v10 = vld [vmem:[%s19791_s0 + $0x428] ss:$16 sps:$4 sm:$0xff]  }
 0x79d   : > { %v18085_v7 = vld [vmem:[%s19791_s0 + $0x6c4] ss:$16 sps:$4 sm:$0xff]   ;;  %v18088_v59 = vld [vmem:[%s19791_s0 + $0x6c0] ss:$16 sps:$4 sm:$0xff]   ;;  %v18156_v39 = vld [vmem:[%s19791_s0 + $0x628] ss:$16 sps:$4 sm:$0xff]  }
 0x79e   : > { %10245 = vmatpush1.bf16.msra.mxu0 %v18069_v1  ;;  %v18089_v43 = vld [vmem:[%s19791_s0 + $0x4e4] ss:$16 sps:$4 sm:$0xff]   ;;  %v18093_v13 = vld [vmem:[%s19791_s0 + $0x4e0] ss:$16 sps:$4 sm:$0xff]   ;;  %v18161_v1 = vld [vmem:[%s19791_s0 + $0x44c] ss:$16 sps:$4 sm:$0xff]  }
 0x79f   : > { %10286 = vmatpush1.bf16.msra.mxu1 %v18070_v60  ;;  %10246 = vmatprep.subr.bf16.mxu0 %v18071_v47  ;;  %v18091_v42 = vld [vmem:[%s19791_s0 + $0x6e4] ss:$16 sps:$4 sm:$0xff]   ;;  %v18094_v19 = vld [vmem:[%s19791_s0 + $0x6e0] ss:$16 sps:$4 sm:$0xff]   ;;  %v18164_v60 = vld [vmem:[%s19791_s0 + $0x64c] ss:$16 sps:$4 sm:$0xff]  }
 0x7a0   : > { %10287 = vmatprep.subr.bf16.mxu1 %v18073_v62  ;;  %v18095_v31 = vld [vmem:[%s19791_s0 + $0x504] ss:$16 sps:$4 sm:$0xff]   ;;  %v18099_v54 = vld [vmem:[%s19791_s0 + $0x500] ss:$16 sps:$4 sm:$0xff]   ;;  %v18159_v47 = vld [vmem:[%s19791_s0 + $0x448] ss:$16 sps:$4 sm:$0xff]  }
 0x7a1   : > { %v18097_v22 = vld [vmem:[%s19791_s0 + $0x704] ss:$16 sps:$4 sm:$0xff]   ;;  %v18100_v15 = vld [vmem:[%s19791_s0 + $0x700] ss:$16 sps:$4 sm:$0xff]   ;;  %v18162_v62 = vld [vmem:[%s19791_s0 + $0x648] ss:$16 sps:$4 sm:$0xff]  }
 0x7a2   : > { %10247 = vmatpush1.bf16.msra.mxu0 %v18075_v33  ;;  %v18101_v32 = vld [vmem:[%s19791_s0 + $0x524] ss:$16 sps:$4 sm:$0xff]   ;;  %v18105_v48 = vld [vmem:[%s19791_s0 + $0x520] ss:$16 sps:$4 sm:$0xff]   ;;  %v18167_v33 = vld [vmem:[%s19791_s0 + $0x46c] ss:$16 sps:$4 sm:$0xff]  }
 0x7a3   : > { %10288 = vmatpush1.bf16.msra.mxu1 %v18076_v36  ;;  %10248 = vmatprep.subr.bf16.mxu0 %v18077_v23  ;;  %v18103_v56 = vld [vmem:[%s19791_s0 + $0x724] ss:$16 sps:$4 sm:$0xff]   ;;  %v18106_v3 = vld [vmem:[%s19791_s0 + $0x720] ss:$16 sps:$4 sm:$0xff]   ;;  %v18170_v36 = vld [vmem:[%s19791_s0 + $0x66c] ss:$16 sps:$4 sm:$0xff]  }
 0x7a4   : > { %10289 = vmatprep.subr.bf16.mxu1 %v18079_v17  ;;  %v18107_v61 = vld [vmem:[%s19791_s0 + $0x544] ss:$16 sps:$4 sm:$0xff]   ;;  %v18111_v8 = vld [vmem:[%s19791_s0 + $0x540] ss:$16 sps:$4 sm:$0xff]   ;;  %v18165_v23 = vld [vmem:[%s19791_s0 + $0x468] ss:$16 sps:$4 sm:$0xff]  }
 0x7a5   : > { %v18109_v4 = vld [vmem:[%s19791_s0 + $0x744] ss:$16 sps:$4 sm:$0xff]   ;;  %v18112_v16 = vld [vmem:[%s19791_s0 + $0x740] ss:$16 sps:$4 sm:$0xff]   ;;  %v18168_v17 = vld [vmem:[%s19791_s0 + $0x668] ss:$16 sps:$4 sm:$0xff]  }
 0x7a6   : > { %10249 = vmatpush1.bf16.msra.mxu0 %v18081_v50  ;;  %v18113_v41 = vld [vmem:[%s19791_s0 + $0x564] ss:$16 sps:$4 sm:$0xff]   ;;  %v18117_v53 = vld [vmem:[%s19791_s0 + $0x560] ss:$16 sps:$4 sm:$0xff]   ;;  %v18173_v50 = vld [vmem:[%s19791_s0 + $0x48c] ss:$16 sps:$4 sm:$0xff]  }
 0x7a7   : > { %10290 = vmatpush1.bf16.msra.mxu1 %v18082_v57  ;;  %10250 = vmatprep.subr.bf16.mxu0 %v18083_v5  ;;  %v18115_v44 = vld [vmem:[%s19791_s0 + $0x764] ss:$16 sps:$4 sm:$0xff]   ;;  %v18118_v18 = vld [vmem:[%s19791_s0 + $0x760] ss:$16 sps:$4 sm:$0xff]   ;;  %v18176_v57 = vld [vmem:[%s19791_s0 + $0x68c] ss:$16 sps:$4 sm:$0xff]  }
 0x7a8   : > { %10291 = vmatprep.subr.bf16.mxu1 %v18085_v7  ;;  %v9454_v11 = vld [vmem:[#allocation3 + $0x10] sm:$0xff]  ;;  %v18171_v5 = vld [vmem:[%s19791_s0 + $0x488] ss:$16 sps:$4 sm:$0xff]  }
 0x7a9   : > { %v21296_v29 = vcombine.high %v9454_v11, %v9454_v11  ;;  %v18119_v34 = vld [vmem:[%s19791_s0 + $0x584] ss:$16 sps:$4 sm:$0xff]   ;;  %v18123_v20 = vld [vmem:[%s19791_s0 + $0x580] ss:$16 sps:$4 sm:$0xff]   ;;  %v21319_v51 = vcombine.low %v9454_v11, %v9454_v11  ;;  %v18174_v7 = vld [vmem:[%s19791_s0 + $0x688] ss:$16 sps:$4 sm:$0xff]  }
 0x7aa   : > { %10251 = vmatpush1.bf16.msra.mxu0 %v18087_v58  ;;  %v18121_v6 = vld [vmem:[%s19791_s0 + $0x784] ss:$16 sps:$4 sm:$0xff]   ;;  %v18124_v21 = vld [vmem:[%s19791_s0 + $0x780] ss:$16 sps:$4 sm:$0xff]   ;;  %v18179_v58 = vld [vmem:[%s19791_s0 + $0x4ac] ss:$16 sps:$4 sm:$0xff]  }
 0x7ab   : > { %10292 = vmatpush1.bf16.msra.mxu1 %v18088_v59  ;;  %10252 = vmatprep.subr.bf16.mxu0 %v18089_v43  ;;  %v18125_v63 = vld [vmem:[%s19791_s0 + $0x5a4] ss:$16 sps:$4 sm:$0xff]   ;;  %v18129_v2 = vld [vmem:[%s19791_s0 + $0x5a0] ss:$16 sps:$4 sm:$0xff]   ;;  %v18182_v59 = vld [vmem:[%s19791_s0 + $0x6ac] ss:$16 sps:$4 sm:$0xff]  }
 0x7ac   : > { %10293 = vmatprep.subr.bf16.mxu1 %v18091_v42  ;;  %10270 = vmatprep.mubr.bf16.mxu0 %v21296_v29  ;;  %v18127_v52 = vld [vmem:[%s19791_s0 + $0x7a4] ss:$16 sps:$4 sm:$0xff]   ;;  %v18130_v55 = vld [vmem:[%s19791_s0 + $0x7a0] ss:$16 sps:$4 sm:$0xff]   ;;  %v18177_v43 = vld [vmem:[%s19791_s0 + $0x4a8] ss:$16 sps:$4 sm:$0xff]  }
 0x7ad   : > { %v18131_v26 = vld [vmem:[%s19791_s0 + $0x5c4] ss:$16 sps:$4 sm:$0xff]   ;;  %v18135_v0 = vld [vmem:[%s19791_s0 + $0x5c0] ss:$16 sps:$4 sm:$0xff]   ;;  %v18180_v42 = vld [vmem:[%s19791_s0 + $0x6a8] ss:$16 sps:$4 sm:$0xff]  }
 0x7ae   : > { %10253 = vmatpush1.bf16.msra.mxu0 %v18093_v13  ;;  %v18133_v40 = vld [vmem:[%s19791_s0 + $0x7c4] ss:$16 sps:$4 sm:$0xff]   ;;  %v18136_v24 = vld [vmem:[%s19791_s0 + $0x7c0] ss:$16 sps:$4 sm:$0xff]   ;;  %v18185_v13 = vld [vmem:[%s19791_s0 + $0x4cc] ss:$16 sps:$4 sm:$0xff]  }
 0x7af   : > { %10294 = vmatpush1.bf16.msra.mxu1 %v18094_v19  ;;  %10254 = vmatprep.subr.bf16.mxu0 %v18095_v31  ;;  %v18137_v27 = vld [vmem:[%s19791_s0 + $0x5e4] ss:$16 sps:$4 sm:$0xff]   ;;  %v18141_v30 = vld [vmem:[%s19791_s0 + $0x5e0] ss:$16 sps:$4 sm:$0xff]   ;;  %v18188_v19 = vld [vmem:[%s19791_s0 + $0x6cc] ss:$16 sps:$4 sm:$0xff]  }
 0x7b0   : > { %10295 = vmatprep.subr.bf16.mxu1 %v18097_v22  ;;  %v18139_v28 = vld [vmem:[%s19791_s0 + $0x7e4] ss:$16 sps:$4 sm:$0xff]   ;;  %v18142_v35 = vld [vmem:[%s19791_s0 + $0x7e0] ss:$16 sps:$4 sm:$0xff]   ;;  %v18183_v31 = vld [vmem:[%s19791_s0 + $0x4c8] ss:$16 sps:$4 sm:$0xff]  }
 0x7b1   : > { %v18186_v22 = vld [vmem:[%s19791_s0 + $0x6c8] ss:$16 sps:$4 sm:$0xff]   ;;  %v18209_v11 = vld [vmem:[%s19791_s0 + $0x54c] ss:$16 sps:$4 sm:$0xff]  }
 0x7b2   : > { %10255 = vmatpush1.bf16.msra.mxu0 %v18099_v54  ;;  %v18191_v54 = vld [vmem:[%s19791_s0 + $0x4ec] ss:$16 sps:$4 sm:$0xff]  }
 0x7b3   : > { %10296 = vmatpush1.bf16.msra.mxu1 %v18100_v15  ;;  %10256 = vmatprep.subr.bf16.mxu0 %v18101_v32  ;;  %v18194_v15 = vld [vmem:[%s19791_s0 + $0x6ec] ss:$16 sps:$4 sm:$0xff]   ;;  %v18189_v32 = vld [vmem:[%s19791_s0 + $0x4e8] ss:$16 sps:$4 sm:$0xff]  }
 0x7b4   : > { %10297 = vmatprep.subr.bf16.mxu1 %v18103_v56  ;;  %v18192_v56 = vld [vmem:[%s19791_s0 + $0x6e8] ss:$16 sps:$4 sm:$0xff]  }
 0x7b6   : > { %10257 = vmatpush1.bf16.msra.mxu0 %v18105_v48  ;;  %v18197_v48 = vld [vmem:[%s19791_s0 + $0x50c] ss:$16 sps:$4 sm:$0xff]  }
 0x7b7   : > { %10298 = vmatpush1.bf16.msra.mxu1 %v18106_v3  ;;  %10258 = vmatprep.subr.bf16.mxu0 %v18107_v61  ;;  %v18200_v3 = vld [vmem:[%s19791_s0 + $0x70c] ss:$16 sps:$4 sm:$0xff]   ;;  %v18195_v61 = vld [vmem:[%s19791_s0 + $0x508] ss:$16 sps:$4 sm:$0xff]  }
 0x7b8   : > { %10299 = vmatprep.subr.bf16.mxu1 %v18109_v4  ;;  %v18198_v4 = vld [vmem:[%s19791_s0 + $0x708] ss:$16 sps:$4 sm:$0xff]  }
 0x7ba   : > { %10259 = vmatpush1.bf16.msra.mxu0 %v18111_v8  ;;  %v18203_v8 = vld [vmem:[%s19791_s0 + $0x52c] ss:$16 sps:$4 sm:$0xff]  }
 0x7bb   : > { %10300 = vmatpush1.bf16.msra.mxu1 %v18112_v16  ;;  %10260 = vmatprep.subr.bf16.mxu0 %v18113_v41  ;;  %v18206_v16 = vld [vmem:[%s19791_s0 + $0x72c] ss:$16 sps:$4 sm:$0xff]   ;;  %v18201_v41 = vld [vmem:[%s19791_s0 + $0x528] ss:$16 sps:$4 sm:$0xff]  }
 0x7bc   : > { %10301 = vmatprep.subr.bf16.mxu1 %v18115_v44  ;;  %v18204_v44 = vld [vmem:[%s19791_s0 + $0x728] ss:$16 sps:$4 sm:$0xff]  }
 0x7be   : > { %10261 = vmatpush1.bf16.msra.mxu0 %v18117_v53  ;;  %v18210_v53 = vld [vmem:[%s19791_s0 + $0x748] ss:$16 sps:$4 sm:$0xff]  }
 0x7bf   : > { %10302 = vmatpush1.bf16.msra.mxu1 %v18118_v18  ;;  %10262 = vmatprep.subr.bf16.mxu0 %v18119_v34  ;;  %v18215_v18 = vld [vmem:[%s19791_s0 + $0x56c] ss:$16 sps:$4 sm:$0xff]   ;;  %v18213_v34 = vld [vmem:[%s19791_s0 + $0x568] ss:$16 sps:$4 sm:$0xff]  }
 0x7c0   : > { %10303 = vmatprep.subr.bf16.mxu1 %v18121_v6  ;;  %v18216_v6 = vld [vmem:[%s19791_s0 + $0x768] ss:$16 sps:$4 sm:$0xff]  }
 0x7c2   : > { %10263 = vmatpush1.bf16.msra.mxu0 %v18123_v20  ;;  %v18221_v20 = vld [vmem:[%s19791_s0 + $0x58c] ss:$16 sps:$4 sm:$0xff]  }
 0x7c3   : > { %10304 = vmatpush1.bf16.msra.mxu1 %v18124_v21  ;;  %10264 = vmatprep.subr.bf16.mxu0 %v18125_v63  ;;  %v18224_v21 = vld [vmem:[%s19791_s0 + $0x78c] ss:$16 sps:$4 sm:$0xff]   ;;  %v18219_v63 = vld [vmem:[%s19791_s0 + $0x588] ss:$16 sps:$4 sm:$0xff]  }
 0x7c4   : > { %10305 = vmatprep.subr.bf16.mxu1 %v18127_v52  ;;  %v18222_v52 = vld [vmem:[%s19791_s0 + $0x788] ss:$16 sps:$4 sm:$0xff]  }
 0x7c6   : > { %10265 = vmatpush1.bf16.msra.mxu0 %v18129_v2  ;;  %v18227_v2 = vld [vmem:[%s19791_s0 + $0x5ac] ss:$16 sps:$4 sm:$0xff]  }
 0x7c7   : > { %10306 = vmatpush1.bf16.msra.mxu1 %v18130_v55  ;;  %10266 = vmatprep.subr.bf16.mxu0 %v18131_v26  ;;  %v18230_v55 = vld [vmem:[%s19791_s0 + $0x7ac] ss:$16 sps:$4 sm:$0xff]   ;;  %v18225_v26 = vld [vmem:[%s19791_s0 + $0x5a8] ss:$16 sps:$4 sm:$0xff]  }
 0x7c8   : > { %10307 = vmatprep.subr.bf16.mxu1 %v18133_v40  ;;  %v18228_v40 = vld [vmem:[%s19791_s0 + $0x7a8] ss:$16 sps:$4 sm:$0xff]  }
 0x7ca   : > { %10267 = vmatpush1.bf16.msra.mxu0 %v18135_v0  ;;  %v18233_v0 = vld [vmem:[%s19791_s0 + $0x5cc] ss:$16 sps:$4 sm:$0xff]  }
 0x7cb   : > { %10308 = vmatpush1.bf16.msra.mxu1 %v18136_v24  ;;  %10268 = vmatprep.subr.bf16.mxu0 %v18137_v27  ;;  %v18236_v24 = vld [vmem:[%s19791_s0 + $0x7cc] ss:$16 sps:$4 sm:$0xff]   ;;  %v18231_v27 = vld [vmem:[%s19791_s0 + $0x5c8] ss:$16 sps:$4 sm:$0xff]  }
 0x7cc   : > { %10309 = vmatprep.subr.bf16.mxu1 %v18139_v28  ;;  %v18234_v28 = vld [vmem:[%s19791_s0 + $0x7c8] ss:$16 sps:$4 sm:$0xff]  }
 0x7ce   : > { %10269 = vmatpush1.bf16.msra.mxu0 %v18141_v30  ;;  %v18239_v30 = vld [vmem:[%s19791_s0 + $0x5ec] ss:$16 sps:$4 sm:$0xff]  }
 0x7cf   : > { %10310 = vmatpush1.bf16.msra.mxu1 %v18142_v35  ;;  %10320 = vmatprep.subr.bf16.mxu0 %v18149_v37  ;;  %v18242_v35 = vld [vmem:[%s19791_s0 + $0x7ec] ss:$16 sps:$4 sm:$0xff]   ;;  %v18237_v37 = vld [vmem:[%s19791_s0 + $0x5e8] ss:$16 sps:$4 sm:$0xff]  }
 0x7d0   : > { %10361 = vmatprep.subr.bf16.mxu1 %v18152_v49  ;;  %v18240_v49 = vld [vmem:[%s19791_s0 + $0x7e8] ss:$16 sps:$4 sm:$0xff]  }
 0x7d1   : > { %10271 = vmatmul.mubr.bf16.vlgmr.msra.gmra.mrb[0].mxu0 %v21319_v51 }
 0x7d2   : > { %10312 = vmatmul.mubr.bf16.vlgmr.msra.gmra.mrb[0].mxu1 %v21321_v38  ;;  %10321 = vmatpush1.bf16.msra.mxu0 %v18147_v9  ;;  %v18245_v9 = vld [vmem:[%s19791_s0 + $0x4] ss:$16 sps:$4 sm:$0xff]  }
 0x7d3   : > { %10362 = vmatpush1.bf16.msra.mxu1 %v18150_v45  ;;  %10322 = vmatprep.subr.bf16.mxu0 %v18155_v25  ;;  %v18248_v45 = vld [vmem:[%s19791_s0 + $0x204] ss:$16 sps:$4 sm:$0xff]   ;;  %v18243_v25 = vld [vmem:[%s19791_s0] ss:$16 sps:$4 sm:$0xff]  }
 0x7d4   : > { %10363 = vmatprep.subr.bf16.mxu1 %v18158_v46  ;;  %10352 = vmatprep.mubr.bf16.mxu0 %v21296_v29  ;;  %v18212_v29 = vld [vmem:[%s19791_s0 + $0x74c] ss:$16 sps:$4 sm:$0xff]   ;;  %v18246_v46 = vld [vmem:[%s19791_s0 + $0x200] ss:$16 sps:$4 sm:$0xff]  }
 0x7d5   : > { %10393 = vmatprep.mubr.bf16.mxu1 %v15395_v14  ;;  %v18218_v14 = vld [vmem:[%s19791_s0 + $0x76c] ss:$16 sps:$4 sm:$0xff]  }
 0x7d6   : > { %10323 = vmatpush1.bf16.msra.mxu0 %v18153_v10  ;;  %v18251_v10 = vld [vmem:[%s19791_s0 + $0x24] ss:$16 sps:$4 sm:$0xff]  }
 0x7d7   : > { %10364 = vmatpush1.bf16.msra.mxu1 %v18156_v39  ;;  %10324 = vmatprep.subr.bf16.mxu0 %v18161_v1  ;;  %v18254_v39 = vld [vmem:[%s19791_s0 + $0x224] ss:$16 sps:$4 sm:$0xff]  }
 0x7d8   : > { %10365 = vmatprep.subr.bf16.mxu1 %v18164_v60  ;;  %v21394_v1 = vld [vmem:[#allocation3] sm:$0xff]  ;;  %v21396_v60 = vld [vmem:[#allocation3 + $0x8] sm:$0xff] }
 0x7da   : > { %10325 = vmatpush1.bf16.msra.mxu0 %v18159_v47  ;;  %v21400_v47 = vcombine.high %v21394_v1, %v21394_v1 }
 0x7db   : > { %10366 = vmatpush1.bf16.msra.mxu1 %v18162_v62  ;;  %10326 = vmatprep.subr.bf16.mxu0 %v18167_v33  ;;  %v21404_v62 = vcombine.high %v21396_v60, %v21396_v60  ;;  %v18249_v33 = vld [vmem:[%s19791_s0 + $0x20] ss:$16 sps:$4 sm:$0xff]  }
 0x7dc   : > { %10367 = vmatprep.subr.bf16.mxu1 %v18170_v36  ;;  %v18252_v36 = vld [vmem:[%s19791_s0 + $0x220] ss:$16 sps:$4 sm:$0xff]  }
 0x7de   : > { %10327 = vmatpush1.bf16.msra.mxu0 %v18165_v23  ;;  %v18257_v23 = vld [vmem:[%s19791_s0 + $0x44] ss:$16 sps:$4 sm:$0xff]  }
 0x7df   : > { %10368 = vmatpush1.bf16.msra.mxu1 %v18168_v17  ;;  %10328 = vmatprep.subr.bf16.mxu0 %v18173_v50  ;;  %v18260_v17 = vld [vmem:[%s19791_s0 + $0x244] ss:$16 sps:$4 sm:$0xff]  }
 0x7e0   : > { %10369 = vmatprep.subr.bf16.mxu1 %v18176_v57  ;;  %v18263_v50 = vld [vmem:[%s19791_s0 + $0x64] ss:$16 sps:$4 sm:$0xff]  }
 0x7e1   : > { %v18266_v57 = vld [vmem:[%s19791_s0 + $0x264] ss:$16 sps:$4 sm:$0xff]  }
 0x7e2   : > { %10329 = vmatpush1.bf16.msra.mxu0 %v18171_v5  ;;  %v18261_v5 = vld [vmem:[%s19791_s0 + $0x60] ss:$16 sps:$4 sm:$0xff]  }
 0x7e3   : > { %10370 = vmatpush1.bf16.msra.mxu1 %v18174_v7  ;;  %10330 = vmatprep.subr.bf16.mxu0 %v18179_v58  ;;  %v18264_v7 = vld [vmem:[%s19791_s0 + $0x260] ss:$16 sps:$4 sm:$0xff]   ;;  %v18269_v58 = vld [vmem:[%s19791_s0 + $0x84] ss:$16 sps:$4 sm:$0xff]  }
 0x7e4   : > { %10371 = vmatprep.subr.bf16.mxu1 %v18182_v59  ;;  %v18272_v59 = vld [vmem:[%s19791_s0 + $0x284] ss:$16 sps:$4 sm:$0xff]  }
 0x7e6   : > { %10331 = vmatpush1.bf16.msra.mxu0 %v18177_v43  ;;  %v18267_v43 = vld [vmem:[%s19791_s0 + $0x80] ss:$16 sps:$4 sm:$0xff]  }
 0x7e7   : > { %10372 = vmatpush1.bf16.msra.mxu1 %v18180_v42  ;;  %10332 = vmatprep.subr.bf16.mxu0 %v18185_v13  ;;  %v18270_v42 = vld [vmem:[%s19791_s0 + $0x280] ss:$16 sps:$4 sm:$0xff]   ;;  %v18275_v13 = vld [vmem:[%s19791_s0 + $0xa4] ss:$16 sps:$4 sm:$0xff]  }
 0x7e8   : > { %10373 = vmatprep.subr.bf16.mxu1 %v18188_v19  ;;  %v18278_v19 = vld [vmem:[%s19791_s0 + $0x2a4] ss:$16 sps:$4 sm:$0xff]  }
 0x7ea   : > { %10333 = vmatpush1.bf16.msra.mxu0 %v18183_v31  ;;  %v18273_v31 = vld [vmem:[%s19791_s0 + $0xa0] ss:$16 sps:$4 sm:$0xff]  }
 0x7eb   : > { %10374 = vmatpush1.bf16.msra.mxu1 %v18186_v22  ;;  %10334 = vmatprep.subr.bf16.mxu0 %v18191_v54  ;;  %v18276_v22 = vld [vmem:[%s19791_s0 + $0x2a0] ss:$16 sps:$4 sm:$0xff]   ;;  %v18281_v54 = vld [vmem:[%s19791_s0 + $0xc4] ss:$16 sps:$4 sm:$0xff]  }
 0x7ec   : > { %10375 = vmatprep.subr.bf16.mxu1 %v18194_v15  ;;  %v18284_v15 = vld [vmem:[%s19791_s0 + $0x2c4] ss:$16 sps:$4 sm:$0xff]  }
 0x7ee   : > { %10335 = vmatpush1.bf16.msra.mxu0 %v18189_v32  ;;  %v18279_v32 = vld [vmem:[%s19791_s0 + $0xc0] ss:$16 sps:$4 sm:$0xff]  }
 0x7ef   : > { %10376 = vmatpush1.bf16.msra.mxu1 %v18192_v56  ;;  %10336 = vmatprep.subr.bf16.mxu0 %v18197_v48  ;;  %v18282_v56 = vld [vmem:[%s19791_s0 + $0x2c0] ss:$16 sps:$4 sm:$0xff]   ;;  %v18287_v48 = vld [vmem:[%s19791_s0 + $0xe4] ss:$16 sps:$4 sm:$0xff]  }
 0x7f0   : > { %10377 = vmatprep.subr.bf16.mxu1 %v18200_v3  ;;  %v18290_v3 = vld [vmem:[%s19791_s0 + $0x2e4] ss:$16 sps:$4 sm:$0xff]  }
 0x7f2   : > { %10337 = vmatpush1.bf16.msra.mxu0 %v18195_v61  ;;  %v18285_v61 = vld [vmem:[%s19791_s0 + $0xe0] ss:$16 sps:$4 sm:$0xff]  }
 0x7f3   : > { %10378 = vmatpush1.bf16.msra.mxu1 %v18198_v4  ;;  %10338 = vmatprep.subr.bf16.mxu0 %v18203_v8  ;;  %v18288_v4 = vld [vmem:[%s19791_s0 + $0x2e0] ss:$16 sps:$4 sm:$0xff]   ;;  %v18293_v8 = vld [vmem:[%s19791_s0 + $0x104] ss:$16 sps:$4 sm:$0xff]  }
 0x7f4   : > { %10379 = vmatprep.subr.bf16.mxu1 %v18206_v16  ;;  %v18296_v16 = vld [vmem:[%s19791_s0 + $0x304] ss:$16 sps:$4 sm:$0xff]  }
 0x7f6   : > { %10339 = vmatpush1.bf16.msra.mxu0 %v18201_v41  ;;  %v18291_v41 = vld [vmem:[%s19791_s0 + $0x100] ss:$16 sps:$4 sm:$0xff]  }
 0x7f7   : > { %10380 = vmatpush1.bf16.msra.mxu1 %v18204_v44  ;;  %10340 = vmatprep.subr.bf16.mxu0 %v18209_v11  ;;  %v18294_v44 = vld [vmem:[%s19791_s0 + $0x300] ss:$16 sps:$4 sm:$0xff]   ;;  %v18299_v11 = vld [vmem:[%s19791_s0 + $0x124] ss:$16 sps:$4 sm:$0xff]  }
 0x7f8   : > { %10381 = vmatprep.subr.bf16.mxu1 %v18212_v29  ;;  %v18302_v29 = vld [vmem:[%s19791_s0 + $0x324] ss:$16 sps:$4 sm:$0xff]  }
 0x7fa   : > { %10341 = vmatpush1.bf16.msra.mxu0 %v18207_v12  ;;  %v18297_v12 = vld [vmem:[%s19791_s0 + $0x120] ss:$16 sps:$4 sm:$0xff]  }
 0x7fb   : > { %10382 = vmatpush1.bf16.msra.mxu1 %v18210_v53  ;;  %10342 = vmatprep.subr.bf16.mxu0 %v18215_v18  ;;  %v18300_v53 = vld [vmem:[%s19791_s0 + $0x320] ss:$16 sps:$4 sm:$0xff]   ;;  %v18305_v18 = vld [vmem:[%s19791_s0 + $0x144] ss:$16 sps:$4 sm:$0xff]  }
 0x7fc   : > { %10383 = vmatprep.subr.bf16.mxu1 %v18218_v14  ;;  %v18308_v14 = vld [vmem:[%s19791_s0 + $0x344] ss:$16 sps:$4 sm:$0xff]  }
 0x7fe   : > { %10343 = vmatpush1.bf16.msra.mxu0 %v18213_v34  ;;  %v18303_v34 = vld [vmem:[%s19791_s0 + $0x140] ss:$16 sps:$4 sm:$0xff]  }
 0x7ff   : > { %10384 = vmatpush1.bf16.msra.mxu1 %v18216_v6  ;;  %10344 = vmatprep.subr.bf16.mxu0 %v18221_v20  ;;  %v18306_v6 = vld [vmem:[%s19791_s0 + $0x340] ss:$16 sps:$4 sm:$0xff]   ;;  %v18311_v20 = vld [vmem:[%s19791_s0 + $0x164] ss:$16 sps:$4 sm:$0xff]  }
 0x800   : > { %10385 = vmatprep.subr.bf16.mxu1 %v18224_v21  ;;  %v18314_v21 = vld [vmem:[%s19791_s0 + $0x364] ss:$16 sps:$4 sm:$0xff]  }
 0x802   : > { %10345 = vmatpush1.bf16.msra.mxu0 %v18219_v63  ;;  %v18309_v63 = vld [vmem:[%s19791_s0 + $0x160] ss:$16 sps:$4 sm:$0xff]  }
 0x803   : > { %10386 = vmatpush1.bf16.msra.mxu1 %v18222_v52  ;;  %10346 = vmatprep.subr.bf16.mxu0 %v18227_v2  ;;  %v18312_v52 = vld [vmem:[%s19791_s0 + $0x360] ss:$16 sps:$4 sm:$0xff]   ;;  %v18317_v2 = vld [vmem:[%s19791_s0 + $0x184] ss:$16 sps:$4 sm:$0xff]  }
 0x804   : > { %10387 = vmatprep.subr.bf16.mxu1 %v18230_v55  ;;  %v18320_v55 = vld [vmem:[%s19791_s0 + $0x384] ss:$16 sps:$4 sm:$0xff]  }
 0x806   : > { %10347 = vmatpush1.bf16.msra.mxu0 %v18225_v26  ;;  %v18315_v26 = vld [vmem:[%s19791_s0 + $0x180] ss:$16 sps:$4 sm:$0xff]  }
 0x807   : > { %10388 = vmatpush1.bf16.msra.mxu1 %v18228_v40  ;;  %10348 = vmatprep.subr.bf16.mxu0 %v18233_v0  ;;  %v18318_v40 = vld [vmem:[%s19791_s0 + $0x380] ss:$16 sps:$4 sm:$0xff]   ;;  %v18323_v0 = vld [vmem:[%s19791_s0 + $0x1a4] ss:$16 sps:$4 sm:$0xff]  }
 0x808   : > { %10389 = vmatprep.subr.bf16.mxu1 %v18236_v24  ;;  %v18326_v24 = vld [vmem:[%s19791_s0 + $0x3a4] ss:$16 sps:$4 sm:$0xff]  }
 0x80a   : > { %10349 = vmatpush1.bf16.msra.mxu0 %v18231_v27  ;;  %v18321_v27 = vld [vmem:[%s19791_s0 + $0x1a0] ss:$16 sps:$4 sm:$0xff]  }
 0x80b   : > { %10390 = vmatpush1.bf16.msra.mxu1 %v18234_v28  ;;  %10350 = vmatprep.subr.bf16.mxu0 %v18239_v30  ;;  %v18324_v28 = vld [vmem:[%s19791_s0 + $0x3a0] ss:$16 sps:$4 sm:$0xff]   ;;  %v18329_v30 = vld [vmem:[%s19791_s0 + $0x1c4] ss:$16 sps:$4 sm:$0xff]  }
 0x80c   : > { %10391 = vmatprep.subr.bf16.mxu1 %v18242_v35  ;;  %v18332_v35 = vld [vmem:[%s19791_s0 + $0x3c4] ss:$16 sps:$4 sm:$0xff]  }
 0x80e   : > { %10351 = vmatpush1.bf16.msra.mxu0 %v18237_v37  ;;  %v18327_v37 = vld [vmem:[%s19791_s0 + $0x1c0] ss:$16 sps:$4 sm:$0xff]  }
 0x80f   : > { %10392 = vmatpush1.bf16.msra.mxu1 %v18240_v49  ;;  %11056 = vmatprep.subr.bf16.mxu0 %v18245_v9  ;;  %v18330_v49 = vld [vmem:[%s19791_s0 + $0x3c0] ss:$16 sps:$4 sm:$0xff]   ;;  %v18335_v9 = vld [vmem:[%s19791_s0 + $0x1e4] ss:$16 sps:$4 sm:$0xff]  }
 0x810   : > { %11097 = vmatprep.subr.bf16.mxu1 %v18248_v45  ;;  %v18338_v45 = vld [vmem:[%s19791_s0 + $0x3e4] ss:$16 sps:$4 sm:$0xff]  }
 0x811   : > { %10353 = vmatmul.mubr.bf16.vlgmr.msra.gmra.mrb[4].mxu0 %v21319_v51  ;;  %v18255_v51 = vld [vmem:[%s19791_s0 + $0x40] ss:$16 sps:$4 sm:$0xff]  }
 0x812   : > { %10394 = vmatmul.mubr.bf16.vlgmr.msra.gmra.mrb[4].mxu1 %v21321_v38  ;;  %11057 = vmatpush1.bf16.msra.mxu0 %v18243_v25  ;;  %v18258_v38 = vld [vmem:[%s19791_s0 + $0x240] ss:$16 sps:$4 sm:$0xff]  }
 0x813   : > { %11098 = vmatpush1.bf16.msra.mxu1 %v18246_v46  ;;  %11058 = vmatprep.subr.bf16.mxu0 %v18251_v10  ;;  %v18333_v25 = vld [vmem:[%s19791_s0 + $0x1e0] ss:$16 sps:$4 sm:$0xff]   ;;  %v18345_v10 = vld [vmem:[%s19791_s0 + $0xc] ss:$16 sps:$4 sm:$0xff]  }
 0x814   : > { %11099 = vmatprep.subr.bf16.mxu1 %v18254_v39  ;;  %11088 = vmatprep.mubr.bf16.mxu0 %v21400_v47  ;;  %v18336_v46 = vld [vmem:[%s19791_s0 + $0x3e0] ss:$16 sps:$4 sm:$0xff]   ;;  %v18348_v39 = vld [vmem:[%s19791_s0 + $0x20c] ss:$16 sps:$4 sm:$0xff]  }
 0x815   : > { %11129 = vmatprep.mubr.bf16.mxu1 %v21404_v62 }
 0x816   : > { %11059 = vmatpush1.bf16.msra.mxu0 %v18249_v33  ;;  %v21472_v33 = vcombine.low %v21394_v1, %v21394_v1  ;;  %v18349_v1 = vld [vmem:[%s19791_s0 + $0x28] ss:$16 sps:$4 sm:$0xff]  }
 0x817   : > { %11100 = vmatpush1.bf16.msra.mxu1 %v18252_v36  ;;  %11060 = vmatprep.subr.bf16.mxu0 %v18257_v23  ;;  %v21476_v36 = vcombine.low %v21396_v60, %v21396_v60  ;;  %v18343_v23 = vld [vmem:[%s19791_s0 + $0x8] ss:$16 sps:$4 sm:$0xff]   ;;  %v18357_v60 = vld [vmem:[%s19791_s0 + $0x4c] ss:$16 sps:$4 sm:$0xff]  }
 0x818   : > { %11101 = vmatprep.subr.bf16.mxu1 %v18260_v17  ;;  %v18346_v17 = vld [vmem:[%s19791_s0 + $0x208] ss:$16 sps:$4 sm:$0xff]  }
 0x81a   : > { %11061 = vmatpush1.bf16.msra.mxu0 %v18255_v51  ;;  %v18351_v51 = vld [vmem:[%s19791_s0 + $0x2c] ss:$16 sps:$4 sm:$0xff]  }
 0x81b   : > { %11102 = vmatpush1.bf16.msra.mxu1 %v18258_v38  ;;  %11062 = vmatprep.subr.bf16.mxu0 %v18263_v50  ;;  %v18354_v38 = vld [vmem:[%s19791_s0 + $0x22c] ss:$16 sps:$4 sm:$0xff]   ;;  %v18352_v50 = vld [vmem:[%s19791_s0 + $0x228] ss:$16 sps:$4 sm:$0xff]  }
 0x81c   : > { %11103 = vmatprep.subr.bf16.mxu1 %v18266_v57  ;;  %v18360_v57 = vld [vmem:[%s19791_s0 + $0x24c] ss:$16 sps:$4 sm:$0xff]  }
 0x81e   : > { %11063 = vmatpush1.bf16.msra.mxu0 %v18261_v5  ;;  %v18355_v5 = vld [vmem:[%s19791_s0 + $0x48] ss:$16 sps:$4 sm:$0xff]  }
 0x81f   : > { %11104 = vmatpush1.bf16.msra.mxu1 %v18264_v7  ;;  %11064 = vmatprep.subr.bf16.mxu0 %v18269_v58  ;;  %v18358_v7 = vld [vmem:[%s19791_s0 + $0x248] ss:$16 sps:$4 sm:$0xff]   ;;  %v18363_v58 = vld [vmem:[%s19791_s0 + $0x6c] ss:$16 sps:$4 sm:$0xff]  }
 0x820   : > { %11105 = vmatprep.subr.bf16.mxu1 %v18272_v59  ;;  %v18366_v59 = vld [vmem:[%s19791_s0 + $0x26c] ss:$16 sps:$4 sm:$0xff]  }
 0x822   : > { %11065 = vmatpush1.bf16.msra.mxu0 %v18267_v43  ;;  %v18361_v43 = vld [vmem:[%s19791_s0 + $0x68] ss:$16 sps:$4 sm:$0xff]  }
 0x823   : > { %11106 = vmatpush1.bf16.msra.mxu1 %v18270_v42  ;;  %11066 = vmatprep.subr.bf16.mxu0 %v18275_v13  ;;  %v18364_v42 = vld [vmem:[%s19791_s0 + $0x268] ss:$16 sps:$4 sm:$0xff]  }
 0x824   : > { %11107 = vmatprep.subr.bf16.mxu1 %v18278_v19  ;;  %v18367_v13 = vld [vmem:[%s19791_s0 + $0x88] ss:$16 sps:$4 sm:$0xff]  }
 0x825   : > { %v18370_v19 = vld [vmem:[%s19791_s0 + $0x288] ss:$16 sps:$4 sm:$0xff]  }
 0x826   : > { %11067 = vmatpush1.bf16.msra.mxu0 %v18273_v31  ;;  %v18375_v31 = vld [vmem:[%s19791_s0 + $0xac] ss:$16 sps:$4 sm:$0xff]  }
 0x827   : > { %11108 = vmatpush1.bf16.msra.mxu1 %v18276_v22  ;;  %11068 = vmatprep.subr.bf16.mxu0 %v18281_v54  ;;  %v18378_v22 = vld [vmem:[%s19791_s0 + $0x2ac] ss:$16 sps:$4 sm:$0xff]   ;;  %v18373_v54 = vld [vmem:[%s19791_s0 + $0xa8] ss:$16 sps:$4 sm:$0xff]  }
 0x828   : > { %11109 = vmatprep.subr.bf16.mxu1 %v18284_v15  ;;  %v18376_v15 = vld [vmem:[%s19791_s0 + $0x2a8] ss:$16 sps:$4 sm:$0xff]  }
 0x82a   : > { %11069 = vmatpush1.bf16.msra.mxu0 %v18279_v32  ;;  %v18381_v32 = vld [vmem:[%s19791_s0 + $0xcc] ss:$16 sps:$4 sm:$0xff]  }
 0x82b   : > { %11110 = vmatpush1.bf16.msra.mxu1 %v18282_v56  ;;  %11070 = vmatprep.subr.bf16.mxu0 %v18287_v48  ;;  %v18384_v56 = vld [vmem:[%s19791_s0 + $0x2cc] ss:$16 sps:$4 sm:$0xff]   ;;  %v18379_v48 = vld [vmem:[%s19791_s0 + $0xc8] ss:$16 sps:$4 sm:$0xff]  }
 0x82c   : > { %11111 = vmatprep.subr.bf16.mxu1 %v18290_v3  ;;  %v18382_v3 = vld [vmem:[%s19791_s0 + $0x2c8] ss:$16 sps:$4 sm:$0xff]  }
 0x82e   : > { %11071 = vmatpush1.bf16.msra.mxu0 %v18285_v61  ;;  %v18387_v61 = vld [vmem:[%s19791_s0 + $0xec] ss:$16 sps:$4 sm:$0xff]  }
 0x82f   : > { %11112 = vmatpush1.bf16.msra.mxu1 %v18288_v4  ;;  %11072 = vmatprep.subr.bf16.mxu0 %v18293_v8  ;;  %v18390_v4 = vld [vmem:[%s19791_s0 + $0x2ec] ss:$16 sps:$4 sm:$0xff]   ;;  %v18385_v8 = vld [vmem:[%s19791_s0 + $0xe8] ss:$16 sps:$4 sm:$0xff]  }
 0x830   : > { %11113 = vmatprep.subr.bf16.mxu1 %v18296_v16  ;;  %v18388_v16 = vld [vmem:[%s19791_s0 + $0x2e8] ss:$16 sps:$4 sm:$0xff]  }
 0x832   : > { %11073 = vmatpush1.bf16.msra.mxu0 %v18291_v41  ;;  %v18393_v41 = vld [vmem:[%s19791_s0 + $0x10c] ss:$16 sps:$4 sm:$0xff]  }
 0x833   : > { %11114 = vmatpush1.bf16.msra.mxu1 %v18294_v44  ;;  %11074 = vmatprep.subr.bf16.mxu0 %v18299_v11  ;;  %v18396_v44 = vld [vmem:[%s19791_s0 + $0x30c] ss:$16 sps:$4 sm:$0xff]   ;;  %v18391_v11 = vld [vmem:[%s19791_s0 + $0x108] ss:$16 sps:$4 sm:$0xff]  }
 0x834   : > { %11115 = vmatprep.subr.bf16.mxu1 %v18302_v29  ;;  %v18394_v29 = vld [vmem:[%s19791_s0 + $0x308] ss:$16 sps:$4 sm:$0xff]  }
 0x836   : > { %11075 = vmatpush1.bf16.msra.mxu0 %v18297_v12  ;;  %v18399_v12 = vld [vmem:[%s19791_s0 + $0x12c] ss:$16 sps:$4 sm:$0xff]  }
 0x837   : > { %11116 = vmatpush1.bf16.msra.mxu1 %v18300_v53  ;;  %11076 = vmatprep.subr.bf16.mxu0 %v18305_v18  ;;  %v18402_v53 = vld [vmem:[%s19791_s0 + $0x32c] ss:$16 sps:$4 sm:$0xff]   ;;  %v18397_v18 = vld [vmem:[%s19791_s0 + $0x128] ss:$16 sps:$4 sm:$0xff]  }
 0x838   : > { %11117 = vmatprep.subr.bf16.mxu1 %v18308_v14  ;;  %v18400_v14 = vld [vmem:[%s19791_s0 + $0x328] ss:$16 sps:$4 sm:$0xff]  }
 0x83a   : > { %11077 = vmatpush1.bf16.msra.mxu0 %v18303_v34  ;;  %v18405_v34 = vld [vmem:[%s19791_s0 + $0x14c] ss:$16 sps:$4 sm:$0xff]  }
 0x83b   : > { %11118 = vmatpush1.bf16.msra.mxu1 %v18306_v6  ;;  %11078 = vmatprep.subr.bf16.mxu0 %v18311_v20  ;;  %v18408_v6 = vld [vmem:[%s19791_s0 + $0x34c] ss:$16 sps:$4 sm:$0xff]   ;;  %v18403_v20 = vld [vmem:[%s19791_s0 + $0x148] ss:$16 sps:$4 sm:$0xff]  }
 0x83c   : > { %11119 = vmatprep.subr.bf16.mxu1 %v18314_v21  ;;  %v18406_v21 = vld [vmem:[%s19791_s0 + $0x348] ss:$16 sps:$4 sm:$0xff]  }
 0x83e   : > { %11079 = vmatpush1.bf16.msra.mxu0 %v18309_v63  ;;  %v18411_v63 = vld [vmem:[%s19791_s0 + $0x16c] ss:$16 sps:$4 sm:$0xff]  }
 0x83f   : > { %11120 = vmatpush1.bf16.msra.mxu1 %v18312_v52  ;;  %11080 = vmatprep.subr.bf16.mxu0 %v18317_v2  ;;  %v18414_v52 = vld [vmem:[%s19791_s0 + $0x36c] ss:$16 sps:$4 sm:$0xff]   ;;  %v18409_v2 = vld [vmem:[%s19791_s0 + $0x168] ss:$16 sps:$4 sm:$0xff]  }
 0x840   : > { %11121 = vmatprep.subr.bf16.mxu1 %v18320_v55  ;;  %v18412_v55 = vld [vmem:[%s19791_s0 + $0x368] ss:$16 sps:$4 sm:$0xff]  }
 0x842   : > { %11081 = vmatpush1.bf16.msra.mxu0 %v18315_v26  ;;  %v18417_v26 = vld [vmem:[%s19791_s0 + $0x18c] ss:$16 sps:$4 sm:$0xff]  }
 0x843   : > { %11122 = vmatpush1.bf16.msra.mxu1 %v18318_v40  ;;  %11082 = vmatprep.subr.bf16.mxu0 %v18323_v0  ;;  %v18420_v40 = vld [vmem:[%s19791_s0 + $0x38c] ss:$16 sps:$4 sm:$0xff]   ;;  %v18415_v0 = vld [vmem:[%s19791_s0 + $0x188] ss:$16 sps:$4 sm:$0xff]  }
 0x844   : > { %11123 = vmatprep.subr.bf16.mxu1 %v18326_v24  ;;  %v18418_v24 = vld [vmem:[%s19791_s0 + $0x388] ss:$16 sps:$4 sm:$0xff]  }
 0x846   : > { %11083 = vmatpush1.bf16.msra.mxu0 %v18321_v27  ;;  %v18423_v27 = vld [vmem:[%s19791_s0 + $0x1ac] ss:$16 sps:$4 sm:$0xff]  }
 0x847   : > { %11124 = vmatpush1.bf16.msra.mxu1 %v18324_v28  ;;  %11084 = vmatprep.subr.bf16.mxu0 %v18329_v30  ;;  %v18426_v28 = vld [vmem:[%s19791_s0 + $0x3ac] ss:$16 sps:$4 sm:$0xff]   ;;  %v18421_v30 = vld [vmem:[%s19791_s0 + $0x1a8] ss:$16 sps:$4 sm:$0xff]  }
 0x848   : > { %11125 = vmatprep.subr.bf16.mxu1 %v18332_v35  ;;  %v18424_v35 = vld [vmem:[%s19791_s0 + $0x3a8] ss:$16 sps:$4 sm:$0xff]  }
 0x84a   : > { %11085 = vmatpush1.bf16.msra.mxu0 %v18327_v37  ;;  %v18429_v37 = vld [vmem:[%s19791_s0 + $0x1cc] ss:$16 sps:$4 sm:$0xff]  }
 0x84b   : > { %11126 = vmatpush1.bf16.msra.mxu1 %v18330_v49  ;;  %11086 = vmatprep.subr.bf16.mxu0 %v18335_v9  ;;  %v18432_v49 = vld [vmem:[%s19791_s0 + $0x3cc] ss:$16 sps:$4 sm:$0xff]   ;;  %v18427_v9 = vld [vmem:[%s19791_s0 + $0x1c8] ss:$16 sps:$4 sm:$0xff]  }
 0x84c   : > { %11127 = vmatprep.subr.bf16.mxu1 %v18338_v45  ;;  %v18430_v45 = vld [vmem:[%s19791_s0 + $0x3c8] ss:$16 sps:$4 sm:$0xff]  }
 0x84e   : > { %11087 = vmatpush1.bf16.msra.mxu0 %v18333_v25  ;;  %v18435_v25 = vld [vmem:[%s19791_s0 + $0x1ec] ss:$16 sps:$4 sm:$0xff]  }
 0x84f   : > { %11128 = vmatpush1.bf16.msra.mxu1 %v18336_v46  ;;  %11138 = vmatprep.subr.bf16.mxu0 %v18345_v10  ;;  %v18438_v46 = vld [vmem:[%s19791_s0 + $0x3ec] ss:$16 sps:$4 sm:$0xff]   ;;  %v18433_v10 = vld [vmem:[%s19791_s0 + $0x1e8] ss:$16 sps:$4 sm:$0xff]  }
 0x850   : > { %11179 = vmatprep.subr.bf16.mxu1 %v18348_v39  ;;  %v18436_v39 = vld [vmem:[%s19791_s0 + $0x3e8] ss:$16 sps:$4 sm:$0xff]  }
 0x851   : > { %11089 = vmatmul.mubr.bf16.vlgmr.msra.gmra.mrb[8].mxu0 %v21472_v33 }
 0x852   : > { %11130 = vmatmul.mubr.bf16.vlgmr.msra.gmra.mrb[8].mxu1 %v21476_v36  ;;  %11139 = vmatpush1.bf16.msra.mxu0 %v18343_v23  ;;  %v18441_v23 = vld [vmem:[%s19791_s0 + $0x804] ss:$16 sps:$4 sm:$0xff]  }
 0x853   : > { %11180 = vmatpush1.bf16.msra.mxu1 %v18346_v17  ;;  %11140 = vmatprep.subr.bf16.mxu0 %v18351_v51  ;;  %v18444_v17 = vld [vmem:[%s19791_s0 + $0xa04] ss:$16 sps:$4 sm:$0xff]  }
 0x854   : > { %11181 = vmatprep.subr.bf16.mxu1 %v18354_v38  ;;  %11170 = vmatprep.mubr.bf16.mxu0 %v21400_v47  ;;  %v18369_v47 = vld [vmem:[%s19791_s0 + $0x8c] ss:$16 sps:$4 sm:$0xff]   ;;  %v21546_v51 = vld [vmem:[#allocation3 + $0x20] sm:$0xff] }
 0x855   : > { %11211 = vmatprep.mubr.bf16.mxu1 %v21404_v62  ;;  %v18372_v62 = vld [vmem:[%s19791_s0 + $0x28c] ss:$16 sps:$4 sm:$0xff]  }
 0x856   : > { %11141 = vmatpush1.bf16.msra.mxu0 %v18349_v1  ;;  %v21548_v38 = vld [vmem:[#allocation3 + $0x28] sm:$0xff]  ;;  %v18439_v1 = vld [vmem:[%s19791_s0 + $0x800] ss:$16 sps:$4 sm:$0xff]  }
 0x857   : > { %11182 = vmatpush1.bf16.msra.mxu1 %v18352_v50  ;;  %11142 = vmatprep.subr.bf16.mxu0 %v18357_v60  ;;  %v18442_v50 = vld [vmem:[%s19791_s0 + $0xa00] ss:$16 sps:$4 sm:$0xff]   ;;  %v18447_v60 = vld [vmem:[%s19791_s0 + $0x824] ss:$16 sps:$4 sm:$0xff]  }
 0x858   : > { %11183 = vmatprep.subr.bf16.mxu1 %v18360_v57  ;;  %v18450_v57 = vld [vmem:[%s19791_s0 + $0xa24] ss:$16 sps:$4 sm:$0xff]  }
 0x85a   : > { %11143 = vmatpush1.bf16.msra.mxu0 %v18355_v5  ;;  %v21556_v5 = vcombine.high %v21546_v51, %v21546_v51 }
 0x85b   : > { %11184 = vmatpush1.bf16.msra.mxu1 %v18358_v7  ;;  %11144 = vmatprep.subr.bf16.mxu0 %v18363_v58  ;;  %v21560_v7 = vcombine.high %v21548_v38, %v21548_v38  ;;  %v18445_v58 = vld [vmem:[%s19791_s0 + $0x820] ss:$16 sps:$4 sm:$0xff]  }
 0x85c   : > { %11185 = vmatprep.subr.bf16.mxu1 %v18366_v59  ;;  %v18448_v59 = vld [vmem:[%s19791_s0 + $0xa20] ss:$16 sps:$4 sm:$0xff]  }
 0x85e   : > { %11145 = vmatpush1.bf16.msra.mxu0 %v18361_v43  ;;  %v18453_v43 = vld [vmem:[%s19791_s0 + $0x844] ss:$16 sps:$4 sm:$0xff]  }
 0x85f   : > { %11186 = vmatpush1.bf16.msra.mxu1 %v18364_v42  ;;  %11146 = vmatprep.subr.bf16.mxu0 %v18369_v47  ;;  %v18456_v42 = vld [vmem:[%s19791_s0 + $0xa44] ss:$16 sps:$4 sm:$0xff]  }
 0x860   : > { %11187 = vmatprep.subr.bf16.mxu1 %v18372_v62  ;;  %v18459_v47 = vld [vmem:[%s19791_s0 + $0x864] ss:$16 sps:$4 sm:$0xff]  }
 0x861   : > { %v18462_v62 = vld [vmem:[%s19791_s0 + $0xa64] ss:$16 sps:$4 sm:$0xff]  }
 0x862   : > { %11147 = vmatpush1.bf16.msra.mxu0 %v18367_v13  ;;  %v18457_v13 = vld [vmem:[%s19791_s0 + $0x860] ss:$16 sps:$4 sm:$0xff]  }
 0x863   : > { %11188 = vmatpush1.bf16.msra.mxu1 %v18370_v19  ;;  %11148 = vmatprep.subr.bf16.mxu0 %v18375_v31  ;;  %v18460_v19 = vld [vmem:[%s19791_s0 + $0xa60] ss:$16 sps:$4 sm:$0xff]   ;;  %v18465_v31 = vld [vmem:[%s19791_s0 + $0x884] ss:$16 sps:$4 sm:$0xff]  }
 0x864   : > { %11189 = vmatprep.subr.bf16.mxu1 %v18378_v22  ;;  %v18468_v22 = vld [vmem:[%s19791_s0 + $0xa84] ss:$16 sps:$4 sm:$0xff]  }
 0x866   : > { %11149 = vmatpush1.bf16.msra.mxu0 %v18373_v54  ;;  %v18463_v54 = vld [vmem:[%s19791_s0 + $0x880] ss:$16 sps:$4 sm:$0xff]  }
 0x867   : > { %11190 = vmatpush1.bf16.msra.mxu1 %v18376_v15  ;;  %11150 = vmatprep.subr.bf16.mxu0 %v18381_v32  ;;  %v18466_v15 = vld [vmem:[%s19791_s0 + $0xa80] ss:$16 sps:$4 sm:$0xff]   ;;  %v18471_v32 = vld [vmem:[%s19791_s0 + $0x8a4] ss:$16 sps:$4 sm:$0xff]  }
 0x868   : > { %11191 = vmatprep.subr.bf16.mxu1 %v18384_v56  ;;  %v18474_v56 = vld [vmem:[%s19791_s0 + $0xaa4] ss:$16 sps:$4 sm:$0xff]  }
 0x86a   : > { %11151 = vmatpush1.bf16.msra.mxu0 %v18379_v48  ;;  %v18469_v48 = vld [vmem:[%s19791_s0 + $0x8a0] ss:$16 sps:$4 sm:$0xff]  }
 0x86b   : > { %11192 = vmatpush1.bf16.msra.mxu1 %v18382_v3  ;;  %11152 = vmatprep.subr.bf16.mxu0 %v18387_v61  ;;  %v18472_v3 = vld [vmem:[%s19791_s0 + $0xaa0] ss:$16 sps:$4 sm:$0xff]   ;;  %v18477_v61 = vld [vmem:[%s19791_s0 + $0x8c4] ss:$16 sps:$4 sm:$0xff]  }
 0x86c   : > { %11193 = vmatprep.subr.bf16.mxu1 %v18390_v4  ;;  %v18480_v4 = vld [vmem:[%s19791_s0 + $0xac4] ss:$16 sps:$4 sm:$0xff]  }
 0x86e   : > { %11153 = vmatpush1.bf16.msra.mxu0 %v18385_v8 }
 0x86f   : > { %11194 = vmatpush1.bf16.msra.mxu1 %v18388_v16  ;;  %11154 = vmatprep.subr.bf16.mxu0 %v18393_v41  ;;  %v18475_v41 = vld [vmem:[%s19791_s0 + $0x8c0] ss:$16 sps:$4 sm:$0xff]  }
 0x870   : > { %11195 = vmatprep.subr.bf16.mxu1 %v18396_v44  ;;  %v18478_v44 = vld [vmem:[%s19791_s0 + $0xac0] ss:$16 sps:$4 sm:$0xff]  }
 0x872   : > { %11155 = vmatpush1.bf16.msra.mxu0 %v18391_v11 }
 0x873   : > { %11196 = vmatpush1.bf16.msra.mxu1 %v18394_v29  ;;  %11156 = vmatprep.subr.bf16.mxu0 %v18399_v12 }
 0x874   : > { %11197 = vmatprep.subr.bf16.mxu1 %v18402_v53 }
 0x876   : > { %11157 = vmatpush1.bf16.msra.mxu0 %v18397_v18 }
 0x877   : > { %11198 = vmatpush1.bf16.msra.mxu1 %v18400_v14  ;;  %11158 = vmatprep.subr.bf16.mxu0 %v18405_v34 }
 0x878   : > { %11199 = vmatprep.subr.bf16.mxu1 %v18408_v6 }
 0x87a   : > { %11159 = vmatpush1.bf16.msra.mxu0 %v18403_v20  ;;  %v18483_v20 = vld [vmem:[%s19791_s0 + $0x8e4] ss:$16 sps:$4 sm:$0xff]  }
 0x87b   : > { %11200 = vmatpush1.bf16.msra.mxu1 %v18406_v21  ;;  %11160 = vmatprep.subr.bf16.mxu0 %v18411_v63  ;;  %v18486_v21 = vld [vmem:[%s19791_s0 + $0xae4] ss:$16 sps:$4 sm:$0xff]   ;;  %v18481_v63 = vld [vmem:[%s19791_s0 + $0x8e0] ss:$16 sps:$4 sm:$0xff]  }
 0x87c   : > { %11201 = vmatprep.subr.bf16.mxu1 %v18414_v52  ;;  %v18484_v52 = vld [vmem:[%s19791_s0 + $0xae0] ss:$16 sps:$4 sm:$0xff]  }
 0x87e   : > { %11161 = vmatpush1.bf16.msra.mxu0 %v18409_v2  ;;  %v18489_v2 = vld [vmem:[%s19791_s0 + $0x904] ss:$16 sps:$4 sm:$0xff]  }
 0x87f   : > { %11202 = vmatpush1.bf16.msra.mxu1 %v18412_v55  ;;  %11162 = vmatprep.subr.bf16.mxu0 %v18417_v26  ;;  %v18492_v55 = vld [vmem:[%s19791_s0 + $0xb04] ss:$16 sps:$4 sm:$0xff]   ;;  %v18487_v26 = vld [vmem:[%s19791_s0 + $0x900] ss:$16 sps:$4 sm:$0xff]  }
 0x880   : > { %11203 = vmatprep.subr.bf16.mxu1 %v18420_v40  ;;  %v18490_v40 = vld [vmem:[%s19791_s0 + $0xb00] ss:$16 sps:$4 sm:$0xff]  }
 0x882   : > { %11163 = vmatpush1.bf16.msra.mxu0 %v18415_v0  ;;  %v18495_v0 = vld [vmem:[%s19791_s0 + $0x924] ss:$16 sps:$4 sm:$0xff]  }
 0x883   : > { %11204 = vmatpush1.bf16.msra.mxu1 %v18418_v24  ;;  %11164 = vmatprep.subr.bf16.mxu0 %v18423_v27  ;;  %v18498_v24 = vld [vmem:[%s19791_s0 + $0xb24] ss:$16 sps:$4 sm:$0xff]   ;;  %v18493_v27 = vld [vmem:[%s19791_s0 + $0x920] ss:$16 sps:$4 sm:$0xff]  }
 0x884   : > { %11205 = vmatprep.subr.bf16.mxu1 %v18426_v28  ;;  %v18496_v28 = vld [vmem:[%s19791_s0 + $0xb20] ss:$16 sps:$4 sm:$0xff]  }
 0x886   : > { %11165 = vmatpush1.bf16.msra.mxu0 %v18421_v30  ;;  %v18501_v30 = vld [vmem:[%s19791_s0 + $0x944] ss:$16 sps:$4 sm:$0xff]  }
 0x887   : > { %11206 = vmatpush1.bf16.msra.mxu1 %v18424_v35  ;;  %11166 = vmatprep.subr.bf16.mxu0 %v18429_v37  ;;  %v18504_v35 = vld [vmem:[%s19791_s0 + $0xb44] ss:$16 sps:$4 sm:$0xff]   ;;  %v18499_v37 = vld [vmem:[%s19791_s0 + $0x940] ss:$16 sps:$4 sm:$0xff]  }
 0x888   : > { %11207 = vmatprep.subr.bf16.mxu1 %v18432_v49  ;;  %v18502_v49 = vld [vmem:[%s19791_s0 + $0xb40] ss:$16 sps:$4 sm:$0xff]  }
 0x88a   : > { %11167 = vmatpush1.bf16.msra.mxu0 %v18427_v9  ;;  %v18507_v9 = vld [vmem:[%s19791_s0 + $0x964] ss:$16 sps:$4 sm:$0xff]  }
 0x88b   : > { %11208 = vmatpush1.bf16.msra.mxu1 %v18430_v45  ;;  %11168 = vmatprep.subr.bf16.mxu0 %v18435_v25  ;;  %v18510_v45 = vld [vmem:[%s19791_s0 + $0xb64] ss:$16 sps:$4 sm:$0xff]   ;;  %v18505_v25 = vld [vmem:[%s19791_s0 + $0x960] ss:$16 sps:$4 sm:$0xff]  }
 0x88c   : > { %11209 = vmatprep.subr.bf16.mxu1 %v18438_v46  ;;  %v18508_v46 = vld [vmem:[%s19791_s0 + $0xb60] ss:$16 sps:$4 sm:$0xff]  }
 0x88e   : > { %11169 = vmatpush1.bf16.msra.mxu0 %v18433_v10  ;;  %v18513_v10 = vld [vmem:[%s19791_s0 + $0x984] ss:$16 sps:$4 sm:$0xff]  }
 0x88f   : > { %11210 = vmatpush1.bf16.msra.mxu1 %v18436_v39  ;;  %12005 = vmatprep.subr.bf16.mxu0 %v18441_v23  ;;  %v18516_v39 = vld [vmem:[%s19791_s0 + $0xb84] ss:$16 sps:$4 sm:$0xff]   ;;  %v18511_v23 = vld [vmem:[%s19791_s0 + $0x980] ss:$16 sps:$4 sm:$0xff]  }
 0x890   : > { %12046 = vmatprep.subr.bf16.mxu1 %v18444_v17  ;;  %v18514_v17 = vld [vmem:[%s19791_s0 + $0xb80] ss:$16 sps:$4 sm:$0xff]  }
 0x891   : > { %11171 = vmatmul.mubr.bf16.vlgmr.msra.gmra.mrb[12].mxu0 %v21472_v33  ;;  %v18451_v33 = vld [vmem:[%s19791_s0 + $0x840] ss:$16 sps:$4 sm:$0xff]  }
 0x892   : > { %11212 = vmatmul.mubr.bf16.vlgmr.msra.gmra.mrb[12].mxu1 %v21476_v36  ;;  %12006 = vmatpush1.bf16.msra.mxu0 %v18439_v1  ;;  %v18454_v36 = vld [vmem:[%s19791_s0 + $0xa40] ss:$16 sps:$4 sm:$0xff]   ;;  %v18519_v1 = vld [vmem:[%s19791_s0 + $0x9a4] ss:$16 sps:$4 sm:$0xff]  }
 0x893   : > { %12047 = vmatpush1.bf16.msra.mxu1 %v18442_v50  ;;  %12007 = vmatprep.subr.bf16.mxu0 %v18447_v60  ;;  %v18522_v50 = vld [vmem:[%s19791_s0 + $0xba4] ss:$16 sps:$4 sm:$0xff]   ;;  %v18517_v60 = vld [vmem:[%s19791_s0 + $0x9a0] ss:$16 sps:$4 sm:$0xff]  }
 0x894   : > { %12048 = vmatprep.subr.bf16.mxu1 %v18450_v57  ;;  %12037 = vmatprep.mubr.bf16.mxu0 %v21556_v5  ;;  %v18520_v57 = vld [vmem:[%s19791_s0 + $0xba0] ss:$16 sps:$4 sm:$0xff]  }
 0x895   : > { %12078 = vmatprep.mubr.bf16.mxu1 %v21560_v7 }
 0x896   : > { %12008 = vmatpush1.bf16.msra.mxu0 %v18445_v58  ;;  %v18525_v58 = vld [vmem:[%s19791_s0 + $0x9c4] ss:$16 sps:$4 sm:$0xff]  }
 0x897   : > { %12049 = vmatpush1.bf16.msra.mxu1 %v18448_v59  ;;  %12009 = vmatprep.subr.bf16.mxu0 %v18453_v43  ;;  %v18528_v59 = vld [vmem:[%s19791_s0 + $0xbc4] ss:$16 sps:$4 sm:$0xff]   ;;  %v18523_v43 = vld [vmem:[%s19791_s0 + $0x9c0] ss:$16 sps:$4 sm:$0xff]  }
 0x898   : > { %12050 = vmatprep.subr.bf16.mxu1 %v18456_v42  ;;  %v18526_v42 = vld [vmem:[%s19791_s0 + $0xbc0] ss:$16 sps:$4 sm:$0xff]  }
 0x89a   : > { %12010 = vmatpush1.bf16.msra.mxu0 %v18451_v33  ;;  %v18531_v33 = vld [vmem:[%s19791_s0 + $0x9e4] ss:$16 sps:$4 sm:$0xff]  }
 0x89b   : > { %12051 = vmatpush1.bf16.msra.mxu1 %v18454_v36  ;;  %12011 = vmatprep.subr.bf16.mxu0 %v18459_v47  ;;  %v18534_v36 = vld [vmem:[%s19791_s0 + $0xbe4] ss:$16 sps:$4 sm:$0xff]   ;;  %v18529_v47 = vld [vmem:[%s19791_s0 + $0x9e0] ss:$16 sps:$4 sm:$0xff]  }
 0x89c   : > { %12052 = vmatprep.subr.bf16.mxu1 %v18462_v62  ;;  %v18532_v62 = vld [vmem:[%s19791_s0 + $0xbe0] ss:$16 sps:$4 sm:$0xff]  }
 0x89e   : > { %12012 = vmatpush1.bf16.msra.mxu0 %v18457_v13  ;;  %v18541_v13 = vld [vmem:[%s19791_s0 + $0x80c] ss:$16 sps:$4 sm:$0xff]  }
 0x89f   : > { %12053 = vmatpush1.bf16.msra.mxu1 %v18460_v19  ;;  %12013 = vmatprep.subr.bf16.mxu0 %v18465_v31  ;;  %v18544_v19 = vld [vmem:[%s19791_s0 + $0xa0c] ss:$16 sps:$4 sm:$0xff]   ;;  %v21632_v31 = vcombine.low %v21546_v51, %v21546_v51  ;;  %v18545_v51 = vld [vmem:[%s19791_s0 + $0x828] ss:$16 sps:$4 sm:$0xff]  }
 0x8a0   : > { %12054 = vmatprep.subr.bf16.mxu1 %v18468_v22  ;;  %v21636_v22 = vcombine.low %v21548_v38, %v21548_v38  ;;  %v18548_v38 = vld [vmem:[%s19791_s0 + $0xa28] ss:$16 sps:$4 sm:$0xff]  }
 0x8a2   : > { %12014 = vmatpush1.bf16.msra.mxu0 %v18463_v54  ;;  %v18539_v54 = vld [vmem:[%s19791_s0 + $0x808] ss:$16 sps:$4 sm:$0xff]  }
 0x8a3   : > { %12055 = vmatpush1.bf16.msra.mxu1 %v18466_v15  ;;  %12015 = vmatprep.subr.bf16.mxu0 %v18471_v32  ;;  %v18542_v15 = vld [vmem:[%s19791_s0 + $0xa08] ss:$16 sps:$4 sm:$0xff]   ;;  %v18547_v32 = vld [vmem:[%s19791_s0 + $0x82c] ss:$16 sps:$4 sm:$0xff]  }
 0x8a4   : > { %12056 = vmatprep.subr.bf16.mxu1 %v18474_v56  ;;  %v10272_v8 = vpop.f32.mrb[0].mxu0  ;;  %v18550_v56 = vld [vmem:[%s19791_s0 + $0xa2c] ss:$16 sps:$4 sm:$0xff]  }
 0x8a5   : > { %v10313_v16 = vpop.f32.mrb[0].mxu1  ;;  %v10274_v29 = vpop.f32.mrb[1].mxu0 }
 0x8a6   : > { %v21588_v11 = vadd.f32 %v10313_v16, %v10272_v8  ;;  %v10315_v12 = vpop.f32.mrb[1].mxu1  ;;  %v10276_v18 = vpop.f32.mrb[2].mxu0  ;;  %12016 = vmatpush1.bf16.msra.mxu0 %v18469_v48  ;;  %v18553_v48 = vld [vmem:[%s19791_s0 + $0x84c] ss:$16 sps:$4 sm:$0xff]  }
 0x8a7   : > { %v21590_v53 = vadd.f32 %v10315_v12, %v10274_v29  ;;  %v10317_v14 = vpop.f32.mrb[2].mxu1  ;;  %12057 = vmatpush1.bf16.msra.mxu1 %v18472_v3  ;;  %v10277_v34 = vpop.f32.mrb[3].mxu0  ;;  %12017 = vmatprep.subr.bf16.mxu0 %v18477_v61  ;;  %v18556_v3 = vld [vmem:[%s19791_s0 + $0xa4c] ss:$16 sps:$4 sm:$0xff]   ;;  %v18551_v61 = vld [vmem:[%s19791_s0 + $0x848] ss:$16 sps:$4 sm:$0xff]  }
 0x8a8   : > { %v10318_v6 = vpop.f32.mrb[3].mxu1  ;;  %12058 = vmatprep.subr.bf16.mxu1 %v18480_v4  ;;  %v18554_v4 = vld [vmem:[%s19791_s0 + $0xa48] ss:$16 sps:$4 sm:$0xff]   ;;  %v18559_v8 = vld [vmem:[%s19791_s0 + $0x86c] ss:$16 sps:$4 sm:$0xff]  }
 0x8a9   : > { %v18562_v16 = vld [vmem:[%s19791_s0 + $0xa6c] ss:$16 sps:$4 sm:$0xff]   ;;  %v18563_v29 = vld [vmem:[%s19791_s0 + $0x888] ss:$16 sps:$4 sm:$0xff]  }
 0x8aa   : > { %12018 = vmatpush1.bf16.msra.mxu0 %v18475_v41  ;;  %v18557_v41 = vld [vmem:[%s19791_s0 + $0x868] ss:$16 sps:$4 sm:$0xff]   ;;  %v18571_v18 = vld [vmem:[%s19791_s0 + $0x8ac] ss:$16 sps:$4 sm:$0xff]  }
 0x8ab   : > { %12059 = vmatpush1.bf16.msra.mxu1 %v18478_v44  ;;  %12019 = vmatprep.subr.bf16.mxu0 %v18483_v20  ;;  %v18568_v44 = vld [vmem:[%s19791_s0 + $0xa8c] ss:$16 sps:$4 sm:$0xff]   ;;  %v18566_v12 = vld [vmem:[%s19791_s0 + $0xa88] ss:$16 sps:$4 sm:$0xff]  }
 0x8ac   : > { %12060 = vmatprep.subr.bf16.mxu1 %v18486_v21  ;;  %v18574_v14 = vld [vmem:[%s19791_s0 + $0xaac] ss:$16 sps:$4 sm:$0xff]   ;;  %v18569_v34 = vld [vmem:[%s19791_s0 + $0x8a8] ss:$16 sps:$4 sm:$0xff]  }
 0x8ad   : > { %v18572_v6 = vld [vmem:[%s19791_s0 + $0xaa8] ss:$16 sps:$4 sm:$0xff]   ;;  %v18577_v20 = vld [vmem:[%s19791_s0 + $0x8cc] ss:$16 sps:$4 sm:$0xff]  }
 0x8ae   : > { %12020 = vmatpush1.bf16.msra.mxu0 %v18481_v63  ;;  %v18580_v21 = vld [vmem:[%s19791_s0 + $0xacc] ss:$16 sps:$4 sm:$0xff]  }
 0x8af   : > { %12061 = vmatpush1.bf16.msra.mxu1 %v18484_v52  ;;  %12021 = vmatprep.subr.bf16.mxu0 %v18489_v2 }
 0x8b0   : > { %12062 = vmatprep.subr.bf16.mxu1 %v18492_v55 }
 0x8b2   : > { %12022 = vmatpush1.bf16.msra.mxu0 %v18487_v26 }
 0x8b3   : > { %12063 = vmatpush1.bf16.msra.mxu1 %v18490_v40  ;;  %12023 = vmatprep.subr.bf16.mxu0 %v18495_v0 }
 0x8b4   : > { %12064 = vmatprep.subr.bf16.mxu1 %v18498_v24 }
 0x8b6   : > { %12024 = vmatpush1.bf16.msra.mxu0 %v18493_v27  ;;  %v18575_v27 = vld [vmem:[%s19791_s0 + $0x8c8] ss:$16 sps:$4 sm:$0xff]  }
 0x8b7   : > { %12065 = vmatpush1.bf16.msra.mxu1 %v18496_v28  ;;  %12025 = vmatprep.subr.bf16.mxu0 %v18501_v30  ;;  %v18578_v28 = vld [vmem:[%s19791_s0 + $0xac8] ss:$16 sps:$4 sm:$0xff]  }
 0x8b8   : > { %12066 = vmatprep.subr.bf16.mxu1 %v18504_v35 }
 0x8ba   : > { %12026 = vmatpush1.bf16.msra.mxu0 %v18499_v37  ;;  %v18583_v37 = vld [vmem:[%s19791_s0 + $0x8ec] ss:$16 sps:$4 sm:$0xff]  }
 0x8bb   : > { %12067 = vmatpush1.bf16.msra.mxu1 %v18502_v49  ;;  %12027 = vmatprep.subr.bf16.mxu0 %v18507_v9  ;;  %v18586_v49 = vld [vmem:[%s19791_s0 + $0xaec] ss:$16 sps:$4 sm:$0xff]   ;;  %v18581_v9 = vld [vmem:[%s19791_s0 + $0x8e8] ss:$16 sps:$4 sm:$0xff]  }
 0x8bc   : > { %12068 = vmatprep.subr.bf16.mxu1 %v18510_v45  ;;  %v18584_v45 = vld [vmem:[%s19791_s0 + $0xae8] ss:$16 sps:$4 sm:$0xff]  }
 0x8be   : > { %12028 = vmatpush1.bf16.msra.mxu0 %v18505_v25  ;;  %v18589_v25 = vld [vmem:[%s19791_s0 + $0x90c] ss:$16 sps:$4 sm:$0xff]  }
 0x8bf   : > { %12069 = vmatpush1.bf16.msra.mxu1 %v18508_v46  ;;  %12029 = vmatprep.subr.bf16.mxu0 %v18513_v10  ;;  %v18592_v46 = vld [vmem:[%s19791_s0 + $0xb0c] ss:$16 sps:$4 sm:$0xff]   ;;  %v18587_v10 = vld [vmem:[%s19791_s0 + $0x908] ss:$16 sps:$4 sm:$0xff]  }
 0x8c0   : > { %12070 = vmatprep.subr.bf16.mxu1 %v18516_v39  ;;  %v18590_v39 = vld [vmem:[%s19791_s0 + $0xb08] ss:$16 sps:$4 sm:$0xff]  }
 0x8c2   : > { %12030 = vmatpush1.bf16.msra.mxu0 %v18511_v23  ;;  %v18595_v23 = vld [vmem:[%s19791_s0 + $0x92c] ss:$16 sps:$4 sm:$0xff]  }
 0x8c3   : > { %12071 = vmatpush1.bf16.msra.mxu1 %v18514_v17  ;;  %12031 = vmatprep.subr.bf16.mxu0 %v18519_v1  ;;  %v18598_v17 = vld [vmem:[%s19791_s0 + $0xb2c] ss:$16 sps:$4 sm:$0xff]   ;;  %v18593_v1 = vld [vmem:[%s19791_s0 + $0x928] ss:$16 sps:$4 sm:$0xff]  }
 0x8c4   : > { %12072 = vmatprep.subr.bf16.mxu1 %v18522_v50  ;;  %v18596_v50 = vld [vmem:[%s19791_s0 + $0xb28] ss:$16 sps:$4 sm:$0xff]  }
 0x8c6   : > { %12032 = vmatpush1.bf16.msra.mxu0 %v18517_v60  ;;  %v18601_v60 = vld [vmem:[%s19791_s0 + $0x94c] ss:$16 sps:$4 sm:$0xff]  }
 0x8c7   : > { %12073 = vmatpush1.bf16.msra.mxu1 %v18520_v57  ;;  %12033 = vmatprep.subr.bf16.mxu0 %v18525_v58  ;;  %v18604_v57 = vld [vmem:[%s19791_s0 + $0xb4c] ss:$16 sps:$4 sm:$0xff]   ;;  %v18599_v58 = vld [vmem:[%s19791_s0 + $0x948] ss:$16 sps:$4 sm:$0xff]  }
 0x8c8   : > { %12074 = vmatprep.subr.bf16.mxu1 %v18528_v59  ;;  %v18602_v59 = vld [vmem:[%s19791_s0 + $0xb48] ss:$16 sps:$4 sm:$0xff]  }
 0x8ca   : > { %12034 = vmatpush1.bf16.msra.mxu0 %v18523_v43  ;;  %v18607_v43 = vld [vmem:[%s19791_s0 + $0x96c] ss:$16 sps:$4 sm:$0xff]  }
 0x8cb   : > { %12075 = vmatpush1.bf16.msra.mxu1 %v18526_v42  ;;  %12035 = vmatprep.subr.bf16.mxu0 %v18531_v33  ;;  %v18610_v42 = vld [vmem:[%s19791_s0 + $0xb6c] ss:$16 sps:$4 sm:$0xff]   ;;  %v18605_v33 = vld [vmem:[%s19791_s0 + $0x968] ss:$16 sps:$4 sm:$0xff]  }
 0x8cc   : > { %12076 = vmatprep.subr.bf16.mxu1 %v18534_v36  ;;  %v18608_v36 = vld [vmem:[%s19791_s0 + $0xb68] ss:$16 sps:$4 sm:$0xff]  }
 0x8ce   : > { %12036 = vmatpush1.bf16.msra.mxu0 %v18529_v47  ;;  %v18613_v47 = vld [vmem:[%s19791_s0 + $0x98c] ss:$16 sps:$4 sm:$0xff]  }
 0x8cf   : > { %12077 = vmatpush1.bf16.msra.mxu1 %v18532_v62  ;;  %12087 = vmatprep.subr.bf16.mxu0 %v18541_v13  ;;  %v18616_v62 = vld [vmem:[%s19791_s0 + $0xb8c] ss:$16 sps:$4 sm:$0xff]   ;;  %v18611_v13 = vld [vmem:[%s19791_s0 + $0x988] ss:$16 sps:$4 sm:$0xff]  }
 0x8d0   : > { %12128 = vmatprep.subr.bf16.mxu1 %v18544_v19  ;;  %v18614_v19 = vld [vmem:[%s19791_s0 + $0xb88] ss:$16 sps:$4 sm:$0xff]  }
 0x8d1   : > { %12038 = vmatmul.mubr.bf16.vlgmr.msra.gmra.mrb[16].mxu0 %v21632_v31 }
 0x8d2   : > { %12079 = vmatmul.mubr.bf16.vlgmr.msra.gmra.mrb[16].mxu1 %v21636_v22  ;;  %12088 = vmatpush1.bf16.msra.mxu0 %v18539_v54  ;;  %v18619_v54 = vld [vmem:[%s19791_s0 + $0x9ac] ss:$16 sps:$4 sm:$0xff]  }
 0x8d3   : > { %12129 = vmatpush1.bf16.msra.mxu1 %v18542_v15  ;;  %12089 = vmatprep.subr.bf16.mxu0 %v18547_v32  ;;  %v18622_v15 = vld [vmem:[%s19791_s0 + $0xbac] ss:$16 sps:$4 sm:$0xff]   ;;  %v18617_v32 = vld [vmem:[%s19791_s0 + $0x9a8] ss:$16 sps:$4 sm:$0xff]  }
 0x8d4   : > { %12130 = vmatprep.subr.bf16.mxu1 %v18550_v56  ;;  %12119 = vmatprep.mubr.bf16.mxu0 %v21556_v5  ;;  %v18560_v5 = vld [vmem:[%s19791_s0 + $0xa68] ss:$16 sps:$4 sm:$0xff]  }
 0x8d5   : > { %12160 = vmatprep.mubr.bf16.mxu1 %v21560_v7  ;;  %v18565_v7 = vld [vmem:[%s19791_s0 + $0x88c] ss:$16 sps:$4 sm:$0xff]   ;;  %v18620_v56 = vld [vmem:[%s19791_s0 + $0xba8] ss:$16 sps:$4 sm:$0xff]  }
 0x8d6   : > { %12090 = vmatpush1.bf16.msra.mxu0 %v18545_v51  ;;  %v18625_v51 = vld [vmem:[%s19791_s0 + $0x9cc] ss:$16 sps:$4 sm:$0xff]  }
 0x8d7   : > { %12131 = vmatpush1.bf16.msra.mxu1 %v18548_v38  ;;  %12091 = vmatprep.subr.bf16.mxu0 %v18553_v48  ;;  %v18628_v38 = vld [vmem:[%s19791_s0 + $0xbcc] ss:$16 sps:$4 sm:$0xff]   ;;  %v18623_v48 = vld [vmem:[%s19791_s0 + $0x9c8] ss:$16 sps:$4 sm:$0xff]  }
 0x8d8   : > { %12132 = vmatprep.subr.bf16.mxu1 %v18556_v3  ;;  %v18626_v3 = vld [vmem:[%s19791_s0 + $0xbc8] ss:$16 sps:$4 sm:$0xff]  }
 0x8da   : > { %12092 = vmatpush1.bf16.msra.mxu0 %v18551_v61  ;;  %v18631_v61 = vld [vmem:[%s19791_s0 + $0x9ec] ss:$16 sps:$4 sm:$0xff]  }
 0x8db   : > { %12133 = vmatpush1.bf16.msra.mxu1 %v18554_v4  ;;  %12093 = vmatprep.subr.bf16.mxu0 %v18559_v8  ;;  %v18634_v4 = vld [vmem:[%s19791_s0 + $0xbec] ss:$16 sps:$4 sm:$0xff]   ;;  %v18629_v8 = vld [vmem:[%s19791_s0 + $0x9e8] ss:$16 sps:$4 sm:$0xff]  }
 0x8dc   : > { %12134 = vmatprep.subr.bf16.mxu1 %v18562_v16  ;;  %v18632_v16 = vld [vmem:[%s19791_s0 + $0xbe8] ss:$16 sps:$4 sm:$0xff]  }
 0x8de   : > { %12094 = vmatpush1.bf16.msra.mxu0 %v18557_v41  ;;  %v18637_v41 = vld [vmem:[%s19791_s0 + $0xc04] ss:$16 sps:$4 sm:$0xff]  }
 0x8df   : > { %12135 = vmatpush1.bf16.msra.mxu1 %v18560_v5  ;;  %12095 = vmatprep.subr.bf16.mxu0 %v18565_v7  ;;  %v18640_v5 = vld [vmem:[%s19791_s0 + $0xe04] ss:$16 sps:$4 sm:$0xff]  }
 0x8e0   : > { %12136 = vmatprep.subr.bf16.mxu1 %v18568_v44  ;;  %v21710_v7 = vld [vmem:[#allocation3 + $0x30] sm:$0xff]  ;;  %v21712_v44 = vld [vmem:[#allocation3 + $0x38] sm:$0xff] }
 0x8e2   : > { %12096 = vmatpush1.bf16.msra.mxu0 %v18563_v29  ;;  %v18635_v29 = vld [vmem:[%s19791_s0 + $0xc00] ss:$16 sps:$4 sm:$0xff]  }
 0x8e3   : > { %12137 = vmatpush1.bf16.msra.mxu1 %v18566_v12  ;;  %12097 = vmatprep.subr.bf16.mxu0 %v18571_v18  ;;  %v18638_v12 = vld [vmem:[%s19791_s0 + $0xe00] ss:$16 sps:$4 sm:$0xff]   ;;  %v18643_v18 = vld [vmem:[%s19791_s0 + $0xc24] ss:$16 sps:$4 sm:$0xff]  }
 0x8e4   : > { %12138 = vmatprep.subr.bf16.mxu1 %v18574_v14  ;;  %v10354_v63 = vpop.f32.mrb[4].mxu0  ;;  %v18646_v14 = vld [vmem:[%s19791_s0 + $0xe24] ss:$16 sps:$4 sm:$0xff]  }
 0x8e5   : > { %v10395_v52 = vpop.f32.mrb[4].mxu1  ;;  %v10356_v55 = vpop.f32.mrb[5].mxu0 }
 0x8e6   : > { %v21666_v2 = vadd.f32 %v10395_v52, %v10354_v63  ;;  %v10397_v26 = vpop.f32.mrb[5].mxu1  ;;  %v10358_v0 = vpop.f32.mrb[6].mxu0  ;;  %12098 = vmatpush1.bf16.msra.mxu0 %v18569_v34  ;;  %v21720_v34 = vcombine.high %v21710_v7, %v21710_v7  ;;  %v18649_v63 = vld [vmem:[%s19791_s0 + $0xc44] ss:$16 sps:$4 sm:$0xff]  }
 0x8e7   : > { %v21668_v40 = vadd.f32 %v10397_v26, %v10356_v55  ;;  %v10399_v24 = vpop.f32.mrb[6].mxu1  ;;  %12139 = vmatpush1.bf16.msra.mxu1 %v18572_v6  ;;  %v10359_v30 = vpop.f32.mrb[7].mxu0  ;;  %12099 = vmatprep.subr.bf16.mxu0 %v18577_v20  ;;  %v21724_v6 = vcombine.high %v21712_v44, %v21712_v44  ;;  %v18641_v20 = vld [vmem:[%s19791_s0 + $0xc20] ss:$16 sps:$4 sm:$0xff]   ;;  %v18652_v52 = vld [vmem:[%s19791_s0 + $0xe44] ss:$16 sps:$4 sm:$0xff]  }
 0x8e8   : > { %v10400_v35 = vpop.f32.mrb[7].mxu1  ;;  %12140 = vmatprep.subr.bf16.mxu1 %v18580_v21  ;;  %v18644_v21 = vld [vmem:[%s19791_s0 + $0xe20] ss:$16 sps:$4 sm:$0xff]   ;;  %v18655_v55 = vld [vmem:[%s19791_s0 + $0xc64] ss:$16 sps:$4 sm:$0xff]  }
 0x8e9   : > { %v18658_v26 = vld [vmem:[%s19791_s0 + $0xe64] ss:$16 sps:$4 sm:$0xff]   ;;  %v18653_v0 = vld [vmem:[%s19791_s0 + $0xc60] ss:$16 sps:$4 sm:$0xff]  }
 0x8ea   : > { %12100 = vmatpush1.bf16.msra.mxu0 %v18575_v27  ;;  %v18656_v24 = vld [vmem:[%s19791_s0 + $0xe60] ss:$16 sps:$4 sm:$0xff]   ;;  %v18661_v27 = vld [vmem:[%s19791_s0 + $0xc84] ss:$16 sps:$4 sm:$0xff]  }
 0x8eb   : > { %12141 = vmatpush1.bf16.msra.mxu1 %v18578_v28  ;;  %12101 = vmatprep.subr.bf16.mxu0 %v18583_v37  ;;  %v18664_v28 = vld [vmem:[%s19791_s0 + $0xe84] ss:$16 sps:$4 sm:$0xff]   ;;  %v18659_v30 = vld [vmem:[%s19791_s0 + $0xc80] ss:$16 sps:$4 sm:$0xff]  }
 0x8ec   : > { %12142 = vmatprep.subr.bf16.mxu1 %v18586_v49  ;;  %v18662_v35 = vld [vmem:[%s19791_s0 + $0xe80] ss:$16 sps:$4 sm:$0xff]   ;;  %v18667_v37 = vld [vmem:[%s19791_s0 + $0xca4] ss:$16 sps:$4 sm:$0xff]  }
 0x8ed   : > { %v18670_v49 = vld [vmem:[%s19791_s0 + $0xea4] ss:$16 sps:$4 sm:$0xff]  }
 0x8ee   : > { %12102 = vmatpush1.bf16.msra.mxu0 %v18581_v9  ;;  %v18665_v9 = vld [vmem:[%s19791_s0 + $0xca0] ss:$16 sps:$4 sm:$0xff]  }
 0x8ef   : > { %12143 = vmatpush1.bf16.msra.mxu1 %v18584_v45  ;;  %12103 = vmatprep.subr.bf16.mxu0 %v18589_v25  ;;  %v18668_v45 = vld [vmem:[%s19791_s0 + $0xea0] ss:$16 sps:$4 sm:$0xff]   ;;  %v18673_v25 = vld [vmem:[%s19791_s0 + $0xcc4] ss:$16 sps:$4 sm:$0xff]  }
 0x8f0   : > { %12144 = vmatprep.subr.bf16.mxu1 %v18592_v46  ;;  %v18676_v46 = vld [vmem:[%s19791_s0 + $0xec4] ss:$16 sps:$4 sm:$0xff]  }
 0x8f2   : > { %12104 = vmatpush1.bf16.msra.mxu0 %v18587_v10 }
 0x8f3   : > { %12145 = vmatpush1.bf16.msra.mxu1 %v18590_v39  ;;  %12105 = vmatprep.subr.bf16.mxu0 %v18595_v23 }
 0x8f4   : > { %12146 = vmatprep.subr.bf16.mxu1 %v18598_v17 }
 0x8f6   : > { %12106 = vmatpush1.bf16.msra.mxu0 %v18593_v1 }
 0x8f7   : > { %12147 = vmatpush1.bf16.msra.mxu1 %v18596_v50  ;;  %12107 = vmatprep.subr.bf16.mxu0 %v18601_v60 }
 0x8f8   : > { %12148 = vmatprep.subr.bf16.mxu1 %v18604_v57 }
 0x8fa   : > { %12108 = vmatpush1.bf16.msra.mxu0 %v18599_v58  ;;  %v18671_v58 = vld [vmem:[%s19791_s0 + $0xcc0] ss:$16 sps:$4 sm:$0xff]  }
 0x8fb   : > { %12149 = vmatpush1.bf16.msra.mxu1 %v18602_v59  ;;  %12109 = vmatprep.subr.bf16.mxu0 %v18607_v43  ;;  %v18674_v59 = vld [vmem:[%s19791_s0 + $0xec0] ss:$16 sps:$4 sm:$0xff]  }
 0x8fc   : > { %12150 = vmatprep.subr.bf16.mxu1 %v18610_v42 }
 0x8fe   : > { %12110 = vmatpush1.bf16.msra.mxu0 %v18605_v33 }
 0x8ff   : > { %12151 = vmatpush1.bf16.msra.mxu1 %v18608_v36  ;;  %12111 = vmatprep.subr.bf16.mxu0 %v18613_v47  ;;  %v18677_v47 = vld [vmem:[%s19791_s0 + $0xce0] ss:$16 sps:$4 sm:$0xff]  }
 0x900   : > { %12152 = vmatprep.subr.bf16.mxu1 %v18616_v62  ;;  %v18680_v62 = vld [vmem:[%s19791_s0 + $0xee0] ss:$16 sps:$4 sm:$0xff]  }
 0x902   : > { %12112 = vmatpush1.bf16.msra.mxu0 %v18611_v13  ;;  %v18685_v13 = vld [vmem:[%s19791_s0 + $0xd04] ss:$16 sps:$4 sm:$0xff]  }
 0x903   : > { %12153 = vmatpush1.bf16.msra.mxu1 %v18614_v19  ;;  %12113 = vmatprep.subr.bf16.mxu0 %v18619_v54  ;;  %v18688_v19 = vld [vmem:[%s19791_s0 + $0xf04] ss:$16 sps:$4 sm:$0xff]   ;;  %v18683_v54 = vld [vmem:[%s19791_s0 + $0xd00] ss:$16 sps:$4 sm:$0xff]  }
 0x904   : > { %12154 = vmatprep.subr.bf16.mxu1 %v18622_v15  ;;  %v18686_v15 = vld [vmem:[%s19791_s0 + $0xf00] ss:$16 sps:$4 sm:$0xff]  }
 0x906   : > { %12114 = vmatpush1.bf16.msra.mxu0 %v18617_v32  ;;  %v18691_v32 = vld [vmem:[%s19791_s0 + $0xd24] ss:$16 sps:$4 sm:$0xff]  }
 0x907   : > { %12155 = vmatpush1.bf16.msra.mxu1 %v18620_v56  ;;  %12115 = vmatprep.subr.bf16.mxu0 %v18625_v51  ;;  %v18694_v56 = vld [vmem:[%s19791_s0 + $0xf24] ss:$16 sps:$4 sm:$0xff]   ;;  %v18689_v51 = vld [vmem:[%s19791_s0 + $0xd20] ss:$16 sps:$4 sm:$0xff]  }
 0x908   : > { %12156 = vmatprep.subr.bf16.mxu1 %v18628_v38  ;;  %v18692_v38 = vld [vmem:[%s19791_s0 + $0xf20] ss:$16 sps:$4 sm:$0xff]  }
 0x90a   : > { %12116 = vmatpush1.bf16.msra.mxu0 %v18623_v48  ;;  %v18697_v48 = vld [vmem:[%s19791_s0 + $0xd44] ss:$16 sps:$4 sm:$0xff]  }
 0x90b   : > { %12157 = vmatpush1.bf16.msra.mxu1 %v18626_v3  ;;  %12117 = vmatprep.subr.bf16.mxu0 %v18631_v61  ;;  %v18700_v3 = vld [vmem:[%s19791_s0 + $0xf44] ss:$16 sps:$4 sm:$0xff]   ;;  %v18695_v61 = vld [vmem:[%s19791_s0 + $0xd40] ss:$16 sps:$4 sm:$0xff]  }
 0x90c   : > { %12158 = vmatprep.subr.bf16.mxu1 %v18634_v4  ;;  %v18698_v4 = vld [vmem:[%s19791_s0 + $0xf40] ss:$16 sps:$4 sm:$0xff]  }
 0x90e   : > { %12118 = vmatpush1.bf16.msra.mxu0 %v18629_v8  ;;  %v18703_v8 = vld [vmem:[%s19791_s0 + $0xd64] ss:$16 sps:$4 sm:$0xff]  }
 0x90f   : > { %12159 = vmatpush1.bf16.msra.mxu1 %v18632_v16  ;;  %12958 = vmatprep.subr.bf16.mxu0 %v18637_v41  ;;  %v18706_v16 = vld [vmem:[%s19791_s0 + $0xf64] ss:$16 sps:$4 sm:$0xff]   ;;  %v18701_v41 = vld [vmem:[%s19791_s0 + $0xd60] ss:$16 sps:$4 sm:$0xff]  }
 0x910   : > { %12999 = vmatprep.subr.bf16.mxu1 %v18640_v5  ;;  %v18704_v5 = vld [vmem:[%s19791_s0 + $0xf60] ss:$16 sps:$4 sm:$0xff]  }
 0x911   : > { %12120 = vmatmul.mubr.bf16.vlgmr.msra.gmra.mrb[20].mxu0 %v21632_v31  ;;  %v18647_v31 = vld [vmem:[%s19791_s0 + $0xc40] ss:$16 sps:$4 sm:$0xff]  }
 0x912   : > { %12161 = vmatmul.mubr.bf16.vlgmr.msra.gmra.mrb[20].mxu1 %v21636_v22  ;;  %12959 = vmatpush1.bf16.msra.mxu0 %v18635_v29  ;;  %v18650_v22 = vld [vmem:[%s19791_s0 + $0xe40] ss:$16 sps:$4 sm:$0xff]   ;;  %v18709_v29 = vld [vmem:[%s19791_s0 + $0xd84] ss:$16 sps:$4 sm:$0xff]  }
 0x913   : > { %13000 = vmatpush1.bf16.msra.mxu1 %v18638_v12  ;;  %12960 = vmatprep.subr.bf16.mxu0 %v18643_v18  ;;  %v18712_v12 = vld [vmem:[%s19791_s0 + $0xf84] ss:$16 sps:$4 sm:$0xff]   ;;  %v18707_v18 = vld [vmem:[%s19791_s0 + $0xd80] ss:$16 sps:$4 sm:$0xff]  }
 0x914   : > { %13001 = vmatprep.subr.bf16.mxu1 %v18646_v14  ;;  %12990 = vmatprep.mubr.bf16.mxu0 %v21720_v34  ;;  %v18710_v14 = vld [vmem:[%s19791_s0 + $0xf80] ss:$16 sps:$4 sm:$0xff]  }
 0x915   : > { %13031 = vmatprep.mubr.bf16.mxu1 %v21724_v6 }
 0x916   : > { %12961 = vmatpush1.bf16.msra.mxu0 %v18641_v20  ;;  %v18715_v20 = vld [vmem:[%s19791_s0 + $0xda4] ss:$16 sps:$4 sm:$0xff]  }
 0x917   : > { %13002 = vmatpush1.bf16.msra.mxu1 %v18644_v21  ;;  %12962 = vmatprep.subr.bf16.mxu0 %v18649_v63  ;;  %v18718_v21 = vld [vmem:[%s19791_s0 + $0xfa4] ss:$16 sps:$4 sm:$0xff]   ;;  %v18713_v63 = vld [vmem:[%s19791_s0 + $0xda0] ss:$16 sps:$4 sm:$0xff]  }
 0x918   : > { %13003 = vmatprep.subr.bf16.mxu1 %v18652_v52  ;;  %v18716_v52 = vld [vmem:[%s19791_s0 + $0xfa0] ss:$16 sps:$4 sm:$0xff]  }
 0x91a   : > { %12963 = vmatpush1.bf16.msra.mxu0 %v18647_v31  ;;  %v18721_v31 = vld [vmem:[%s19791_s0 + $0xdc4] ss:$16 sps:$4 sm:$0xff]  }
 0x91b   : > { %13004 = vmatpush1.bf16.msra.mxu1 %v18650_v22  ;;  %12964 = vmatprep.subr.bf16.mxu0 %v18655_v55  ;;  %v18724_v22 = vld [vmem:[%s19791_s0 + $0xfc4] ss:$16 sps:$4 sm:$0xff]   ;;  %v18719_v55 = vld [vmem:[%s19791_s0 + $0xdc0] ss:$16 sps:$4 sm:$0xff]  }
 0x91c   : > { %13005 = vmatprep.subr.bf16.mxu1 %v18658_v26  ;;  %v18722_v26 = vld [vmem:[%s19791_s0 + $0xfc0] ss:$16 sps:$4 sm:$0xff]  }
 0x91e   : > { %12965 = vmatpush1.bf16.msra.mxu0 %v18653_v0  ;;  %v18727_v0 = vld [vmem:[%s19791_s0 + $0xde4] ss:$16 sps:$4 sm:$0xff]  }
 0x91f   : > { %13006 = vmatpush1.bf16.msra.mxu1 %v18656_v24  ;;  %12966 = vmatprep.subr.bf16.mxu0 %v18661_v27  ;;  %v18730_v24 = vld [vmem:[%s19791_s0 + $0xfe4] ss:$16 sps:$4 sm:$0xff]   ;;  %v18725_v27 = vld [vmem:[%s19791_s0 + $0xde0] ss:$16 sps:$4 sm:$0xff]  }
 0x920   : > { %13007 = vmatprep.subr.bf16.mxu1 %v18664_v28  ;;  %v18728_v28 = vld [vmem:[%s19791_s0 + $0xfe0] ss:$16 sps:$4 sm:$0xff]  }
 0x922   : > { %12967 = vmatpush1.bf16.msra.mxu0 %v18659_v30  ;;  %v18737_v30 = vld [vmem:[%s19791_s0 + $0xc0c] ss:$16 sps:$4 sm:$0xff]  }
 0x923   : > { %13008 = vmatpush1.bf16.msra.mxu1 %v18662_v35  ;;  %12968 = vmatprep.subr.bf16.mxu0 %v18667_v37  ;;  %v18740_v35 = vld [vmem:[%s19791_s0 + $0xe0c] ss:$16 sps:$4 sm:$0xff]   ;;  %v21798_v37 = vcombine.low %v21710_v7, %v21710_v7  ;;  %v18741_v7 = vld [vmem:[%s19791_s0 + $0xc28] ss:$16 sps:$4 sm:$0xff]  }
 0x924   : > { %13009 = vmatprep.subr.bf16.mxu1 %v18670_v49  ;;  %v11090_v10 = vpop.f32.mrb[8].mxu0  ;;  %v21802_v49 = vcombine.low %v21712_v44, %v21712_v44  ;;  %v18744_v44 = vld [vmem:[%s19791_s0 + $0xe28] ss:$16 sps:$4 sm:$0xff]  }
 0x925   : > { %v11131_v39 = vpop.f32.mrb[8].mxu1  ;;  %v11091_v23 = vadd.f32 %v11090_v10, %v21588_v11  ;;  %v11092_v17 = vpop.f32.mrb[9].mxu0  ;;  %v18679_v11 = vld [vmem:[%s19791_s0 + $0xce4] ss:$16 sps:$4 sm:$0xff]   ;;  %v18749_v10 = vld [vmem:[%s19791_s0 + $0xc4c] ss:$16 sps:$4 sm:$0xff]  }
 0x926   : > { %v11133_v1 = vpop.f32.mrb[9].mxu1  ;;  %v11093_v50 = vadd.f32 %v11092_v17, %v21590_v53  ;;  %v11094_v60 = vpop.f32.mrb[10].mxu0  ;;  %12969 = vmatpush1.bf16.msra.mxu0 %v18665_v9  ;;  %v18682_v53 = vld [vmem:[%s19791_s0 + $0xee4] ss:$16 sps:$4 sm:$0xff]   ;;  %v18735_v9 = vld [vmem:[%s19791_s0 + $0xc08] ss:$16 sps:$4 sm:$0xff]  }
 0x927   : > { %v11135_v57 = vpop.f32.mrb[10].mxu1  ;;  %13010 = vmatpush1.bf16.msra.mxu1 %v18668_v45  ;;  %v21754_v43 = vadd.f32 %v11131_v39, %v11091_v23  ;;  %v11095_v42 = vpop.f32.mrb[11].mxu0  ;;  %12970 = vmatprep.subr.bf16.mxu0 %v18673_v25  ;;  %v18738_v45 = vld [vmem:[%s19791_s0 + $0xe08] ss:$16 sps:$4 sm:$0xff]   ;;  %v18743_v25 = vld [vmem:[%s19791_s0 + $0xc2c] ss:$16 sps:$4 sm:$0xff]  }
 0x928   : > { %v11136_v33 = vpop.f32.mrb[11].mxu1  ;;  %13011 = vmatprep.subr.bf16.mxu1 %v18676_v46  ;;  %v21758_v36 = vadd.f32 %v11133_v1, %v11093_v50  ;;  %v18746_v46 = vld [vmem:[%s19791_s0 + $0xe2c] ss:$16 sps:$4 sm:$0xff]   ;;  %v18747_v23 = vld [vmem:[%s19791_s0 + $0xc48] ss:$16 sps:$4 sm:$0xff]  }
 0x929   : > { %v18752_v39 = vld [vmem:[%s19791_s0 + $0xe4c] ss:$16 sps:$4 sm:$0xff]   ;;  %v18750_v17 = vld [vmem:[%s19791_s0 + $0xe48] ss:$16 sps:$4 sm:$0xff]  }
 0x92a   : > { %12971 = vmatpush1.bf16.msra.mxu0 %v18671_v58  ;;  %v18755_v1 = vld [vmem:[%s19791_s0 + $0xc6c] ss:$16 sps:$4 sm:$0xff]   ;;  %v18753_v60 = vld [vmem:[%s19791_s0 + $0xc68] ss:$16 sps:$4 sm:$0xff]  }
 0x92b   : > { %13012 = vmatpush1.bf16.msra.mxu1 %v18674_v59  ;;  %12972 = vmatprep.subr.bf16.mxu0 %v18679_v11  ;;  %v18758_v50 = vld [vmem:[%s19791_s0 + $0xe6c] ss:$16 sps:$4 sm:$0xff]   ;;  %v18759_v58 = vld [vmem:[%s19791_s0 + $0xc88] ss:$16 sps:$4 sm:$0xff]  }
 0x92c   : > { %13013 = vmatprep.subr.bf16.mxu1 %v18682_v53  ;;  %v18764_v57 = vld [vmem:[%s19791_s0 + $0xe8c] ss:$16 sps:$4 sm:$0xff]   ;;  %v18762_v59 = vld [vmem:[%s19791_s0 + $0xe88] ss:$16 sps:$4 sm:$0xff]  }
 0x92d   : > { %v18767_v42 = vld [vmem:[%s19791_s0 + $0xcac] ss:$16 sps:$4 sm:$0xff]   ;;  %v18765_v11 = vld [vmem:[%s19791_s0 + $0xca8] ss:$16 sps:$4 sm:$0xff]  }
 0x92e   : > { %12973 = vmatpush1.bf16.msra.mxu0 %v18677_v47  ;;  %v18770_v33 = vld [vmem:[%s19791_s0 + $0xeac] ss:$16 sps:$4 sm:$0xff]   ;;  %v18768_v53 = vld [vmem:[%s19791_s0 + $0xea8] ss:$16 sps:$4 sm:$0xff]  }
 0x92f   : > { %13014 = vmatpush1.bf16.msra.mxu1 %v18680_v62  ;;  %12974 = vmatprep.subr.bf16.mxu0 %v18685_v13  ;;  %v18773_v47 = vld [vmem:[%s19791_s0 + $0xccc] ss:$16 sps:$4 sm:$0xff]  }
 0x930   : > { %13015 = vmatprep.subr.bf16.mxu1 %v18688_v19  ;;  %v18776_v62 = vld [vmem:[%s19791_s0 + $0xecc] ss:$16 sps:$4 sm:$0xff]  }
 0x932   : > { %12975 = vmatpush1.bf16.msra.mxu0 %v18683_v54 }
 0x933   : > { %13016 = vmatpush1.bf16.msra.mxu1 %v18686_v15  ;;  %12976 = vmatprep.subr.bf16.mxu0 %v18691_v32 }
 0x934   : > { %13017 = vmatprep.subr.bf16.mxu1 %v18694_v56 }
 0x936   : > { %12977 = vmatpush1.bf16.msra.mxu0 %v18689_v51 }
 0x937   : > { %13018 = vmatpush1.bf16.msra.mxu1 %v18692_v38  ;;  %12978 = vmatprep.subr.bf16.mxu0 %v18697_v48  ;;  %v18771_v48 = vld [vmem:[%s19791_s0 + $0xcc8] ss:$16 sps:$4 sm:$0xff]  }
 0x938   : > { %13019 = vmatprep.subr.bf16.mxu1 %v18700_v3  ;;  %v18774_v3 = vld [vmem:[%s19791_s0 + $0xec8] ss:$16 sps:$4 sm:$0xff]  }
 0x93a   : > { %12979 = vmatpush1.bf16.msra.mxu0 %v18695_v61 }
 0x93b   : > { %13020 = vmatpush1.bf16.msra.mxu1 %v18698_v4  ;;  %12980 = vmatprep.subr.bf16.mxu0 %v18703_v8 }
 0x93c   : > { %13021 = vmatprep.subr.bf16.mxu1 %v18706_v16 }
 0x93e   : > { %12981 = vmatpush1.bf16.msra.mxu0 %v18701_v41  ;;  %v18777_v41 = vld [vmem:[%s19791_s0 + $0xce8] ss:$16 sps:$4 sm:$0xff]  }
 0x93f   : > { %13022 = vmatpush1.bf16.msra.mxu1 %v18704_v5  ;;  %12982 = vmatprep.subr.bf16.mxu0 %v18709_v29  ;;  %v18780_v5 = vld [vmem:[%s19791_s0 + $0xee8] ss:$16 sps:$4 sm:$0xff]   ;;  %v18785_v29 = vld [vmem:[%s19791_s0 + $0xd0c] ss:$16 sps:$4 sm:$0xff]  }
 0x940   : > { %13023 = vmatprep.subr.bf16.mxu1 %v18712_v12  ;;  %v18788_v12 = vld [vmem:[%s19791_s0 + $0xf0c] ss:$16 sps:$4 sm:$0xff]  }
 0x942   : > { %12983 = vmatpush1.bf16.msra.mxu0 %v18707_v18  ;;  %v18783_v18 = vld [vmem:[%s19791_s0 + $0xd08] ss:$16 sps:$4 sm:$0xff]  }
 0x943   : > { %13024 = vmatpush1.bf16.msra.mxu1 %v18710_v14  ;;  %12984 = vmatprep.subr.bf16.mxu0 %v18715_v20  ;;  %v18786_v14 = vld [vmem:[%s19791_s0 + $0xf08] ss:$16 sps:$4 sm:$0xff]   ;;  %v18791_v20 = vld [vmem:[%s19791_s0 + $0xd2c] ss:$16 sps:$4 sm:$0xff]  }
 0x944   : > { %13025 = vmatprep.subr.bf16.mxu1 %v18718_v21  ;;  %v18794_v21 = vld [vmem:[%s19791_s0 + $0xf2c] ss:$16 sps:$4 sm:$0xff]  }
 0x946   : > { %12985 = vmatpush1.bf16.msra.mxu0 %v18713_v63  ;;  %v18789_v63 = vld [vmem:[%s19791_s0 + $0xd28] ss:$16 sps:$4 sm:$0xff]  }
 0x947   : > { %13026 = vmatpush1.bf16.msra.mxu1 %v18716_v52  ;;  %12986 = vmatprep.subr.bf16.mxu0 %v18721_v31  ;;  %v18792_v52 = vld [vmem:[%s19791_s0 + $0xf28] ss:$16 sps:$4 sm:$0xff]   ;;  %v18797_v31 = vld [vmem:[%s19791_s0 + $0xd4c] ss:$16 sps:$4 sm:$0xff]  }
 0x948   : > { %13027 = vmatprep.subr.bf16.mxu1 %v18724_v22  ;;  %v18800_v22 = vld [vmem:[%s19791_s0 + $0xf4c] ss:$16 sps:$4 sm:$0xff]  }
 0x94a   : > { %12987 = vmatpush1.bf16.msra.mxu0 %v18719_v55  ;;  %v18795_v55 = vld [vmem:[%s19791_s0 + $0xd48] ss:$16 sps:$4 sm:$0xff]  }
 0x94b   : > { %13028 = vmatpush1.bf16.msra.mxu1 %v18722_v26  ;;  %12988 = vmatprep.subr.bf16.mxu0 %v18727_v0  ;;  %v18798_v26 = vld [vmem:[%s19791_s0 + $0xf48] ss:$16 sps:$4 sm:$0xff]   ;;  %v18803_v0 = vld [vmem:[%s19791_s0 + $0xd6c] ss:$16 sps:$4 sm:$0xff]  }
 0x94c   : > { %13029 = vmatprep.subr.bf16.mxu1 %v18730_v24  ;;  %v18806_v24 = vld [vmem:[%s19791_s0 + $0xf6c] ss:$16 sps:$4 sm:$0xff]  }
 0x94e   : > { %12989 = vmatpush1.bf16.msra.mxu0 %v18725_v27  ;;  %v18801_v27 = vld [vmem:[%s19791_s0 + $0xd68] ss:$16 sps:$4 sm:$0xff]  }
 0x94f   : > { %13030 = vmatpush1.bf16.msra.mxu1 %v18728_v28  ;;  %13040 = vmatprep.subr.bf16.mxu0 %v18737_v30  ;;  %v18804_v28 = vld [vmem:[%s19791_s0 + $0xf68] ss:$16 sps:$4 sm:$0xff]   ;;  %v18809_v30 = vld [vmem:[%s19791_s0 + $0xd8c] ss:$16 sps:$4 sm:$0xff]  }
 0x950   : > { %13081 = vmatprep.subr.bf16.mxu1 %v18740_v35  ;;  %v18812_v35 = vld [vmem:[%s19791_s0 + $0xf8c] ss:$16 sps:$4 sm:$0xff]  }
 0x951   : > { %12991 = vmatmul.mubr.bf16.vlgmr.msra.gmra.mrb[24].mxu0 %v21798_v37 }
 0x952   : > { %13032 = vmatmul.mubr.bf16.vlgmr.msra.gmra.mrb[24].mxu1 %v21802_v49  ;;  %13041 = vmatpush1.bf16.msra.mxu0 %v18735_v9  ;;  %v18807_v9 = vld [vmem:[%s19791_s0 + $0xd88] ss:$16 sps:$4 sm:$0xff]  }
 0x953   : > { %13082 = vmatpush1.bf16.msra.mxu1 %v18738_v45  ;;  %13042 = vmatprep.subr.bf16.mxu0 %v18743_v25  ;;  %v18810_v45 = vld [vmem:[%s19791_s0 + $0xf88] ss:$16 sps:$4 sm:$0xff]   ;;  %v18815_v25 = vld [vmem:[%s19791_s0 + $0xdac] ss:$16 sps:$4 sm:$0xff]  }
 0x954   : > { %13083 = vmatprep.subr.bf16.mxu1 %v18746_v46  ;;  %13072 = vmatprep.mubr.bf16.mxu0 %v21720_v34  ;;  %v18756_v34 = vld [vmem:[%s19791_s0 + $0xe68] ss:$16 sps:$4 sm:$0xff]   ;;  %v18818_v46 = vld [vmem:[%s19791_s0 + $0xfac] ss:$16 sps:$4 sm:$0xff]  }
 0x955   : > { %13113 = vmatprep.mubr.bf16.mxu1 %v21724_v6  ;;  %v18761_v6 = vld [vmem:[%s19791_s0 + $0xc8c] ss:$16 sps:$4 sm:$0xff]  }
 0x956   : > { %13043 = vmatpush1.bf16.msra.mxu0 %v18741_v7  ;;  %v18813_v7 = vld [vmem:[%s19791_s0 + $0xda8] ss:$16 sps:$4 sm:$0xff]  }
 0x957   : > { %13084 = vmatpush1.bf16.msra.mxu1 %v18744_v44  ;;  %13044 = vmatprep.subr.bf16.mxu0 %v18749_v10  ;;  %v18816_v44 = vld [vmem:[%s19791_s0 + $0xfa8] ss:$16 sps:$4 sm:$0xff]   ;;  %v18821_v10 = vld [vmem:[%s19791_s0 + $0xdcc] ss:$16 sps:$4 sm:$0xff]  }
 0x958   : > { %13085 = vmatprep.subr.bf16.mxu1 %v18752_v39  ;;  %v18824_v39 = vld [vmem:[%s19791_s0 + $0xfcc] ss:$16 sps:$4 sm:$0xff]  }
 0x95a   : > { %13045 = vmatpush1.bf16.msra.mxu0 %v18747_v23  ;;  %v18819_v23 = vld [vmem:[%s19791_s0 + $0xdc8] ss:$16 sps:$4 sm:$0xff]  }
 0x95b   : > { %13086 = vmatpush1.bf16.msra.mxu1 %v18750_v17  ;;  %13046 = vmatprep.subr.bf16.mxu0 %v18755_v1  ;;  %v18822_v17 = vld [vmem:[%s19791_s0 + $0xfc8] ss:$16 sps:$4 sm:$0xff]   ;;  %v18827_v1 = vld [vmem:[%s19791_s0 + $0xdec] ss:$16 sps:$4 sm:$0xff]  }
 0x95c   : > { %13087 = vmatprep.subr.bf16.mxu1 %v18758_v50  ;;  %v18830_v50 = vld [vmem:[%s19791_s0 + $0xfec] ss:$16 sps:$4 sm:$0xff]  }
 0x95e   : > { %13047 = vmatpush1.bf16.msra.mxu0 %v18753_v60  ;;  %v18825_v60 = vld [vmem:[%s19791_s0 + $0xde8] ss:$16 sps:$4 sm:$0xff]  }
 0x95f   : > { %13088 = vmatpush1.bf16.msra.mxu1 %v18756_v34  ;;  %13048 = vmatprep.subr.bf16.mxu0 %v18761_v6  ;;  %v18828_v34 = vld [vmem:[%s19791_s0 + $0xfe8] ss:$16 sps:$4 sm:$0xff]  }
 0x960   : > { %13089 = vmatprep.subr.bf16.mxu1 %v18764_v57 }
 0x962   : > { %13049 = vmatpush1.bf16.msra.mxu0 %v18759_v58 }
 0x963   : > { %13090 = vmatpush1.bf16.msra.mxu1 %v18762_v59  ;;  %13050 = vmatprep.subr.bf16.mxu0 %v18767_v42 }
 0x964   : > { %13091 = vmatprep.subr.bf16.mxu1 %v18770_v33  ;;  %v11172_v13 = vpop.f32.mrb[12].mxu0 }
 0x965   : > { %v11213_v19 = vpop.f32.mrb[12].mxu1  ;;  %v11173_v54 = vadd.f32 %v11172_v13, %v21666_v2  ;;  %v11174_v15 = vpop.f32.mrb[13].mxu0  ;;  %v18779_v2 = vld [vmem:[%s19791_s0 + $0xcec] ss:$16 sps:$4 sm:$0xff]  }
 0x966   : > { %v11215_v32 = vpop.f32.mrb[13].mxu1  ;;  %v11175_v56 = vadd.f32 %v11174_v15, %v21668_v40  ;;  %v11176_v51 = vpop.f32.mrb[14].mxu0  ;;  %13051 = vmatpush1.bf16.msra.mxu0 %v18765_v11  ;;  %v18782_v40 = vld [vmem:[%s19791_s0 + $0xeec] ss:$16 sps:$4 sm:$0xff]  }
 0x967   : > { %v11217_v38 = vpop.f32.mrb[14].mxu1  ;;  %13092 = vmatpush1.bf16.msra.mxu1 %v18768_v53  ;;  %v21836_v61 = vadd.f32 %v11213_v19, %v11173_v54  ;;  %v11177_v4 = vpop.f32.mrb[15].mxu0  ;;  %13052 = vmatprep.subr.bf16.mxu0 %v18773_v47  ;;  %v13128_v54 = vlaneseq }
 0x968   : > { %v11218_v8 = vpop.f32.mrb[15].mxu1  ;;  %13093 = vmatprep.subr.bf16.mxu1 %v18776_v62  ;;  %v21840_v16 = vadd.f32 %v11215_v32, %v11175_v56 }
 0x969   : > { %v13129_v15 = vshrl.u32 %v13128_v54, 7  ;;  %v13126_v8 = vld [vmem:[%s563_s3] sm:$0xf] }
 0x96a   : > { %13053 = vmatpush1.bf16.msra.mxu0 %v18771_v48 }
 0x96b   : > { %13094 = vmatpush1.bf16.msra.mxu1 %v18774_v3  ;;  %13054 = vmatprep.subr.bf16.mxu0 %v18779_v2  ;;  %v13138_v38 = vsub.s32 2, %v13129_v15  ;;  %v13142_v2 = vsub.s32 3, %v13129_v15 }
 0x96c   : > { %13095 = vmatprep.subr.bf16.mxu1 %v18782_v40 }
 0x96e   : > { %13055 = vmatpush1.bf16.msra.mxu0 %v18777_v41 }
 0x96f   : > { %13096 = vmatpush1.bf16.msra.mxu1 %v18780_v5  ;;  %13056 = vmatprep.subr.bf16.mxu0 %v18785_v29  ;;  %v13139_v5 = vrot.slane %v13126_v8, %v13138_v38  ;;  %v13143_v29 = vrot.slane %v13126_v8, %v13142_v2 }
 0x970   : > { %13097 = vmatprep.subr.bf16.mxu1 %v18788_v12  ;;  %v13130_v12 = vsub.s32 0, %v13129_v15 }
 0x972   : > { %13057 = vmatpush1.bf16.msra.mxu0 %v18783_v18  ;;  %v13134_v18 = vsub.s32 1, %v13129_v15 }
 0x973   : > { %13098 = vmatpush1.bf16.msra.mxu1 %v18786_v14  ;;  %13058 = vmatprep.subr.bf16.mxu0 %v18791_v20 }
 0x974   : > { %13099 = vmatprep.subr.bf16.mxu1 %v18794_v21 }
 0x976   : > { %13059 = vmatpush1.bf16.msra.mxu0 %v18789_v63  ;;  %v13131_v63 = vrot.slane %v13126_v8, %v13130_v12 }
 0x977   : > { %13100 = vmatpush1.bf16.msra.mxu1 %v18792_v52  ;;  %13060 = vmatprep.subr.bf16.mxu0 %v18797_v31 }
 0x978   : > { %13101 = vmatprep.subr.bf16.mxu1 %v18800_v22 }
 0x97a   : > { %13061 = vmatpush1.bf16.msra.mxu0 %v18795_v55  ;;  %v13135_v55 = vrot.slane %v13126_v8, %v13134_v18 }
 0x97b   : > { %13102 = vmatpush1.bf16.msra.mxu1 %v18798_v26  ;;  %13062 = vmatprep.subr.bf16.mxu0 %v18803_v0 }
 0x97c   : > { %13103 = vmatprep.subr.bf16.mxu1 %v18806_v24 }
 0x97e   : > { %13063 = vmatpush1.bf16.msra.mxu0 %v18801_v27 }
 0x97f   : > { %13104 = vmatpush1.bf16.msra.mxu1 %v18804_v28  ;;  %13064 = vmatprep.subr.bf16.mxu0 %v18809_v30 }
 0x980   : > { %13105 = vmatprep.subr.bf16.mxu1 %v18812_v35 }
 0x982   : > { %13065 = vmatpush1.bf16.msra.mxu0 %v18807_v9 }
 0x983   : > { %13106 = vmatpush1.bf16.msra.mxu1 %v18810_v45  ;;  %13066 = vmatprep.subr.bf16.mxu0 %v18815_v25 }
 0x984   : > { %13107 = vmatprep.subr.bf16.mxu1 %v18818_v46 }
 0x986   : > { %13067 = vmatpush1.bf16.msra.mxu0 %v18813_v7 }
 0x987   : > { %13108 = vmatpush1.bf16.msra.mxu1 %v18816_v44  ;;  %13068 = vmatprep.subr.bf16.mxu0 %v18821_v10 }
 0x988   : > { %13109 = vmatprep.subr.bf16.mxu1 %v18824_v39 }
 0x98a   : > { %13069 = vmatpush1.bf16.msra.mxu0 %v18819_v23 }
 0x98b   : > { %13110 = vmatpush1.bf16.msra.mxu1 %v18822_v17  ;;  %13070 = vmatprep.subr.bf16.mxu0 %v18827_v1 }
 0x98c   : > { %13111 = vmatprep.subr.bf16.mxu1 %v18830_v50 }
 0x98e   : > { %13071 = vmatpush1.bf16.msra.mxu0 %v18825_v60 }
 0x98f   : > { %13112 = vmatpush1.bf16.msra.mxu1 %v18828_v34 }
 0x991   : > { %13073 = vmatmul.mubr.bf16.vlgmr.msra.gmra.mrb[28].mxu0 %v21798_v37 }
 0x992   : > { %13114 = vmatmul.mubr.bf16.vlgmr.msra.gmra.mrb[28].mxu1 %v21802_v49 }
 0x9a4   : > { %v12039_v6 = vpop.f32.mrb[16].mxu0 }
 0x9a5   : > { %v12080_v57 = vpop.f32.mrb[16].mxu1  ;;  %v12041_v59 = vpop.f32.mrb[17].mxu0 }
 0x9a6   : > { %v12081_v58 = vadd.f32 %v12080_v57, %v12039_v6  ;;  %v12082_v42 = vpop.f32.mrb[17].mxu1  ;;  %v12043_v11 = vpop.f32.mrb[18].mxu0 }
 0x9a7   : > { %v12083_v33 = vadd.f32 %v12082_v42, %v12041_v59  ;;  %v12084_v53 = vpop.f32.mrb[18].mxu1  ;;  %v12044_v62 = vpop.f32.mrb[19].mxu0 }
 0x9a8   : > { %v12169_v47 = vadd.f32 %v12081_v58, %v21754_v43  ;;  %v12085_v13 = vpop.f32.mrb[19].mxu1 }
 0x9a9   : > { %v12170_v19 = vadd.f32 %v12083_v33, %v21758_v36 }
 0x9e4   : > { %v12121_v37 = vpop.f32.mrb[20].mxu0 }
 0x9e5   : > { %v12162_v32 = vpop.f32.mrb[20].mxu1  ;;  %v12123_v56 = vpop.f32.mrb[21].mxu0 }
 0x9e6   : > { %v12163_v49 = vadd.f32 %v12162_v32, %v12121_v37  ;;  %v12164_v51 = vpop.f32.mrb[21].mxu1  ;;  %v12125_v3 = vpop.f32.mrb[22].mxu0 }
 0x9e7   : > { %v12165_v48 = vadd.f32 %v12164_v51, %v12123_v56  ;;  %v12166_v4 = vpop.f32.mrb[22].mxu1  ;;  %v12126_v40 = vpop.f32.mrb[23].mxu0 }
 0x9e8   : > { %v12171_v43 = vadd.f32 %v12163_v49, %v21836_v61  ;;  %v12167_v41 = vpop.f32.mrb[23].mxu1 }
 0x9e9   : > { %v12172_v36 = vadd.f32 %v12165_v48, %v21840_v16 }
 0xa24   : > { %v12992_v14 = vpop.f32.mrb[24].mxu0 }
 0xa25   : > { %v13033_v20 = vpop.f32.mrb[24].mxu1  ;;  %v12994_v52 = vpop.f32.mrb[25].mxu0 }
 0xa26   : > { %v13034_v21 = vadd.f32 %v13033_v20, %v12992_v14  ;;  %v13035_v31 = vpop.f32.mrb[25].mxu1  ;;  %v12996_v26 = vpop.f32.mrb[26].mxu0 }
 0xa27   : > { %v13036_v22 = vadd.f32 %v13035_v31, %v12994_v52  ;;  %v13037_v0 = vpop.f32.mrb[26].mxu1  ;;  %v12997_v24 = vpop.f32.mrb[27].mxu0 }
 0xa28   : > { %v13122_v61 = vadd.f32 %v13034_v21, %v12169_v47  ;;  %v13038_v27 = vpop.f32.mrb[27].mxu1 }
 0xa29   : > { %v13123_v28 = vadd.f32 %v13036_v22, %v12170_v19 }
 0xa2a   : > { %v13148_v30 = vadd.f32 %v13131_v63, %v13122_v61 }
 0xa2b   : > { %v13149_v16 = vadd.f32 %v13135_v55, %v13123_v28 }
 0xa2c   : > { %v13152_v35 = vmax.f32 %v13148_v30, 0.0 }
 0xa2d   : > { %v13153_v9 = vmax.f32 %v13149_v16, 0.0 }
 0xa2f   : > { %v16039_v45 = vpack.c.bf16 %v13153_v9, %v13152_v35 }
 0xa31   : > { %13176 = vst [vmem:[%s13175_s1] sm:$0xff] %v16039_v45 }
 0xa64   : > { %v13074_v25 = vpop.f32.mrb[28].mxu0 }
 0xa65   : > { %v13115_v46 = vpop.f32.mrb[28].mxu1  ;;  %v13076_v44 = vpop.f32.mrb[29].mxu0 }
 0xa66   : > { %v13116_v7 = vadd.f32 %v13115_v46, %v13074_v25  ;;  %v13117_v10 = vpop.f32.mrb[29].mxu1  ;;  %v13078_v23 = vpop.f32.mrb[30].mxu0 }
 0xa67   : > { %v13118_v39 = vadd.f32 %v13117_v10, %v13076_v44  ;;  %v13119_v17 = vpop.f32.mrb[30].mxu1  ;;  %v13079_v50 = vpop.f32.mrb[31].mxu0 }
 0xa68   : > { %v13124_v1 = vadd.f32 %v13116_v7, %v12171_v43  ;;  %v13120_v60 = vpop.f32.mrb[31].mxu1 }
 0xa69   : > { %v13125_v34 = vadd.f32 %v13118_v39, %v12172_v36 }
 0xa6a   : > { %v13150_v6 = vadd.f32 %v13139_v5, %v13124_v1 }
 0xa6b   : > { %v13151_v57 = vadd.f32 %v13143_v29, %v13125_v34 }
 0xa6c   : > { %v13154_v58 = vmax.f32 %v13150_v6, 0.0 }
 0xa6d   : > { %v13155_v59 = vmax.f32 %v13151_v57, 0.0 }
 0xa6f   : > { %v16040_v42 = vpack.c.bf16 %v13155_v59, %v13154_v58 }
 0xa71   : > { %13177 = vst [vmem:[%s13175_s1 + $0x8] sm:$0xff] %v16040_v42 }
 0xa72 PF: > { %p15925_p4 = scmp.ne.s32.totalorder %s19576_s6, 14 }
 0xa73   : > { %s22243_s30 = sld [smem:[#allocation41_spill]] (!%p15925_p4)  ;;  %vm13896_vm0 = vcmask (!%p15925_p4), 523264  }
 0xa74   : > { %13181 = sbr.rel (%p15925_p4) target bundleno = 3127 (0xc37), region = 104 }
 0xa78   : > { %v13249_v52 = vld [vmem:[#allocation4 + $0x10] sm:$0xff] (!%p15925_p4)  ;;  %v13250_v31 = vld [vmem:[#allocation4 + $0x18] sm:$0xff] (!%p15925_p4) }
 0xa79   : > { %s22244_s28 = smov (!%p15925_p4), %s22243_s30  ;;  %v18831_v33 = vld [vmem:[%s22243_s30 + $0x140] sm:$0xff] (!%p15925_p4)   ;;  %v15926_v22 = vcombine.low (!%p15925_p4), %v13249_v52, %v13249_v52  ;;  %v15927_v55 = vcombine.high (!%p15925_p4), %v13249_v52, %v13249_v52  ;;  %v15928_v26 = vcombine.low (!%p15925_p4), %v13250_v31, %v13250_v31  ;;  %v15929_v0 = vcombine.high (!%p15925_p4), %v13250_v31, %v13250_v31 }
 0xa7a   : > { %v18832_v11 = vld [vmem:[%s22244_s28 + $0x1c0] sm:$0xff] (!%p15925_p4)   ;;  %16042 = vmatprep.subr.bf16.mxu0 (!%p15925_p4), %v18831_v33  ;;  %v18835_v62 = vld [vmem:[%s22244_s28 + $0x148] sm:$0xff] (!%p15925_p4)   ;;  %v18839_v15 = vld [vmem:[%s22244_s28 + $0x150] sm:$0xff] (!%p15925_p4)  }
 0xa7b   : > { %v18833_v53 = vld [vmem:[%s22244_s28 + $0x100] sm:$0xff]   ;;  %16064 = vmatprep.subr.bf16.mxu1 %v18832_v11  ;;  %v18836_v13 = vld [vmem:[%s22244_s28 + $0x1c8] sm:$0xff]   ;;  %v18840_v37 = vld [vmem:[%s22244_s28 + $0x1d0] sm:$0xff]   ;;  %13553 = vmatprep.mubr.bf16.mxu0 %v15927_v55 }
 0xa7c   : > { %v18834_v47 = vld [vmem:[%s22244_s28 + $0x180] sm:$0xff]   ;;  %16043 = vmatpush3.bf16.msra.mxu0 %v18833_v53  ;;  %v18837_v19 = vld [vmem:[%s22244_s28 + $0x108] sm:$0xff]   ;;  %v18841_v32 = vld [vmem:[%s22244_s28 + $0x110] sm:$0xff]   ;;  %13593 = vmatprep.mubr.bf16.mxu1 %v15929_v0 }
 0xa7d   : > { %16065 = vmatpush3.bf16.msra.mxu1 %v18834_v47  ;;  %16044 = vmatprep.subr.bf16.mxu0 %v18835_v62  ;;  %v18838_v54 = vld [vmem:[%s22244_s28 + $0x188] sm:$0xff]   ;;  %v18842_v49 = vld [vmem:[%s22244_s28 + $0x190] sm:$0xff]   ;;  %v18843_v56 = vld [vmem:[%s22244_s28 + $0x158] sm:$0xff]  }
 0xa7e   : > { %16066 = vmatprep.subr.bf16.mxu1 %v18836_v13  ;;  %v18844_v51 = vld [vmem:[%s22244_s28 + $0x1d8] sm:$0xff]   ;;  %v18847_v3 = vld [vmem:[%s22244_s28 + $0x160] sm:$0xff]   ;;  %v18851_v43 = vld [vmem:[%s22244_s28 + $0x168] sm:$0xff]  }
 0xa7f   : > { %v18845_v38 = vld [vmem:[%s22244_s28 + $0x118] sm:$0xff]   ;;  %v18848_v4 = vld [vmem:[%s22244_s28 + $0x1e0] sm:$0xff]   ;;  %v18852_v40 = vld [vmem:[%s22244_s28 + $0x1e8] sm:$0xff]  }
 0xa80   : > { %16045 = vmatpush3.bf16.msra.mxu0 %v18837_v19  ;;  %v18846_v48 = vld [vmem:[%s22244_s28 + $0x198] sm:$0xff]   ;;  %v18849_v8 = vld [vmem:[%s22244_s28 + $0x120] sm:$0xff]   ;;  %v18853_v41 = vld [vmem:[%s22244_s28 + $0x128] sm:$0xff]  }
 0xa81   : > { %16067 = vmatpush3.bf16.msra.mxu1 %v18838_v54  ;;  %16046 = vmatprep.subr.bf16.mxu0 %v18839_v15  ;;  %v18850_v2 = vld [vmem:[%s22244_s28 + $0x1a0] sm:$0xff]   ;;  %v18854_v5 = vld [vmem:[%s22244_s28 + $0x1a8] sm:$0xff]   ;;  %v18855_v36 = vld [vmem:[%s22244_s28 + $0x170] sm:$0xff]  }
 0xa82   : > { %16068 = vmatprep.subr.bf16.mxu1 %v18840_v37  ;;  %v18856_v29 = vld [vmem:[%s22244_s28 + $0x1f0] sm:$0xff]   ;;  %v18859_v14 = vld [vmem:[%s22244_s28 + $0x178] sm:$0xff]   ;;  %v18867_v61 = vld [vmem:[%s22244_s28 + $0x40] sm:$0xff]  }
 0xa83   : > { %v18857_v12 = vld [vmem:[%s22244_s28 + $0x130] sm:$0xff]   ;;  %v18860_v20 = vld [vmem:[%s22244_s28 + $0x1f8] sm:$0xff]   ;;  %v18868_v24 = vld [vmem:[%s22244_s28 + $0xc0] sm:$0xff]  }
 0xa84   : > { %16047 = vmatpush3.bf16.msra.mxu0 %v18841_v32  ;;  %v18858_v18 = vld [vmem:[%s22244_s28 + $0x1b0] sm:$0xff]   ;;  %v18861_v21 = vld [vmem:[%s22244_s28 + $0x138] sm:$0xff]   ;;  %v18869_v27 = vld [vmem:[%s22244_s28] sm:$0xff]  }
 0xa85   : > { %16069 = vmatpush3.bf16.msra.mxu1 %v18842_v49  ;;  %16048 = vmatprep.subr.bf16.mxu0 %v18843_v56  ;;  %v18862_v63 = vld [vmem:[%s22244_s28 + $0x1b8] sm:$0xff]   ;;  %v18870_v28 = vld [vmem:[%s22244_s28 + $0x80] sm:$0xff]   ;;  %v18871_v30 = vld [vmem:[%s22244_s28 + $0x48] sm:$0xff]  }
 0xa86   : > { %16070 = vmatprep.subr.bf16.mxu1 %v18844_v51  ;;  %v18872_v16 = vld [vmem:[%s22244_s28 + $0xc8] sm:$0xff]   ;;  %v18875_v45 = vld [vmem:[%s22244_s28 + $0x50] sm:$0xff]   ;;  %v18879_v44 = vld [vmem:[%s22244_s28 + $0x58] sm:$0xff]  }
 0xa87   : > { %v18873_v35 = vld [vmem:[%s22244_s28 + $0x8] sm:$0xff]   ;;  %v18876_v25 = vld [vmem:[%s22244_s28 + $0xd0] sm:$0xff]   ;;  %v18880_v10 = vld [vmem:[%s22244_s28 + $0xd8] sm:$0xff]  }
 0xa88   : > { %16049 = vmatpush3.bf16.msra.mxu0 %v18845_v38  ;;  %v18874_v9 = vld [vmem:[%s22244_s28 + $0x88] sm:$0xff]   ;;  %v18877_v46 = vld [vmem:[%s22244_s28 + $0x10] sm:$0xff]   ;;  %v18881_v39 = vld [vmem:[%s22244_s28 + $0x18] sm:$0xff]  }
 0xa89   : > { %16071 = vmatpush3.bf16.msra.mxu1 %v18846_v48  ;;  %16050 = vmatprep.subr.bf16.mxu0 %v18847_v3  ;;  %v18878_v7 = vld [vmem:[%s22244_s28 + $0x90] sm:$0xff]   ;;  %v18882_v23 = vld [vmem:[%s22244_s28 + $0x98] sm:$0xff]   ;;  %v18883_v17 = vld [vmem:[%s22244_s28 + $0x60] sm:$0xff]  }
 0xa8a   : > { %16072 = vmatprep.subr.bf16.mxu1 %v18848_v4  ;;  %v18884_v1 = vld [vmem:[%s22244_s28 + $0xe0] sm:$0xff]   ;;  %v18887_v34 = vld [vmem:[%s22244_s28 + $0x68] sm:$0xff]   ;;  %v18891_v59 = vld [vmem:[%s22244_s28 + $0x70] sm:$0xff]  }
 0xa8b   : > { %v18885_v50 = vld [vmem:[%s22244_s28 + $0x20] sm:$0xff]   ;;  %v18888_v6 = vld [vmem:[%s22244_s28 + $0xe8] sm:$0xff]   ;;  %v18892_v42 = vld [vmem:[%s22244_s28 + $0xf0] sm:$0xff]  }
 0xa8c   : > { %16051 = vmatpush3.bf16.msra.mxu0 %v18849_v8  ;;  %v18886_v60 = vld [vmem:[%s22244_s28 + $0xa0] sm:$0xff]   ;;  %v18889_v57 = vld [vmem:[%s22244_s28 + $0x28] sm:$0xff]   ;;  %v18893_v33 = vld [vmem:[%s22244_s28 + $0x30] sm:$0xff]  }
 0xa8d   : > { %16073 = vmatpush3.bf16.msra.mxu1 %v18850_v2  ;;  %16052 = vmatprep.subr.bf16.mxu0 %v18851_v43  ;;  %v18890_v58 = vld [vmem:[%s22244_s28 + $0xa8] sm:$0xff]   ;;  %v18894_v11 = vld [vmem:[%s22244_s28 + $0xb0] sm:$0xff]   ;;  %v18895_v53 = vld [vmem:[%s22244_s28 + $0x78] sm:$0xff]  }
 0xa8e   : > { %16074 = vmatprep.subr.bf16.mxu1 %v18852_v40  ;;  %v18896_v47 = vld [vmem:[%s22244_s28 + $0xf8] sm:$0xff]   ;;  %v13182_v19 = vld [vmem:[#allocation4] sm:$0xff]  ;;  %v13183_v37 = vld [vmem:[#allocation4 + $0x8] sm:$0xff] }
 0xa8f   : > { %v18897_v62 = vld [vmem:[%s22244_s28 + $0x38] sm:$0xff]   ;;  %v15962_v54 = vcombine.low %v13182_v19, %v13182_v19  ;;  %v15963_v15 = vcombine.high %v13182_v19, %v13182_v19  ;;  %v15964_v32 = vcombine.low %v13183_v37, %v13183_v37  ;;  %v15965_v49 = vcombine.high %v13183_v37, %v13183_v37 }
 0xa90   : > { %16053 = vmatpush3.bf16.msra.mxu0 %v18853_v41  ;;  %v18898_v13 = vld [vmem:[%s22244_s28 + $0xb8] sm:$0xff]  }
 0xa91   : > { %16075 = vmatpush3.bf16.msra.mxu1 %v18854_v5  ;;  %16054 = vmatprep.subr.bf16.mxu0 %v18855_v36 }
 0xa92   : > { %16076 = vmatprep.subr.bf16.mxu1 %v18856_v29 }
 0xa94   : > { %16055 = vmatpush3.bf16.msra.mxu0 %v18857_v12 }
 0xa95   : > { %16077 = vmatpush3.bf16.msra.mxu1 %v18858_v18  ;;  %16056 = vmatprep.subr.bf16.mxu0 %v18859_v14 }
 0xa96   : > { %16078 = vmatprep.subr.bf16.mxu1 %v18860_v20 }
 0xa98   : > { %16057 = vmatpush3.bf16.msra.mxu0 %v18861_v21 }
 0xa99   : > { %16079 = vmatpush3.bf16.msra.mxu1 %v18862_v63  ;;  %16086 = vmatprep.subr.bf16.mxu0 %v18867_v61 }
 0xa9a   : > { %16108 = vmatprep.subr.bf16.mxu1 %v18868_v24 }
 0xa9b   : > { %13554 = vmatmul.mubr.bf16.vlgmr.msra.gmra.mrb[0].mxu0 %v15926_v22  ;;  %v15998_v22 = vld [vmem:[#allocation17] ss:$0 sm:$0xff] }
 0xa9c   : > { %13594 = vmatmul.mubr.bf16.vlgmr.msra.gmra.mrb[0].mxu1 %v15928_v26  ;;  %16087 = vmatpush3.bf16.msra.mxu0 %v18869_v27 }
 0xa9d   : > { %16109 = vmatpush3.bf16.msra.mxu1 %v18870_v28  ;;  %16088 = vmatprep.subr.bf16.mxu0 %v18871_v30 }
 0xa9e   : > { %16110 = vmatprep.subr.bf16.mxu1 %v18872_v16  ;;  %13839 = vmatprep.mubr.bf16.mxu0 %v15963_v15 }
 0xa9f   : > { %13879 = vmatprep.mubr.bf16.mxu1 %v15965_v49 }
 0xaa0   : > { %16089 = vmatpush3.bf16.msra.mxu0 %v18873_v35 }
 0xaa1   : > { %16111 = vmatpush3.bf16.msra.mxu1 %v18874_v9  ;;  %16090 = vmatprep.subr.bf16.mxu0 %v18875_v45 }
 0xaa2   : > { %16112 = vmatprep.subr.bf16.mxu1 %v18876_v25 }
 0xaa4   : > { %16091 = vmatpush3.bf16.msra.mxu0 %v18877_v46 }
 0xaa5   : > { %16113 = vmatpush3.bf16.msra.mxu1 %v18878_v7  ;;  %16092 = vmatprep.subr.bf16.mxu0 %v18879_v44 }
 0xaa6   : > { %16114 = vmatprep.subr.bf16.mxu1 %v18880_v10 }
 0xaa8   : > { %16093 = vmatpush3.bf16.msra.mxu0 %v18881_v39 }
 0xaa9   : > { %16115 = vmatpush3.bf16.msra.mxu1 %v18882_v23  ;;  %16094 = vmatprep.subr.bf16.mxu0 %v18883_v17 }
 0xaaa   : > { %16116 = vmatprep.subr.bf16.mxu1 %v18884_v1 }
 0xaac   : > { %16095 = vmatpush3.bf16.msra.mxu0 %v18885_v50 }
 0xaad   : > { %16117 = vmatpush3.bf16.msra.mxu1 %v18886_v60  ;;  %16096 = vmatprep.subr.bf16.mxu0 %v18887_v34 }
 0xaae   : > { %16118 = vmatprep.subr.bf16.mxu1 %v18888_v6 }
 0xab0   : > { %16097 = vmatpush3.bf16.msra.mxu0 %v18889_v57 }
 0xab1   : > { %16119 = vmatpush3.bf16.msra.mxu1 %v18890_v58  ;;  %16098 = vmatprep.subr.bf16.mxu0 %v18891_v59 }
 0xab2   : > { %16120 = vmatprep.subr.bf16.mxu1 %v18892_v42 }
 0xab4   : > { %16099 = vmatpush3.bf16.msra.mxu0 %v18893_v33 }
 0xab5   : > { %16121 = vmatpush3.bf16.msra.mxu1 %v18894_v11  ;;  %16100 = vmatprep.subr.bf16.mxu0 %v18895_v53 }
 0xab6   : > { %16122 = vmatprep.subr.bf16.mxu1 %v18896_v47 }
 0xab8   : > { %16101 = vmatpush3.bf16.msra.mxu0 %v18897_v62 }
 0xab9   : > { %16123 = vmatpush3.bf16.msra.mxu1 %v18898_v13 }
 0xabb   : > { %13840 = vmatmul.mubr.bf16.vlgmr.msra.gmra.mrb[4].mxu0 %v15962_v54 }
 0xabc   : > { %13880 = vmatmul.mubr.bf16.vlgmr.msra.gmra.mrb[4].mxu1 %v15964_v32 }
 0xb6e   : > { %v16058_v56 = vpop.f32.mrb[0].mxu0 }
 0xb6f   : > { %v16080_v51 = vpop.f32.mrb[0].mxu1  ;;  %v16059_v38 = vpop.f32.mrb[1].mxu0 }
 0xb70   : > { %v16081_v48 = vpop.f32.mrb[1].mxu1  ;;  %v16060_v3 = vadd.f32 %v16059_v38, %v16058_v56  ;;  %v16061_v8 = vpop.f32.mrb[2].mxu0 }
 0xb71   : > { %v16082_v4 = vadd.f32 %v16081_v48, %v16080_v51  ;;  %v16083_v2 = vpop.f32.mrb[2].mxu1  ;;  %v16062_v43 = vpop.f32.mrb[3].mxu0 }
 0xb72   : > { %v16084_v40 = vpop.f32.mrb[3].mxu1 }
 0xb73   : > { %v13596_v41 = vadd.f32 %v16082_v4, %v16060_v3 }
 0xb8e   : > { %v16102_v5 = vpop.f32.mrb[4].mxu0 }
 0xb8f   : > { %v16124_v36 = vpop.f32.mrb[4].mxu1  ;;  %v16103_v29 = vpop.f32.mrb[5].mxu0 }
 0xb90   : > { %v16125_v12 = vpop.f32.mrb[5].mxu1  ;;  %v16104_v18 = vadd.f32 %v16103_v29, %v16102_v5  ;;  %v16105_v20 = vpop.f32.mrb[6].mxu0 }
 0xb91   : > { %v16126_v14 = vadd.f32 %v16125_v12, %v16124_v36  ;;  %v16127_v21 = vpop.f32.mrb[6].mxu1  ;;  %v16106_v63 = vpop.f32.mrb[7].mxu0 }
 0xb92   : > { %v16128_v52 = vpop.f32.mrb[7].mxu1  ;;  %v13842_v31 = vadd.f32 %v16104_v18, %v13596_v41 }
 0xb94   : > { %v13882_v55 = vadd.f32 %v16126_v14, %v13842_v31 }
 0xb96   : > { %v13894_v26 = vadd.f32 %v15998_v22, %v13882_v55 }
 0xb98   : > { %v13895_v0 = vmul.f32 %v13894_v26, %v13894_v26 }
 0xb9a   : > { %v13897_v61 = vsel %vm13896_vm0, %v13895_v0, 0.0 }
 0xb9b   : > { %13898 = vadd.xlane.f32.xlu0 %v13897_v61 }
 0xc28   : > { %v13899_v24 = vpop.xlane.xlu0 %13898 }
 0xc29   : > { %18903 = vrsqrt.f32 %v13899_v24 }
 0xc33   : > { %v18904_v27 = vpop.eup %18903 }
 0xc34   : > { %v13901_v28 = vmul.f32 %v18904_v27, %v13894_v26 }
 0xc36   : > { %13902 = vst.msk [vmem:[#allocation19] sm:$0xff] %vm13896_vm0, %v13901_v28 }
 0xc37 PF: > { %p16197_p5 = scmp.eq.s32.totalorder %s19576_s6, 14  ;;  %s19284_s5 = smov [#allocation19]  }
 0xc38   : > { %s13910_s12 = sshll.u32 %s19284_s5, 4  ;;  %s13911_s12 = int_to_ptr.vmem [resolvable:$true] %s13910_s12 }
 0xc39   : > { %s19141_s1 = scalar_lea.vmem %s13911_s12, 128  ;;  %p19148_p11 = scmp.lt.s32.totalorder %s13911_s12, %s13911_s12 }
 0xc3a   : > { %p19142_p10 = scmp.ne.s32.totalorder %s13911_s12, %s19141_s1  ;;  %p19149_p1 = scmp.lt.s32.totalorder %s19141_s1, %s19141_s1 }
 0xc3c   : > { %p19143_p7 = pnand %p19142_p10, %p16197_p5  ;;  %p19150_p0 = por %p19149_p1, %p19148_p11 }
 0xc3e   : > { %p19144_p3 = pneg %p19143_p7 }
 0xc40   : > { %p19151_p12 = pnand %p19150_p0, %p19144_p3 }
 0xc42   : > { %19154 = shalt.err (!%p19151_p12)
}
 0xc43   : > { %s22245_s30 = sld [smem:[#allocation43_spill]] }
 0xc49   : > { %s22246_s21 = smov %s22245_s30  ;;  %s19155_s17 = scalar_lea.hbm %s22245_s30, 128 }
 0xc4a   : > { %p19156_p2 = scmp.ne.s32.totalorder %s22246_s21, %s19155_s17  ;;  %p19161_p8 = scmp.lt.u32.totalorder %s19155_s17, %s22246_s21 }
 0xc4c   : > { %p19157_p13 = pnand %p19156_p2, %p16197_p5 }
 0xc4e   : > { %p19158_p6 = pneg %p19157_p13 }
 0xc50   : > { %p19163_p9 = pnand %p19161_p8, %p19158_p6 }
 0xc52   : > { %19166 = shalt.err (!%p19163_p9)
}
 0xc53   : > { %16163 = dma.vmem_to_hbm [thread:$0]  (%p16197_p5), %s13911_s12, 128, %s22246_s21, [#allocation7]  }
 0xc54   : > { %19228 = dma.done.wait (%p16197_p5), [#allocation7], 128  }
 0xc55   : > { %19230 = vsyncadd (%p16197_p5), [#allocation7], 4294967168 }
 0xc56 PF: > { %s22247_s18 = sld [smem:[#allocation27_spill]]  ;;  %s22248_s0 = sld [smem:[#allocation33_spill]] }
 0xc57   : > { %s22249_s7 = sld [smem:[#allocation31_spill]]  ;;  %s22250_s3 = sld [smem:[#allocation26_spill]] }
 0xc58   : > { %s22251_s17 = sld [smem:[#allocation28_spill]]  ;;  %s22252_s30 = smov %s19237_s10 }
 0xc59   : > { %s22253_s10 = smov %s19241_s11  ;;  %s22255_s12 = smov %s19249_s13 }
 0xc5a   : > { %s22256_s13 = smov %s19253_s14  ;;  %s22258_s15 = smov %s19261_s16 }
 0xc5c   : > { %p28_p4 = scmp.ge.s32.totalorder %s22247_s18, 17   ;;  %s22254_s11 = smov %s22248_s0 }
 0xc5d   : > { %s22257_s14 = smov %s22249_s7  ;;  %s22259_s16 = smov %s22250_s3 }
 0xc5e   :  { %30 = sbr.rel (!%p28_p4) target bundleno = 24 (0x18), region = 191 }
 0xc65   :  { %13923 = vsyncpa [#allocation6], 1 }
 0xc66   :  { %13925 = vsyncpa [#allocation6 + $0x1], 1 }
 0xc67   :  { %13926 = vsyncpa [#allocation9], 1 }
 0xc68   :  { %13928 = vsyncpa [#allocation9 + $0x1], 1 }
 0xc69   :  { %13929 = vsyncpa [#allocation12], 1 }
 0xc6a   :  { %13931 = vsyncpa [#allocation12 + $0x1], 1 }
 0xc6b   :  { %13932 = vsyncpa [#allocation15], 1 }
 0xc6c   :  { %13934 = vsyncpa [#allocation15 + $0x1], 1 }
 0xc6d   :  { %13935 = vsyncpa [#allocation18], 1 }
 0xc6e   :  { %13936 = vsyncpa [#allocation7], 1 }
 0xc6f   :  { %13938 = vsyncpa [#allocation7 + $0x1], 1 }

</bundles_post_ra>
